<compile_context>
chip_gen: v7x
topology: tpu7x:2x2x1
jax: 0.10.0
libtpu: 0.0.40
codegen_flags: <defaults>
</compile_context>

<pallas_src>
import math

import jax
import jax.numpy as jnp
from jax.experimental import pallas as pl
from jax.experimental.pallas import tpu as pltpu

EPS = 1e-5  # image_norm_eps


# ------------------------- in-kernel math helpers -------------------------

def _layernorm(x, w, b):
    mu = jnp.mean(x, axis=-1, keepdims=True)
    xc = x - mu
    var = jnp.mean(xc * xc, axis=-1, keepdims=True)
    inv = jax.lax.rsqrt(var + EPS)
    return xc * inv * w + b


def _softmax(x):
    # approx reciprocal (EUP slot); ~1e-3-level deviation vs exact divide, fine for inference.
    m = jnp.max(x, axis=-1, keepdims=True)
    e = jnp.exp(x - m)
    s = jnp.sum(e, axis=-1, keepdims=True)
    return e * pl.reciprocal(s, approx=True)


def _quick_gelu(x):
    # image_mlp_activations = quick_gelu (CLIP-style); keep in f32 (v5e has no bf16 VPU/EUP)
    return x * jax.nn.sigmoid(1.702 * x)


# ------------------------------ Pallas kernel ------------------------------

def make_block_kernel(num_heads, head_dim, q_block):
    def kernel(xf_ref,
               ln1w_ref, ln1b_ref, wq_ref, bq_ref, wkv_ref, bkv_ref,
               wo_ref, bo_ref, ln2w_ref, ln2b_ref, w1_ref, b1_ref, w2_ref, b2_ref,
               out_ref, hf_cache, k_cache, v_cache):
        bf16 = jnp.bfloat16
        f32 = jnp.float32
        S = xf_ref.shape[1]
        D = xf_ref.shape[2]
        H, hd = num_heads, head_dim

        # ---- once per batch element (q-tile 0): LN1 over the FULL sequence + fused K|V
        #      projection, cached per head in VMEM scratch (flash-style KV residency) ----
        @pl.when(pl.program_id(1) == 0)
        def _build_kv_cache():
            xf = xf_ref[0]                                           # (S, D) f32
            hf = _layernorm(xf, ln1w_ref[...], ln1b_ref[...])        # f32
            hf_cache[...] = hf.astype(bf16)                          # reused by the Q path
            kv = jnp.dot(hf_cache[...], wkv_ref[...],
                         preferred_element_type=f32) + bkv_ref[...]  # (S, 2D) f32
            # head split via one reshape+transpose (XLU) instead of H masked lane slices
            kv4 = jnp.transpose(kv.astype(bf16).reshape(S, 2 * H, hd), (1, 0, 2))  # (2H,S,hd)
            k_cache[...] = kv4[:H]
            v_cache[...] = kv4[H:]

        # ---- attention branch on this q tile: x + Attn(LN(x)) ----
        q_start = pl.multiple_of(pl.program_id(1) * q_block, q_block)
        xq = xf_ref[0, pl.ds(q_start, q_block), :]                   # (tq, D) f32 (residual)
        hq = hf_cache[pl.ds(q_start, q_block), :]                    # (tq, D) bf16 (LN1 cached)

        # 1/sqrt(head_dim) is folded into wq/bq at param-prep time.
        q = jnp.dot(hq, wq_ref[...], preferred_element_type=f32) + bq_ref[...]     # (tq, D) f32
        q3 = jnp.transpose(q.astype(bf16).reshape(q_block, H, hd), (1, 0, 2))       # (H, tq, hd)

        scores = jnp.einsum('hqd,hkd->hqk', q3, k_cache[...],
                            preferred_element_type=f32)              # (H, tq, S) f32
        probs = _softmax(scores)                                     # f32 softmax
        ctx = jnp.einsum('hqk,hkd->hqd', probs.astype(bf16), v_cache[...],
                         preferred_element_type=f32)                 # (H, tq, hd) f32

        attn = jnp.transpose(ctx, (1, 0, 2)).reshape(q_block, D)     # merge_heads
        attn = jnp.dot(attn.astype(bf16), wo_ref[...],
                       preferred_element_type=f32) + bo_ref[...]
        x1 = xq + attn

        # ---- MLP branch: x + MLP(LN(x)) ----
        h2 = _layernorm(x1, ln2w_ref[...], ln2b_ref[...])
        m = jnp.dot(h2.astype(bf16), w1_ref[...], preferred_element_type=f32) + b1_ref[...]
        m = _quick_gelu(m)
        m = jnp.dot(m.astype(bf16), w2_ref[...], preferred_element_type=f32) + b2_ref[...]
        out_ref[0] = x1 + m

    return kernel


# --------------------------------- wrapper ---------------------------------

_PARAM_ORDER = ["ln1_w", "ln1_b", "wq", "bq", "wkv", "bkv", "wo", "bo",
                "ln2_w", "ln2_b", "w1", "b1", "w2", "b2"]


def _vmem_limit_bytes():
    """Generation-aware VMEM budget: leave headroom below physical capacity."""
    cap = 128 * 1024 * 1024
    try:
        info = pltpu.get_tpu_info()
        cap = int(getattr(info, "vmem_capacity_bytes", cap) or cap)
    except Exception:
        pass
    return int(max(32 * 1024 * 1024, min(cap - 8 * 1024 * 1024, 100 * 1024 * 1024)))


def residual_block(x, kparams, num_heads, head_dim, q_block=None):
    B, S, D = x.shape
    assert num_heads * head_dim == D
    if q_block is None:
        q_block = min(S, 256)
    assert S % q_block == 0 and q_block % 8 == 0 and D % 128 == 0
    nq = S // q_block
    plist = [kparams[k] for k in _PARAM_ORDER]

    def const_spec(arr):
        # Grid-invariant operand: single-buffer it (no re-fetch, half the VMEM).
        zeros = (0,) * arr.ndim
        idx = lambda b, i, z=zeros: z
        try:
            return pl.BlockSpec(arr.shape, idx, pipeline_mode=pl.Buffered(1))
        except TypeError:  # older jax without pipeline_mode kwarg
            return pl.BlockSpec(arr.shape, idx)

    in_specs = ([pl.BlockSpec((1, S, D), lambda b, i: (b, 0, 0))]   # full-seq x (single copy)
                + [const_spec(a) for a in plist])
    out_specs = pl.BlockSpec((1, q_block, D), lambda b, i: (b, i, 0))

    return pl.pallas_call(
        make_block_kernel(num_heads, head_dim, q_block),
        out_shape=jax.ShapeDtypeStruct((B, S, D), jnp.float32),
        grid_spec=pltpu.PrefetchScalarGridSpec(
            num_scalar_prefetch=0,
            grid=(B, nq),
            in_specs=in_specs,
            out_specs=out_specs,
            scratch_shapes=[pltpu.VMEM((S, D), jnp.bfloat16),                    # LN1(x) cache
                            pltpu.VMEM((num_heads, S, head_dim), jnp.bfloat16),  # K cache
                            pltpu.VMEM((num_heads, S, head_dim), jnp.bfloat16)], # V cache
        ),
        compiler_params=pltpu.CompilerParams(
            dimension_semantics=("parallel", "arbitrary"),
            vmem_limit_bytes=_vmem_limit_bytes(),
        ),
    )(x, *plist)


def block_collection(x, layer_params, num_heads, head_dim, q_block=None):
    """Matches BlockCollection.forward: returns list of per-layer hidden states."""
    hidden_states = []
    for p in layer_params:
        x = residual_block(x, p, num_heads, head_dim, q_block=q_block)
        hidden_states.append(x)
    return hidden_states


# ---------------------------- parameter creation ----------------------------

def init_layer_params(key, emb_dim, mlp_dim, initializer_range=0.02):
    """Raw (torch-equivalent) f32 parameters; weights pre-transposed to (in, out)."""
    ks = jax.random.split(key, 6)
    f32 = jnp.float32
    return {
        "ln1_w": jnp.ones((1, emb_dim), f32),
        "ln1_b": jnp.zeros((1, emb_dim), f32),
        "ln2_w": jnp.ones((1, emb_dim), f32),
        "ln2_b": jnp.zeros((1, emb_dim), f32),
        "wq": jax.random.normal(ks[0], (emb_dim, emb_dim), f32) * initializer_range,
        "bq": jnp.zeros((1, emb_dim), f32),
        "wk": jax.random.normal(ks[1], (emb_dim, emb_dim), f32) * initializer_range,
        "bk": jnp.zeros((1, emb_dim), f32),
        "wv": jax.random.normal(ks[2], (emb_dim, emb_dim), f32) * initializer_range,
        "bv": jnp.zeros((1, emb_dim), f32),
        "wo": jax.random.normal(ks[3], (emb_dim, emb_dim), f32) * initializer_range,
        "bo": jnp.zeros((1, emb_dim), f32),
        # trunc_normal approximated by plain normal (init-only)
        "w1": jax.random.normal(ks[4], (emb_dim, mlp_dim), f32) * math.sqrt(1.0 / emb_dim),
        "b1": jnp.zeros((1, mlp_dim), f32),
        "w2": jax.random.normal(ks[5], (mlp_dim, emb_dim), f32) * math.sqrt(1.0 / mlp_dim),
        "b2": jnp.zeros((1, emb_dim), f32),
    }


def prep_layer_params(p, num_heads, head_dim):
    """One-time prep: fold 1/sqrt(head_dim) into wq/bq, fuse K|V, cast MXU weights to bf16."""
    scale = 1.0 / math.sqrt(head_dim)
    bf16 = jnp.bfloat16
    return {
        "ln1_w": p["ln1_w"], "ln1_b": p["ln1_b"],
        "wq": (p["wq"] * scale).astype(bf16),
        "bq": p["bq"] * scale,
        "wkv": jnp.concatenate([p["wk"], p["wv"]], axis=1).astype(bf16),
        "bkv": jnp.concatenate([p["bk"], p["bv"]], axis=1),
        "wo": p["wo"].astype(bf16), "bo": p["bo"],
        "ln2_w": p["ln2_w"], "ln2_b": p["ln2_b"],
        "w1": p["w1"].astype(bf16), "b1": p["b1"],
        "w2": p["w2"].astype(bf16), "b2": p["b2"],
    }


# ------------------------------------ main ------------------------------------

if __name__ == "__main__":
    # small synthetic vision-backbone config
    B = 2                 # batch
    S = 256               # image sequence length (num patches)
    D = 128               # image_emb_dim
    MLP = 256             # image_mlp_dim
    H = 2                 # image_num_heads (== image_num_key_value_heads, no GQA)
    HD = D // H           # image_head_dim
    L = 2                 # image_num_layers
    Q_BLOCK = 128         # flash-style q tile -> grid (B, S // Q_BLOCK)

    key = jax.random.PRNGKey(0)
    kx, kp = jax.random.split(key)
    x = jax.random.normal(kx, (B, S, D), jnp.float32)

    layer_keys = jax.random.split(kp, L)
    raw_params = [init_layer_params(layer_keys[i], D, MLP) for i in range(L)]
    layer_params = [prep_layer_params(p, H, HD) for p in raw_params]

    hidden_states = block_collection(x, layer_params, H, HD, q_block=Q_BLOCK)
    for hs in hidden_states:
        jax.block_until_ready(hs)
    assert len(hidden_states) == L and hidden_states[-1].shape == (B, S, D)
    assert bool(jnp.all(jnp.isfinite(hidden_states[-1])))
    print("KERNEL_OK")
</pallas_src>

<mosaic_0001>
module attributes {stable_mosaic.version = 11 : i64} {
  func.func @kernel(%arg0: i32, %arg1: i32, %arg2: memref<1x256x128xf32, #tpu.memory_space<vmem>>, %arg3: memref<1x128xf32, #tpu.memory_space<vmem>>, %arg4: memref<1x128xf32, #tpu.memory_space<vmem>>, %arg5: memref<128x128xbf16, #tpu.memory_space<vmem>>, %arg6: memref<1x128xf32, #tpu.memory_space<vmem>>, %arg7: memref<128x256xbf16, #tpu.memory_space<vmem>>, %arg8: memref<1x256xf32, #tpu.memory_space<vmem>>, %arg9: memref<128x128xbf16, #tpu.memory_space<vmem>>, %arg10: memref<1x128xf32, #tpu.memory_space<vmem>>, %arg11: memref<1x128xf32, #tpu.memory_space<vmem>>, %arg12: memref<1x128xf32, #tpu.memory_space<vmem>>, %arg13: memref<128x256xbf16, #tpu.memory_space<vmem>>, %arg14: memref<1x256xf32, #tpu.memory_space<vmem>>, %arg15: memref<256x128xbf16, #tpu.memory_space<vmem>>, %arg16: memref<1x128xf32, #tpu.memory_space<vmem>>, %arg17: memref<1x128x128xf32, #tpu.memory_space<vmem>>, %arg18: memref<256x128xbf16, #tpu.memory_space<vmem>>, %arg19: memref<2x256x64xbf16, #tpu.memory_space<vmem>>, %arg20: memref<2x256x64xbf16, #tpu.memory_space<vmem>>) attributes {dimension_semantics = [#tpu.dimension_semantics<parallel>, #tpu.dimension_semantics<arbitrary>], iteration_bounds = array<i64: 2, 2>, scalar_prefetch = 0 : i64, scratch_operands = 3 : i64, tpu.core_type = #tpu.core_type<tc>, window_params = [{transform_indices = @transform_0, window_bounds = array<i64: 1, 256, 128>}, {pipeline_mode = #tpu.pipeline_mode<synchronous>, transform_indices = @transform_1, window_bounds = array<i64: 1, 128>}, {pipeline_mode = #tpu.pipeline_mode<synchronous>, transform_indices = @transform_2, window_bounds = array<i64: 1, 128>}, {pipeline_mode = #tpu.pipeline_mode<synchronous>, transform_indices = @transform_3, window_bounds = array<i64: 128, 128>}, {pipeline_mode = #tpu.pipeline_mode<synchronous>, transform_indices = @transform_4, window_bounds = array<i64: 1, 128>}, {pipeline_mode = #tpu.pipeline_mode<synchronous>, transform_indices = @transform_5, window_bounds = array<i64: 128, 256>}, {pipeline_mode = #tpu.pipeline_mode<synchronous>, transform_indices = @transform_6, window_bounds = array<i64: 1, 256>}, {pipeline_mode = #tpu.pipeline_mode<synchronous>, transform_indices = @transform_7, window_bounds = array<i64: 128, 128>}, {pipeline_mode = #tpu.pipeline_mode<synchronous>, transform_indices = @transform_8, window_bounds = array<i64: 1, 128>}, {pipeline_mode = #tpu.pipeline_mode<synchronous>, transform_indices = @transform_9, window_bounds = array<i64: 1, 128>}, {pipeline_mode = #tpu.pipeline_mode<synchronous>, transform_indices = @transform_10, window_bounds = array<i64: 1, 128>}, {pipeline_mode = #tpu.pipeline_mode<synchronous>, transform_indices = @transform_11, window_bounds = array<i64: 128, 256>}, {pipeline_mode = #tpu.pipeline_mode<synchronous>, transform_indices = @transform_12, window_bounds = array<i64: 1, 256>}, {pipeline_mode = #tpu.pipeline_mode<synchronous>, transform_indices = @transform_13, window_bounds = array<i64: 256, 128>}, {pipeline_mode = #tpu.pipeline_mode<synchronous>, transform_indices = @transform_14, window_bounds = array<i64: 1, 128>}, {transform_indices = @transform_15, window_bounds = array<i64: 1, 128, 128>}]} {
    %c0_i32 = arith.constant 0 : i32
    %0 = arith.cmpi eq, %arg1, %c0_i32 : i32
    %1 = arith.extui %0 : i1 to i32
    %c0_i32_0 = arith.constant 0 : i32
    %2 = arith.cmpi ne, %1, %c0_i32_0 : i32
    scf.if %2 {
      %c0_46 = arith.constant 0 : index
      %c0_47 = arith.constant 0 : index
      %c0_48 = arith.constant 0 : index
      %88 = vector.load %arg2[%c0_46, %c0_47, %c0_48] : memref<1x256x128xf32, #tpu.memory_space<vmem>>, vector<1x256x128xf32>
      %89 = vector.shape_cast %88 : vector<1x256x128xf32> to vector<256x128xf32>
      %c0_49 = arith.constant 0 : index
      %c0_50 = arith.constant 0 : index
      %90 = vector.load %arg3[%c0_49, %c0_50] : memref<1x128xf32, #tpu.memory_space<vmem>>, vector<1x128xf32>
      %c0_51 = arith.constant 0 : index
      %c0_52 = arith.constant 0 : index
      %91 = vector.load %arg4[%c0_51, %c0_52] : memref<1x128xf32, #tpu.memory_space<vmem>>, vector<1x128xf32>
      %cst_53 = arith.constant dense<0.000000e+00> : vector<256xf32>
      %92 = vector.multi_reduction <add>, %89, %cst_53 [1] : vector<256x128xf32> to vector<256xf32>
      %93 = vector.shape_cast %92 : vector<256xf32> to vector<256x1xf32>
      %cst_54 = arith.constant 1.280000e+02 : f32
      %94 = vector.broadcast %cst_54 : f32 to vector<256x1xf32>
      %95 = arith.divf %93, %94 : vector<256x1xf32>
      %96 = vector.broadcast %95 : vector<256x1xf32> to vector<256x128xf32>
      %97 = arith.subf %89, %96 : vector<256x128xf32>
      %98 = arith.mulf %97, %97 : vector<256x128xf32>
      %cst_55 = arith.constant dense<0.000000e+00> : vector<256xf32>
      %99 = vector.multi_reduction <add>, %98, %cst_55 [1] : vector<256x128xf32> to vector<256xf32>
      %100 = vector.shape_cast %99 : vector<256xf32> to vector<256x1xf32>
      %cst_56 = arith.constant 1.280000e+02 : f32
      %101 = vector.broadcast %cst_56 : f32 to vector<256x1xf32>
      %102 = arith.divf %100, %101 : vector<256x1xf32>
      %cst_57 = arith.constant 9.99999974E-6 : f32
      %103 = vector.broadcast %cst_57 : f32 to vector<256x1xf32>
      %104 = arith.addf %102, %103 : vector<256x1xf32>
      %105 = math.rsqrt %104 : vector<256x1xf32>
      %106 = vector.broadcast %105 : vector<256x1xf32> to vector<256x128xf32>
      %107 = arith.mulf %97, %106 : vector<256x128xf32>
      %108 = vector.broadcast %90 : vector<1x128xf32> to vector<256x128xf32>
      %109 = arith.mulf %107, %108 : vector<256x128xf32>
      %110 = vector.broadcast %91 : vector<1x128xf32> to vector<256x128xf32>
      %111 = arith.addf %109, %110 : vector<256x128xf32>
      %112 = arith.truncf %111 : vector<256x128xf32> to vector<256x128xbf16>
      %c0_58 = arith.constant 0 : index
      %c0_59 = arith.constant 0 : index
      %113 = vector.load %arg18[%c0_58, %c0_59] : memref<256x128xbf16, #tpu.memory_space<vmem>>, vector<256x128xbf16>
      tpu.vector_store %arg18[%c0_58, %c0_59], %112 {strides = array<i32>} : memref<256x128xbf16, #tpu.memory_space<vmem>>, vector<256x128xbf16>,
      %c0_60 = arith.constant 0 : index
      %c0_61 = arith.constant 0 : index
      %114 = vector.load %arg18[%c0_60, %c0_61] : memref<256x128xbf16, #tpu.memory_space<vmem>>, vector<256x128xbf16>
      %c0_62 = arith.constant 0 : index
      %c0_63 = arith.constant 0 : index
      %115 = vector.load %arg7[%c0_62, %c0_63] : memref<128x256xbf16, #tpu.memory_space<vmem>>, vector<128x256xbf16>
      %cst_64 = arith.constant dense<0.000000e+00> : vector<256x256xf32>
      %116 = tpu.matmul %114, %115, %cst_64 {dimension_numbers = #tpu.dot_dimension_numbers<[1], [0], [0], [1], [0, 0, 1, 1], [], []>} : vector<256x128xbf16>, vector<128x256xbf16>, vector<256x256xf32> -> vector<256x256xf32>
      %c0_65 = arith.constant 0 : index
      %c0_66 = arith.constant 0 : index
      %117 = vector.load %arg8[%c0_65, %c0_66] : memref<1x256xf32, #tpu.memory_space<vmem>>, vector<1x256xf32>
      %118 = vector.broadcast %117 : vector<1x256xf32> to vector<256x256xf32>
      %119 = arith.addf %116, %118 : vector<256x256xf32>
      %120 = arith.truncf %119 : vector<256x256xf32> to vector<256x256xbf16>
      %121 = vector.shape_cast %120 : vector<256x256xbf16> to vector<256x4x64xbf16>
      %122 = tpu.transpose %121, [1, 0, 2] : vector<256x4x64xbf16> -> vector<4x256x64xbf16>
      %123 = vector.extract_strided_slice %122 {offsets = [0, 0, 0], sizes = [2, 256, 64], strides = [1, 1, 1]} : vector<4x256x64xbf16> to vector<2x256x64xbf16>
      %c0_67 = arith.constant 0 : index
      %c0_68 = arith.constant 0 : index
      %c0_69 = arith.constant 0 : index
      %124 = vector.load %arg19[%c0_67, %c0_68, %c0_69] : memref<2x256x64xbf16, #tpu.memory_space<vmem>>, vector<2x256x64xbf16>
      tpu.vector_store %arg19[%c0_67, %c0_68, %c0_69], %123 {strides = array<i32>} : memref<2x256x64xbf16, #tpu.memory_space<vmem>>, vector<2x256x64xbf16>,
      %125 = vector.extract_strided_slice %122 {offsets = [2, 0, 0], sizes = [2, 256, 64], strides = [1, 1, 1]} : vector<4x256x64xbf16> to vector<2x256x64xbf16>
      %c0_70 = arith.constant 0 : index
      %c0_71 = arith.constant 0 : index
      %c0_72 = arith.constant 0 : index
      %126 = vector.load %arg20[%c0_70, %c0_71, %c0_72] : memref<2x256x64xbf16, #tpu.memory_space<vmem>>, vector<2x256x64xbf16>
      tpu.vector_store %arg20[%c0_70, %c0_71, %c0_72], %125 {strides = array<i32>} : memref<2x256x64xbf16, #tpu.memory_space<vmem>>, vector<2x256x64xbf16>,
    } else {
    }
    %c128_i32 = arith.constant 128 : i32
    %3 = arith.muli %arg1, %c128_i32 : i32
    %4 = tpu.assume_multiple %3, 128 : i32
    %c0 = arith.constant 0 : index
    %5 = arith.index_cast %4 : i32 to index
    %c0_1 = arith.constant 0 : index
    %6 = vector.load %arg2[%c0, %5, %c0_1] : memref<1x256x128xf32, #tpu.memory_space<vmem>>, vector<1x128x128xf32>
    %7 = vector.shape_cast %6 : vector<1x128x128xf32> to vector<128x128xf32>
    %8 = arith.index_cast %4 : i32 to index
    %c0_2 = arith.constant 0 : index
    %9 = vector.load %arg18[%8, %c0_2] : memref<256x128xbf16, #tpu.memory_space<vmem>>, vector<128x128xbf16>
    %c0_3 = arith.constant 0 : index
    %c0_4 = arith.constant 0 : index
    %10 = vector.load %arg5[%c0_3, %c0_4] : memref<128x128xbf16, #tpu.memory_space<vmem>>, vector<128x128xbf16>
    %cst = arith.constant dense<0.000000e+00> : vector<128x128xf32>
    %11 = tpu.matmul %9, %10, %cst {dimension_numbers = #tpu.dot_dimension_numbers<[1], [0], [0], [1], [0, 0, 1, 1], [], []>} : vector<128x128xbf16>, vector<128x128xbf16>, vector<128x128xf32> -> vector<128x128xf32>
    %c0_5 = arith.constant 0 : index
    %c0_6 = arith.constant 0 : index
    %12 = vector.load %arg6[%c0_5, %c0_6] : memref<1x128xf32, #tpu.memory_space<vmem>>, vector<1x128xf32>
    %13 = vector.broadcast %12 : vector<1x128xf32> to vector<128x128xf32>
    %14 = arith.addf %11, %13 : vector<128x128xf32>
    %15 = arith.truncf %14 : vector<128x128xf32> to vector<128x128xbf16>
    %16 = vector.shape_cast %15 : vector<128x128xbf16> to vector<128x2x64xbf16>
    %17 = tpu.transpose %16, [1, 0, 2] : vector<128x2x64xbf16> -> vector<2x128x64xbf16>
    %c0_7 = arith.constant 0 : index
    %c0_8 = arith.constant 0 : index
    %c0_9 = arith.constant 0 : index
    %18 = vector.load %arg19[%c0_7, %c0_8, %c0_9] : memref<2x256x64xbf16, #tpu.memory_space<vmem>>, vector<2x256x64xbf16>
    "tpu.trace_start"() <{level = 10 : i32, message = "hqd,hkd->hqk"}> : () -> ()
    %cst_10 = arith.constant dense<0.000000e+00> : vector<2x128x256xf32>
    %19 = tpu.matmul %17, %18, %cst_10 {dimension_numbers = #tpu.dot_dimension_numbers<[2], [2], [1], [1], [0, 0, 0, 1, 1, 1], [0], [0]>} : vector<2x128x64xbf16>, vector<2x256x64xbf16>, vector<2x128x256xf32> -> vector<2x128x256xf32>
    "tpu.trace_stop"() : () -> ()
    %cst_11 = arith.constant dense<0xFF800000> : vector<2x128xf32>
    %20 = vector.multi_reduction <maximumf>, %19, %cst_11 [2] : vector<2x128x256xf32> to vector<2x128xf32>
    %21 = vector.shape_cast %20 : vector<2x128xf32> to vector<2x128x1xf32>
    %22 = vector.broadcast %21 : vector<2x128x1xf32> to vector<2x128x256xf32>
    %23 = arith.subf %19, %22 : vector<2x128x256xf32>
    %24 = math.exp %23 : vector<2x128x256xf32>
    %cst_12 = arith.constant dense<0.000000e+00> : vector<2x128xf32>
    %25 = vector.multi_reduction <add>, %24, %cst_12 [2] : vector<2x128x256xf32> to vector<2x128xf32>
    %26 = vector.shape_cast %25 : vector<2x128xf32> to vector<2x128x1xf32>
    %27 = tpu.reciprocal %26 {approx = true} : vector<2x128x1xf32> -> vector<2x128x1xf32>
    %28 = vector.broadcast %27 : vector<2x128x1xf32> to vector<2x128x256xf32>
    %29 = arith.mulf %24, %28 : vector<2x128x256xf32>
    %30 = arith.truncf %29 : vector<2x128x256xf32> to vector<2x128x256xbf16>
    %c0_13 = arith.constant 0 : index
    %c0_14 = arith.constant 0 : index
    %c0_15 = arith.constant 0 : index
    %31 = vector.load %arg20[%c0_13, %c0_14, %c0_15] : memref<2x256x64xbf16, #tpu.memory_space<vmem>>, vector<2x256x64xbf16>
    "tpu.trace_start"() <{level = 10 : i32, message = "hqk,hkd->hqd"}> : () -> ()
    %cst_16 = arith.constant dense<0.000000e+00> : vector<2x128x64xf32>
    %32 = tpu.matmul %30, %31, %cst_16 {dimension_numbers = #tpu.dot_dimension_numbers<[2], [1], [1], [2], [0, 0, 0, 1, 1, 2], [0], [0]>} : vector<2x128x256xbf16>, vector<2x256x64xbf16>, vector<2x128x64xf32> -> vector<2x128x64xf32>
    "tpu.trace_stop"() : () -> ()
    %33 = tpu.transpose %32, [1, 0, 2] : vector<2x128x64xf32> -> vector<128x2x64xf32>
    %34 = vector.shape_cast %33 : vector<128x2x64xf32> to vector<128x128xf32>
    %35 = arith.truncf %34 : vector<128x128xf32> to vector<128x128xbf16>
    %c0_17 = arith.constant 0 : index
    %c0_18 = arith.constant 0 : index
    %36 = vector.load %arg9[%c0_17, %c0_18] : memref<128x128xbf16, #tpu.memory_space<vmem>>, vector<128x128xbf16>
    %cst_19 = arith.constant dense<0.000000e+00> : vector<128x128xf32>
    %37 = tpu.matmul %35, %36, %cst_19 {dimension_numbers = #tpu.dot_dimension_numbers<[1], [0], [0], [1], [0, 0, 1, 1], [], []>} : vector<128x128xbf16>, vector<128x128xbf16>, vector<128x128xf32> -> vector<128x128xf32>
    %c0_20 = arith.constant 0 : index
    %c0_21 = arith.constant 0 : index
    %38 = vector.load %arg10[%c0_20, %c0_21] : memref<1x128xf32, #tpu.memory_space<vmem>>, vector<1x128xf32>
    %39 = vector.broadcast %38 : vector<1x128xf32> to vector<128x128xf32>
    %40 = arith.addf %37, %39 : vector<128x128xf32>
    %41 = arith.addf %7, %40 : vector<128x128xf32>
    %c0_22 = arith.constant 0 : index
    %c0_23 = arith.constant 0 : index
    %42 = vector.load %arg11[%c0_22, %c0_23] : memref<1x128xf32, #tpu.memory_space<vmem>>, vector<1x128xf32>
    %c0_24 = arith.constant 0 : index
    %c0_25 = arith.constant 0 : index
    %43 = vector.load %arg12[%c0_24, %c0_25] : memref<1x128xf32, #tpu.memory_space<vmem>>, vector<1x128xf32>
    %cst_26 = arith.constant dense<0.000000e+00> : vector<128xf32>
    %44 = vector.multi_reduction <add>, %41, %cst_26 [1] : vector<128x128xf32> to vector<128xf32>
    %45 = vector.shape_cast %44 : vector<128xf32> to vector<128x1xf32>
    %cst_27 = arith.constant 1.280000e+02 : f32
    %46 = vector.broadcast %cst_27 : f32 to vector<128x1xf32>
    %47 = arith.divf %45, %46 : vector<128x1xf32>
    %48 = vector.broadcast %47 : vector<128x1xf32> to vector<128x128xf32>
    %49 = arith.subf %41, %48 : vector<128x128xf32>
    %50 = arith.mulf %49, %49 : vector<128x128xf32>
    %cst_28 = arith.constant dense<0.000000e+00> : vector<128xf32>
    %51 = vector.multi_reduction <add>, %50, %cst_28 [1] : vector<128x128xf32> to vector<128xf32>
    %52 = vector.shape_cast %51 : vector<128xf32> to vector<128x1xf32>
    %cst_29 = arith.constant 1.280000e+02 : f32
    %53 = vector.broadcast %cst_29 : f32 to vector<128x1xf32>
    %54 = arith.divf %52, %53 : vector<128x1xf32>
    %cst_30 = arith.constant 9.99999974E-6 : f32
    %55 = vector.broadcast %cst_30 : f32 to vector<128x1xf32>
    %56 = arith.addf %54, %55 : vector<128x1xf32>
    %57 = math.rsqrt %56 : vector<128x1xf32>
    %58 = vector.broadcast %57 : vector<128x1xf32> to vector<128x128xf32>
    %59 = arith.mulf %49, %58 : vector<128x128xf32>
    %60 = vector.broadcast %42 : vector<1x128xf32> to vector<128x128xf32>
    %61 = arith.mulf %59, %60 : vector<128x128xf32>
    %62 = vector.broadcast %43 : vector<1x128xf32> to vector<128x128xf32>
    %63 = arith.addf %61, %62 : vector<128x128xf32>
    %64 = arith.truncf %63 : vector<128x128xf32> to vector<128x128xbf16>
    %c0_31 = arith.constant 0 : index
    %c0_32 = arith.constant 0 : index
    %65 = vector.load %arg13[%c0_31, %c0_32] : memref<128x256xbf16, #tpu.memory_space<vmem>>, vector<128x256xbf16>
    %cst_33 = arith.constant dense<0.000000e+00> : vector<128x256xf32>
    %66 = tpu.matmul %64, %65, %cst_33 {dimension_numbers = #tpu.dot_dimension_numbers<[1], [0], [0], [1], [0, 0, 1, 1], [], []>} : vector<128x128xbf16>, vector<128x256xbf16>, vector<128x256xf32> -> vector<128x256xf32>
    %c0_34 = arith.constant 0 : index
    %c0_35 = arith.constant 0 : index
    %67 = vector.load %arg14[%c0_34, %c0_35] : memref<1x256xf32, #tpu.memory_space<vmem>>, vector<1x256xf32>
    %68 = vector.broadcast %67 : vector<1x256xf32> to vector<128x256xf32>
    %69 = arith.addf %66, %68 : vector<128x256xf32>
    %cst_36 = arith.constant 1.702000e+00 : f32
    %70 = vector.broadcast %cst_36 : f32 to vector<128x256xf32>
    %71 = arith.mulf %70, %69 : vector<128x256xf32>
    %72 = arith.negf %71 : vector<128x256xf32>
    %73 = math.exp %72 : vector<128x256xf32>
    %cst_37 = arith.constant 1.000000e+00 : f32
    %74 = vector.broadcast %cst_37 : f32 to vector<128x256xf32>
    %75 = arith.addf %74, %73 : vector<128x256xf32>
    %76 = arith.divf %74, %75 : vector<128x256xf32>
    %77 = arith.mulf %69, %76 : vector<128x256xf32>
    %78 = arith.truncf %77 : vector<128x256xf32> to vector<128x256xbf16>
    %c0_38 = arith.constant 0 : index
    %c0_39 = arith.constant 0 : index
    %79 = vector.load %arg15[%c0_38, %c0_39] : memref<256x128xbf16, #tpu.memory_space<vmem>>, vector<256x128xbf16>
    %cst_40 = arith.constant dense<0.000000e+00> : vector<128x128xf32>
    %80 = tpu.matmul %78, %79, %cst_40 {dimension_numbers = #tpu.dot_dimension_numbers<[1], [0], [0], [1], [0, 0, 1, 1], [], []>} : vector<128x256xbf16>, vector<256x128xbf16>, vector<128x128xf32> -> vector<128x128xf32>
    %c0_41 = arith.constant 0 : index
    %c0_42 = arith.constant 0 : index
    %81 = vector.load %arg16[%c0_41, %c0_42] : memref<1x128xf32, #tpu.memory_space<vmem>>, vector<1x128xf32>
    %82 = vector.broadcast %81 : vector<1x128xf32> to vector<128x128xf32>
    %83 = arith.addf %80, %82 : vector<128x128xf32>
    %84 = arith.addf %41, %83 : vector<128x128xf32>
    %c0_43 = arith.constant 0 : index
    %c0_44 = arith.constant 0 : index
    %c0_45 = arith.constant 0 : index
    %85 = vector.load %arg17[%c0_43, %c0_44, %c0_45] : memref<1x128x128xf32, #tpu.memory_space<vmem>>, vector<1x128x128xf32>
    %86 = vector.shape_cast %85 : vector<1x128x128xf32> to vector<128x128xf32>
    %87 = vector.shape_cast %84 : vector<128x128xf32> to vector<1x128x128xf32>
    tpu.vector_store %arg17[%c0_43, %c0_44, %c0_45], %87 {strides = array<i32>} : memref<1x128x128xf32, #tpu.memory_space<vmem>>, vector<1x128x128xf32>,
    return
  }
  func.func @transform_0(%arg0: i32, %arg1: i32) -> (i32, i32, i32) {
    %c0_i32 = arith.constant 0 : i32
    %c0_i32_0 = arith.constant 0 : i32
    %c0_i32_1 = arith.constant 0 : i32
    return %arg0, %c0_i32, %c0_i32_0 : i32, i32, i32
  }
  func.func @transform_1(%arg0: i32, %arg1: i32) -> (i32, i32) {
    %c0_i32 = arith.constant 0 : i32
    %c0_i32_0 = arith.constant 0 : i32
    %c0_i32_1 = arith.constant 0 : i32
    return %c0_i32, %c0_i32_0 : i32, i32
  }
  func.func @transform_2(%arg0: i32, %arg1: i32) -> (i32, i32) {
    %c0_i32 = arith.constant 0 : i32
    %c0_i32_0 = arith.constant 0 : i32
    %c0_i32_1 = arith.constant 0 : i32
    return %c0_i32, %c0_i32_0 : i32, i32
  }
  func.func @transform_3(%arg0: i32, %arg1: i32) -> (i32, i32) {
    %c0_i32 = arith.constant 0 : i32
    %c0_i32_0 = arith.constant 0 : i32
    %c0_i32_1 = arith.constant 0 : i32
    return %c0_i32, %c0_i32_0 : i32, i32
  }
  func.func @transform_4(%arg0: i32, %arg1: i32) -> (i32, i32) {
    %c0_i32 = arith.constant 0 : i32
    %c0_i32_0 = arith.constant 0 : i32
    %c0_i32_1 = arith.constant 0 : i32
    return %c0_i32, %c0_i32_0 : i32, i32
  }
  func.func @transform_5(%arg0: i32, %arg1: i32) -> (i32, i32) {
    %c0_i32 = arith.constant 0 : i32
    %c0_i32_0 = arith.constant 0 : i32
    %c0_i32_1 = arith.constant 0 : i32
    return %c0_i32, %c0_i32_0 : i32, i32
  }
  func.func @transform_6(%arg0: i32, %arg1: i32) -> (i32, i32) {
    %c0_i32 = arith.constant 0 : i32
    %c0_i32_0 = arith.constant 0 : i32
    %c0_i32_1 = arith.constant 0 : i32
    return %c0_i32, %c0_i32_0 : i32, i32
  }
  func.func @transform_7(%arg0: i32, %arg1: i32) -> (i32, i32) {
    %c0_i32 = arith.constant 0 : i32
    %c0_i32_0 = arith.constant 0 : i32
    %c0_i32_1 = arith.constant 0 : i32
    return %c0_i32, %c0_i32_0 : i32, i32
  }
  func.func @transform_8(%arg0: i32, %arg1: i32) -> (i32, i32) {
    %c0_i32 = arith.constant 0 : i32
    %c0_i32_0 = arith.constant 0 : i32
    %c0_i32_1 = arith.constant 0 : i32
    return %c0_i32, %c0_i32_0 : i32, i32
  }
  func.func @transform_9(%arg0: i32, %arg1: i32) -> (i32, i32) {
    %c0_i32 = arith.constant 0 : i32
    %c0_i32_0 = arith.constant 0 : i32
    %c0_i32_1 = arith.constant 0 : i32
    return %c0_i32, %c0_i32_0 : i32, i32
  }
  func.func @transform_10(%arg0: i32, %arg1: i32) -> (i32, i32) {
    %c0_i32 = arith.constant 0 : i32
    %c0_i32_0 = arith.constant 0 : i32
    %c0_i32_1 = arith.constant 0 : i32
    return %c0_i32, %c0_i32_0 : i32, i32
  }
  func.func @transform_11(%arg0: i32, %arg1: i32) -> (i32, i32) {
    %c0_i32 = arith.constant 0 : i32
    %c0_i32_0 = arith.constant 0 : i32
    %c0_i32_1 = arith.constant 0 : i32
    return %c0_i32, %c0_i32_0 : i32, i32
  }
  func.func @transform_12(%arg0: i32, %arg1: i32) -> (i32, i32) {
    %c0_i32 = arith.constant 0 : i32
    %c0_i32_0 = arith.constant 0 : i32
    %c0_i32_1 = arith.constant 0 : i32
    return %c0_i32, %c0_i32_0 : i32, i32
  }
  func.func @transform_13(%arg0: i32, %arg1: i32) -> (i32, i32) {
    %c0_i32 = arith.constant 0 : i32
    %c0_i32_0 = arith.constant 0 : i32
    %c0_i32_1 = arith.constant 0 : i32
    return %c0_i32, %c0_i32_0 : i32, i32
  }
  func.func @transform_14(%arg0: i32, %arg1: i32) -> (i32, i32) {
    %c0_i32 = arith.constant 0 : i32
    %c0_i32_0 = arith.constant 0 : i32
    %c0_i32_1 = arith.constant 0 : i32
    return %c0_i32, %c0_i32_0 : i32, i32
  }
  func.func @transform_15(%arg0: i32, %arg1: i32) -> (i32, i32, i32) {
    %c0_i32 = arith.constant 0 : i32
    %c0_i32_0 = arith.constant 0 : i32
    return %arg0, %arg1, %c0_i32 : i32, i32, i32
  }
}

</mosaic_0001>

<bundles_post_ra>
// kernel: tpu_custom_call.1
= control target key start
LH: loop header
LB: loop body
LE: loop exit
PB: predicated region body
PF: predicated region fallthrough
CT: control target
= control target key end

     0   :  { %s19047_s0 = inlined_call_operand.hbm [shape: f32[2,256,128], index: 0, kind: input, shape index: {}]   ;;  %s19048_s1 = inlined_call_operand.hbm [shape: f32[1,128], index: 1, kind: input, shape index: {}]   ;;  %s19049_s2 = inlined_call_operand.hbm [shape: f32[1,128], index: 2, kind: input, shape index: {}]   ;;  %s19050_s3 = inlined_call_operand.hbm [shape: bf16[128,128], index: 3, kind: input, shape index: {}]   ;;  %s19051_s4 = inlined_call_operand.hbm [shape: f32[1,128], index: 4, kind: input, shape index: {}]   ;;  %s19052_s5 = inlined_call_operand.hbm [shape: bf16[128,256], index: 5, kind: input, shape index: {}]   ;;  %s19053_s6 = inlined_call_operand.hbm [shape: f32[1,256], index: 6, kind: input, shape index: {}]   ;;  %s19054_s7 = inlined_call_operand.hbm [shape: bf16[128,128], index: 7, kind: input, shape index: {}]   ;;  %s19055_s8 = inlined_call_operand.hbm [shape: f32[1,128], index: 8, kind: input, shape index: {}]   ;;  %s19056_s9 = inlined_call_operand.hbm [shape: f32[1,128], index: 9, kind: input, shape index: {}]   ;;  %s19057_s10 = inlined_call_operand.hbm [shape: f32[1,128], index: 10, kind: input, shape index: {}]   ;;  %s19058_s11 = inlined_call_operand.hbm [shape: bf16[128,256], index: 11, kind: input, shape index: {}]   ;;  %s19059_s12 = inlined_call_operand.hbm [shape: f32[1,256], index: 12, kind: input, shape index: {}]   ;;  %s19060_s13 = inlined_call_operand.hbm [shape: bf16[256,128], index: 13, kind: input, shape index: {}]   ;;  %s19061_s14 = inlined_call_operand.hbm [shape: f32[1,128], index: 14, kind: input, shape index: {}]   ;;  %s19062_s15 = inlined_call_operand.hbm [shape: f32[2,256,128], index: 15, kind: output, shape index: {}]  }
   0x1   :  { %19141 = sst [smem:[#allocation72_spill]] %s19047_s0 }
   0x2   :  { %19142 = sst [smem:[#allocation73_spill]] %s19048_s1 }
   0x3   :  { %19143 = sst [smem:[#allocation74_spill]] %s19049_s2 }
   0x4   :  { %19144 = sst [smem:[#allocation75_spill]] %s19050_s3 }
   0x5   :  { %19145 = sst [smem:[#allocation76_spill]] %s19051_s4 }
   0x6   :  { %19146 = sst [smem:[#allocation77_spill]] %s19052_s5 }
   0x7   :  { %19147 = sst [smem:[#allocation78_spill]] %s19053_s6 }
   0x8   :  { %19148 = sst [smem:[#allocation79_spill]] %s19054_s7 }
   0x9   :  { %19149 = sst [smem:[#allocation80_spill]] %s19062_s15 }
   0xa   :  { %20 = vsyncpa [#allocation6], 0 }
   0xb   :  { %22 = vsyncpa [#allocation6 + $0x1], 0 }
   0xc   :  { %23 = vsyncpa [#allocation9], 0 }
   0xd   :  { %24 = vsyncpa [#allocation12], 0 }
   0xe   :  { %25 = vsyncpa [#allocation15], 0 }
   0xf   :  { %26 = vsyncpa [#allocation18], 0 }
  0x10   :  { %27 = vsyncpa [#allocation21], 0 }
  0x11   :  { %28 = vsyncpa [#allocation24], 0 }
  0x12   :  { %29 = vsyncpa [#allocation27], 0 }
  0x13   :  { %30 = vsyncpa [#allocation7], 0 }
  0x14   :  { %32 = vsyncpa [#allocation7 + $0x1], 0  ;;  %s14524_s18 = smov 0   ;;  %s14526_s19 = smov 0  }
  0x15   :  { %s14528_s20 = smov 0   ;;  %s14530_s21 = smov 0  }
  0x16   :  { %s14532_s22 = smov 0   ;;  %s14534_s23 = smov 0  }
  0x17   :  { %s14536_s24 = smov 0   ;;  %s14538_s25 = smov 0  }
  0x18   :  { %s14540_s26 = smov 0   ;;  %s14542_s27 = smov 0  }
  0x19   :  { %s14544_s28 = smov 0  }
  0x1a LB: > { %19150 = sst [smem:[#allocation39_spill]] %s14371_s18  ;;  %s19065_s29 = sadd.s32 4294967295, %s14411_s28   ;;  %s14411_s28 = sphi %s14544_s28, %s38_s28   ;;  %s14407_s27 = sphi %s14542_s27, %s19369_s27   ;;  %s14403_s26 = sphi %s14540_s26, %s19368_s26   ;;  %s14399_s25 = sphi %s14538_s25, %s19363_s25   ;;  %s14395_s24 = sphi %s14536_s24, %s19367_s24   ;;  %s14391_s23 = sphi %s14534_s23, %s19366_s23   ;;  %s14387_s22 = sphi %s14532_s22, %s19361_s22   ;;  %s14383_s21 = sphi %s14530_s21, %s19360_s21   ;;  %s14379_s20 = sphi %s14528_s20, %s19365_s20   ;;  %s14375_s19 = sphi %s14526_s19, %s19359_s19   ;;  %s14371_s18 = sphi %s14524_s18, %s19358_s18  }
  0x1b   : > { %19151 = sst [smem:[#allocation40_spill]] %s14375_s19  ;;  %p12368_p0 = scmp.ge.s32.totalorder %s14411_s28, 1 }
  0x1c   : > { %19152 = sst [smem:[#allocation41_spill]] %s14379_s20  ;;  %p14583_p1 = scmp.eq.s32.totalorder %s19065_s29, 0 }
  0x1d   : > { %19153 = sst [smem:[#allocation42_spill]] %s14383_s21  ;;  %p403_p2 = scmp.lt.s32.totalorder %s14411_s28, 5 }
  0x1e   : > { %19154 = sst [smem:[#allocation43_spill]] %s14387_s22  ;;  %s14413_s17 = smov [#allocation8]  }
  0x1f   : > { %19155 = sst [smem:[#allocation44_spill]] %s14391_s23  ;;  %p14588_p3 = pnand %p12368_p0, %p403_p2 }
  0x20   : > { %19156 = sst [smem:[#allocation45_spill]] %s14395_s24  ;;  %s416_s15 = sshll.u32 %s14413_s17, 4  ;;  %s417_s15 = int_to_ptr.vmem [resolvable:$true] %s416_s15 }
  0x21   : > { %19157 = sst [smem:[#allocation46_spill]] %s14399_s25  ;;  %p13105_p4 = pneg %p14588_p3 }
  0x22   : > { %19158 = sst [smem:[#allocation47_spill]] %s14403_s26  ;;  %s14414_s25 = smov [#allocation11]  }
  0x23   : > { %19159 = sst [smem:[#allocation48_spill]] %s14407_s27  ;;  %s437_s24 = sshll.u32 %s14414_s25, 4  ;;  %s14600_s24 = int_to_ptr.vmem [resolvable:$true] %s437_s24 }
  0x24   : > { %s19160_s30 = scalar_select %p14583_p1, 1, 0 }
  0x25   : > { %s19162_s16 = scalar_select %p14588_p3, 1, 0 }
  0x26   : > { %19161 = sst [smem:[#allocation49_spill]] %s19160_s30  ;;  %p14596_p5 = pnand %p13105_p4, %p14583_p1 }
  0x27   : > { %19163 = sst [smem:[#allocation50_spill]] %s19162_s16  ;;  %s14415_s0 = smov [#allocation14]  }
  0x28   : > { %s14602_s18 = sshll.u32 %s14415_s0, 4  ;;  %s19165_s1 = sld [smem:[#allocation73_spill]]  ;;  %s462_s18 = int_to_ptr.vmem [resolvable:$true] %s14602_s18 }
  0x29   : > { %p14612_p7 = pneg %p14596_p5 }
  0x2e   : > { %s13839_s17 = scalar_lea.hbm %s19165_s1, 16 }
  0x2f   : > { %p13840_p6 = scmp.ne.s32.totalorder %s19165_s1, %s13839_s17  ;;  %p13846_p10 = scmp.lt.u32.totalorder %s13839_s17, %s19165_s1 }
  0x31   : > { %p13842_p8 = pnand %p14612_p7, %p13840_p6 }
  0x33   : > { %p13843_p9 = pneg %p13842_p8 }
  0x35   : > { %p13848_p11 = pnand %p13846_p10, %p13843_p9 }
  0x37   : > { %13851 = shalt.err (!%p13848_p11)
}
  0x38   : > { %s13852_s19 = scalar_lea.vmem %s417_s15, 16  ;;  %s13859_s20 = scalar_lea.vmem %s417_s15, 32 }
  0x39   : > { %p13853_p12 = scmp.ne.s32.totalorder %s417_s15, %s13852_s19  ;;  %p13860_p2 = scmp.lt.s32.totalorder %s417_s15, %s417_s15 }
  0x3a   : > { %p13861_p4 = scmp.lt.s32.totalorder %s13859_s20, %s13852_s19 }
  0x3b   : > { %p13855_p13 = pnand %p13853_p12, %p14612_p7 }
  0x3c   : > { %p13862_p3 = por %p13861_p4, %p13860_p2 }
  0x3d   : > { %p13856_p0 = pneg %p13855_p13 }
  0x3f   : > { %p13863_p1 = pnand %p13862_p3, %p13856_p0 }
  0x41   : > { %13866 = shalt.err (!%p13863_p1)
}
  0x42   : > { %13108 = dma.hbm_to_vmem [thread:$0]  (!%p14596_p5), %s19165_s1, 16, %s417_s15, [#allocation9]  }
  0x43   : > { %s19167_s3 = sld [smem:[#allocation75_spill]] }
  0x49   : > { %s13867_s0 = scalar_lea.hbm %s19167_s3, 1024 }
  0x4a   : > { %p13868_p6 = scmp.ne.s32.totalorder %s19167_s3, %s13867_s0  ;;  %p13874_p1 = scmp.lt.u32.totalorder %s13867_s0, %s19167_s3 }
  0x4c   : > { %p13870_p8 = pnand %p13868_p6, %p14612_p7 }
  0x4e   : > { %p13871_p9 = pneg %p13870_p8 }
  0x50   : > { %p13876_p3 = pnand %p13874_p1, %p13871_p9 }
  0x52   : > { %13879 = shalt.err (!%p13876_p3)
}
  0x53   : > { %s13880_s15 = scalar_lea.vmem %s14600_s24, 1024  ;;  %p13888_p13 = scmp.lt.s32.totalorder %s14600_s24, %s14600_s24 }
  0x54   : > { %p13881_p10 = scmp.ne.s32.totalorder %s14600_s24, %s13880_s15  ;;  %p13889_p0 = scmp.lt.s32.totalorder %s13880_s15, %s13880_s15 }
  0x56   : > { %p13883_p11 = pnand %p13881_p10, %p14612_p7  ;;  %p13890_p2 = por %p13889_p0, %p13888_p13 }
  0x58   : > { %p13884_p12 = pneg %p13883_p11 }
  0x5a   : > { %p13891_p4 = pnand %p13890_p2, %p13884_p12 }
  0x5c   : > { %13894 = shalt.err (!%p13891_p4)
}
  0x5d   : > { %s19078_s22 = smov 64   ;;  %s19080_s23 = smov 4  }
  0x5e   : > { %13114 = dma.hbm_to_vmem [thread:$0]  (!%p14596_p5), %s19167_s3, 1024, %s14600_s24, [#allocation12], %s19078_s22, %s19078_s22, %s19080_s23  }
  0x5f   : > { %s19168_s5 = sld [smem:[#allocation77_spill]] }
  0x65   : > { %s13895_s0 = scalar_lea.hbm %s19168_s5, 2048 }
  0x66   : > { %p13896_p6 = scmp.ne.s32.totalorder %s19168_s5, %s13895_s0  ;;  %p13902_p1 = scmp.lt.u32.totalorder %s13895_s0, %s19168_s5 }
  0x68   : > { %p13898_p8 = pnand %p13896_p6, %p14612_p7 }
  0x6a   : > { %p13899_p9 = pneg %p13898_p8 }
  0x6c   : > { %p13904_p3 = pnand %p13902_p1, %p13899_p9 }
  0x6e   : > { %13907 = shalt.err (!%p13904_p3)
}
  0x6f   : > { %s13908_s21 = scalar_lea.vmem %s462_s18, 2048  ;;  %p13916_p13 = scmp.lt.s32.totalorder %s462_s18, %s462_s18 }
  0x70   : > { %p13909_p10 = scmp.ne.s32.totalorder %s462_s18, %s13908_s21  ;;  %p13917_p0 = scmp.lt.s32.totalorder %s13908_s21, %s13908_s21 }
  0x72   : > { %p13911_p11 = pnand %p13909_p10, %p14612_p7  ;;  %p13918_p2 = por %p13917_p0, %p13916_p13 }
  0x74   : > { %p13912_p12 = pneg %p13911_p11 }
  0x76   : > { %p13919_p4 = pnand %p13918_p2, %p13912_p12 }
  0x78   : > { %13922 = shalt.err (!%p13919_p4)
}
  0x79   : > { %s19084_s24 = smov 128   ;;  %s19086_s16 = smov 8  }
  0x7a   : > { %13120 = dma.hbm_to_vmem [thread:$0]  (!%p14596_p5), %s19168_s5, 2048, %s462_s18, [#allocation15], %s19084_s24, %s19084_s24, %s19086_s16  }
  0x7b   : > { %s14420_s17 = smov [#allocation17]   ;;  %s14421_s19 = smov [#allocation20]  }
  0x7c   : > { %s485_s0 = sshll.u32 %s14420_s17, 4  ;;  %s510_s20 = sshll.u32 %s14421_s19, 4  ;;  %s486_s0 = int_to_ptr.vmem [resolvable:$true] %s485_s0  ;;  %s511_s20 = int_to_ptr.vmem [resolvable:$true] %s510_s20 }
  0x7d   : > { %s19169_s7 = sld [smem:[#allocation79_spill]] }
  0x83   : > { %s13923_s22 = scalar_lea.hbm %s19169_s7, 1024 }
  0x84   : > { %p13924_p6 = scmp.ne.s32.totalorder %s19169_s7, %s13923_s22  ;;  %p13930_p1 = scmp.lt.u32.totalorder %s13923_s22, %s19169_s7 }
  0x86   : > { %p13926_p8 = pnand %p13924_p6, %p14612_p7 }
  0x88   : > { %p13927_p9 = pneg %p13926_p8 }
  0x8a   : > { %p13932_p3 = pnand %p13930_p1, %p13927_p9 }
  0x8c   : > { %13935 = shalt.err (!%p13932_p3)
}
  0x8d   : > { %s13936_s18 = scalar_lea.vmem %s486_s0, 1024  ;;  %p13944_p13 = scmp.lt.s32.totalorder %s486_s0, %s486_s0 }
  0x8e   : > { %p13937_p10 = scmp.ne.s32.totalorder %s486_s0, %s13936_s18  ;;  %p13945_p0 = scmp.lt.s32.totalorder %s13936_s18, %s13936_s18 }
  0x90   : > { %p13939_p11 = pnand %p13937_p10, %p14612_p7  ;;  %p13946_p2 = por %p13945_p0, %p13944_p13 }
  0x92   : > { %p13940_p12 = pneg %p13939_p11 }
  0x94   : > { %p13947_p4 = pnand %p13946_p2, %p13940_p12 }
  0x96   : > { %13950 = shalt.err (!%p13947_p4)
}
  0x97   : > { %s19170_s3 = smov 4   ;;  %s19171_s23 = smov 64  }
  0x98   : > { %13126 = dma.hbm_to_vmem [thread:$0]  (!%p14596_p5), %s19169_s7, 1024, %s486_s0, [#allocation18], %s19171_s23, %s19171_s23, %s19170_s3  }
  0x99   : > { %s13951_s30 = scalar_lea.hbm %s19056_s9, 16 }
  0x9a   : > { %p13952_p6 = scmp.ne.s32.totalorder %s19056_s9, %s13951_s30  ;;  %p13958_p1 = scmp.lt.u32.totalorder %s13951_s30, %s19056_s9 }
  0x9c   : > { %p13954_p8 = pnand %p13952_p6, %p14612_p7 }
  0x9e   : > { %p13955_p9 = pneg %p13954_p8 }
  0xa0   : > { %p13960_p3 = pnand %p13958_p1, %p13955_p9 }
  0xa2   : > { %13963 = shalt.err (!%p13960_p3)
}
  0xa3   : > { %s13964_s18 = scalar_lea.vmem %s511_s20, 16  ;;  %s13971_s0 = scalar_lea.vmem %s511_s20, 32 }
  0xa4   : > { %p13965_p10 = scmp.ne.s32.totalorder %s511_s20, %s13964_s18  ;;  %p13972_p13 = scmp.lt.s32.totalorder %s511_s20, %s511_s20 }
  0xa5   : > { %p13973_p0 = scmp.lt.s32.totalorder %s13971_s0, %s13964_s18 }
  0xa6   : > { %p13967_p11 = pnand %p13965_p10, %p14612_p7 }
  0xa7   : > { %p13974_p2 = por %p13973_p0, %p13972_p13 }
  0xa8   : > { %p13968_p12 = pneg %p13967_p11 }
  0xaa   : > { %p13975_p4 = pnand %p13974_p2, %p13968_p12 }
  0xac   : > { %13978 = shalt.err (!%p13975_p4)
}
  0xad   : > { %13132 = dma.hbm_to_vmem [thread:$0]  (!%p14596_p5), %s19056_s9, 16, %s511_s20, [#allocation21]  }
  0xae   : > { %s14422_s22 = smov [#allocation23]   ;;  %s14423_s30 = smov [#allocation26]  }
  0xaf   : > { %s531_s1 = sshll.u32 %s14422_s22, 4  ;;  %s555_s17 = sshll.u32 %s14423_s30, 4  ;;  %s532_s1 = int_to_ptr.vmem [resolvable:$true] %s531_s1  ;;  %s556_s17 = int_to_ptr.vmem [resolvable:$true] %s555_s17 }
  0xb0   : > { %s13979_s21 = scalar_lea.hbm %s19058_s11, 2048 }
  0xb1   : > { %p13980_p6 = scmp.ne.s32.totalorder %s19058_s11, %s13979_s21  ;;  %p13986_p1 = scmp.lt.u32.totalorder %s13979_s21, %s19058_s11 }
  0xb3   : > { %p13982_p8 = pnand %p13980_p6, %p14612_p7 }
  0xb5   : > { %p13983_p9 = pneg %p13982_p8 }
  0xb7   : > { %p13988_p3 = pnand %p13986_p1, %p13983_p9 }
  0xb9   : > { %13991 = shalt.err (!%p13988_p3)
}
  0xba   : > { %s13992_s20 = scalar_lea.vmem %s532_s1, 2048  ;;  %p14000_p13 = scmp.lt.s32.totalorder %s532_s1, %s532_s1 }
  0xbb   : > { %p13993_p10 = scmp.ne.s32.totalorder %s532_s1, %s13992_s20  ;;  %p14001_p0 = scmp.lt.s32.totalorder %s13992_s20, %s13992_s20 }
  0xbd   : > { %p13995_p11 = pnand %p13993_p10, %p14612_p7  ;;  %p14002_p2 = por %p14001_p0, %p14000_p13 }
  0xbf   : > { %p13996_p12 = pneg %p13995_p11 }
  0xc1   : > { %p14003_p4 = pnand %p14002_p2, %p13996_p12 }
  0xc3   : > { %14006 = shalt.err (!%p14003_p4)
}
  0xc4   : > { %s19172_s27 = smov 128   ;;  %s14007_s15 = scalar_lea.hbm %s19060_s13, 2048 }
  0xc5   : > { %13138 = dma.hbm_to_vmem [thread:$0]  (!%p14596_p5), %s19058_s11, 2048, %s532_s1, [#allocation24], %s19172_s27, %s19172_s27, %s19086_s16  }
  0xc6   : > { %p14008_p6 = scmp.ne.s32.totalorder %s19060_s13, %s14007_s15  ;;  %p14014_p1 = scmp.lt.u32.totalorder %s14007_s15, %s19060_s13 }
  0xc8   : > { %p14010_p8 = pnand %p14008_p6, %p14612_p7 }
  0xca   : > { %p14011_p9 = pneg %p14010_p8 }
  0xcc   : > { %p14016_p3 = pnand %p14014_p1, %p14011_p9 }
  0xce   : > { %14019 = shalt.err (!%p14016_p3)
}
  0xcf   : > { %s14020_s20 = scalar_lea.vmem %s556_s17, 2048  ;;  %p14028_p13 = scmp.lt.s32.totalorder %s556_s17, %s556_s17 }
  0xd0   : > { %p14021_p10 = scmp.ne.s32.totalorder %s556_s17, %s14020_s20  ;;  %p14029_p0 = scmp.lt.s32.totalorder %s14020_s20, %s14020_s20 }
  0xd2   : > { %p14023_p11 = pnand %p14021_p10, %p14612_p7  ;;  %p14030_p2 = por %p14029_p0, %p14028_p13 }
  0xd4   : > { %p14024_p12 = pneg %p14023_p11 }
  0xd6   : > { %p14031_p4 = pnand %p14030_p2, %p14024_p12 }
  0xd8   : > { %14034 = shalt.err (!%p14031_p4)
}
  0xd9   : > { %13144 = dma.hbm_to_vmem [thread:$0]  (!%p14596_p5), %s19060_s13, 2048, %s556_s17, [#allocation27], %s19171_s23, %s19171_s23, %s19170_s3  }
  0xda   : > { %s14424_s22 = smov [#allocation10]   ;;  %s14425_s19 = smov [#allocation13]  }
  0xdb   : > { %s427_s30 = sshll.u32 %s14424_s22, 4  ;;  %s451_s15 = sshll.u32 %s14425_s19, 4  ;;  %s428_s30 = int_to_ptr.vmem [resolvable:$true] %s427_s30  ;;  %s452_s15 = int_to_ptr.vmem [resolvable:$true] %s451_s15 }
  0xdc   : > { %s19173_s2 = sld [smem:[#allocation74_spill]] }
  0xe2   : > { %s14035_s0 = scalar_lea.hbm %s19173_s2, 16 }
  0xe3   : > { %p14036_p6 = scmp.ne.s32.totalorder %s19173_s2, %s14035_s0  ;;  %p14042_p1 = scmp.lt.u32.totalorder %s14035_s0, %s19173_s2 }
  0xe5   : > { %p14038_p8 = pnand %p14036_p6, %p14612_p7 }
  0xe7   : > { %p14039_p9 = pneg %p14038_p8 }
  0xe9   : > { %p14044_p3 = pnand %p14042_p1, %p14039_p9 }
  0xeb   : > { %14047 = shalt.err (!%p14044_p3)
}
  0xec   : > { %s14048_s3 = scalar_lea.vmem %s428_s30, 16  ;;  %s14055_s23 = scalar_lea.vmem %s428_s30, 32 }
  0xed   : > { %p14049_p10 = scmp.ne.s32.totalorder %s428_s30, %s14048_s3  ;;  %p14056_p13 = scmp.lt.s32.totalorder %s428_s30, %s428_s30 }
  0xee   : > { %p14057_p0 = scmp.lt.s32.totalorder %s14055_s23, %s14048_s3 }
  0xef   : > { %p14051_p11 = pnand %p14049_p10, %p14612_p7 }
  0xf0   : > { %p14058_p2 = por %p14057_p0, %p14056_p13 }
  0xf1   : > { %p14052_p12 = pneg %p14051_p11 }
  0xf3   : > { %p14059_p4 = pnand %p14058_p2, %p14052_p12 }
  0xf5   : > { %14062 = shalt.err (!%p14059_p4)
}
  0xf6   : > { %13111 = dma.hbm_to_vmem [thread:$0]  (!%p14596_p5), %s19173_s2, 16, %s428_s30, [#allocation9]  }
  0xf7   : > { %s19174_s4 = sld [smem:[#allocation76_spill]] }
  0xfd   : > { %s14063_s19 = scalar_lea.hbm %s19174_s4, 16 }
  0xfe   : > { %p14064_p6 = scmp.ne.s32.totalorder %s19174_s4, %s14063_s19  ;;  %p14070_p1 = scmp.lt.u32.totalorder %s14063_s19, %s19174_s4 }
 0x100   : > { %p14066_p8 = pnand %p14064_p6, %p14612_p7 }
 0x102   : > { %p14067_p9 = pneg %p14066_p8 }
 0x104   : > { %p14072_p3 = pnand %p14070_p1, %p14067_p9 }
 0x106   : > { %14075 = shalt.err (!%p14072_p3)
}
 0x107   : > { %s14076_s20 = scalar_lea.vmem %s452_s15, 16  ;;  %s14083_s30 = scalar_lea.vmem %s452_s15, 32 }
 0x108   : > { %p14077_p10 = scmp.ne.s32.totalorder %s452_s15, %s14076_s20  ;;  %p14084_p13 = scmp.lt.s32.totalorder %s452_s15, %s452_s15 }
 0x109   : > { %p14085_p0 = scmp.lt.s32.totalorder %s14083_s30, %s14076_s20 }
 0x10a   : > { %p14079_p11 = pnand %p14077_p10, %p14612_p7 }
 0x10b   : > { %p14086_p2 = por %p14085_p0, %p14084_p13 }
 0x10c   : > { %p14080_p12 = pneg %p14079_p11 }
 0x10e   : > { %p14087_p4 = pnand %p14086_p2, %p14080_p12 }
 0x110   : > { %14090 = shalt.err (!%p14087_p4)
}
 0x111   : > { %13117 = dma.hbm_to_vmem [thread:$0]  (!%p14596_p5), %s19174_s4, 16, %s452_s15, [#allocation12]  }
 0x112   : > { %s14426_s23 = smov [#allocation16]   ;;  %s14427_s24 = smov [#allocation19]  }
 0x113   : > { %s475_s17 = sshll.u32 %s14426_s23, 4  ;;  %s499_s16 = sshll.u32 %s14427_s24, 4  ;;  %s476_s17 = int_to_ptr.vmem [resolvable:$true] %s475_s17  ;;  %s500_s16 = int_to_ptr.vmem [resolvable:$true] %s499_s16 }
 0x114   : > { %s19175_s6 = sld [smem:[#allocation78_spill]] }
 0x11a   : > { %s14091_s21 = scalar_lea.hbm %s19175_s6, 32 }
 0x11b   : > { %p14092_p6 = scmp.ne.s32.totalorder %s19175_s6, %s14091_s21  ;;  %p14098_p1 = scmp.lt.u32.totalorder %s14091_s21, %s19175_s6 }
 0x11d   : > { %p14094_p8 = pnand %p14092_p6, %p14612_p7 }
 0x11f   : > { %p14095_p9 = pneg %p14094_p8 }
 0x121   : > { %p14100_p3 = pnand %p14098_p1, %p14095_p9 }
 0x123   : > { %14103 = shalt.err (!%p14100_p3)
}
 0x124   : > { %s14104_s15 = scalar_lea.vmem %s476_s17, 32  ;;  %p14112_p13 = scmp.lt.s32.totalorder %s476_s17, %s476_s17 }
 0x125   : > { %p14105_p10 = scmp.ne.s32.totalorder %s476_s17, %s14104_s15  ;;  %p14113_p0 = scmp.lt.s32.totalorder %s14104_s15, %s14104_s15 }
 0x127   : > { %p14107_p11 = pnand %p14105_p10, %p14612_p7  ;;  %p14114_p2 = por %p14113_p0, %p14112_p13 }
 0x129   : > { %p14108_p12 = pneg %p14107_p11 }
 0x12b   : > { %p14115_p4 = pnand %p14114_p2, %p14108_p12 }
 0x12d   : > { %14118 = shalt.err (!%p14115_p4)
}
 0x12e   : > { %13123 = dma.hbm_to_vmem [thread:$0]  (!%p14596_p5), %s19175_s6, 32, %s476_s17, [#allocation15]  }
 0x12f   : > { %s14119_s24 = scalar_lea.hbm %s19055_s8, 16 }
 0x130   : > { %p14120_p6 = scmp.ne.s32.totalorder %s19055_s8, %s14119_s24  ;;  %p14126_p1 = scmp.lt.u32.totalorder %s14119_s24, %s19055_s8 }
 0x132   : > { %p14122_p8 = pnand %p14120_p6, %p14612_p7 }
 0x134   : > { %p14123_p9 = pneg %p14122_p8 }
 0x136   : > { %p14128_p3 = pnand %p14126_p1, %p14123_p9 }
 0x138   : > { %14131 = shalt.err (!%p14128_p3)
}
 0x139   : > { %s14132_s0 = scalar_lea.vmem %s500_s16, 16  ;;  %s14139_s17 = scalar_lea.vmem %s500_s16, 32 }
 0x13a   : > { %p14133_p10 = scmp.ne.s32.totalorder %s500_s16, %s14132_s0  ;;  %p14140_p13 = scmp.lt.s32.totalorder %s500_s16, %s500_s16 }
 0x13b   : > { %p14141_p0 = scmp.lt.s32.totalorder %s14139_s17, %s14132_s0 }
 0x13c   : > { %p14135_p11 = pnand %p14133_p10, %p14612_p7 }
 0x13d   : > { %p14142_p2 = por %p14141_p0, %p14140_p13 }
 0x13e   : > { %p14136_p12 = pneg %p14135_p11 }
 0x140   : > { %p14143_p4 = pnand %p14142_p2, %p14136_p12 }
 0x142   : > { %14146 = shalt.err (!%p14143_p4)
}
 0x143   : > { %13129 = dma.hbm_to_vmem [thread:$0]  (!%p14596_p5), %s19055_s8, 16, %s500_s16, [#allocation18]  }
 0x144   : > { %s14428_s15 = smov [#allocation22]   ;;  %s14429_s1 = smov [#allocation25]  }
 0x145   : > { %s521_s30 = sshll.u32 %s14428_s15, 4  ;;  %s545_s3 = sshll.u32 %s14429_s1, 4  ;;  %s522_s30 = int_to_ptr.vmem [resolvable:$true] %s521_s30  ;;  %s546_s3 = int_to_ptr.vmem [resolvable:$true] %s545_s3 }
 0x146   : > { %s14147_s22 = scalar_lea.hbm %s19057_s10, 16 }
 0x147   : > { %p14148_p6 = scmp.ne.s32.totalorder %s19057_s10, %s14147_s22  ;;  %p14154_p1 = scmp.lt.u32.totalorder %s14147_s22, %s19057_s10 }
 0x149   : > { %p14150_p8 = pnand %p14148_p6, %p14612_p7 }
 0x14b   : > { %p14151_p9 = pneg %p14150_p8 }
 0x14d   : > { %p14156_p3 = pnand %p14154_p1, %p14151_p9 }
 0x14f   : > { %14159 = shalt.err (!%p14156_p3)
}
 0x150   : > { %s14160_s16 = scalar_lea.vmem %s522_s30, 16  ;;  %s14167_s17 = scalar_lea.vmem %s522_s30, 32 }
 0x151   : > { %p14161_p10 = scmp.ne.s32.totalorder %s522_s30, %s14160_s16  ;;  %p14168_p13 = scmp.lt.s32.totalorder %s522_s30, %s522_s30 }
 0x152   : > { %p14169_p0 = scmp.lt.s32.totalorder %s14167_s17, %s14160_s16 }
 0x153   : > { %p14163_p11 = pnand %p14161_p10, %p14612_p7 }
 0x154   : > { %p14170_p2 = por %p14169_p0, %p14168_p13 }
 0x155   : > { %p14164_p12 = pneg %p14163_p11 }
 0x157   : > { %p14171_p4 = pnand %p14170_p2, %p14164_p12 }
 0x159   : > { %14174 = shalt.err (!%p14171_p4)
}
 0x15a   : > { %13135 = dma.hbm_to_vmem [thread:$0]  (!%p14596_p5), %s19057_s10, 16, %s522_s30, [#allocation21]  }
 0x15b   : > { %s14175_s23 = scalar_lea.hbm %s19059_s12, 32 }
 0x15c   : > { %p14176_p6 = scmp.ne.s32.totalorder %s19059_s12, %s14175_s23  ;;  %p14182_p1 = scmp.lt.u32.totalorder %s14175_s23, %s19059_s12 }
 0x15e   : > { %p14178_p8 = pnand %p14176_p6, %p14612_p7 }
 0x160   : > { %p14179_p9 = pneg %p14178_p8 }
 0x162   : > { %p14184_p3 = pnand %p14182_p1, %p14179_p9 }
 0x164   : > { %14187 = shalt.err (!%p14184_p3)
}
 0x165   : > { %s14188_s18 = scalar_lea.vmem %s546_s3, 32  ;;  %p14196_p13 = scmp.lt.s32.totalorder %s546_s3, %s546_s3 }
 0x166   : > { %p14189_p10 = scmp.ne.s32.totalorder %s546_s3, %s14188_s18  ;;  %p14197_p0 = scmp.lt.s32.totalorder %s14188_s18, %s14188_s18 }
 0x168   : > { %p14191_p11 = pnand %p14189_p10, %p14612_p7  ;;  %p14198_p2 = por %p14197_p0, %p14196_p13 }
 0x16a   : > { %p14192_p12 = pneg %p14191_p11 }
 0x16c   : > { %p14199_p4 = pnand %p14198_p2, %p14192_p12 }
 0x16e   : > { %14202 = shalt.err (!%p14199_p4)
}
 0x16f   : > { %13141 = dma.hbm_to_vmem [thread:$0]  (!%p14596_p5), %s19059_s12, 32, %s546_s3, [#allocation24]  }
 0x170   : > { %s14430_s16 = smov [#allocation28]   ;;  %s14203_s15 = scalar_lea.hbm %s19061_s14, 16 }
 0x171   : > { %s569_s17 = sshll.u32 %s14430_s16, 4  ;;  %p14204_p6 = scmp.ne.s32.totalorder %s19061_s14, %s14203_s15  ;;  %s570_s17 = int_to_ptr.vmem [resolvable:$true] %s569_s17 }
 0x172   : > { %p14210_p1 = scmp.lt.u32.totalorder %s14203_s15, %s19061_s14 }
 0x173   : > { %p14206_p8 = pnand %p14204_p6, %p14612_p7 }
 0x175   : > { %p14207_p9 = pneg %p14206_p8 }
 0x177   : > { %p14212_p3 = pnand %p14210_p1, %p14207_p9 }
 0x179   : > { %14215 = shalt.err (!%p14212_p3)
}
 0x17a   : > { %s14216_s3 = scalar_lea.vmem %s570_s17, 16  ;;  %s14223_s19 = scalar_lea.vmem %s570_s17, 32 }
 0x17b   : > { %p14217_p10 = scmp.ne.s32.totalorder %s570_s17, %s14216_s3  ;;  %p14224_p13 = scmp.lt.s32.totalorder %s570_s17, %s570_s17 }
 0x17c   : > { %p14225_p0 = scmp.lt.s32.totalorder %s14223_s19, %s14216_s3 }
 0x17d   : > { %p14219_p11 = pnand %p14217_p10, %p14612_p7 }
 0x17e   : > { %p14226_p2 = por %p14225_p0, %p14224_p13 }
 0x17f   : > { %p14220_p12 = pneg %p14219_p11 }
 0x181   : > { %p14227_p4 = pnand %p14226_p2, %p14220_p12 }
 0x183   : > { %14230 = shalt.err (!%p14227_p4)
}
 0x184   : > { %s19176_s30 = sld [smem:[#allocation47_spill]]  ;;  %s19177_s0 = sld [smem:[#allocation48_spill]] }
 0x185   : > { %s19178_s16 = sld [smem:[#allocation44_spill]]  ;;  %s19179_s26 = sld [smem:[#allocation43_spill]] }
 0x186   : > { %s19180_s25 = sld [smem:[#allocation42_spill]]  ;;  %s19181_s20 = sld [smem:[#allocation49_spill]] }
 0x187   : > { %13147 = dma.hbm_to_vmem [thread:$0]  (!%p14596_p5), %s19061_s14, 16, %s570_s17, [#allocation27]  }
 0x188   : > { %s19182_s15 = sld [smem:[#allocation41_spill]]  ;;  %s12367_s1 = sadd.s32 4294967294, %s14411_s28  }
 0x189   : > { %s19183_s23 = sld [smem:[#allocation40_spill]]  ;;  %p65_p8 = scmp.eq.s32.totalorder %s14411_s28, 0 }
 0x18a   : > { %s47_s29 = sadd.s32 1, %s19176_s30  ;;  %s50_s24 = sadd.s32 1, %s19177_s0 }
 0x18b   : > { %p48_p7 = scmp.ge.s32.totalorder %s47_s29, 2  ;;  %s57_s22 = sadd.s32 1, %s19178_s16 }
 0x18c   : > { %p64_p6 = scmp.ne.s32.totalorder %s19178_s16, %s19179_s26  ;;  %p70_p9 = scmp.ne.s32.totalorder %s19179_s26, %s19180_s25 }
 0x18d   : > { %s19371_s29 = smov (%p48_p7, %s47_s29), 0  ;;  %s19373_s24 = smov (!%p48_p7, %s50_s24), %s19177_s0 }
 0x18e   : > { %s19184_s17 = sld [smem:[#allocation39_spill]]  ;;  %p52_p5 = scmp.ge.s32.totalorder %s19373_s24, 2 }
 0x18f   : > { %s375_s3 = ssub.s32 %s19176_s30, %s19371_s29  ;;  %p14897_p1 = por %p65_p8, %p64_p6 }
 0x190   : > { %p19186_p3 = scmp.ne.s32.totalorder %s19181_s20, 0  ;;  %s19375_s24 = smov (%p52_p5, %s19373_s24), 0 }
 0x191   : > { %s379_s18 = sadd.s32 1, %s19182_s15  ;;  %p389_p11 = scmp.ne.s32.totalorder %s19182_s15, %s19183_s23 }
 0x192   : > { %p14903_p10 = por %p19186_p3, %p70_p9  ;;  %s54_s26 = ssub.s32 %s19177_s0, %s19375_s24 }
 0x193   : > { %s19188_s25 = sadd.s32 4294967295, %s14411_s28   ;;  %p55_p13 = scmp.eq.s32.totalorder %s54_s26, 0 }
 0x194   : > { %p390_p12 = scmp.eq.s32.totalorder %s19188_s25, 3  ;;  %s376_s30 = sor.u32 %s375_s3, %s54_s26 }
 0x195   : > { %p377_p0 = scmp.eq.s32.totalorder %s376_s30, 0  ;;  %p395_p4 = scmp.ne.s32.totalorder %s19183_s23, %s19184_s17 }
 0x196   : > { %p14916_p2 = por %p390_p12, %p389_p11  ;;  %p396_p7 = scmp.eq.s32.totalorder %s12367_s1, 3 }
 0x197   : > { %s14921_s2 = scalar_select %p55_p13, %s19178_s16, %s57_s22  }
 0x198   : > { %s19189_s20 = scalar_select %p14916_p2, 1, 0 }
 0x199   : > { %s19377_s15 = smov (!%p377_p0, %s19182_s15), %s379_s18  ;;  %p13170_p6 = scmp.lt.s32.totalorder %s14411_s28, 4 }
 0x19a   : > { %s580_s4 = sand.u32 1, %s19178_s16   ;;  %p14930_p8 = por %p396_p7, %p395_p4 }
 0x19b   : > { %s12384_s25 = sshll.u32 %s580_s4, 8  ;;  %s12660_s6 = sshll.u32 %s19177_s0, 12 }
 0x19c   : > { %s19190_s5 = scalar_select %p14930_p8, 1, 0 }
 0x19d   : > { %s19191_s30 = sld [smem:[#allocation72_spill]]  ;;  %s584_s22 = scalar_lea.vmem [#allocation5], %s12384_s25 }
 0x19e   : > { %s591_s23 = sshll.u32 %s584_s22, 4  ;;  %p14942_p9 = pnand %p13170_p6, %p14897_p1  ;;  %s14946_s23 = int_to_ptr.vmem [resolvable:$true] %s591_s23 }
 0x19f   : > { %s14948_s0 = scalar_lea.sflag [#allocation6], %s580_s4 }
 0x1a0   : > { %p14233_p3 = pneg %p14942_p9 }
 0x1a3   : > { %s14938_s7 = scalar_lea.hbm %s19191_s30, %s12660_s6  ;;  %s14236_s19 = scalar_lea.hbm %s19191_s30, 8192 }
 0x1a4   : > { %s14231_s1 = scalar_lea.hbm %s14938_s7, 4096  ;;  %p14237_p1 = scmp.lt.u32.totalorder %s14938_s7, %s19191_s30 }
 0x1a5   : > { %p14232_p5 = scmp.ne.s32.totalorder %s14938_s7, %s14231_s1  ;;  %p14238_p13 = scmp.lt.u32.totalorder %s14236_s19, %s14231_s1 }
 0x1a6   : > { %p14240_p4 = scmp.lt.u32.totalorder %s14231_s1, %s14938_s7 }
 0x1a7   : > { %p14234_p11 = pnand %p14233_p3, %p14232_p5  ;;  %p14239_p0 = por %p14238_p13, %p14237_p1 }
 0x1a9   : > { %p14235_p12 = pneg %p14234_p11  ;;  %p14241_p7 = por %p14240_p4, %p14239_p0 }
 0x1ab   : > { %p14242_p6 = pnand %p14241_p7, %p14235_p12 }
 0x1ad   : > { %14245 = shalt.err (!%p14242_p6)
}
 0x1ae   : > { %s14246_s4 = scalar_lea.vmem %s14946_s23, 4096  ;;  %s14431_s3 = smov [#allocation5]  }
 0x1af   : > { %p14247_p5 = scmp.ne.s32.totalorder %s14946_s23, %s14246_s4  ;;  %s14251_s26 = sshll.u32 %s14431_s3, 4  ;;  %s14252_s26 = int_to_ptr.vmem [resolvable:$false] %s14251_s26 }
 0x1b0   : > { %s14253_s22 = scalar_lea.vmem %s14252_s26, 8192  ;;  %p14254_p2 = scmp.lt.s32.totalorder %s14946_s23, %s14252_s26 }
 0x1b1   : > { %p14249_p11 = pnand %p14247_p5, %p14233_p3  ;;  %p14255_p1 = scmp.lt.s32.totalorder %s14253_s22, %s14246_s4 }
 0x1b3   : > { %p14250_p8 = pneg %p14249_p11  ;;  %p14256_p13 = por %p14255_p1, %p14254_p2 }
 0x1b5   : > { %p14257_p0 = pnand %p14256_p13, %p14250_p8 }
 0x1b7   : > { %14260 = shalt.err (!%p14257_p0)
}
 0x1b8   : > { %s19193_s1 = smov 8   ;;  %s19194_s6 = sld [smem:[#allocation50_spill]] }
 0x1b9   : > { %13151 = dma.hbm_to_vmem [thread:$0]  (!%p14942_p9), %s14938_s7, 4096, %s14946_s23, %s14948_s0, %s19172_s27, %s19172_s27, %s19193_s1  }
 0x1be   : > { %p19195_p3 = scmp.ne.s32.totalorder %s19194_s6, 0 }
 0x1c0   : > { %603 = sbr.rel (%p19195_p3) target bundleno = 3926 (0xf56), region = 80 }
 0x1c7   : > { %s19196_s17 = sld [smem:[#allocation43_spill]] }
 0x1cd   : > { %s605_s19 = sand.u32 1, %s19196_s17  }
 0x1ce   : > { %s12388_s18 = sshll.u32 %s605_s19, 8  ;;  %s606_s25 = scalar_lea.sflag [#allocation6], %s605_s19 }
 0x1cf   : > { %s14982_s4 = scalar_lea.vmem [#allocation5], %s12388_s18 }
 0x1d0   : > { %14334 = dma.done.wait (%p14903_p10), %s606_s25, 4096  }
 0x1d1   : > { %14336 = vsyncadd (%p14903_p10), %s606_s25, 4294963200  ;;  %s19197_s16 = sld [smem:[#allocation49_spill]] }
 0x1d7   : > { %p19198_p2 = scmp.ne.s32.totalorder %s19197_s16, 0 }
 0x1d9   : > { %14338 = dma.done.wait (%p19198_p2), [#allocation9], 32  }
 0x1da   : > { %14340 = vsyncadd (%p19198_p2), [#allocation9], 4294967264 }
 0x1db   : > { %14342 = dma.done.wait (%p19198_p2), [#allocation12], 1040  }
 0x1dc   : > { %14344 = vsyncadd (%p19198_p2), [#allocation12], 4294966256 }
 0x1dd   : > { %14346 = dma.done.wait (%p19198_p2), [#allocation15], 2080  }
 0x1de   : > { %14348 = vsyncadd (%p19198_p2), [#allocation15], 4294965216 }
 0x1df   : > { %14350 = dma.done.wait (%p19198_p2), [#allocation18], 1040  }
 0x1e0   : > { %14352 = vsyncadd (%p19198_p2), [#allocation18], 4294966256 }
 0x1e1   : > { %14354 = dma.done.wait (%p19198_p2), [#allocation21], 32  }
 0x1e2   : > { %14356 = vsyncadd (%p19198_p2), [#allocation21], 4294967264 }
 0x1e3   : > { %14358 = dma.done.wait (%p19198_p2), [#allocation24], 2080  }
 0x1e4   : > { %14360 = vsyncadd (%p19198_p2), [#allocation24], 4294965216 }
 0x1e5   : > { %14362 = dma.done.wait (%p19198_p2), [#allocation27], 2064  }
 0x1e6   : > { %14364 = vsyncadd (%p19198_p2), [#allocation27], 4294965232  ;;  %s19199_s7 = sld [smem:[#allocation40_spill]] }
 0x1e7   : > { %s19200_s0 = sld [smem:[#allocation45_spill]] }
 0x1ec   : > { %s709_s27 = sand.u32 1, %s19199_s7  }
 0x1ed   : > { %s12403_s21 = sshll.u32 %s709_s27, 7  ;;  %p12404_p10 = scmp.ne.s32.totalorder %s19200_s0, 0 }
 0x1ee   : > { %s15019_s23 = scalar_lea.vmem [#allocation29], %s12403_s21 }
 0x1ef   : > { %717 = sbr.rel (%p12404_p10) target bundleno = 1454 (0x5ae), region = 144 }
 0x1f6   : > { %v15023_v0 = vld [vmem:[%s14982_s4] sm:$0xff]  ;;  %v15031_v2 = vld [vmem:[%s14982_s4 + $0x8] sm:$0xff]  ;;  %v15039_v4 = vld [vmem:[%s14982_s4 + $0x10] sm:$0xff]  ;;  %s14433_s3 = smov 64   ;;  %vm5888_vm0 = vcmask 523264  }
 0x1f7   : > { %v15026_v1 = vld [vmem:[%s14982_s4 + $0x80] sm:$0xff]  ;;  %752 = vadd.xlane.f32.xlu0 %v15023_v0  ;;  %v15034_v3 = vld [vmem:[%s14982_s4 + $0x88] sm:$0xff]  ;;  %v15042_v5 = vld [vmem:[%s14982_s4 + $0x18] sm:$0xff] }
 0x1f8   : > { %784 = vadd.xlane.f32.xlu1 %v15026_v1  ;;  %v15047_v6 = vld [vmem:[%s14982_s4 + $0x90] sm:$0xff]  ;;  %v15050_v7 = vld [vmem:[%s14982_s4 + $0x98] sm:$0xff]  ;;  %v15053_v8 = vld [vmem:[%s14982_s4 + $0x20] sm:$0xff] }
 0x1f9   : > { %v15056_v9 = vld [vmem:[%s14982_s4 + $0x28] sm:$0xff]  ;;  %v15063_v10 = vld [vmem:[%s14982_s4 + $0xa0] sm:$0xff]  ;;  %v15071_v12 = vld [vmem:[%s14982_s4 + $0x30] sm:$0xff] }
 0x1fa   : > { %v15066_v11 = vld [vmem:[%s14982_s4 + $0xa8] sm:$0xff]  ;;  %v15074_v13 = vld [vmem:[%s14982_s4 + $0x38] sm:$0xff]  ;;  %v15079_v14 = vld [vmem:[%s14982_s4 + $0xb0] sm:$0xff] }
 0x1fb   : > { %754 = vadd.xlane.f32.xlu0 %v15031_v2  ;;  %v15082_v15 = vld [vmem:[%s14982_s4 + $0xb8] sm:$0xff]  ;;  %v15087_v16 = vld [vmem:[%s14982_s4 + $0x40] sm:$0xff]  ;;  %v15090_v17 = vld [vmem:[%s14982_s4 + $0x48] sm:$0xff] }
 0x1fc   : > { %786 = vadd.xlane.f32.xlu1 %v15034_v3  ;;  %v15095_v18 = vld [vmem:[%s14982_s4 + $0xc0] sm:$0xff]  ;;  %v15098_v19 = vld [vmem:[%s14982_s4 + $0xc8] sm:$0xff]  ;;  %v15103_v20 = vld [vmem:[%s14982_s4 + $0x50] sm:$0xff] }
 0x1fd   : > { %v15106_v21 = vld [vmem:[%s14982_s4 + $0x58] sm:$0xff]  ;;  %v15111_v22 = vld [vmem:[%s14982_s4 + $0xd0] sm:$0xff]  ;;  %v15119_v24 = vld [vmem:[%s14982_s4 + $0x60] sm:$0xff] }
 0x1fe   : > { %v15114_v23 = vld [vmem:[%s14982_s4 + $0xd8] sm:$0xff]  ;;  %v15122_v25 = vld [vmem:[%s14982_s4 + $0x68] sm:$0xff]  ;;  %v15127_v26 = vld [vmem:[%s14982_s4 + $0xe0] sm:$0xff] }
 0x1ff   : > { %756 = vadd.xlane.f32.xlu0 %v15039_v4  ;;  %v15130_v27 = vld [vmem:[%s14982_s4 + $0xe8] sm:$0xff]  ;;  %v15135_v28 = vld [vmem:[%s14982_s4 + $0x70] sm:$0xff]  ;;  %v15138_v29 = vld [vmem:[%s14982_s4 + $0x78] sm:$0xff] }
 0x200   : > { %758 = vadd.xlane.f32.xlu1 %v15042_v5  ;;  %v15143_v30 = vld [vmem:[%s14982_s4 + $0xf0] sm:$0xff]  ;;  %v15146_v31 = vld [vmem:[%s14982_s4 + $0xf8] sm:$0xff] }
 0x201   : > { %v13303_v59 = vld [vmem:[#allocation14 + $0x4] ss:$8 sps:$4 sm:$0xff]  }
 0x202   : > { %1337 = vmatprep.subr.bf16.mxu0 %v13303_v59  ;;  %13013 = vmatprep.subr.bf16.mxu1 %v13303_v59 }
 0x203   : > { %788 = vadd.xlane.f32.xlu0 %v15047_v6 }
 0x204   : > { %790 = vadd.xlane.f32.xlu1 %v15050_v7 }
 0x207   : > { %760 = vadd.xlane.f32.xlu0 %v15053_v8 }
 0x208   : > { %762 = vadd.xlane.f32.xlu1 %v15056_v9 }
 0x20b   : > { %792 = vadd.xlane.f32.xlu0 %v15063_v10 }
 0x20c   : > { %794 = vadd.xlane.f32.xlu1 %v15066_v11 }
 0x20f   : > { %764 = vadd.xlane.f32.xlu0 %v15071_v12 }
 0x210   : > { %766 = vadd.xlane.f32.xlu1 %v15074_v13 }
 0x213   : > { %796 = vadd.xlane.f32.xlu0 %v15079_v14 }
 0x214   : > { %798 = vadd.xlane.f32.xlu1 %v15082_v15 }
 0x217   : > { %768 = vadd.xlane.f32.xlu0 %v15087_v16 }
 0x218   : > { %770 = vadd.xlane.f32.xlu1 %v15090_v17 }
 0x21b   : > { %800 = vadd.xlane.f32.xlu0 %v15095_v18 }
 0x21c   : > { %802 = vadd.xlane.f32.xlu1 %v15098_v19 }
 0x21f   : > { %772 = vadd.xlane.f32.xlu0 %v15103_v20 }
 0x220   : > { %774 = vadd.xlane.f32.xlu1 %v15106_v21 }
 0x223   : > { %804 = vadd.xlane.f32.xlu0 %v15111_v22 }
 0x224   : > { %806 = vadd.xlane.f32.xlu1 %v15114_v23 }
 0x227   : > { %776 = vadd.xlane.f32.xlu0 %v15119_v24 }
 0x228   : > { %778 = vadd.xlane.f32.xlu1 %v15122_v25 }
 0x22b   : > { %808 = vadd.xlane.f32.xlu0 %v15127_v26 }
 0x22c   : > { %810 = vadd.xlane.f32.xlu1 %v15130_v27 }
 0x22f   : > { %780 = vadd.xlane.f32.xlu0 %v15135_v28 }
 0x230   : > { %782 = vadd.xlane.f32.xlu1 %v15138_v29 }
 0x233   : > { %812 = vadd.xlane.f32.xlu0 %v15143_v30 }
 0x234   : > { %814 = vadd.xlane.f32.xlu1 %v15146_v31 }
 0x284   : > { %v753_v32 = vpop.xlane.xlu0 %752 }
 0x285   : > { %v785_v33 = vpop.xlane.xlu1 %784  ;;  %v817_v34 = vmul.f32 0.0078125, %v753_v32  ;;  %v13306_v32 = vld [vmem:[#allocation14 + $0x14] ss:$8 sps:$4 sm:$0xff]  }
 0x286   : > { %v833_v35 = vmul.f32 0.0078125, %v785_v33 }
 0x287   : > { %v15151_v36 = vsub.f32 %v15023_v0, %v817_v34 }
 0x288   : > { %v15154_v37 = vsub.f32 %v15026_v1, %v833_v35  ;;  %v755_v38 = vpop.xlane.xlu0 %754  ;;  %v13305_v1 = vld [vmem:[#allocation14] ss:$8 sps:$4 sm:$0xff]   ;;  %v13308_v35 = vld [vmem:[#allocation14 + $0x10] ss:$8 sps:$4 sm:$0xff]  }
 0x289   : > { %v787_v39 = vpop.xlane.xlu1 %786  ;;  %v818_v40 = vmul.f32 0.0078125, %v755_v38  ;;  %v881_v41 = vmul.f32 %v15151_v36, %v15151_v36  ;;  %1338 = vmatpush1.bf16.msra.mxu0 %v13305_v1  ;;  %13021 = vmatpush1.bf16.msra.mxu1 %v13305_v1 }
 0x28a   : > { %v834_v42 = vmul.f32 0.0078125, %v787_v39  ;;  %v897_v45 = vmul.f32 %v15154_v37, %v15154_v37  ;;  %1339 = vmatprep.subr.bf16.mxu0 %v13306_v32  ;;  %13014 = vmatprep.subr.bf16.mxu1 %v13306_v32 }
 0x28b   : > { %v15159_v43 = vsub.f32 %v15031_v2, %v818_v40  ;;  %913 = vadd.xlane.f32.xlu0 %v881_v41 }
 0x28c   : > { %v15162_v44 = vsub.f32 %v15034_v3, %v834_v42  ;;  %v757_v46 = vpop.xlane.xlu0 %756  ;;  %v13309_v42 = vld [vmem:[#allocation14 + $0x24] ss:$8 sps:$4 sm:$0xff]  }
 0x28d   : > { %v759_v47 = vpop.xlane.xlu1 %758  ;;  %v819_v48 = vmul.f32 0.0078125, %v757_v46  ;;  %v882_v49 = vmul.f32 %v15159_v43, %v15159_v43  ;;  %1340 = vmatpush1.bf16.msra.mxu0 %v13308_v35  ;;  %13022 = vmatpush1.bf16.msra.mxu1 %v13308_v35 }
 0x28e   : > { %v820_v50 = vmul.f32 0.0078125, %v759_v47  ;;  %v898_v53 = vmul.f32 %v15162_v44, %v15162_v44  ;;  %v13311_v47 = vld [vmem:[#allocation14 + $0x20] ss:$8 sps:$4 sm:$0xff]   ;;  %1341 = vmatprep.subr.bf16.mxu0 %v13309_v42  ;;  %13015 = vmatprep.subr.bf16.mxu1 %v13309_v42 }
 0x28f   : > { %v15169_v51 = vsub.f32 %v15039_v4, %v819_v48  ;;  %945 = vadd.xlane.f32.xlu0 %v897_v45  ;;  %915 = vadd.xlane.f32.xlu1 %v882_v49 }
 0x290   : > { %v15172_v52 = vsub.f32 %v15042_v5, %v820_v50  ;;  %v789_v54 = vpop.xlane.xlu0 %788 }
 0x291   : > { %v791_v55 = vpop.xlane.xlu1 %790  ;;  %v835_v56 = vmul.f32 0.0078125, %v789_v54  ;;  %v883_v57 = vmul.f32 %v15169_v51, %v15169_v51  ;;  %1342 = vmatpush1.bf16.msra.mxu0 %v13311_v47  ;;  %13023 = vmatpush1.bf16.msra.mxu1 %v13311_v47  ;;  %v13312_v54 = vld [vmem:[#allocation14 + $0x34] ss:$8 sps:$4 sm:$0xff]  }
 0x292   : > { %v836_v58 = vmul.f32 0.0078125, %v791_v55  ;;  %v884_v62 = vmul.f32 %v15172_v52, %v15172_v52  ;;  %1343 = vmatprep.subr.bf16.mxu0 %v13312_v54  ;;  %13016 = vmatprep.subr.bf16.mxu1 %v13312_v54 }
 0x293   : > { %v15179_v60 = vsub.f32 %v15047_v6, %v835_v56  ;;  %947 = vadd.xlane.f32.xlu1 %v898_v53  ;;  %917 = vadd.xlane.f32.xlu0 %v883_v57  ;;  %v13314_v57 = vld [vmem:[#allocation14 + $0x30] ss:$8 sps:$4 sm:$0xff]  }
 0x294   : > { %v15182_v61 = vsub.f32 %v15050_v7, %v836_v58  ;;  %v761_v63 = vpop.xlane.xlu0 %760 }
 0x295   : > { %v763_v0 = vpop.xlane.xlu1 %762  ;;  %v821_v2 = vmul.f32 0.0078125, %v761_v63  ;;  %v899_v3 = vmul.f32 %v15179_v60, %v15179_v60  ;;  %1344 = vmatpush1.bf16.msra.mxu0 %v13314_v57  ;;  %13024 = vmatpush1.bf16.msra.mxu1 %v13314_v57 }
 0x296   : > { %v822_v4 = vmul.f32 0.0078125, %v763_v0  ;;  %v900_v7 = vmul.f32 %v15182_v61, %v15182_v61  ;;  %v13315_v0 = vld [vmem:[#allocation14 + $0x44] ss:$8 sps:$4 sm:$0xff]  }
 0x297   : > { %v15189_v5 = vsub.f32 %v15053_v8, %v821_v2  ;;  %919 = vadd.xlane.f32.xlu1 %v884_v62  ;;  %949 = vadd.xlane.f32.xlu0 %v899_v3  ;;  %v13317_v3 = vld [vmem:[#allocation14 + $0x40] ss:$8 sps:$4 sm:$0xff]  }
 0x298   : > { %v15192_v6 = vsub.f32 %v15056_v9, %v822_v4  ;;  %v793_v33 = vpop.xlane.xlu0 %792  ;;  %1345 = vmatprep.subr.bf16.mxu0 %v13315_v0  ;;  %13017 = vmatprep.subr.bf16.mxu1 %v13315_v0 }
 0x299   : > { %v795_v34 = vpop.xlane.xlu1 %794  ;;  %v837_v38 = vmul.f32 0.0078125, %v793_v33  ;;  %v885_v39 = vmul.f32 %v15189_v5, %v15189_v5  ;;  %1346 = vmatpush1.bf16.msra.mxu0 %v13317_v3  ;;  %13025 = vmatpush1.bf16.msra.mxu1 %v13317_v3 }
 0x29a   : > { %v838_v40 = vmul.f32 0.0078125, %v795_v34  ;;  %v886_v41 = vmul.f32 %v15192_v6, %v15192_v6  ;;  %v13318_v34 = vld [vmem:[#allocation14 + $0x54] ss:$8 sps:$4 sm:$0xff]  }
 0x29b   : > { %v15199_v8 = vsub.f32 %v15063_v10, %v837_v38  ;;  %951 = vadd.xlane.f32.xlu1 %v900_v7  ;;  %921 = vadd.xlane.f32.xlu0 %v885_v39  ;;  %v13320_v39 = vld [vmem:[#allocation14 + $0x50] ss:$8 sps:$4 sm:$0xff]  }
 0x29c   : > { %v15202_v9 = vsub.f32 %v15066_v11, %v838_v40  ;;  %v765_v45 = vpop.xlane.xlu0 %764  ;;  %1347 = vmatprep.subr.bf16.mxu0 %v13318_v34  ;;  %13018 = vmatprep.subr.bf16.mxu1 %v13318_v34 }
 0x29d   : > { %v767_v46 = vpop.xlane.xlu1 %766  ;;  %v823_v48 = vmul.f32 0.0078125, %v765_v45  ;;  %v901_v49 = vmul.f32 %v15199_v8, %v15199_v8  ;;  %1348 = vmatpush1.bf16.msra.mxu0 %v13320_v39  ;;  %13026 = vmatpush1.bf16.msra.mxu1 %v13320_v39 }
 0x29e   : > { %v824_v50 = vmul.f32 0.0078125, %v767_v46  ;;  %v902_v53 = vmul.f32 %v15202_v9, %v15202_v9  ;;  %v13321_v46 = vld [vmem:[#allocation14 + $0x64] ss:$8 sps:$4 sm:$0xff]  }
 0x29f   : > { %v15209_v10 = vsub.f32 %v15071_v12, %v823_v48  ;;  %923 = vadd.xlane.f32.xlu1 %v886_v41  ;;  %953 = vadd.xlane.f32.xlu0 %v901_v49  ;;  %v13323_v49 = vld [vmem:[#allocation14 + $0x60] ss:$8 sps:$4 sm:$0xff]  }
 0x2a0   : > { %v15212_v11 = vsub.f32 %v15074_v13, %v824_v50  ;;  %v797_v55 = vpop.xlane.xlu0 %796  ;;  %1349 = vmatprep.subr.bf16.mxu0 %v13321_v46  ;;  %13019 = vmatprep.subr.bf16.mxu1 %v13321_v46 }
 0x2a1   : > { %v799_v56 = vpop.xlane.xlu1 %798  ;;  %v839_v58 = vmul.f32 0.0078125, %v797_v55  ;;  %v887_v59 = vmul.f32 %v15209_v10, %v15209_v10  ;;  %1350 = vmatpush1.bf16.msra.mxu0 %v13323_v49  ;;  %13027 = vmatpush1.bf16.msra.mxu1 %v13323_v49 }
 0x2a2   : > { %v840_v62 = vmul.f32 0.0078125, %v799_v56  ;;  %v888_v63 = vmul.f32 %v15212_v11, %v15212_v11  ;;  %v13324_v56 = vld [vmem:[#allocation14 + $0x74] ss:$8 sps:$4 sm:$0xff]  }
 0x2a3   : > { %v15219_v12 = vsub.f32 %v15079_v14, %v839_v58  ;;  %955 = vadd.xlane.f32.xlu1 %v902_v53  ;;  %925 = vadd.xlane.f32.xlu0 %v887_v59  ;;  %v13326_v59 = vld [vmem:[#allocation14 + $0x70] ss:$8 sps:$4 sm:$0xff]  }
 0x2a4   : > { %v15222_v13 = vsub.f32 %v15082_v15, %v840_v62  ;;  %v769_v1 = vpop.xlane.xlu0 %768  ;;  %1351 = vmatprep.subr.bf16.mxu0 %v13324_v56  ;;  %13020 = vmatprep.subr.bf16.mxu1 %v13324_v56 }
 0x2a5   : > { %v771_v2 = vpop.xlane.xlu1 %770  ;;  %v825_v4 = vmul.f32 0.0078125, %v769_v1  ;;  %v903_v7 = vmul.f32 %v15219_v12, %v15219_v12  ;;  %1352 = vmatpush1.bf16.msra.mxu0 %v13326_v59  ;;  %13028 = vmatpush1.bf16.msra.mxu1 %v13326_v59 }
 0x2a6   : > { %v826_v32 = vmul.f32 0.0078125, %v771_v2  ;;  %v904_v33 = vmul.f32 %v15222_v13, %v15222_v13 }
 0x2a7   : > { %v15229_v14 = vsub.f32 %v15087_v16, %v825_v4  ;;  %927 = vadd.xlane.f32.xlu1 %v888_v63  ;;  %957 = vadd.xlane.f32.xlu0 %v903_v7  ;;  %v14432_v4 = vmov 0  }
 0x2a8   : > { %v15232_v15 = vsub.f32 %v15090_v17, %v826_v32  ;;  %v801_v35 = vpop.xlane.xlu0 %800  ;;  %1369 = vmatprep.mubr.bf16.mxu0 %v14432_v4  ;;  %1449 = vmatprep.mubr.bf16.mxu1 %v14432_v4 }
 0x2a9   : > { %v803_v38 = vpop.xlane.xlu1 %802  ;;  %v841_v40 = vmul.f32 0.0078125, %v801_v35  ;;  %v889_v41 = vmul.f32 %v15229_v14, %v15229_v14 }
 0x2aa   : > { %v842_v42 = vmul.f32 0.0078125, %v803_v38  ;;  %v890_v45 = vmul.f32 %v15232_v15, %v15232_v15 }
 0x2ab   : > { %v15239_v16 = vsub.f32 %v15095_v18, %v841_v40  ;;  %959 = vadd.xlane.f32.xlu1 %v904_v33  ;;  %929 = vadd.xlane.f32.xlu0 %v889_v41 }
 0x2ac   : > { %v15242_v17 = vsub.f32 %v15098_v19, %v842_v42  ;;  %v773_v47 = vpop.xlane.xlu0 %772 }
 0x2ad   : > { %v775_v48 = vpop.xlane.xlu1 %774  ;;  %v827_v50 = vmul.f32 0.0078125, %v773_v47  ;;  %v905_v53 = vmul.f32 %v15239_v16, %v15239_v16 }
 0x2ae   : > { %v828_v54 = vmul.f32 0.0078125, %v775_v48  ;;  %v906_v55 = vmul.f32 %v15242_v17, %v15242_v17 }
 0x2af   : > { %v15249_v18 = vsub.f32 %v15103_v20, %v827_v50  ;;  %931 = vadd.xlane.f32.xlu1 %v890_v45  ;;  %961 = vadd.xlane.f32.xlu0 %v905_v53 }
 0x2b0   : > { %v15252_v19 = vsub.f32 %v15106_v21, %v828_v54  ;;  %v805_v57 = vpop.xlane.xlu0 %804 }
 0x2b1   : > { %v807_v58 = vpop.xlane.xlu1 %806  ;;  %v843_v62 = vmul.f32 0.0078125, %v805_v57  ;;  %v891_v63 = vmul.f32 %v15249_v18, %v15249_v18 }
 0x2b2   : > { %v844_v0 = vmul.f32 0.0078125, %v807_v58  ;;  %v892_v1 = vmul.f32 %v15252_v19, %v15252_v19 }
 0x2b3   : > { %v15259_v20 = vsub.f32 %v15111_v22, %v843_v62  ;;  %963 = vadd.xlane.f32.xlu1 %v906_v55  ;;  %933 = vadd.xlane.f32.xlu0 %v891_v63 }
 0x2b4   : > { %v15262_v21 = vsub.f32 %v15114_v23, %v844_v0  ;;  %v777_v2 = vpop.xlane.xlu0 %776 }
 0x2b5   : > { %v779_v3 = vpop.xlane.xlu1 %778  ;;  %v829_v7 = vmul.f32 0.0078125, %v777_v2  ;;  %v907_v22 = vmul.f32 %v15259_v20, %v15259_v20 }
 0x2b6   : > { %v830_v32 = vmul.f32 0.0078125, %v779_v3  ;;  %v908_v34 = vmul.f32 %v15262_v21, %v15262_v21 }
 0x2b7   : > { %v15271_v33 = vsub.f32 %v15119_v24, %v829_v7  ;;  %935 = vadd.xlane.f32.xlu1 %v892_v1  ;;  %965 = vadd.xlane.f32.xlu0 %v907_v22 }
 0x2b8   : > { %v15274_v23 = vsub.f32 %v15122_v25, %v830_v32  ;;  %v809_v35 = vpop.xlane.xlu0 %808 }
 0x2b9   : > { %v811_v38 = vpop.xlane.xlu1 %810  ;;  %v845_v39 = vmul.f32 0.0078125, %v809_v35  ;;  %v893_v40 = vmul.f32 %v15271_v33, %v15271_v33 }
 0x2ba   : > { %v846_v41 = vmul.f32 0.0078125, %v811_v38  ;;  %v894_v25 = vmul.f32 %v15274_v23, %v15274_v23 }
 0x2bb   : > { %v15281_v42 = vsub.f32 %v15127_v26, %v845_v39  ;;  %967 = vadd.xlane.f32.xlu1 %v908_v34  ;;  %937 = vadd.xlane.f32.xlu0 %v893_v40 }
 0x2bc   : > { %v15284_v24 = vsub.f32 %v15130_v27, %v846_v41  ;;  %v781_v45 = vpop.xlane.xlu0 %780 }
 0x2bd   : > { %v783_v46 = vpop.xlane.xlu1 %782  ;;  %v831_v47 = vmul.f32 0.0078125, %v781_v45  ;;  %v909_v48 = vmul.f32 %v15281_v42, %v15281_v42 }
 0x2be   : > { %v832_v49 = vmul.f32 0.0078125, %v783_v46  ;;  %v910_v27 = vmul.f32 %v15284_v24, %v15284_v24 }
 0x2bf   : > { %v15291_v50 = vsub.f32 %v15135_v28, %v831_v47  ;;  %939 = vadd.xlane.f32.xlu1 %v894_v25  ;;  %969 = vadd.xlane.f32.xlu0 %v909_v48 }
 0x2c0   : > { %v15294_v26 = vsub.f32 %v15138_v29, %v832_v49  ;;  %v813_v53 = vpop.xlane.xlu0 %812 }
 0x2c1   : > { %v815_v54 = vpop.xlane.xlu1 %814  ;;  %v847_v55 = vmul.f32 0.0078125, %v813_v53  ;;  %v895_v56 = vmul.f32 %v15291_v50, %v15291_v50 }
 0x2c2   : > { %v848_v57 = vmul.f32 0.0078125, %v815_v54  ;;  %v896_v29 = vmul.f32 %v15294_v26, %v15294_v26 }
 0x2c3   : > { %v15301_v58 = vsub.f32 %v15143_v30, %v847_v55  ;;  %971 = vadd.xlane.f32.xlu1 %v910_v27  ;;  %941 = vadd.xlane.f32.xlu0 %v895_v56  ;;  %v15313_v55 = vld [vmem:[#allocation8] ss:$0 sm:$0xff] }
 0x2c4   : > { %v15304_v28 = vsub.f32 %v15146_v31, %v848_v57 }
 0x2c5   : > { %v911_v59 = vmul.f32 %v15301_v58, %v15301_v58 }
 0x2c6   : > { %v912_v62 = vmul.f32 %v15304_v28, %v15304_v28 }
 0x2c7   : > { %943 = vadd.xlane.f32.xlu1 %v896_v29  ;;  %973 = vadd.xlane.f32.xlu0 %v911_v59 }
 0x2cb   : > { %975 = vadd.xlane.f32.xlu1 %v912_v62 }
 0x318   : > { %v914_v63 = vpop.xlane.xlu0 %913 }
 0x319   : > { %v977_v30 = vmul.f32 0.0078125, %v914_v63 }
 0x31b   : > { %v1009_v0 = vadd.f32 1e-05, %v977_v30 }
 0x31c   : > { %v916_v1 = vpop.xlane.xlu1 %915  ;;  %v946_v2 = vpop.xlane.xlu0 %945 }
 0x31d   : > { %13327 = vrsqrt.f32 %v1009_v0  ;;  %v978_v31 = vmul.f32 0.0078125, %v916_v1  ;;  %v993_v3 = vmul.f32 0.0078125, %v946_v2 }
 0x31f   : > { %v1010_v7 = vadd.f32 1e-05, %v978_v31  ;;  %v1025_v22 = vadd.f32 1e-05, %v993_v3  ;;  %v15317_v31 = vld [vmem:[#allocation10] ss:$0 sm:$0xff] }
 0x320   : > { %v948_v32 = vpop.xlane.xlu1 %947  ;;  %v918_v34 = vpop.xlane.xlu0 %917 }
 0x321   : > { %13329 = vrsqrt.f32 %v1010_v7  ;;  %v994_v35 = vmul.f32 0.0078125, %v948_v32  ;;  %v979_v38 = vmul.f32 0.0078125, %v918_v34 }
 0x322   : > { %13331 = vrsqrt.f32 %v1025_v22 }
 0x323   : > { %v1026_v39 = vadd.f32 1e-05, %v994_v35  ;;  %v1011_v40 = vadd.f32 1e-05, %v979_v38 }
 0x324   : > { %v920_v41 = vpop.xlane.xlu1 %919  ;;  %v950_v25 = vpop.xlane.xlu0 %949 }
 0x325   : > { %13333 = vrsqrt.f32 %v1026_v39  ;;  %v980_v45 = vmul.f32 0.0078125, %v920_v41  ;;  %v995_v46 = vmul.f32 0.0078125, %v950_v25 }
 0x326   : > { %13335 = vrsqrt.f32 %v1011_v40 }
 0x327   : > { %v13328_v47 = vpop.eup %13327  ;;  %v1012_v48 = vadd.f32 1e-05, %v980_v45  ;;  %v1027_v49 = vadd.f32 1e-05, %v995_v46 }
 0x328   : > { %v1073_v27 = vmul.f32 %v13328_v47, %v15151_v36  ;;  %v952_v53 = vpop.xlane.xlu1 %951  ;;  %v922_v54 = vpop.xlane.xlu0 %921 }
 0x329   : > { %13337 = vrsqrt.f32 %v1012_v48  ;;  %v996_v56 = vmul.f32 0.0078125, %v952_v53  ;;  %v981_v57 = vmul.f32 0.0078125, %v922_v54 }
 0x32a   : > { %13339 = vrsqrt.f32 %v1027_v49  ;;  %v1111_v30 = vmul.f32 %v15313_v55, %v1073_v27 }
 0x32b   : > { %v13330_v29 = vpop.eup %13329  ;;  %v1028_v59 = vadd.f32 1e-05, %v996_v56  ;;  %v1013_v62 = vadd.f32 1e-05, %v981_v57 }
 0x32c   : > { %v13332_v63 = vpop.eup %13331  ;;  %v1074_v0 = vmul.f32 %v13330_v29, %v15159_v43  ;;  %v924_v1 = vpop.xlane.xlu1 %923  ;;  %v1149_v39 = vadd.f32 %v15317_v31, %v1111_v30 }
 0x32d   : > { %v954_v2 = vpop.xlane.xlu0 %953  ;;  %v1089_v36 = vmul.f32 %v13332_v63, %v15154_v37  ;;  %13341 = vrsqrt.f32 %v1028_v59  ;;  %v982_v3 = vmul.f32 0.0078125, %v924_v1 }
 0x32e   : > { %v997_v7 = vmul.f32 0.0078125, %v954_v2  ;;  %v1112_v22 = vmul.f32 %v15313_v55, %v1074_v0  ;;  %13343 = vrsqrt.f32 %v1013_v62 }
 0x32f   : > { %v13334_v32 = vpop.eup %13333  ;;  %v1014_v34 = vadd.f32 1e-05, %v982_v3  ;;  %v1127_v40 = vmul.f32 %v15313_v55, %v1089_v36 }
 0x330   : > { %v1029_v35 = vadd.f32 1e-05, %v997_v7  ;;  %v13336_v38 = vpop.eup %13335  ;;  %v1150_v43 = vadd.f32 %v15317_v31, %v1112_v22  ;;  %v1090_v41 = vmul.f32 %v13334_v32, %v15162_v44  ;;  %v956_v25 = vpop.xlane.xlu1 %955 }
 0x331   : > { %v926_v37 = vpop.xlane.xlu0 %925  ;;  %v1075_v45 = vmul.f32 %v13336_v38, %v15169_v51  ;;  %13345 = vrsqrt.f32 %v1014_v34  ;;  %v998_v46 = vmul.f32 0.0078125, %v956_v25  ;;  %v1165_v57 = vadd.f32 %v15317_v31, %v1127_v40 }
 0x332   : > { %v1181_v47 = vpack.c.bf16 %v1150_v43, %v1149_v39  ;;  %v1128_v48 = vmul.f32 %v15313_v55, %v1090_v41  ;;  %13347 = vrsqrt.f32 %v1029_v35  ;;  %v983_v49 = vmul.f32 0.0078125, %v926_v37 }
 0x333   : > { %v13338_v27 = vpop.eup %13337  ;;  %v1113_v53 = vmul.f32 %v15313_v55, %v1075_v45  ;;  %v1030_v54 = vadd.f32 1e-05, %v998_v46 }
 0x334   : > { %v13340_v56 = vpop.eup %13339  ;;  %1197 = vst [vmem:[#allocation2] sm:$0xff] %v1181_v47  ;;  %v1166_v44 = vadd.f32 %v15317_v31, %v1128_v48  ;;  %v1076_v29 = vmul.f32 %v13338_v27, %v15172_v52  ;;  %v1015_v51 = vadd.f32 1e-05, %v983_v49  ;;  %v928_v59 = vpop.xlane.xlu1 %927  ;;  %1370 = vmatmul.mubr.bf16.vlgmr.msra.gmra.mrb[0].mxu0 %v1181_v47 }
 0x335   : > { %v958_v62 = vpop.xlane.xlu0 %957  ;;  %v1091_v63 = vmul.f32 %v13340_v56, %v15179_v60  ;;  %13349 = vrsqrt.f32 %v1030_v54  ;;  %v984_v30 = vmul.f32 0.0078125, %v928_v59  ;;  %1379 = vmatprep.mubr.bf16.mxu0 %v14432_v4  ;;  %v1151_v3 = vadd.f32 %v15317_v31, %v1113_v53 }
 0x336   : > { %v1189_v0 = vpack.c.bf16 %v1166_v44, %v1165_v57  ;;  %v1114_v1 = vmul.f32 %v15313_v55, %v1076_v29  ;;  %13351 = vrsqrt.f32 %v1015_v51  ;;  %v999_v2 = vmul.f32 0.0078125, %v958_v62 }
 0x337   : > { %v13342_v36 = vpop.eup %13341  ;;  %v1016_v7 = vadd.f32 1e-05, %v984_v30  ;;  %v1129_v32 = vmul.f32 %v15313_v55, %v1091_v63 }
 0x338   : > { %v13344_v52 = vpop.eup %13343  ;;  %1205 = vst [vmem:[#allocation2 + $0x40] sm:$0xff] %v1189_v0  ;;  %v1152_v22 = vadd.f32 %v15317_v31, %v1114_v1  ;;  %v1092_v60 = vmul.f32 %v13342_v36, %v15182_v61  ;;  %v1031_v34 = vadd.f32 1e-05, %v999_v2  ;;  %v960_v35 = vpop.xlane.xlu1 %959  ;;  %1450 = vmatmul.mubr.bf16.vlgmr.msra.gmra.mrb[0].mxu1 %v1189_v0 }
 0x339   : > { %v930_v38 = vpop.xlane.xlu0 %929  ;;  %v1077_v39 = vmul.f32 %v13344_v52, %v15189_v5  ;;  %13353 = vrsqrt.f32 %v1016_v7  ;;  %v1000_v43 = vmul.f32 0.0078125, %v960_v35  ;;  %1459 = vmatprep.mubr.bf16.mxu1 %v14432_v4  ;;  %v1167_v47 = vadd.f32 %v15317_v31, %v1129_v32 }
 0x33a   : > { %v1182_v40 = vpack.c.bf16 %v1152_v22, %v1151_v3  ;;  %v1130_v41 = vmul.f32 %v15313_v55, %v1092_v60  ;;  %13355 = vrsqrt.f32 %v1031_v34  ;;  %v985_v25 = vmul.f32 0.0078125, %v930_v38 }
 0x33b   : > { %v13346_v37 = vpop.eup %13345  ;;  %v1115_v45 = vmul.f32 %v15313_v55, %v1077_v39  ;;  %v1032_v46 = vadd.f32 1e-05, %v1000_v43 }
 0x33c   : > { %v13348_v61 = vpop.eup %13347  ;;  %1198 = vst [vmem:[#allocation2 + $0x8] sm:$0xff] %v1182_v40  ;;  %v1168_v48 = vadd.f32 %v15317_v31, %v1130_v41  ;;  %v1078_v5 = vmul.f32 %v13346_v37, %v15192_v6  ;;  %v1017_v49 = vadd.f32 1e-05, %v985_v25  ;;  %v932_v27 = vpop.xlane.xlu1 %931  ;;  %1380 = vmatmul.mubr.bf16.gmra.mrb[4].mxu0 %v1182_v40 }
 0x33d   : > { %v962_v53 = vpop.xlane.xlu0 %961  ;;  %v1093_v54 = vmul.f32 %v13348_v61, %v15199_v8  ;;  %13357 = vrsqrt.f32 %v1032_v46  ;;  %v986_v56 = vmul.f32 0.0078125, %v932_v27  ;;  %1389 = vmatprep.mubr.bf16.mxu0 %v14432_v4  ;;  %v1153_v59 = vadd.f32 %v15317_v31, %v1115_v45 }
 0x33e   : > { %v1190_v57 = vpack.c.bf16 %v1168_v48, %v1167_v47  ;;  %v1116_v44 = vmul.f32 %v15313_v55, %v1078_v5  ;;  %13359 = vrsqrt.f32 %v1017_v49  ;;  %v1001_v29 = vmul.f32 0.0078125, %v962_v53 }
 0x33f   : > { %v13350_v51 = vpop.eup %13349  ;;  %v1018_v62 = vadd.f32 1e-05, %v986_v56  ;;  %v1131_v30 = vmul.f32 %v15313_v55, %v1093_v54 }
 0x340   : > { %v13352_v6 = vpop.eup %13351  ;;  %1206 = vst [vmem:[#allocation2 + $0x48] sm:$0xff] %v1190_v57  ;;  %v1154_v63 = vadd.f32 %v15317_v31, %v1116_v44  ;;  %v1094_v8 = vmul.f32 %v13350_v51, %v15202_v9  ;;  %v1033_v0 = vadd.f32 1e-05, %v1001_v29  ;;  %v964_v1 = vpop.xlane.xlu1 %963  ;;  %1460 = vmatmul.mubr.bf16.gmra.mrb[4].mxu1 %v1190_v57 }
 0x341   : > { %v934_v2 = vpop.xlane.xlu0 %933  ;;  %v1079_v36 = vmul.f32 %v13352_v6, %v15209_v10  ;;  %13361 = vrsqrt.f32 %v1018_v62  ;;  %v1002_v3 = vmul.f32 0.0078125, %v964_v1  ;;  %1469 = vmatprep.mubr.bf16.mxu1 %v14432_v4  ;;  %v1169_v35 = vadd.f32 %v15317_v31, %v1131_v30 }
 0x342   : > { %v1183_v7 = vpack.c.bf16 %v1154_v63, %v1153_v59  ;;  %v1132_v52 = vmul.f32 %v15313_v55, %v1094_v8  ;;  %13363 = vrsqrt.f32 %v1033_v0  ;;  %v987_v22 = vmul.f32 0.0078125, %v934_v2 }
 0x343   : > { %v13354_v32 = vpop.eup %13353  ;;  %v1117_v60 = vmul.f32 %v15313_v55, %v1079_v36  ;;  %v1034_v34 = vadd.f32 1e-05, %v1002_v3 }
 0x344   : > { %v13356_v9 = vpop.eup %13355  ;;  %1199 = vst [vmem:[#allocation2 + $0x10] sm:$0xff] %v1183_v7  ;;  %v1170_v38 = vadd.f32 %v15317_v31, %v1132_v52  ;;  %v1080_v10 = vmul.f32 %v13354_v32, %v15212_v11  ;;  %v1019_v39 = vadd.f32 1e-05, %v987_v22  ;;  %v936_v43 = vpop.xlane.xlu1 %935  ;;  %1390 = vmatmul.mubr.bf16.gmra.mrb[8].mxu0 %v1183_v7 }
 0x345   : > { %v966_v40 = vpop.xlane.xlu0 %965  ;;  %v1095_v41 = vmul.f32 %v13356_v9, %v15219_v12  ;;  %13365 = vrsqrt.f32 %v1034_v34  ;;  %v988_v25 = vmul.f32 0.0078125, %v936_v43  ;;  %1399 = vmatprep.mubr.bf16.mxu0 %v14432_v4  ;;  %v1155_v47 = vadd.f32 %v15317_v31, %v1117_v60 }
 0x346   : > { %v1191_v37 = vpack.c.bf16 %v1170_v38, %v1169_v35  ;;  %v1118_v45 = vmul.f32 %v15313_v55, %v1080_v10  ;;  %13367 = vrsqrt.f32 %v1019_v39  ;;  %v1003_v46 = vmul.f32 0.0078125, %v966_v40 }
 0x347   : > { %v13358_v61 = vpop.eup %13357  ;;  %v1020_v48 = vadd.f32 1e-05, %v988_v25  ;;  %v1133_v49 = vmul.f32 %v15313_v55, %v1095_v41 }
 0x348   : > { %v13360_v11 = vpop.eup %13359  ;;  %1207 = vst [vmem:[#allocation2 + $0x50] sm:$0xff] %v1191_v37  ;;  %v1156_v5 = vadd.f32 %v15317_v31, %v1118_v45  ;;  %v1096_v12 = vmul.f32 %v13358_v61, %v15222_v13  ;;  %v1035_v27 = vadd.f32 1e-05, %v1003_v46  ;;  %v968_v53 = vpop.xlane.xlu1 %967  ;;  %1470 = vmatmul.mubr.bf16.gmra.mrb[8].mxu1 %v1191_v37 }
 0x349   : > { %v938_v54 = vpop.xlane.xlu0 %937  ;;  %v1081_v56 = vmul.f32 %v13360_v11, %v15229_v14  ;;  %13369 = vrsqrt.f32 %v1020_v48  ;;  %v1004_v57 = vmul.f32 0.0078125, %v968_v53  ;;  %1479 = vmatprep.mubr.bf16.mxu1 %v14432_v4  ;;  %v1171_v63 = vadd.f32 %v15317_v31, %v1133_v49 }
 0x34a   : > { %v1184_v44 = vpack.c.bf16 %v1156_v5, %v1155_v47  ;;  %v1134_v29 = vmul.f32 %v15313_v55, %v1096_v12  ;;  %13371 = vrsqrt.f32 %v1035_v27  ;;  %v989_v51 = vmul.f32 0.0078125, %v938_v54 }
 0x34b   : > { %v13362_v59 = vpop.eup %13361  ;;  %v1119_v62 = vmul.f32 %v15313_v55, %v1081_v56  ;;  %v1036_v6 = vadd.f32 1e-05, %v1004_v57 }
 0x34c   : > { %v13364_v13 = vpop.eup %13363  ;;  %1200 = vst [vmem:[#allocation2 + $0x18] sm:$0xff] %v1184_v44  ;;  %v1172_v30 = vadd.f32 %v15317_v31, %v1134_v29  ;;  %v1082_v14 = vmul.f32 %v13362_v59, %v15232_v15  ;;  %v1021_v8 = vadd.f32 1e-05, %v989_v51  ;;  %v940_v0 = vpop.xlane.xlu1 %939  ;;  %1400 = vmatmul.mubr.bf16.gmra.mrb[12].mxu0 %v1184_v44 }
 0x34d   : > { %v970_v1 = vpop.xlane.xlu0 %969  ;;  %v1097_v2 = vmul.f32 %v13364_v13, %v15239_v16  ;;  %13373 = vrsqrt.f32 %v1036_v6  ;;  %v990_v36 = vmul.f32 0.0078125, %v940_v0  ;;  %1409 = vmatprep.mubr.bf16.mxu0 %v14432_v4  ;;  %v1157_v32 = vadd.f32 %v15317_v31, %v1119_v62 }
 0x34e   : > { %v1192_v3 = vpack.c.bf16 %v1172_v30, %v1171_v63  ;;  %v1120_v7 = vmul.f32 %v15313_v55, %v1082_v14  ;;  %13375 = vrsqrt.f32 %v1021_v8  ;;  %v1005_v52 = vmul.f32 0.0078125, %v970_v1 }
 0x34f   : > { %v13366_v22 = vpop.eup %13365  ;;  %v1022_v60 = vadd.f32 1e-05, %v990_v36  ;;  %v1135_v9 = vmul.f32 %v15313_v55, %v1097_v2 }
 0x350   : > { %v13368_v15 = vpop.eup %13367  ;;  %1208 = vst [vmem:[#allocation2 + $0x58] sm:$0xff] %v1192_v3  ;;  %v1158_v34 = vadd.f32 %v15317_v31, %v1120_v7  ;;  %v1098_v16 = vmul.f32 %v13366_v22, %v15242_v17  ;;  %v1037_v35 = vadd.f32 1e-05, %v1005_v52  ;;  %v972_v38 = vpop.xlane.xlu1 %971  ;;  %1480 = vmatmul.mubr.bf16.gmra.mrb[12].mxu1 %v1192_v3 }
 0x351   : > { %v942_v10 = vpop.xlane.xlu0 %941  ;;  %v1083_v39 = vmul.f32 %v13368_v15, %v15249_v18  ;;  %13377 = vrsqrt.f32 %v1022_v60  ;;  %v1006_v43 = vmul.f32 0.0078125, %v972_v38  ;;  %1489 = vmatprep.mubr.bf16.mxu1 %v14432_v4  ;;  %v1173_v61 = vadd.f32 %v15317_v31, %v1135_v9 }
 0x352   : > { %v1185_v40 = vpack.c.bf16 %v1158_v34, %v1157_v32  ;;  %v1136_v41 = vmul.f32 %v15313_v55, %v1098_v16  ;;  %13379 = vrsqrt.f32 %v1037_v35  ;;  %v991_v25 = vmul.f32 0.0078125, %v942_v10 }
 0x353   : > { %v13370_v37 = vpop.eup %13369  ;;  %v1121_v45 = vmul.f32 %v15313_v55, %v1083_v39  ;;  %v1038_v46 = vadd.f32 1e-05, %v1006_v43 }
 0x354   : > { %v13372_v17 = vpop.eup %13371  ;;  %1201 = vst [vmem:[#allocation2 + $0x20] sm:$0xff] %v1185_v40  ;;  %v1174_v47 = vadd.f32 %v15317_v31, %v1136_v41  ;;  %v1084_v18 = vmul.f32 %v13370_v37, %v15252_v19  ;;  %v1023_v48 = vadd.f32 1e-05, %v991_v25  ;;  %v944_v11 = vpop.xlane.xlu1 %943  ;;  %1410 = vmatmul.mubr.bf16.gmra.mrb[16].mxu0 %v1185_v40 }
 0x355   : > { %v974_v5 = vpop.xlane.xlu0 %973  ;;  %v1099_v49 = vmul.f32 %v13372_v17, %v15259_v20  ;;  %13381 = vrsqrt.f32 %v1038_v46  ;;  %v992_v12 = vmul.f32 0.0078125, %v944_v11  ;;  %1419 = vmatprep.mubr.bf16.mxu0 %v14432_v4  ;;  %v1159_v57 = vadd.f32 %v15317_v31, %v1121_v45  ;;  %v1245_v11 = vld [vmem:[#allocation16] sm:$0x3] }
 0x356   : > { %v1193_v27 = vpack.c.bf16 %v1174_v47, %v1173_v61  ;;  %v1122_v53 = vmul.f32 %v15313_v55, %v1084_v18  ;;  %13383 = vrsqrt.f32 %v1023_v48  ;;  %v1007_v54 = vmul.f32 0.0078125, %v974_v5 }
 0x357   : > { %v13374_v56 = vpop.eup %13373  ;;  %v1024_v44 = vadd.f32 1e-05, %v992_v12  ;;  %v1137_v51 = vmul.f32 %v15313_v55, %v1099_v49  ;;  %v1247_v18 = vlaneseq }
 0x358   : > { %v13376_v19 = vpop.eup %13375  ;;  %1209 = vst [vmem:[#allocation2 + $0x60] sm:$0xff] %v1193_v27  ;;  %v1160_v29 = vadd.f32 %v15317_v31, %v1122_v53  ;;  %v1100_v20 = vmul.f32 %v13374_v56, %v15262_v21  ;;  %v1039_v59 = vadd.f32 1e-05, %v1007_v54  ;;  %v976_v62 = vpop.xlane.xlu1 %975  ;;  %1490 = vmatmul.mubr.bf16.gmra.mrb[16].mxu1 %v1193_v27 }
 0x359   : > { %v1085_v6 = vmul.f32 %v13376_v19, %v15271_v33  ;;  %13385 = vrsqrt.f32 %v1024_v44  ;;  %v1008_v13 = vmul.f32 0.0078125, %v976_v62  ;;  %1499 = vmatprep.mubr.bf16.mxu1 %v14432_v4  ;;  %v1175_v1 = vadd.f32 %v15317_v31, %v1137_v51 }
 0x35a   : > { %v1186_v63 = vpack.c.bf16 %v1160_v29, %v1159_v57  ;;  %v1138_v30 = vmul.f32 %v15313_v55, %v1100_v20  ;;  %13387 = vrsqrt.f32 %v1039_v59  ;;  %v15426_v48 = vshrl.u32 %v1247_v18, 7 }
 0x35b   : > { %v13378_v14 = vpop.eup %13377  ;;  %v1040_v8 = vadd.f32 1e-05, %v1008_v13  ;;  %v1123_v2 = vmul.f32 %v15313_v55, %v1085_v6 }
 0x35c   : > { %v13380_v0 = vpop.eup %13379  ;;  %1202 = vst [vmem:[#allocation2 + $0x28] sm:$0xff] %v1186_v63  ;;  %v1176_v21 = vadd.f32 %v15317_v31, %v1138_v30  ;;  %v1086_v33 = vmul.f32 %v13378_v14, %v15274_v23  ;;  %1420 = vmatmul.mubr.bf16.gmra.mrb[20].mxu0 %v1186_v63  ;;  %v1253_v5 = vsub.s32 1, %v15426_v48 }
 0x35d   : > { %v1101_v36 = vmul.f32 %v13380_v0, %v15281_v42  ;;  %13389 = vrsqrt.f32 %v1040_v8  ;;  %1429 = vmatprep.mubr.bf16.mxu0 %v14432_v4  ;;  %v1161_v32 = vadd.f32 %v15317_v31, %v1123_v2 }
 0x35e   : > { %v1194_v3 = vpack.c.bf16 %v1176_v21, %v1175_v1  ;;  %v1124_v7 = vmul.f32 %v15313_v55, %v1086_v33  ;;  %v15432_v12 = vrot.slane %v1245_v11, %v1253_v5 }
 0x35f   : > { %v13382_v52 = vpop.eup %13381  ;;  %v1139_v15 = vmul.f32 %v15313_v55, %v1101_v36 }
 0x360   : > { %v13384_v22 = vpop.eup %13383  ;;  %1210 = vst [vmem:[#allocation2 + $0x68] sm:$0xff] %v1194_v3  ;;  %v1162_v60 = vadd.f32 %v15317_v31, %v1124_v7  ;;  %v1102_v23 = vmul.f32 %v13382_v52, %v15284_v24  ;;  %1500 = vmatmul.mubr.bf16.gmra.mrb[20].mxu1 %v1194_v3 }
 0x361   : > { %v1087_v42 = vmul.f32 %v13384_v22, %v15291_v50  ;;  %1509 = vmatprep.mubr.bf16.mxu1 %v14432_v4  ;;  %v1177_v38 = vadd.f32 %v15317_v31, %v1139_v15 }
 0x362   : > { %v1187_v34 = vpack.c.bf16 %v1162_v60, %v1161_v32  ;;  %v1140_v9 = vmul.f32 %v15313_v55, %v1102_v23 }
 0x363   : > { %v13386_v16 = vpop.eup %13385  ;;  %v1125_v39 = vmul.f32 %v15313_v55, %v1087_v42 }
 0x364   : > { %v13388_v35 = vpop.eup %13387  ;;  %1203 = vst [vmem:[#allocation2 + $0x30] sm:$0xff] %v1187_v34  ;;  %v1178_v10 = vadd.f32 %v15317_v31, %v1140_v9  ;;  %v1088_v43 = vmul.f32 %v13386_v16, %v15294_v26  ;;  %1430 = vmatmul.mubr.bf16.gmra.mrb[24].mxu0 %v1187_v34 }
 0x365   : > { %v1103_v24 = vmul.f32 %v13388_v35, %v15301_v58  ;;  %1439 = vmatprep.mubr.bf16.mxu0 %v14432_v4  ;;  %v1163_v25 = vadd.f32 %v15317_v31, %v1125_v39 }
 0x366   : > { %v1195_v50 = vpack.c.bf16 %v1178_v10, %v1177_v38  ;;  %v1126_v40 = vmul.f32 %v15313_v55, %v1088_v43 }
 0x367   : > { %v13390_v41 = vpop.eup %13389  ;;  %v1141_v45 = vmul.f32 %v15313_v55, %v1103_v24 }
 0x368   : > { %1211 = vst [vmem:[#allocation2 + $0x70] sm:$0xff] %v1195_v50  ;;  %v1164_v37 = vadd.f32 %v15317_v31, %v1126_v40  ;;  %v1104_v46 = vmul.f32 %v13390_v41, %v15304_v28  ;;  %1510 = vmatmul.mubr.bf16.gmra.mrb[24].mxu1 %v1195_v50  ;;  %v1249_v28 = vsub.s32 0, %v15426_v48 }
 0x369   : > { %1519 = vmatprep.mubr.bf16.mxu1 %v14432_v4  ;;  %v1179_v17 = vadd.f32 %v15317_v31, %v1141_v45 }
 0x36a   : > { %v1188_v26 = vpack.c.bf16 %v1164_v37, %v1163_v25  ;;  %v1142_v58 = vmul.f32 %v15313_v55, %v1104_v46  ;;  %v15430_v49 = vrot.slane %v1245_v11, %v1249_v28 }
 0x36c   : > { %1204 = vst [vmem:[#allocation2 + $0x38] sm:$0xff] %v1188_v26  ;;  %v1180_v61 = vadd.f32 %v15317_v31, %v1142_v58  ;;  %1440 = vmatmul.mubr.bf16.gmra.mrb[28].mxu0 %v1188_v26 }
 0x36e   : > { %v1196_v47 = vpack.c.bf16 %v1180_v61, %v1179_v17 }
 0x370   : > { %1212 = vst [vmem:[#allocation2 + $0x78] sm:$0xff] %v1196_v47  ;;  %1520 = vmatmul.mubr.bf16.gmra.mrb[28].mxu1 %v1196_v47 }
 0x407   : > { %v1371_v55 = vpop.f32.mrb[0].mxu0 }
 0x408   : > { %v1373_v27 = vpop.f32.mrb[1].mxu0  ;;  %v1372_v31 = vadd.f32 %v1371_v55, %v15430_v49 }
 0x409   : > { %v1375_v53 = vpop.f32.mrb[2].mxu0  ;;  %v1374_v57 = vadd.f32 %v1373_v27, %v15432_v12 }
 0x40a   : > { %v1376_v54 = vadd.f32 %v1375_v53, %v15430_v49  ;;  %v1377_v56 = vpop.f32.mrb[3].mxu0 }
 0x40b   : > { %v1378_v44 = vadd.f32 %v1377_v56, %v15432_v12  ;;  %v1451_v19 = vpop.f32.mrb[0].mxu1 }
 0x40c   : > { %v15438_v29 = vpack.c.bf16 %v1376_v54, %v1372_v31  ;;  %v1453_v51 = vpop.f32.mrb[1].mxu1  ;;  %v1452_v62 = vadd.f32 %v1451_v19, %v15430_v49 }
 0x40d   : > { %v15440_v20 = vpack.c.bf16 %v1378_v44, %v1374_v57  ;;  %v1455_v59 = vpop.f32.mrb[2].mxu1  ;;  %v1454_v63 = vadd.f32 %v1453_v51, %v15432_v12 }
 0x40e   : > { %v1456_v6 = vadd.f32 %v1455_v59, %v15430_v49  ;;  %1578 = vrot.lane.b32.xlu0 %v15438_v29, %s14433_s3  ;;  %v1457_v13 = vpop.f32.mrb[3].mxu1 }
 0x40f   : > { %v1458_v30 = vadd.f32 %v1457_v13, %v15432_v12  ;;  %v1381_v14 = vpop.f32.mrb[4].mxu0 }
 0x410   : > { %v15448_v8 = vpack.c.bf16 %v1456_v6, %v1452_v62  ;;  %v1383_v0 = vpop.f32.mrb[5].mxu0  ;;  %v1382_v2 = vadd.f32 %v1381_v14, %v15430_v49 }
 0x411   : > { %v15450_v1 = vpack.c.bf16 %v1458_v30, %v1454_v63  ;;  %v1385_v21 = vpop.f32.mrb[6].mxu0  ;;  %v1384_v3 = vadd.f32 %v1383_v0, %v15432_v12 }
 0x412   : > { %v1386_v33 = vadd.f32 %v1385_v21, %v15430_v49  ;;  %1594 = vrot.lane.b32.xlu0 %v15448_v8, %s14433_s3  ;;  %v1387_v36 = vpop.f32.mrb[7].mxu0 }
 0x413   : > { %v1388_v7 = vadd.f32 %v1387_v36, %v15432_v12  ;;  %v1461_v52 = vpop.f32.mrb[4].mxu1 }
 0x414   : > { %v15458_v22 = vpack.c.bf16 %v1386_v33, %v1382_v2  ;;  %v1463_v32 = vpop.f32.mrb[5].mxu1  ;;  %v1462_v23 = vadd.f32 %v1461_v52, %v15430_v49 }
 0x415   : > { %v15460_v60 = vpack.c.bf16 %v1388_v7, %v1384_v3  ;;  %v1465_v15 = vpop.f32.mrb[6].mxu1  ;;  %v1464_v9 = vadd.f32 %v1463_v32, %v15432_v12 }
 0x416   : > { %v1466_v42 = vadd.f32 %v1465_v15, %v15430_v49  ;;  %1626 = vrot.lane.b32.xlu0 %v15440_v20, %s14433_s3  ;;  %1580 = vrot.lane.b32.xlu1 %v15458_v22, %s14433_s3  ;;  %v1467_v34 = vpop.f32.mrb[7].mxu1 }
 0x417   : > { %v1468_v16 = vadd.f32 %v1467_v34, %v15432_v12  ;;  %v1391_v35 = vpop.f32.mrb[8].mxu0 }
 0x418   : > { %v15470_v38 = vpack.c.bf16 %v1466_v42, %v1462_v23  ;;  %v1393_v10 = vpop.f32.mrb[9].mxu0  ;;  %v1392_v24 = vadd.f32 %v1391_v35, %v15430_v49 }
 0x419   : > { %v15472_v39 = vpack.c.bf16 %v1468_v16, %v1464_v9  ;;  %v1395_v43 = vpop.f32.mrb[10].mxu0  ;;  %v1394_v41 = vadd.f32 %v1393_v10, %v15432_v12 }
 0x41a   : > { %v1396_v50 = vadd.f32 %v1395_v43, %v15430_v49  ;;  %1642 = vrot.lane.b32.xlu0 %v15450_v1, %s14433_s3  ;;  %1596 = vrot.lane.b32.xlu1 %v15470_v38, %s14433_s3  ;;  %v1397_v40 = vpop.f32.mrb[11].mxu0 }
 0x41b   : > { %v1398_v25 = vadd.f32 %v1397_v40, %v15432_v12  ;;  %v1471_v37 = vpop.f32.mrb[8].mxu1 }
 0x41c   : > { %v15482_v45 = vpack.c.bf16 %v1396_v50, %v1392_v24  ;;  %v1473_v46 = vpop.f32.mrb[9].mxu1  ;;  %v1472_v17 = vadd.f32 %v1471_v37, %v15430_v49 }
 0x41d   : > { %v15484_v26 = vpack.c.bf16 %v1398_v25, %v1394_v41  ;;  %v1475_v58 = vpop.f32.mrb[10].mxu1  ;;  %v1474_v18 = vadd.f32 %v1473_v46, %v15432_v12 }
 0x41e   : > { %v1476_v61 = vadd.f32 %v1475_v58, %v15430_v49  ;;  %1628 = vrot.lane.b32.xlu1 %v15460_v60, %s14433_s3  ;;  %v1477_v47 = vpop.f32.mrb[11].mxu1 }
 0x41f   : > { %v1478_v28 = vadd.f32 %v1477_v47, %v15432_v12  ;;  %v1401_v11 = vpop.f32.mrb[12].mxu0 }
 0x420   : > { %v15492_v5 = vpack.c.bf16 %v1476_v61, %v1472_v17  ;;  %v1403_v55 = vpop.f32.mrb[13].mxu0  ;;  %v1402_v31 = vadd.f32 %v1401_v11, %v15430_v49 }
 0x421   : > { %v15494_v27 = vpack.c.bf16 %v1478_v28, %v1474_v18  ;;  %v1405_v53 = vpop.f32.mrb[14].mxu0  ;;  %v1404_v57 = vadd.f32 %v1403_v55, %v15432_v12 }
 0x422   : > { %v1406_v54 = vadd.f32 %v1405_v53, %v15430_v49  ;;  %1644 = vrot.lane.b32.xlu1 %v15472_v39, %s14433_s3  ;;  %1598 = vrot.lane.b32.xlu0 %v15492_v5, %s14433_s3  ;;  %v1407_v56 = vpop.f32.mrb[15].mxu0 }
 0x423   : > { %v1408_v44 = vadd.f32 %v1407_v56, %v15432_v12  ;;  %v1481_v19 = vpop.f32.mrb[12].mxu1 }
 0x424   : > { %v15504_v51 = vpack.c.bf16 %v1406_v54, %v1402_v31  ;;  %v1483_v59 = vpop.f32.mrb[13].mxu1  ;;  %v1482_v13 = vadd.f32 %v1481_v19, %v15430_v49 }
 0x425   : > { %v15506_v62 = vpack.c.bf16 %v1408_v44, %v1404_v57  ;;  %v1485_v6 = vpop.f32.mrb[14].mxu1  ;;  %v1484_v14 = vadd.f32 %v1483_v59, %v15432_v12 }
 0x426   : > { %v1486_v63 = vadd.f32 %v1485_v6, %v15430_v49  ;;  %1582 = vrot.lane.b32.xlu1 %v15482_v45, %s14433_s3  ;;  %1630 = vrot.lane.b32.xlu0 %v15484_v26, %s14433_s3  ;;  %v1487_v30 = vpop.f32.mrb[15].mxu1 }
 0x427   : > { %v1488_v0 = vadd.f32 %v1487_v30, %v15432_v12  ;;  %v1411_v21 = vpop.f32.mrb[16].mxu0 }
 0x428   : > { %v15516_v2 = vpack.c.bf16 %v1486_v63, %v1482_v13  ;;  %v1413_v33 = vpop.f32.mrb[17].mxu0  ;;  %v1412_v7 = vadd.f32 %v1411_v21, %v15430_v49 }
 0x429   : > { %v15518_v36 = vpack.c.bf16 %v1488_v0, %v1484_v14  ;;  %v1415_v3 = vpop.f32.mrb[18].mxu0  ;;  %v1414_v15 = vadd.f32 %v1413_v33, %v15432_v12 }
 0x42a   : > { %v1416_v52 = vadd.f32 %v1415_v3, %v15430_v49  ;;  %1646 = vrot.lane.b32.xlu0 %v15494_v27, %s14433_s3  ;;  %1584 = vrot.lane.b32.xlu1 %v15504_v51, %s14433_s3  ;;  %v1417_v32 = vpop.f32.mrb[19].mxu0 }
 0x42b   : > { %v1418_v23 = vadd.f32 %v1417_v32, %v15432_v12  ;;  %v1491_v42 = vpop.f32.mrb[16].mxu1 }
 0x42c   : > { %v15528_v34 = vpack.c.bf16 %v1416_v52, %v1412_v7  ;;  %v1493_v9 = vpop.f32.mrb[17].mxu1  ;;  %v1492_v10 = vadd.f32 %v1491_v42, %v15430_v49 }
 0x42d   : > { %v15530_v16 = vpack.c.bf16 %v1418_v23, %v1414_v15  ;;  %v1495_v35 = vpop.f32.mrb[18].mxu1  ;;  %v1494_v50 = vadd.f32 %v1493_v9, %v15432_v12 }
 0x42e   : > { %v1496_v43 = vadd.f32 %v1495_v35, %v15430_v49  ;;  %1600 = vrot.lane.b32.xlu1 %v15516_v2, %s14433_s3  ;;  %1586 = vrot.lane.b32.xlu0 %v15528_v34, %s14433_s3  ;;  %v1497_v24 = vpop.f32.mrb[19].mxu1 }
 0x42f   : > { %v1498_v40 = vadd.f32 %v1497_v24, %v15432_v12  ;;  %v1421_v41 = vpop.f32.mrb[20].mxu0 }
 0x430   : > { %v15540_v25 = vpack.c.bf16 %v1496_v43, %v1492_v10  ;;  %v1423_v37 = vpop.f32.mrb[21].mxu0  ;;  %v1422_v17 = vadd.f32 %v1421_v41, %v15430_v49 }
 0x431   : > { %v15542_v46 = vpack.c.bf16 %v1498_v40, %v1494_v50  ;;  %v1425_v58 = vpop.f32.mrb[22].mxu0  ;;  %v1424_v18 = vadd.f32 %v1423_v37, %v15432_v12 }
 0x432   : > { %v1426_v61 = vadd.f32 %v1425_v58, %v15430_v49  ;;  %1632 = vrot.lane.b32.xlu1 %v15506_v62, %s14433_s3  ;;  %1602 = vrot.lane.b32.xlu0 %v15540_v25, %s14433_s3  ;;  %v1427_v47 = vpop.f32.mrb[23].mxu0 }
 0x433   : > { %v1428_v28 = vadd.f32 %v1427_v47, %v15432_v12  ;;  %v1501_v11 = vpop.f32.mrb[20].mxu1 }
 0x434   : > { %v15552_v55 = vpack.c.bf16 %v1426_v61, %v1422_v17  ;;  %v1503_v53 = vpop.f32.mrb[21].mxu1  ;;  %v1502_v56 = vadd.f32 %v1501_v11, %v15430_v49 }
 0x435   : > { %v15554_v31 = vpack.c.bf16 %v1428_v28, %v1424_v18  ;;  %v1505_v54 = vpop.f32.mrb[22].mxu1  ;;  %v1504_v19 = vadd.f32 %v1503_v53, %v15432_v12 }
 0x436   : > { %v1506_v57 = vadd.f32 %v1505_v54, %v15430_v49  ;;  %1648 = vrot.lane.b32.xlu1 %v15518_v36, %s14433_s3  ;;  %1634 = vrot.lane.b32.xlu0 %v15530_v16, %s14433_s3  ;;  %v1507_v44 = vpop.f32.mrb[23].mxu1 }
 0x437   : > { %v1508_v59 = vadd.f32 %v1507_v44, %v15432_v12  ;;  %v1431_v6 = vpop.f32.mrb[24].mxu0 }
 0x438   : > { %v15564_v13 = vpack.c.bf16 %v1506_v57, %v1502_v56  ;;  %v1433_v63 = vpop.f32.mrb[25].mxu0  ;;  %v1432_v0 = vadd.f32 %v1431_v6, %v15430_v49 }
 0x439   : > { %v15566_v30 = vpack.c.bf16 %v1508_v59, %v1504_v19  ;;  %v1435_v14 = vpop.f32.mrb[26].mxu0  ;;  %v1434_v3 = vadd.f32 %v1433_v63, %v15432_v12 }
 0x43a   : > { %v1436_v21 = vadd.f32 %v1435_v14, %v15430_v49  ;;  %1650 = vrot.lane.b32.xlu0 %v15542_v46, %s14433_s3  ;;  %1588 = vrot.lane.b32.xlu1 %v15552_v55, %s14433_s3  ;;  %v1437_v33 = vpop.f32.mrb[27].mxu0 }
 0x43b   : > { %v1438_v7 = vadd.f32 %v1437_v33, %v15432_v12  ;;  %v1511_v52 = vpop.f32.mrb[24].mxu1 }
 0x43c   : > { %v15576_v32 = vpack.c.bf16 %v1436_v21, %v1432_v0  ;;  %v1513_v15 = vpop.f32.mrb[25].mxu1  ;;  %v1512_v9 = vadd.f32 %v1511_v52, %v15430_v49  ;;  %v14435_v21 = vmov 1934713408   ;;  %v15628_v52 = vpack.i.b16 %v14432_v4, %v14432_v4 }
 0x43d   : > { %v15578_v23 = vpack.c.bf16 %v1438_v7, %v1434_v3  ;;  %v1515_v42 = vpop.f32.mrb[26].mxu1  ;;  %v1514_v43 = vadd.f32 %v1513_v15, %v15432_v12  ;;  %v1953_v33 = vunpack.c.l.s4 %v14435_v21 }
 0x43e   : > { %v1516_v35 = vadd.f32 %v1515_v42, %v15430_v49  ;;  %1604 = vrot.lane.b32.xlu1 %v15564_v13, %s14433_s3  ;;  %1590 = vrot.lane.b32.xlu0 %v15576_v32, %s14433_s3  ;;  %v1517_v10 = vpop.f32.mrb[27].mxu1 }
 0x43f   : > { %v1518_v24 = vadd.f32 %v1517_v10, %v15432_v12  ;;  %v1441_v50 = vpop.f32.mrb[28].mxu0  ;;  %v1954_v7 = vunpack.c.0.s8 %v1953_v33  ;;  %v1670_v10 = vshrl.u32 %v15440_v20, 16 }
 0x440   : > { %v15588_v40 = vpack.c.bf16 %v1516_v35, %v1512_v9  ;;  %v1443_v41 = vpop.f32.mrb[29].mxu0  ;;  %v1442_v17 = vadd.f32 %v1441_v50, %v15430_v49  ;;  %v1662_v9 = vshrl.u32 %v15438_v29, 16  ;;  %v1796_v35 = vshrl.u32 %v15448_v8, 16 }
 0x441   : > { %v15590_v37 = vpack.c.bf16 %v1518_v24, %v1514_v43  ;;  %v1445_v58 = vpop.f32.mrb[30].mxu0  ;;  %v1444_v18 = vadd.f32 %v1443_v41, %v15432_v12  ;;  %v15634_v42 = vsub.s32 %v1954_v7, %v15426_v48  ;;  %v1684_v24 = vshrl.u32 %v15458_v22, 16 }
 0x442   : > { %v1446_v61 = vadd.f32 %v1445_v58, %v15430_v49  ;;  %1636 = vrot.lane.b32.xlu1 %v15554_v31, %s14433_s3  ;;  %1606 = vrot.lane.b32.xlu0 %v15588_v40, %s14433_s3  ;;  %v1447_v47 = vpop.f32.mrb[31].mxu0 }
 0x443   : > { %v1448_v28 = vadd.f32 %v1447_v47, %v15432_v12  ;;  %v1521_v11 = vpop.f32.mrb[28].mxu1 }
 0x444   : > { %v15600_v53 = vpack.c.bf16 %v1446_v61, %v1442_v17  ;;  %v1522_v54 = vadd.f32 %v1521_v11, %v15430_v49  ;;  %v1523_v56 = vpop.f32.mrb[29].mxu1 }
 0x445   : > { %v15603_v57 = vpack.c.bf16 %v1448_v28, %v1444_v18  ;;  %v1524_v44 = vadd.f32 %v1523_v56, %v15432_v12  ;;  %v1525_v19 = vpop.f32.mrb[30].mxu1 }
 0x446   : > { %v1526_v59 = vadd.f32 %v1525_v19, %v15430_v49  ;;  %1652 = vrot.lane.b32.xlu1 %v15566_v30, %s14433_s3  ;;  %1638 = vrot.lane.b32.xlu0 %v15578_v23, %s14433_s3  ;;  %v1527_v6 = vpop.f32.mrb[31].mxu1  ;;  %v14434_v49 = vmov 1983009808  }
 0x447   : > { %19201 = vst [vmem:[#allocation51_spill] sm:$0xff] %v15603_v57  ;;  %v1528_v63 = vadd.f32 %v1527_v6, %v15432_v12  ;;  %v1922_v12 = vunpack.c.l.s4 %v14434_v49 }
 0x448   : > { %v15612_v14 = vpack.c.bf16 %v1526_v59, %v1522_v54 }
 0x449   : > { %v15614_v0 = vpack.c.bf16 %v1528_v63, %v1524_v44  ;;  %v1923_v3 = vunpack.c.0.s8 %v1922_v12 }
 0x44a   : > { %19202 = vst [vmem:[#allocation52_spill] sm:$0xff] %v15612_v14  ;;  %1654 = vrot.lane.b32.xlu0 %v15590_v37, %s14433_s3  ;;  %1592 = vrot.lane.b32.xlu1 %v15600_v53, %s14433_s3 }
 0x44b   : > { %19203 = vst [vmem:[#allocation53_spill] sm:$0xff] %v15614_v0  ;;  %v15631_v15 = vsub.s32 %v1923_v3, %v15426_v48 }
 0x44e   : > { %1608 = vrot.lane.b32.xlu1 %v15612_v14, %s14433_s3 }
 0x452   : > { %1640 = vrot.lane.b32.xlu1 %v15603_v57, %s14433_s3 }
 0x456   : > { %1656 = vrot.lane.b32.xlu1 %v15614_v0, %s14433_s3 }
 0x480   : > { %v1579_v58 = vpop.permute.xlu0 %1578 }
 0x481   : > { %v1660_v18 = vpack.i.b16 %v1579_v58, %v15438_v29  ;;  %v1663_v28 = vshrl.u32 %v1579_v58, 16 }
 0x483   : > { %v1664_v6 = vpack.i.b16 %v1663_v28, %v1662_v9  ;;  %v1920_v12 = vcombine.high %v1660_v18, %v15628_v52  ;;  %v1927_v33 = vrot.slane %v1660_v18, %v15631_v15 }
 0x484   : > { %v1595_v21 = vpop.permute.xlu0 %1594 }
 0x485   : > { %v1986_v58 = vcombine.high %v1664_v6, %v15628_v52  ;;  %v1794_v59 = vpack.i.b16 %v1595_v21, %v15448_v8  ;;  %v1797_v49 = vshrl.u32 %v1595_v21, 16  ;;  %v1934_v8 = vrot.slane %v1920_v12, %v15631_v15 }
 0x486   : > { %v1993_v9 = vrot.slane %v1664_v6, %v15631_v15 }
 0x487   : > { %v2976_v3 = vcombine.high %v1794_v59, %v15628_v52  ;;  %v1798_v28 = vpack.i.b16 %v1797_v49, %v1796_v35  ;;  %v2000_v19 = vrot.slane %v1986_v58, %v15631_v15  ;;  %v15680_v7 = vrot.slane %v1794_v59, %v15631_v15 }
 0x488   : > { %v1581_v21 = vpop.permute.xlu1 %1580  ;;  %v1627_v44 = vpop.permute.xlu0 %1626 }
 0x489   : > { %v1682_v63 = vpack.i.b16 %v1581_v21, %v15458_v22  ;;  %v1685_v18 = vshrl.u32 %v1581_v21, 16  ;;  %v1668_v56 = vpack.i.b16 %v1627_v44, %v15440_v20  ;;  %v15683_v54 = vrot.slane %v2976_v3, %v15631_v15 }
 0x48a   : > { %v3042_v6 = vcombine.high %v1798_v28, %v15628_v52  ;;  %v1671_v35 = vshrl.u32 %v1627_v44, 16  ;;  %v15687_v49 = vrot.slane %v1798_v28, %v15631_v15 }
 0x48b   : > { %v1686_v12 = vpack.i.b16 %v1685_v18, %v1684_v24  ;;  %v2052_v58 = vcombine.high %v1682_v63, %v15628_v52  ;;  %v1935_v22 = vcombine.high %v1668_v56, %v15628_v52  ;;  %v15695_v20 = vrot.slane %v1682_v63, %v15631_v15 }
 0x48c   : > { %v15692_v21 = vrot.slane %v3042_v6, %v15631_v15  ;;  %v1672_v59 = vpack.i.b16 %v1671_v35, %v1670_v10  ;;  %v1942_v3 = vrot.slane %v1668_v56, %v15631_v15  ;;  %v1597_v29 = vpop.permute.xlu1 %1596 }
 0x48d   : > { %v15699_v44 = vrot.slane %v2052_v58, %v15631_v15  ;;  %v2118_v28 = vcombine.high %v1686_v12, %v15628_v52  ;;  %v15703_v24 = vrot.slane %v1686_v12, %v15631_v15  ;;  %v1949_v18 = vrot.slane %v1935_v22, %v15631_v15 }
 0x48e   : > { %v1950_v47 = vcombine.low %v1927_v33, %v1942_v3  ;;  %v1951_v6 = vcombine.high %v1927_v33, %v1942_v3  ;;  %v2001_v11 = vcombine.high %v1672_v59, %v15628_v52  ;;  %v2008_v63 = vrot.slane %v1672_v59, %v15631_v15 }
 0x48f   : > { %v15709_v10 = vrot.slane %v2118_v28, %v15631_v15  ;;  %v1966_v56 = vcombine.low %v1934_v8, %v1949_v18  ;;  %v1967_v35 = vcombine.high %v1934_v8, %v1949_v18  ;;  %v1810_v58 = vpack.i.b16 %v1597_v29, %v15470_v38 }
 0x490   : > { %v1958_v61 = vrot.slane %v1950_v47, %v15634_v42  ;;  %v1965_v12 = vrot.slane %v1951_v6, %v15634_v42  ;;  %v2015_v17 = vrot.slane %v2001_v11, %v15631_v15  ;;  %v2016_v22 = vcombine.low %v1993_v9, %v2008_v63 }
 0x491   : > { %v1974_v33 = vrot.slane %v1966_v56, %v15634_v42  ;;  %v1981_v3 = vrot.slane %v1967_v35, %v15634_v42  ;;  %v2017_v48 = vcombine.high %v1993_v9, %v2008_v63  ;;  %v1813_v59 = vshrl.u32 %v1597_v29, 16 }
 0x492   : > { %v2024_v28 = vrot.slane %v2016_v22, %v15634_v42  ;;  %v2032_v41 = vcombine.low %v2000_v19, %v2015_v17  ;;  %v2033_v4 = vcombine.high %v2000_v19, %v2015_v17  ;;  %v4032_v8 = vcombine.low %v1958_v61, %v1965_v12 }
 0x493   : > { %v2031_v18 = vrot.slane %v2017_v48, %v15634_v42  ;;  %v12423_v43 = vcombine.high %v1958_v61, %v1965_v12  ;;  %v4048_v47 = vcombine.low %v1974_v33, %v1981_v3  ;;  %v12424_v50 = vcombine.high %v1974_v33, %v1981_v3  ;;  %v1643_v3 = vpop.permute.xlu0 %1642 }
 0x494   : > { %v2040_v6 = vrot.slane %v2032_v41, %v15634_v42  ;;  %v2047_v11 = vrot.slane %v2033_v4, %v15634_v42  ;;  %v4039_v56 = vrot.slane %v4032_v8, %v15631_v15  ;;  %v19204_v35 = vshrl.u32 %v15470_v38, 16  ;;  %v1629_v8 = vpop.permute.xlu1 %1628 }
 0x495   : > { %v4047_v29 = vrot.slane %v12423_v43, %v15631_v15  ;;  %v4055_v63 = vrot.slane %v4048_v47, %v15631_v15  ;;  %v4063_v17 = vrot.slane %v12424_v50, %v15631_v15  ;;  %v4082_v19 = vcombine.low %v2024_v28, %v2031_v18 }
 0x496   : > { %v1814_v9 = vpack.i.b16 %v1813_v59, %v19204_v35  ;;  %v12425_v48 = vcombine.high %v2024_v28, %v2031_v18  ;;  %v4098_v61 = vcombine.low %v2040_v6, %v2047_v11  ;;  %v12426_v12 = vcombine.high %v2040_v6, %v2047_v11 }
 0x497   : > { %v3108_v22 = vcombine.high %v1810_v58, %v15628_v52  ;;  %v4064_v41 = vcombine.low %v4039_v56, %v4047_v29  ;;  %v4072_v4 = vcombine.low %v4055_v63, %v4063_v17  ;;  %v4089_v33 = vrot.slane %v4082_v19, %v15631_v15 }
 0x498   : > { %v15730_v38 = vrot.slane %v1810_v58, %v15631_v15  ;;  %v4097_v43 = vrot.slane %v12425_v48, %v15631_v15  ;;  %v4105_v59 = vrot.slane %v4098_v61, %v15631_v15  ;;  %v4113_v50 = vrot.slane %v12426_v12, %v15631_v15 }
 0x499   : > { %v15736_v28 = vrot.slane %v3108_v22, %v15631_v15  ;;  %v4071_v18 = vrot.slane %v4064_v41, %v15634_v42  ;;  %v4079_v47 = vrot.slane %v4072_v4, %v15634_v42  ;;  %v3174_v6 = vcombine.high %v1814_v9, %v15628_v52 }
 0x49a   : > { %v15742_v58 = vrot.slane %v1814_v9, %v15631_v15  ;;  %v4114_v11 = vcombine.low %v4089_v33, %v4097_v43  ;;  %v4122_v56 = vcombine.low %v4105_v59, %v4113_v50  ;;  %v1802_v35 = vpack.i.b16 %v1643_v3, %v15450_v1 }
 0x49b   : > { %v1805_v29 = vshrl.u32 %v1643_v3, 16  ;;  %v4080_v63 = vcombine.low %v4071_v18, %v4079_v47  ;;  %v4081_v17 = vcombine.high %v4071_v18, %v4079_v47  ;;  %v15746_v19 = vrot.slane %v3174_v6, %v15631_v15 }
 0x49c   : > { %v1690_v48 = vpack.i.b16 %v1629_v8, %v15460_v60  ;;  %v4121_v61 = vrot.slane %v4114_v11, %v15634_v42  ;;  %v4129_v12 = vrot.slane %v4122_v56, %v15634_v42  ;;  %v19205_v22 = vshrl.u32 %v15450_v1, 16 }
 0x49d   : > { %v2991_v41 = vcombine.high %v1802_v35, %v15628_v52  ;;  %v5636_v4 = vshrl.u32 %v4080_v63, 16  ;;  %v5644_v33 = vshrl.u32 %v4081_v17, 16  ;;  %v2998_v3 = vrot.slane %v1802_v35, %v15631_v15 }
 0x49e   : > { %v1806_v9 = vpack.i.b16 %v1805_v29, %v19205_v22  ;;  %v1693_v43 = vshrl.u32 %v1629_v8, 16  ;;  %v4130_v59 = vcombine.low %v4121_v61, %v4129_v12  ;;  %v4131_v50 = vcombine.high %v4121_v61, %v4129_v12 }
 0x49f   : > { %v3005_v18 = vrot.slane %v2991_v41, %v15631_v15  ;;  %v3006_v6 = vcombine.low %v15680_v7, %v2998_v3  ;;  %v3007_v11 = vcombine.high %v15680_v7, %v2998_v3  ;;  %v19206_v56 = vshrl.u32 %v15460_v60, 16 }
 0x4a0   : > { %v3057_v47 = vcombine.high %v1806_v9, %v15628_v52  ;;  %v3064_v1 = vrot.slane %v1806_v9, %v15631_v15  ;;  %v5634_v22 = vpack.i.b16 %v4130_v59, %v4080_v63  ;;  %v5637_v0 = vshrl.u32 %v4130_v59, 16 }
 0x4a1   : > { %v15762_v29 = vpack.i.b16 %v1693_v43, %v19206_v56  ;;  %v5642_v35 = vpack.i.b16 %v4131_v50, %v4081_v17  ;;  %v5645_v8 = vshrl.u32 %v4131_v50, 16  ;;  %v3014_v61 = vrot.slane %v3006_v6, %v15634_v42 }
 0x4a2   : > { %v3021_v12 = vrot.slane %v3007_v11, %v15634_v42  ;;  %v3022_v41 = vcombine.low %v15683_v54, %v3005_v18  ;;  %v3023_v57 = vcombine.high %v15683_v54, %v3005_v18  ;;  %v5638_v14 = vpack.i.b16 %v5637_v0, %v5636_v4  ;;  %5889 = vst.msk [vmem:[#allocation3] sm:$0xff] %vm5888_vm0, %v5634_v22 }
 0x4a3   : > { %v5646_v7 = vpack.i.b16 %v5645_v8, %v5644_v33  ;;  %5921 = vst.msk [vmem:[#allocation4] sm:$0xff] %vm5888_vm0, %v5642_v35  ;;  %v3071_v60 = vrot.slane %v3057_v47, %v15631_v15  ;;  %v3072_v63 = vcombine.low %v15687_v49, %v3064_v1  ;;  %v3073_v3 = vcombine.high %v15687_v49, %v3064_v1 }
 0x4a4   : > { %v3030_v17 = vrot.slane %v3022_v41, %v15634_v42  ;;  %v3037_v9 = vrot.slane %v3023_v57, %v15634_v42  ;;  %v4832_v43 = vcombine.low %v3014_v61, %v3021_v12  ;;  %5905 = vst.msk [vmem:[#allocation3 + $0x80] sm:$0xff] %vm5888_vm0, %v5638_v14  ;;  %v12455_v33 = vcombine.high %v3014_v61, %v3021_v12 }
 0x4a5   : > { %5937 = vst.msk [vmem:[#allocation4 + $0x80] sm:$0xff] %vm5888_vm0, %v5646_v7  ;;  %v3080_v0 = vrot.slane %v3072_v63, %v15634_v42  ;;  %v3088_v54 = vcombine.low %v15692_v21, %v3071_v60  ;;  %v3089_v4 = vcombine.high %v15692_v21, %v3071_v60  ;;  %v3087_v59 = vrot.slane %v3073_v3, %v15634_v42 }
 0x4a6   : > { %v4839_v50 = vrot.slane %v4832_v43, %v15631_v15  ;;  %v4848_v18 = vcombine.low %v3030_v17, %v3037_v9  ;;  %v12456_v57 = vcombine.high %v3030_v17, %v3037_v9  ;;  %v4847_v14 = vrot.slane %v12455_v33, %v15631_v15 }
 0x4a7   : > { %v3096_v49 = vrot.slane %v3088_v54, %v15634_v42  ;;  %v3103_v47 = vrot.slane %v3089_v4, %v15634_v42  ;;  %v2067_v6 = vcombine.high %v1690_v48, %v15628_v52  ;;  %v4882_v21 = vcombine.low %v3080_v0, %v3087_v59 }
 0x4a8   : > { %v4855_v11 = vrot.slane %v4848_v18, %v15631_v15  ;;  %v4863_v1 = vrot.slane %v12456_v57, %v15631_v15  ;;  %v12457_v56 = vcombine.high %v3080_v0, %v3087_v59  ;;  %v4864_v22 = vcombine.low %v4839_v50, %v4847_v14 }
 0x4a9   : > { %v4898_v35 = vcombine.low %v3096_v49, %v3103_v47  ;;  %v12458_v8 = vcombine.high %v3096_v49, %v3103_v47  ;;  %v2074_v61 = vrot.slane %v1690_v48, %v15631_v15  ;;  %v4889_v41 = vrot.slane %v4882_v21, %v15631_v15 }
 0x4aa   : > { %v4872_v12 = vcombine.low %v4855_v11, %v4863_v1  ;;  %v4897_v7 = vrot.slane %v12457_v56, %v15631_v15  ;;  %v2081_v60 = vrot.slane %v2067_v6, %v15631_v15  ;;  %v4871_v63 = vrot.slane %v4864_v22, %v15634_v42 }
 0x4ab   : > { %v4905_v17 = vrot.slane %v4898_v35, %v15631_v15  ;;  %v4913_v9 = vrot.slane %v12458_v8, %v15631_v15  ;;  %v2082_v3 = vcombine.low %v15695_v20, %v2074_v61  ;;  %v2083_v48 = vcombine.high %v15695_v20, %v2074_v61 }
 0x4ac   : > { %v4879_v43 = vrot.slane %v4872_v12, %v15634_v42  ;;  %v4914_v0 = vcombine.low %v4889_v41, %v4897_v7  ;;  %v2098_v54 = vcombine.low %v15699_v44, %v2081_v60  ;;  %v2099_v59 = vcombine.high %v15699_v44, %v2081_v60 }
 0x4ad   : > { %v4922_v4 = vcombine.low %v4905_v17, %v4913_v9  ;;  %v2090_v33 = vrot.slane %v2082_v3, %v15634_v42  ;;  %v2133_v50 = vcombine.high %v15762_v29, %v15628_v52  ;;  %v2097_v47 = vrot.slane %v2083_v48, %v15634_v42 }
 0x4ae   : > { %v4880_v18 = vcombine.low %v4871_v63, %v4879_v43  ;;  %v4881_v57 = vcombine.high %v4871_v63, %v4879_v43  ;;  %v4921_v49 = vrot.slane %v4914_v0, %v15634_v42  ;;  %v2106_v20 = vrot.slane %v2098_v54, %v15634_v42 }
 0x4af   : > { %v4929_v14 = vrot.slane %v4922_v4, %v15634_v42  ;;  %v2113_v6 = vrot.slane %v2099_v59, %v15634_v42  ;;  %v2140_v11 = vrot.slane %v15762_v29, %v15631_v15  ;;  %v2147_v21 = vrot.slane %v2133_v50, %v15631_v15 }
 0x4b0   : > { %v5764_v1 = vshrl.u32 %v4880_v18, 16  ;;  %v5772_v44 = vshrl.u32 %v4881_v57, 16  ;;  %v4132_v56 = vcombine.low %v2090_v33, %v2097_v47  ;;  %v12427_v60 = vcombine.high %v2090_v33, %v2097_v47 }
 0x4b1   : > { %v4930_v22 = vcombine.low %v4921_v49, %v4929_v14  ;;  %v4931_v35 = vcombine.high %v4921_v49, %v4929_v14  ;;  %v2148_v8 = vcombine.low %v15703_v24, %v2140_v11  ;;  %v2149_v61 = vcombine.high %v15703_v24, %v2140_v11  ;;  %v1645_v24 = vpop.permute.xlu1 %1644 }
 0x4b2   : > { %v2164_v12 = vcombine.low %v15709_v10, %v2147_v21  ;;  %v2165_v41 = vcombine.high %v15709_v10, %v2147_v21  ;;  %v4139_v7 = vrot.slane %v4132_v56, %v15631_v15  ;;  %v4147_v10 = vrot.slane %v12427_v60, %v15631_v15 }
 0x4b3   : > { %v5762_v63 = vpack.i.b16 %v4930_v22, %v4880_v18  ;;  %v5765_v29 = vshrl.u32 %v4930_v22, 16  ;;  %v5770_v17 = vpack.i.b16 %v4931_v35, %v4881_v57  ;;  %v5773_v9 = vshrl.u32 %v4931_v35, 16 }
 0x4b4   : > { %v2156_v3 = vrot.slane %v2148_v8, %v15634_v42  ;;  %v2163_v43 = vrot.slane %v2149_v61, %v15634_v42  ;;  %v2172_v0 = vrot.slane %v2164_v12, %v15634_v42  ;;  %v2179_v48 = vrot.slane %v2165_v41, %v15634_v42 }
 0x4b5   : > { %v5766_v54 = vpack.i.b16 %v5765_v29, %v5764_v1  ;;  %v5774_v4 = vpack.i.b16 %v5773_v9, %v5772_v44  ;;  %5897 = vst.msk [vmem:[#allocation3 + $0x40] sm:$0xff] %vm5888_vm0, %v5762_v63  ;;  %5929 = vst.msk [vmem:[#allocation4 + $0x40] sm:$0xff] %vm5888_vm0, %v5770_v17  ;;  %v4148_v33 = vcombine.low %v2106_v20, %v2113_v6  ;;  %v15827_v1 = vpop.permute.xlu0 %1598  ;;  %v1821_v35 = vshrl.u32 %v1645_v24, 16 }
 0x4b6   : > { %v12428_v59 = vcombine.high %v2106_v20, %v2113_v6  ;;  %v4182_v50 = vcombine.low %v2156_v3, %v2163_v43  ;;  %v12429_v18 = vcombine.high %v2156_v3, %v2163_v43  ;;  %v4198_v57 = vcombine.low %v2172_v0, %v2179_v48 }
 0x4b7   : > { %5913 = vst.msk [vmem:[#allocation3 + $0xc0] sm:$0xff] %vm5888_vm0, %v5766_v54  ;;  %5945 = vst.msk [vmem:[#allocation4 + $0xc0] sm:$0xff] %vm5888_vm0, %v5774_v4  ;;  %v4155_v49 = vrot.slane %v4148_v33, %v15631_v15  ;;  %v4164_v47 = vcombine.low %v4139_v7, %v4147_v10  ;;  %v12430_v14 = vcombine.high %v2172_v0, %v2179_v48  ;;  %v19207_v63 = vshrl.u32 %v15472_v39, 16 }
 0x4b8   : > { %v1818_v11 = vpack.i.b16 %v1645_v24, %v15472_v39  ;;  %v4163_v44 = vrot.slane %v12428_v59, %v15631_v15  ;;  %v4189_v21 = vrot.slane %v4182_v50, %v15631_v15  ;;  %v4197_v20 = vrot.slane %v12429_v18, %v15631_v15 }
 0x4b9   : > { %v4205_v6 = vrot.slane %v4198_v57, %v15631_v15  ;;  %v4171_v56 = vrot.slane %v4164_v47, %v15634_v42  ;;  %v4213_v22 = vrot.slane %v12430_v14, %v15631_v15  ;;  %v15839_v7 = vpack.i.b16 %v15827_v1, %v15492_v5 }
 0x4ba   : > { %v3123_v8 = vcombine.high %v1818_v11, %v15628_v52  ;;  %v4172_v61 = vcombine.low %v4155_v49, %v4163_v44  ;;  %v4214_v12 = vcombine.low %v4189_v21, %v4197_v20  ;;  %v3130_v41 = vrot.slane %v1818_v11, %v15631_v15 }
 0x4bb   : > { %v4222_v60 = vcombine.low %v4205_v6, %v4213_v22  ;;  %v1822_v29 = vpack.i.b16 %v1821_v35, %v19207_v63  ;;  %v1829_v9 = vshrl.u32 %v15827_v1, 16 }
 0x4bc   : > { %v3137_v17 = vrot.slane %v3123_v8, %v15631_v15  ;;  %v4179_v3 = vrot.slane %v4172_v61, %v15634_v42  ;;  %v4221_v43 = vrot.slane %v4214_v12, %v15634_v42  ;;  %v3138_v0 = vcombine.low %v15730_v38, %v3130_v41 }
 0x4bd   : > { %v3139_v48 = vcombine.high %v15730_v38, %v3130_v41  ;;  %v4229_v24 = vrot.slane %v4222_v60, %v15634_v42  ;;  %v3189_v39 = vcombine.high %v1822_v29, %v15628_v52  ;;  %v3196_v11 = vrot.slane %v1822_v29, %v15631_v15 }
 0x4be   : > { %v3154_v54 = vcombine.low %v15736_v28, %v3137_v17  ;;  %v3155_v4 = vcombine.high %v15736_v28, %v3137_v17  ;;  %v4180_v10 = vcombine.low %v4171_v56, %v4179_v3  ;;  %v4181_v33 = vcombine.high %v4171_v56, %v4179_v3 }
 0x4bf   : > { %v3146_v59 = vrot.slane %v3138_v0, %v15634_v42  ;;  %v3153_v50 = vrot.slane %v3139_v48, %v15634_v42  ;;  %v4230_v18 = vcombine.low %v4221_v43, %v4229_v24  ;;  %v4231_v57 = vcombine.high %v4221_v43, %v4229_v24 }
 0x4c0   : > { %v3162_v49 = vrot.slane %v3154_v54, %v15634_v42  ;;  %v3169_v38 = vrot.slane %v3155_v4, %v15634_v42  ;;  %v5652_v47 = vshrl.u32 %v4180_v10, 16  ;;  %v5660_v14 = vshrl.u32 %v4181_v33, 16 }
 0x4c1   : > { %v3203_v28 = vrot.slane %v3189_v39, %v15631_v15  ;;  %v5650_v1 = vpack.i.b16 %v4230_v18, %v4180_v10  ;;  %v5653_v44 = vshrl.u32 %v4230_v18, 16  ;;  %v5658_v21 = vpack.i.b16 %v4231_v57, %v4181_v33 }
 0x4c2   : > { %v5661_v20 = vshrl.u32 %v4231_v57, 16  ;;  %v3204_v6 = vcombine.low %v15742_v58, %v3196_v11  ;;  %v3205_v56 = vcombine.high %v15742_v58, %v3196_v11  ;;  %v4932_v12 = vcombine.low %v3146_v59, %v3153_v50 }
 0x4c3   : > { %v3220_v22 = vcombine.low %v15746_v19, %v3203_v28  ;;  %v3221_v35 = vcombine.high %v15746_v19, %v3203_v28  ;;  %v5654_v8 = vpack.i.b16 %v5653_v44, %v5652_v47  ;;  %5890 = vst.msk [vmem:[#allocation3 + $0x8] sm:$0xff] %vm5888_vm0, %v5650_v1  ;;  %5922 = vst.msk [vmem:[#allocation4 + $0x8] sm:$0xff] %vm5888_vm0, %v5658_v21  ;;  %v19208_v33 = vshrl.u32 %v15492_v5, 16  ;;  %v1631_v5 = vpop.permute.xlu0 %1630 }
 0x4c4   : > { %v5662_v61 = vpack.i.b16 %v5661_v20, %v5660_v14  ;;  %v12459_v41 = vcombine.high %v3146_v59, %v3153_v50  ;;  %v3212_v60 = vrot.slane %v3204_v6, %v15634_v42  ;;  %v3219_v63 = vrot.slane %v3205_v56, %v15634_v42 }
 0x4c5   : > { %v3228_v29 = vrot.slane %v3220_v22, %v15634_v42  ;;  %v3235_v58 = vrot.slane %v3221_v35, %v15634_v42  ;;  %5906 = vst.msk [vmem:[#allocation3 + $0x88] sm:$0xff] %vm5888_vm0, %v5654_v8  ;;  %v4939_v19 = vrot.slane %v4932_v12, %v15631_v15  ;;  %v4948_v3 = vcombine.low %v3162_v49, %v3169_v38 }
 0x4c6   : > { %5938 = vst.msk [vmem:[#allocation4 + $0x88] sm:$0xff] %vm5888_vm0, %v5662_v61  ;;  %v4947_v17 = vrot.slane %v12459_v41, %v15631_v15  ;;  %v12460_v43 = vcombine.high %v3162_v49, %v3169_v38  ;;  %v4982_v0 = vcombine.low %v3212_v60, %v3219_v63  ;;  %v12461_v48 = vcombine.high %v3212_v60, %v3219_v63  ;;  %v1583_v38 = vpop.permute.xlu1 %1582 }
 0x4c7   : > { %v4998_v24 = vcombine.low %v3228_v29, %v3235_v58  ;;  %v12462_v54 = vcombine.high %v3228_v29, %v3235_v58  ;;  %v4955_v4 = vrot.slane %v4948_v3, %v15631_v15  ;;  %v1830_v59 = vpack.i.b16 %v1829_v9, %v19208_v33 }
 0x4c8   : > { %v4963_v39 = vrot.slane %v12460_v43, %v15631_v15  ;;  %v4964_v10 = vcombine.low %v4939_v19, %v4947_v17  ;;  %v4989_v50 = vrot.slane %v4982_v0, %v15631_v15  ;;  %v4997_v18 = vrot.slane %v12461_v48, %v15631_v15 }
 0x4c9   : > { %v5005_v57 = vrot.slane %v4998_v24, %v15631_v15  ;;  %v5013_v49 = vrot.slane %v12462_v54, %v15631_v15  ;;  %v3240_v11 = vcombine.high %v15839_v7, %v15628_v52  ;;  %v15886_v28 = vrot.slane %v15839_v7, %v15631_v15 }
 0x4ca   : > { %v4971_v47 = vrot.slane %v4964_v10, %v15634_v42  ;;  %v4972_v14 = vcombine.low %v4955_v4, %v4963_v39  ;;  %v5014_v9 = vcombine.low %v4989_v50, %v4997_v18  ;;  %v3306_v44 = vcombine.high %v1830_v59, %v15628_v52  ;;  %v1585_v54 = vpop.permute.xlu1 %1584 }
 0x4cb   : > { %v5022_v1 = vcombine.low %v5005_v57, %v5013_v49  ;;  %v15890_v21 = vrot.slane %v1830_v59, %v15631_v15  ;;  %v15894_v6 = vrot.slane %v3240_v11, %v15631_v15  ;;  %v1698_v56 = vpack.i.b16 %v1583_v38, %v15482_v45 }
 0x4cc   : > { %v4979_v20 = vrot.slane %v4972_v14, %v15634_v42  ;;  %v1701_v22 = vshrl.u32 %v1583_v38, 16  ;;  %v5021_v35 = vrot.slane %v5014_v9, %v15634_v42  ;;  %v15900_v8 = vrot.slane %v3306_v44, %v15631_v15 }
 0x4cd   : > { %v5029_v7 = vrot.slane %v5022_v1, %v15634_v42  ;;  %v1706_v61 = vpack.i.b16 %v1631_v5, %v15484_v26  ;;  %v19209_v60 = vshrl.u32 %v15482_v45, 16  ;;  %v2184_v29 = vcombine.high %v1698_v56, %v15628_v52 }
 0x4ce   : > { %v4980_v12 = vcombine.low %v4971_v47, %v4979_v20  ;;  %v4981_v41 = vcombine.high %v4971_v47, %v4979_v20  ;;  %v2191_v17 = vrot.slane %v1698_v56, %v15631_v15  ;;  %v1709_v3 = vshrl.u32 %v1631_v5, 16 }
 0x4cf   : > { %v1702_v63 = vpack.i.b16 %v1701_v22, %v19209_v60  ;;  %v5030_v58 = vcombine.low %v5021_v35, %v5029_v7  ;;  %v5031_v19 = vcombine.high %v5021_v35, %v5029_v7  ;;  %v2198_v48 = vrot.slane %v2184_v29, %v15631_v15 }
 0x4d0   : > { %v5780_v43 = vshrl.u32 %v4980_v12, 16  ;;  %v5788_v0 = vshrl.u32 %v4981_v41, 16  ;;  %v19210_v50 = vshrl.u32 %v15484_v26, 16  ;;  %v2199_v57 = vcombine.high %v1706_v61, %v15628_v52 }
 0x4d1   : > { %v2250_v24 = vcombine.high %v1702_v63, %v15628_v52  ;;  %v5778_v4 = vpack.i.b16 %v5030_v58, %v4980_v12  ;;  %v5781_v39 = vshrl.u32 %v5030_v58, 16  ;;  %v5786_v10 = vpack.i.b16 %v5031_v19, %v4981_v41 }
 0x4d2   : > { %v5789_v33 = vshrl.u32 %v5031_v19, 16  ;;  %v2257_v45 = vrot.slane %v1702_v63, %v15631_v15  ;;  %v1710_v18 = vpack.i.b16 %v1709_v3, %v19210_v50  ;;  %v2206_v47 = vrot.slane %v1706_v61, %v15631_v15 }
 0x4d3   : > { %v2264_v59 = vrot.slane %v2250_v24, %v15631_v15  ;;  %v5782_v49 = vpack.i.b16 %v5781_v39, %v5780_v43  ;;  %5898 = vst.msk [vmem:[#allocation3 + $0x48] sm:$0xff] %vm5888_vm0, %v5778_v4  ;;  %5930 = vst.msk [vmem:[#allocation4 + $0x48] sm:$0xff] %vm5888_vm0, %v5786_v10  ;;  %v1714_v14 = vpack.i.b16 %v1585_v54, %v15504_v51  ;;  %v1717_v26 = vshrl.u32 %v1585_v54, 16 }
 0x4d4   : > { %v5790_v38 = vpack.i.b16 %v5789_v33, %v5788_v0  ;;  %v2213_v11 = vrot.slane %v2199_v57, %v15631_v15  ;;  %v2265_v5 = vcombine.high %v1710_v18, %v15628_v52  ;;  %v2272_v9 = vrot.slane %v1710_v18, %v15631_v15 }
 0x4d5   : > { %5914 = vst.msk [vmem:[#allocation3 + $0xc8] sm:$0xff] %vm5888_vm0, %v5782_v49  ;;  %v2214_v1 = vcombine.low %v2191_v17, %v2206_v47  ;;  %v2215_v44 = vcombine.high %v2191_v17, %v2206_v47  ;;  %v2316_v20 = vcombine.high %v1714_v14, %v15628_v52  ;;  %v15925_v56 = vrot.slane %v1714_v14, %v15631_v15 }
 0x4d6   : > { %5946 = vst.msk [vmem:[#allocation4 + $0xc8] sm:$0xff] %vm5888_vm0, %v5790_v38  ;;  %v2230_v22 = vcombine.low %v2198_v48, %v2213_v11  ;;  %v2231_v35 = vcombine.high %v2198_v48, %v2213_v11  ;;  %v2279_v7 = vrot.slane %v2265_v5, %v15631_v15  ;;  %v2280_v61 = vcombine.low %v2257_v45, %v2272_v9  ;;  %v1647_v38 = vpop.permute.xlu0 %1646 }
 0x4d7   : > { %v2222_v12 = vrot.slane %v2214_v1, %v15634_v42  ;;  %v2229_v41 = vrot.slane %v2215_v44, %v15634_v42  ;;  %v2281_v60 = vcombine.high %v2257_v45, %v2272_v9  ;;  %v19211_v63 = vshrl.u32 %v15504_v51, 16  ;;  %v1601_v9 = vpop.permute.xlu1 %1600 }
 0x4d8   : > { %v2238_v58 = vrot.slane %v2230_v22, %v15634_v42  ;;  %v2245_v19 = vrot.slane %v2231_v35, %v15634_v42  ;;  %v2288_v17 = vrot.slane %v2280_v61, %v15634_v42  ;;  %v2296_v3 = vcombine.low %v2264_v59, %v2279_v7 }
 0x4d9   : > { %v1718_v29 = vpack.i.b16 %v1717_v26, %v19211_v63  ;;  %v2295_v43 = vrot.slane %v2281_v60, %v15634_v42  ;;  %v2297_v0 = vcombine.high %v2264_v59, %v2279_v7  ;;  %v4232_v48 = vcombine.low %v2222_v12, %v2229_v41 }
 0x4da   : > { %v12431_v24 = vcombine.high %v2222_v12, %v2229_v41  ;;  %v2304_v54 = vrot.slane %v2296_v3, %v15634_v42  ;;  %v4248_v4 = vcombine.low %v2238_v58, %v2245_v19  ;;  %v12432_v39 = vcombine.high %v2238_v58, %v2245_v19 }
 0x4db   : > { %v15938_v10 = vrot.slane %v2316_v20, %v15631_v15  ;;  %v2311_v51 = vrot.slane %v2297_v0, %v15634_v42  ;;  %v4239_v33 = vrot.slane %v4232_v48, %v15631_v15  ;;  %v4282_v50 = vcombine.low %v2288_v17, %v2295_v43 }
 0x4dc   : > { %v4247_v45 = vrot.slane %v12431_v24, %v15631_v15  ;;  %v4255_v18 = vrot.slane %v4248_v4, %v15631_v15  ;;  %v4263_v59 = vrot.slane %v12432_v39, %v15631_v15  ;;  %v12433_v57 = vcombine.high %v2288_v17, %v2295_v43 }
 0x4dd   : > { %v2382_v49 = vcombine.high %v1718_v29, %v15628_v52  ;;  %v4289_v14 = vrot.slane %v4282_v50, %v15631_v15  ;;  %v4298_v11 = vcombine.low %v2304_v54, %v2311_v51  ;;  %v12434_v5 = vcombine.high %v2304_v54, %v2311_v51 }
 0x4de   : > { %v4264_v47 = vcombine.low %v4239_v33, %v4247_v45  ;;  %v4272_v26 = vcombine.low %v4255_v18, %v4263_v59  ;;  %v4297_v1 = vrot.slane %v12433_v57, %v15631_v15  ;;  %v15949_v44 = vrot.slane %v1718_v29, %v15631_v15 }
 0x4df   : > { %v15952_v20 = vrot.slane %v2382_v49, %v15631_v15  ;;  %v4305_v35 = vrot.slane %v4298_v11, %v15631_v15  ;;  %v4313_v7 = vrot.slane %v12434_v5, %v15631_v15  ;;  %v1834_v61 = vpack.i.b16 %v1647_v38, %v15494_v27 }
 0x4e0   : > { %v4271_v22 = vrot.slane %v4264_v47, %v15634_v42  ;;  %v4279_v12 = vrot.slane %v4272_v26, %v15634_v42  ;;  %v4314_v41 = vcombine.low %v4289_v14, %v4297_v1  ;;  %v1837_v60 = vshrl.u32 %v1647_v38, 16 }
 0x4e1   : > { %v15960_v63 = vpack.i.b16 %v1601_v9, %v15516_v2  ;;  %v4322_v29 = vcombine.low %v4305_v35, %v4313_v7  ;;  %v3255_v58 = vcombine.high %v1834_v61, %v15628_v52  ;;  %v3262_v19 = vrot.slane %v1834_v61, %v15631_v15 }
 0x4e2   : > { %v1845_v17 = vshrl.u32 %v1601_v9, 16  ;;  %v4280_v3 = vcombine.low %v4271_v22, %v4279_v12  ;;  %v4281_v43 = vcombine.high %v4271_v22, %v4279_v12  ;;  %v4321_v0 = vrot.slane %v4314_v41, %v15634_v42 }
 0x4e3   : > { %v19212_v48 = vshrl.u32 %v15494_v27, 16  ;;  %v4329_v54 = vrot.slane %v4322_v29, %v15634_v42  ;;  %v3269_v4 = vrot.slane %v3255_v58, %v15631_v15  ;;  %v3270_v39 = vcombine.low %v15886_v28, %v3262_v19 }
 0x4e4   : > { %v3271_v51 = vcombine.high %v15886_v28, %v3262_v19  ;;  %v5668_v33 = vshrl.u32 %v4280_v3, 16  ;;  %v5676_v45 = vshrl.u32 %v4281_v43, 16 }
 0x4e5   : > { %v1838_v24 = vpack.i.b16 %v1837_v60, %v19212_v48  ;;  %v4330_v59 = vcombine.low %v4321_v0, %v4329_v54  ;;  %v4331_v57 = vcombine.high %v4321_v0, %v4329_v54  ;;  %v3278_v49 = vrot.slane %v3270_v39, %v15634_v42 }
 0x4e6   : > { %v3285_v27 = vrot.slane %v3271_v51, %v15634_v42  ;;  %v3286_v38 = vcombine.low %v15894_v6, %v3269_v4  ;;  %v3287_v47 = vcombine.high %v15894_v6, %v3269_v4  ;;  %v19213_v0 = vshrl.u32 %v15516_v2, 16 }
 0x4e7   : > { %v3321_v50 = vcombine.high %v1838_v24, %v15628_v52  ;;  %v3328_v18 = vrot.slane %v1838_v24, %v15631_v15  ;;  %v5666_v11 = vpack.i.b16 %v4330_v59, %v4280_v3  ;;  %v5669_v5 = vshrl.u32 %v4330_v59, 16 }
 0x4e8   : > { %v5674_v9 = vpack.i.b16 %v4331_v57, %v4281_v43  ;;  %v5677_v26 = vshrl.u32 %v4331_v57, 16  ;;  %v3294_v1 = vrot.slane %v3286_v38, %v15634_v42  ;;  %v3301_v22 = vrot.slane %v3287_v47, %v15634_v42  ;;  %v1633_v47 = vpop.permute.xlu1 %1632 }
 0x4e9   : > { %v3335_v14 = vrot.slane %v3321_v50, %v15631_v15  ;;  %v3336_v28 = vcombine.low %v15890_v21, %v3328_v18  ;;  %v3337_v35 = vcombine.high %v15890_v21, %v3328_v18  ;;  %v5670_v61 = vpack.i.b16 %v5669_v5, %v5668_v33  ;;  %5891 = vst.msk [vmem:[#allocation3 + $0x10] sm:$0xff] %vm5888_vm0, %v5666_v11 }
 0x4ea   : > { %v5678_v12 = vpack.i.b16 %v5677_v26, %v5676_v45  ;;  %5923 = vst.msk [vmem:[#allocation4 + $0x10] sm:$0xff] %vm5888_vm0, %v5674_v9  ;;  %v5032_v29 = vcombine.low %v3278_v49, %v3285_v27  ;;  %v12463_v58 = vcombine.high %v3278_v49, %v3285_v27  ;;  %v5048_v19 = vcombine.low %v3294_v1, %v3301_v22 }
 0x4eb   : > { %v3344_v7 = vrot.slane %v3336_v28, %v15634_v42  ;;  %v3352_v6 = vcombine.low %v15900_v8, %v3335_v14  ;;  %v3353_v41 = vcombine.high %v15900_v8, %v3335_v14  ;;  %v3351_v60 = vrot.slane %v3337_v35, %v15634_v42  ;;  %5907 = vst.msk [vmem:[#allocation3 + $0x90] sm:$0xff] %vm5888_vm0, %v5670_v61 }
 0x4ec   : > { %5939 = vst.msk [vmem:[#allocation4 + $0x90] sm:$0xff] %vm5888_vm0, %v5678_v12  ;;  %v12464_v43 = vcombine.high %v3294_v1, %v3301_v22  ;;  %v1846_v48 = vpack.i.b16 %v1845_v17, %v19213_v0  ;;  %v5039_v24 = vrot.slane %v5032_v29, %v15631_v15  ;;  %v5047_v8 = vrot.slane %v12463_v58, %v15631_v15  ;;  %v1587_v17 = vpop.permute.xlu0 %1586 }
 0x4ed   : > { %v3360_v21 = vrot.slane %v3352_v6, %v15634_v42  ;;  %v3367_v3 = vrot.slane %v3353_v41, %v15634_v42  ;;  %v5055_v54 = vrot.slane %v5048_v19, %v15631_v15  ;;  %v5082_v4 = vcombine.low %v3344_v7, %v3351_v60 }
 0x4ee   : > { %v5063_v39 = vrot.slane %v12464_v43, %v15631_v15  ;;  %v12465_v51 = vcombine.high %v3344_v7, %v3351_v60  ;;  %v5064_v50 = vcombine.low %v5039_v24, %v5047_v8  ;;  %v3372_v59 = vcombine.high %v15960_v63, %v15628_v52 }
 0x4ef   : > { %v5098_v33 = vcombine.low %v3360_v21, %v3367_v3  ;;  %v12466_v45 = vcombine.high %v3360_v21, %v3367_v3  ;;  %v5089_v18 = vrot.slane %v5082_v4, %v15631_v15  ;;  %v16003_v2 = vrot.slane %v15960_v63, %v15631_v15 }
 0x4f0   : > { %v5072_v57 = vcombine.low %v5055_v54, %v5063_v39  ;;  %v5097_v49 = vrot.slane %v12465_v51, %v15631_v15  ;;  %v5071_v14 = vrot.slane %v5064_v50, %v15634_v42  ;;  %v16010_v28 = vrot.slane %v3372_v59, %v15631_v15  ;;  %v1603_v51 = vpop.permute.xlu0 %1602 }
 0x4f1   : > { %v5105_v27 = vrot.slane %v5098_v33, %v15631_v15  ;;  %v5113_v38 = vrot.slane %v12466_v45, %v15631_v15  ;;  %v3438_v11 = vcombine.high %v1846_v48, %v15628_v52  ;;  %v16014_v5 = vrot.slane %v1846_v48, %v15631_v15 }
 0x4f2   : > { %v5079_v63 = vrot.slane %v5072_v57, %v15634_v42  ;;  %v5114_v9 = vcombine.low %v5089_v18, %v5097_v49  ;;  %v1730_v1 = vpack.i.b16 %v1587_v17, %v15528_v34  ;;  %v1733_v35 = vshrl.u32 %v1587_v17, 16 }
 0x4f3   : > { %v5122_v26 = vcombine.low %v5105_v27, %v5113_v38  ;;  %v16019_v22 = vrot.slane %v3438_v11, %v15631_v15  ;;  %v1722_v7 = vpack.i.b16 %v1633_v47, %v15506_v62  ;;  %v1725_v61 = vshrl.u32 %v1633_v47, 16 }
 0x4f4   : > { %v5080_v12 = vcombine.low %v5071_v14, %v5079_v63  ;;  %v5081_v6 = vcombine.high %v5071_v14, %v5079_v63  ;;  %v5121_v41 = vrot.slane %v5114_v9, %v15634_v42  ;;  %v19214_v29 = vshrl.u32 %v15528_v34, 16 }
 0x4f5   : > { %v5129_v60 = vrot.slane %v5122_v26, %v15634_v42  ;;  %v2448_v19 = vcombine.high %v1730_v1, %v15628_v52  ;;  %v16028_v21 = vrot.slane %v1730_v1, %v15631_v15  ;;  %v19215_v3 = vshrl.u32 %v15506_v62, 16 }
 0x4f6   : > { %v1734_v58 = vpack.i.b16 %v1733_v35, %v19214_v29  ;;  %v5796_v24 = vshrl.u32 %v5080_v12, 16  ;;  %v5804_v8 = vshrl.u32 %v5081_v6, 16  ;;  %v2331_v39 = vcombine.high %v1722_v7, %v15628_v52 }
 0x4f7   : > { %v1726_v43 = vpack.i.b16 %v1725_v61, %v19215_v3  ;;  %v5130_v0 = vcombine.low %v5121_v41, %v5129_v60  ;;  %v5131_v48 = vcombine.high %v5121_v41, %v5129_v60  ;;  %v16033_v54 = vrot.slane %v2448_v19, %v15631_v15 }
 0x4f8   : > { %v2514_v4 = vcombine.high %v1734_v58, %v15628_v52  ;;  %v16037_v34 = vrot.slane %v1734_v58, %v15631_v15  ;;  %v2338_v59 = vrot.slane %v1722_v7, %v15631_v15  ;;  %v2345_v17 = vrot.slane %v2331_v39, %v15631_v15 }
 0x4f9   : > { %v5794_v33 = vpack.i.b16 %v5130_v0, %v5080_v12  ;;  %v5797_v45 = vshrl.u32 %v5130_v0, 16  ;;  %v5802_v50 = vpack.i.b16 %v5131_v48, %v5081_v6  ;;  %v5805_v62 = vshrl.u32 %v5131_v48, 16 }
 0x4fa   : > { %v16041_v18 = vrot.slane %v2514_v4, %v15631_v15  ;;  %v2397_v57 = vcombine.high %v1726_v43, %v15628_v52  ;;  %v2404_v38 = vrot.slane %v1726_v43, %v15631_v15  ;;  %v1858_v47 = vpack.i.b16 %v1603_v51, %v15540_v25 }
 0x4fb   : > { %v5798_v49 = vpack.i.b16 %v5797_v45, %v5796_v24  ;;  %v5806_v27 = vpack.i.b16 %v5805_v62, %v5804_v8  ;;  %5899 = vst.msk [vmem:[#allocation3 + $0x50] sm:$0xff] %vm5888_vm0, %v5794_v33  ;;  %5931 = vst.msk [vmem:[#allocation4 + $0x50] sm:$0xff] %vm5888_vm0, %v5802_v50  ;;  %v2346_v14 = vcombine.low %v15925_v56, %v2338_v59  ;;  %v1861_v7 = vshrl.u32 %v1603_v51, 16 }
 0x4fc   : > { %v2347_v11 = vcombine.high %v15925_v56, %v2338_v59  ;;  %v2362_v63 = vcombine.low %v15938_v10, %v2345_v17  ;;  %v2363_v9 = vcombine.high %v15938_v10, %v2345_v17  ;;  %v2411_v26 = vrot.slane %v2397_v57, %v15631_v15 }
 0x4fd   : > { %5915 = vst.msk [vmem:[#allocation3 + $0xd0] sm:$0xff] %vm5888_vm0, %v5798_v49  ;;  %5947 = vst.msk [vmem:[#allocation4 + $0xd0] sm:$0xff] %vm5888_vm0, %v5806_v27  ;;  %v2412_v1 = vcombine.low %v15949_v44, %v2404_v38  ;;  %v2413_v35 = vcombine.high %v15949_v44, %v2404_v38  ;;  %v2354_v61 = vrot.slane %v2346_v14, %v15634_v42  ;;  %v19216_v17 = vshrl.u32 %v15540_v25, 16  ;;  %v1649_v27 = vpop.permute.xlu1 %1648 }
 0x4fe   : > { %v2361_v12 = vrot.slane %v2347_v11, %v15634_v42  ;;  %v2370_v56 = vrot.slane %v2362_v63, %v15634_v42  ;;  %v2377_v6 = vrot.slane %v2363_v9, %v15634_v42  ;;  %v2428_v60 = vcombine.low %v15952_v20, %v2411_v26 }
 0x4ff   : > { %v2420_v10 = vrot.slane %v2412_v1, %v15634_v42  ;;  %v2427_v41 = vrot.slane %v2413_v35, %v15634_v42  ;;  %v2429_v29 = vcombine.high %v15952_v20, %v2411_v26  ;;  %v1862_v57 = vpack.i.b16 %v1861_v7, %v19216_v17  ;;  %v1635_v35 = vpop.permute.xlu0 %1634 }
 0x500   : > { %v4332_v58 = vcombine.low %v2354_v61, %v2361_v12  ;;  %v12435_v19 = vcombine.high %v2354_v61, %v2361_v12  ;;  %v4348_v44 = vcombine.low %v2370_v56, %v2377_v6  ;;  %v12436_v3 = vcombine.high %v2370_v56, %v2377_v6 }
 0x501   : > { %v2436_v43 = vrot.slane %v2428_v60, %v15634_v42  ;;  %v2443_v0 = vrot.slane %v2429_v29, %v15634_v42  ;;  %v4382_v48 = vcombine.low %v2420_v10, %v2427_v41  ;;  %v12437_v24 = vcombine.high %v2420_v10, %v2427_v41 }
 0x502   : > { %v4339_v8 = vrot.slane %v4332_v58, %v15631_v15  ;;  %v4347_v4 = vrot.slane %v12435_v19, %v15631_v15  ;;  %v4355_v39 = vrot.slane %v4348_v44, %v15631_v15  ;;  %v4363_v51 = vrot.slane %v12436_v3, %v15631_v15 }
 0x503   : > { %v4389_v20 = vrot.slane %v4382_v48, %v15631_v15  ;;  %v4397_v33 = vrot.slane %v12437_v24, %v15631_v15  ;;  %v4398_v45 = vcombine.low %v2436_v43, %v2443_v0  ;;  %v12438_v50 = vcombine.high %v2436_v43, %v2443_v0 }
 0x504   : > { %v4364_v62 = vcombine.low %v4339_v8, %v4347_v4  ;;  %v4372_v59 = vcombine.low %v4355_v39, %v4363_v51  ;;  %v3504_v49 = vcombine.high %v1858_v47, %v15628_v52  ;;  %v16081_v63 = vrot.slane %v1858_v47, %v15631_v15 }
 0x505   : > { %v4405_v38 = vrot.slane %v4398_v45, %v15631_v15  ;;  %v4413_v14 = vrot.slane %v12438_v50, %v15631_v15  ;;  %v4414_v11 = vcombine.low %v4389_v20, %v4397_v33  ;;  %v3570_v25 = vcombine.high %v1862_v57, %v15628_v52 }
 0x506   : > { %v4371_v9 = vrot.slane %v4364_v62, %v15634_v42  ;;  %v4379_v26 = vrot.slane %v4372_v59, %v15634_v42  ;;  %v16086_v1 = vrot.slane %v3504_v49, %v15631_v15  ;;  %v16091_v12 = vrot.slane %v1862_v57, %v15631_v15 }
 0x507   : > { %v4421_v7 = vrot.slane %v4414_v11, %v15634_v42  ;;  %v4422_v61 = vcombine.low %v4405_v38, %v4413_v14  ;;  %v1850_v56 = vpack.i.b16 %v1649_v27, %v15518_v36  ;;  %v16095_v10 = vrot.slane %v3570_v25, %v15631_v15 }
 0x508   : > { %v4380_v47 = vcombine.low %v4371_v9, %v4379_v26  ;;  %v4381_v6 = vcombine.high %v4371_v9, %v4379_v26  ;;  %v1853_v41 = vshrl.u32 %v1649_v27, 16  ;;  %v1738_v19 = vpack.i.b16 %v1635_v35, %v15530_v16 }
 0x509   : > { %v4429_v60 = vrot.slane %v4422_v61, %v15634_v42  ;;  %v3387_v29 = vcombine.high %v1850_v56, %v15628_v52  ;;  %v3394_v58 = vrot.slane %v1850_v56, %v15631_v15  ;;  %v19217_v43 = vshrl.u32 %v15518_v36, 16 }
 0x50a   : > { %v5684_v44 = vshrl.u32 %v4380_v47, 16  ;;  %v5692_v3 = vshrl.u32 %v4381_v6, 16  ;;  %v1741_v48 = vshrl.u32 %v1635_v35, 16  ;;  %v19218_v45 = vshrl.u32 %v15530_v16, 16 }
 0x50b   : > { %v1854_v0 = vpack.i.b16 %v1853_v41, %v19217_v43  ;;  %v4430_v24 = vcombine.low %v4421_v7, %v4429_v60  ;;  %v4431_v8 = vcombine.high %v4421_v7, %v4429_v60  ;;  %v3401_v4 = vrot.slane %v3387_v29, %v15631_v15 }
 0x50c   : > { %v3402_v39 = vcombine.low %v16003_v2, %v3394_v58  ;;  %v3403_v51 = vcombine.high %v16003_v2, %v3394_v58  ;;  %v16110_v50 = vpack.i.b16 %v1741_v48, %v19218_v45 }
 0x50d   : > { %v3453_v20 = vcombine.high %v1854_v0, %v15628_v52  ;;  %v3460_v33 = vrot.slane %v1854_v0, %v15631_v15  ;;  %v5682_v62 = vpack.i.b16 %v4430_v24, %v4380_v47  ;;  %v5685_v36 = vshrl.u32 %v4430_v24, 16 }
 0x50e   : > { %v5690_v59 = vpack.i.b16 %v4431_v8, %v4381_v6  ;;  %v5693_v17 = vshrl.u32 %v4431_v8, 16  ;;  %v3410_v57 = vrot.slane %v3402_v39, %v15634_v42  ;;  %v3417_v49 = vrot.slane %v3403_v51, %v15634_v42 }
 0x50f   : > { %v3418_v27 = vcombine.low %v16010_v28, %v3401_v4  ;;  %v3419_v2 = vcombine.high %v16010_v28, %v3401_v4  ;;  %v5686_v38 = vpack.i.b16 %v5685_v36, %v5684_v44  ;;  %5892 = vst.msk [vmem:[#allocation3 + $0x18] sm:$0xff] %vm5888_vm0, %v5682_v62  ;;  %v3467_v16 = vrot.slane %v3453_v20, %v15631_v15 }
 0x510   : > { %v5694_v14 = vpack.i.b16 %v5693_v17, %v5692_v3  ;;  %5924 = vst.msk [vmem:[#allocation4 + $0x18] sm:$0xff] %vm5888_vm0, %v5690_v59  ;;  %v3468_v11 = vcombine.low %v16014_v5, %v3460_v33  ;;  %v3469_v25 = vcombine.high %v16014_v5, %v3460_v33  ;;  %v5132_v35 = vcombine.low %v3410_v57, %v3417_v49 }
 0x511   : > { %v3426_v9 = vrot.slane %v3418_v27, %v15634_v42  ;;  %v3433_v26 = vrot.slane %v3419_v2, %v15634_v42  ;;  %5908 = vst.msk [vmem:[#allocation3 + $0x98] sm:$0xff] %vm5888_vm0, %v5686_v38  ;;  %v3484_v7 = vcombine.low %v16019_v22, %v3467_v16  ;;  %v3485_v61 = vcombine.high %v16019_v22, %v3467_v16 }
 0x512   : > { %5940 = vst.msk [vmem:[#allocation4 + $0x98] sm:$0xff] %vm5888_vm0, %v5694_v14  ;;  %v3476_v28 = vrot.slane %v3468_v11, %v15634_v42  ;;  %v12467_v56 = vcombine.high %v3410_v57, %v3417_v49  ;;  %v3483_v47 = vrot.slane %v3469_v25, %v15634_v42  ;;  %v5139_v6 = vrot.slane %v5132_v35, %v15631_v15 }
 0x513   : > { %v5148_v41 = vcombine.low %v3426_v9, %v3433_v26  ;;  %v12468_v60 = vcombine.high %v3426_v9, %v3433_v26  ;;  %v3492_v5 = vrot.slane %v3484_v7, %v15634_v42  ;;  %v3499_v29 = vrot.slane %v3485_v61, %v15634_v42 }
 0x514   : > { %v5147_v58 = vrot.slane %v12467_v56, %v15631_v15  ;;  %v2463_v44 = vcombine.high %v1738_v19, %v15628_v52  ;;  %v5182_v22 = vcombine.low %v3476_v28, %v3483_v47  ;;  %v12469_v0 = vcombine.high %v3476_v28, %v3483_v47 }
 0x515   : > { %v5155_v3 = vrot.slane %v5148_v41, %v15631_v15  ;;  %v5163_v43 = vrot.slane %v12468_v60, %v15631_v15  ;;  %v5198_v24 = vcombine.low %v3492_v5, %v3499_v29  ;;  %v12470_v8 = vcombine.high %v3492_v5, %v3499_v29 }
 0x516   : > { %v5164_v48 = vcombine.low %v5139_v6, %v5147_v58  ;;  %v2470_v4 = vrot.slane %v1738_v19, %v15631_v15  ;;  %v5189_v51 = vrot.slane %v5182_v22, %v15631_v15  ;;  %v5197_v20 = vrot.slane %v12469_v0, %v15631_v15 }
 0x517   : > { %v5172_v39 = vcombine.low %v5155_v3, %v5163_v43  ;;  %v2477_v33 = vrot.slane %v2463_v44, %v15631_v15  ;;  %v5205_v62 = vrot.slane %v5198_v24, %v15631_v15  ;;  %v5213_v36 = vrot.slane %v12470_v8, %v15631_v15 }
 0x518   : > { %v5171_v45 = vrot.slane %v5164_v48, %v15634_v42  ;;  %v2478_v59 = vcombine.low %v16028_v21, %v2470_v4  ;;  %v5214_v57 = vcombine.low %v5189_v51, %v5197_v20  ;;  %v2479_v19 = vcombine.high %v16028_v21, %v2470_v4 }
 0x519   : > { %v5179_v17 = vrot.slane %v5172_v39, %v15634_v42  ;;  %v2494_v49 = vcombine.low %v16033_v54, %v2477_v33  ;;  %v5222_v27 = vcombine.low %v5205_v62, %v5213_v36  ;;  %v2495_v38 = vcombine.high %v16033_v54, %v2477_v33 }
 0x51a   : > { %v2486_v2 = vrot.slane %v2478_v59, %v15634_v42  ;;  %v2529_v14 = vcombine.high %v16110_v50, %v15628_v52  ;;  %v5221_v9 = vrot.slane %v5214_v57, %v15634_v42  ;;  %v2493_v26 = vrot.slane %v2479_v19, %v15634_v42  ;;  %v1651_v19 = vpop.permute.xlu0 %1650 }
 0x51b   : > { %v5180_v16 = vcombine.low %v5171_v45, %v5179_v17  ;;  %v5181_v11 = vcombine.high %v5171_v45, %v5179_v17  ;;  %v5229_v25 = vrot.slane %v5222_v27, %v15634_v42  ;;  %v2502_v21 = vrot.slane %v2494_v49, %v15634_v42 }
 0x51c   : > { %v2509_v35 = vrot.slane %v2495_v38, %v15634_v42  ;;  %v2536_v28 = vrot.slane %v16110_v50, %v15631_v15  ;;  %v2543_v61 = vrot.slane %v2529_v14, %v15631_v15  ;;  %v4432_v56 = vcombine.low %v2486_v2, %v2493_v26 }
 0x51d   : > { %v5812_v7 = vshrl.u32 %v5180_v16, 16  ;;  %v5820_v54 = vshrl.u32 %v5181_v11, 16  ;;  %v5230_v47 = vcombine.low %v5221_v9, %v5229_v25  ;;  %v5231_v6 = vcombine.high %v5221_v9, %v5229_v25 }
 0x51e   : > { %v2544_v41 = vcombine.low %v16037_v34, %v2536_v28  ;;  %v2545_v60 = vcombine.high %v16037_v34, %v2536_v28  ;;  %v2560_v5 = vcombine.low %v16041_v18, %v2543_v61  ;;  %v2561_v29 = vcombine.high %v16041_v18, %v2543_v61  ;;  %v1589_v34 = vpop.permute.xlu1 %1588 }
 0x51f   : > { %v4439_v58 = vrot.slane %v4432_v56, %v15631_v15  ;;  %v12439_v44 = vcombine.high %v2486_v2, %v2493_v26  ;;  %v5810_v3 = vpack.i.b16 %v5230_v47, %v5180_v16  ;;  %v5813_v50 = vshrl.u32 %v5230_v47, 16 }
 0x520   : > { %v5818_v43 = vpack.i.b16 %v5231_v6, %v5181_v11  ;;  %v5821_v22 = vshrl.u32 %v5231_v6, 16  ;;  %v2552_v0 = vrot.slane %v2544_v41, %v15634_v42  ;;  %v2559_v48 = vrot.slane %v2545_v60, %v15634_v42 }
 0x521   : > { %v2568_v24 = vrot.slane %v2560_v5, %v15634_v42  ;;  %v2575_v8 = vrot.slane %v2561_v29, %v15634_v42  ;;  %v5814_v4 = vpack.i.b16 %v5813_v50, %v5812_v7  ;;  %5900 = vst.msk [vmem:[#allocation3 + $0x58] sm:$0xff] %vm5888_vm0, %v5810_v3  ;;  %v4447_v18 = vrot.slane %v12439_v44, %v15631_v15 }
 0x522   : > { %v5822_v39 = vpack.i.b16 %v5821_v22, %v5820_v54  ;;  %5932 = vst.msk [vmem:[#allocation4 + $0x58] sm:$0xff] %vm5888_vm0, %v5818_v43  ;;  %v4448_v51 = vcombine.low %v2502_v21, %v2509_v35  ;;  %v12440_v20 = vcombine.high %v2502_v21, %v2509_v35  ;;  %v4482_v33 = vcombine.low %v2552_v0, %v2559_v48 }
 0x523   : > { %v12441_v45 = vcombine.high %v2552_v0, %v2559_v48  ;;  %v4498_v62 = vcombine.low %v2568_v24, %v2575_v8  ;;  %5916 = vst.msk [vmem:[#allocation3 + $0xd8] sm:$0xff] %vm5888_vm0, %v5814_v4  ;;  %v4464_v59 = vcombine.low %v4439_v58, %v4447_v18  ;;  %v12442_v17 = vcombine.high %v2568_v24, %v2575_v8  ;;  %v1605_v18 = vpop.permute.xlu1 %1604 }
 0x524   : > { %5948 = vst.msk [vmem:[#allocation4 + $0xd8] sm:$0xff] %vm5888_vm0, %v5822_v39  ;;  %v4455_v36 = vrot.slane %v4448_v51, %v15631_v15  ;;  %v1746_v57 = vpack.i.b16 %v1589_v34, %v15552_v55  ;;  %v4463_v49 = vrot.slane %v12440_v20, %v15631_v15  ;;  %v4489_v27 = vrot.slane %v4482_v33, %v15631_v15 }
 0x525   : > { %v4497_v2 = vrot.slane %v12441_v45, %v15631_v15  ;;  %v4505_v38 = vrot.slane %v4498_v62, %v15631_v15  ;;  %v4471_v14 = vrot.slane %v4464_v59, %v15634_v42  ;;  %v4513_v16 = vrot.slane %v12442_v17, %v15631_v15 }
 0x526   : > { %v1749_v11 = vshrl.u32 %v1589_v34, 16  ;;  %v2580_v9 = vcombine.high %v1746_v57, %v15628_v52  ;;  %v4472_v26 = vcombine.low %v4455_v36, %v4463_v49  ;;  %v16183_v21 = vrot.slane %v1746_v57, %v15631_v15 }
 0x527   : > { %v4514_v25 = vcombine.low %v4489_v27, %v4497_v2  ;;  %v1866_v35 = vpack.i.b16 %v1651_v19, %v15542_v46  ;;  %v4522_v28 = vcombine.low %v4505_v38, %v4513_v16  ;;  %v19219_v7 = vshrl.u32 %v15552_v55, 16 }
 0x528   : > { %v16189_v61 = vrot.slane %v2580_v9, %v15631_v15  ;;  %v1869_v56 = vshrl.u32 %v1651_v19, 16  ;;  %v4479_v47 = vrot.slane %v4472_v26, %v15634_v42  ;;  %v19220_v55 = vshrl.u32 %v15542_v46, 16 }
 0x529   : > { %v1750_v54 = vpack.i.b16 %v1749_v11, %v19219_v7  ;;  %v4521_v6 = vrot.slane %v4514_v25, %v15634_v42  ;;  %v3519_v41 = vcombine.high %v1866_v35, %v15628_v52  ;;  %v3526_v60 = vrot.slane %v1866_v35, %v15631_v15 }
 0x52a   : > { %v4529_v5 = vrot.slane %v4522_v28, %v15634_v42  ;;  %v1870_v44 = vpack.i.b16 %v1869_v56, %v19220_v55  ;;  %v4480_v3 = vcombine.low %v4471_v14, %v4479_v47  ;;  %v4481_v50 = vcombine.high %v4471_v14, %v4479_v47 }
 0x52b   : > { %v2646_v29 = vcombine.high %v1750_v54, %v15628_v52  ;;  %v16198_v58 = vrot.slane %v1750_v54, %v15631_v15  ;;  %v3533_v43 = vrot.slane %v3519_v41, %v15631_v15  ;;  %v3534_v22 = vcombine.low %v16081_v63, %v3526_v60 }
 0x52c   : > { %v4530_v0 = vcombine.low %v4521_v6, %v4529_v5  ;;  %v4531_v48 = vcombine.high %v4521_v6, %v4529_v5  ;;  %v3535_v8 = vcombine.high %v16081_v63, %v3526_v60  ;;  %v5700_v34 = vshrl.u32 %v4480_v3, 16 }
 0x52d   : > { %v16205_v24 = vrot.slane %v2646_v29, %v15631_v15  ;;  %v5708_v4 = vshrl.u32 %v4481_v50, 16  ;;  %v3542_v39 = vrot.slane %v3534_v22, %v15634_v42  ;;  %v3550_v46 = vcombine.low %v16086_v1, %v3533_v43 }
 0x52e   : > { %v5698_v51 = vpack.i.b16 %v4530_v0, %v4480_v3  ;;  %v5701_v20 = vshrl.u32 %v4530_v0, 16  ;;  %v5706_v33 = vpack.i.b16 %v4531_v48, %v4481_v50  ;;  %v5709_v45 = vshrl.u32 %v4531_v48, 16  ;;  %v1591_v0 = vpop.permute.xlu0 %1590 }
 0x52f   : > { %v3549_v62 = vrot.slane %v3535_v8, %v15634_v42  ;;  %v3551_v36 = vcombine.high %v16086_v1, %v3533_v43  ;;  %v3558_v59 = vrot.slane %v3550_v46, %v15634_v42  ;;  %v3585_v17 = vcombine.high %v1870_v44, %v15628_v52 }
 0x530   : > { %v5702_v63 = vpack.i.b16 %v5701_v20, %v5700_v34  ;;  %v5710_v57 = vpack.i.b16 %v5709_v45, %v5708_v4  ;;  %5893 = vst.msk [vmem:[#allocation3 + $0x20] sm:$0xff] %vm5888_vm0, %v5698_v51  ;;  %5925 = vst.msk [vmem:[#allocation4 + $0x20] sm:$0xff] %vm5888_vm0, %v5706_v33  ;;  %v3592_v19 = vrot.slane %v1870_v44, %v15631_v15  ;;  %v1877_v11 = vshrl.u32 %v1605_v18, 16  ;;  %v1637_v4 = vpop.permute.xlu1 %1636 }
 0x531   : > { %v1874_v49 = vpack.i.b16 %v1605_v18, %v15564_v13  ;;  %v3565_v27 = vrot.slane %v3551_v36, %v15634_v42  ;;  %v3599_v2 = vrot.slane %v3585_v17, %v15631_v15  ;;  %v5232_v38 = vcombine.low %v3542_v39, %v3549_v62 }
 0x532   : > { %v12471_v1 = vcombine.high %v3542_v39, %v3549_v62  ;;  %5909 = vst.msk [vmem:[#allocation3 + $0xa0] sm:$0xff] %vm5888_vm0, %v5702_v63  ;;  %5941 = vst.msk [vmem:[#allocation4 + $0xa0] sm:$0xff] %vm5888_vm0, %v5710_v57  ;;  %v3600_v14 = vcombine.low %v16091_v12, %v3592_v19  ;;  %v3601_v16 = vcombine.high %v16091_v12, %v3592_v19  ;;  %v19221_v60 = vshrl.u32 %v15564_v13, 16 }
 0x533   : > { %v3636_v9 = vcombine.high %v1874_v49, %v15628_v52  ;;  %v3616_v26 = vcombine.low %v16095_v10, %v3599_v2  ;;  %v3617_v25 = vcombine.high %v16095_v10, %v3599_v2  ;;  %v5239_v35 = vrot.slane %v5232_v38, %v15631_v15 }
 0x534   : > { %v5247_v28 = vrot.slane %v12471_v1, %v15631_v15  ;;  %v3608_v7 = vrot.slane %v3600_v14, %v15634_v42  ;;  %v3615_v54 = vrot.slane %v3601_v16, %v15634_v42  ;;  %v5248_v56 = vcombine.low %v3558_v59, %v3565_v27 }
 0x535   : > { %v12472_v47 = vcombine.high %v3558_v59, %v3565_v27  ;;  %v3624_v6 = vrot.slane %v3616_v26, %v15634_v42  ;;  %v3631_v12 = vrot.slane %v3617_v25, %v15634_v42  ;;  %v1878_v5 = vpack.i.b16 %v1877_v11, %v19221_v60 }
 0x536   : > { %v5264_v41 = vcombine.low %v5239_v35, %v5247_v28  ;;  %v5255_v10 = vrot.slane %v5248_v56, %v15631_v15  ;;  %v5282_v55 = vcombine.low %v3608_v7, %v3615_v54  ;;  %v12473_v44 = vcombine.high %v3608_v7, %v3615_v54 }
 0x537   : > { %v5263_v29 = vrot.slane %v12472_v47, %v15631_v15  ;;  %v5298_v50 = vcombine.low %v3624_v6, %v3631_v12  ;;  %v12474_v43 = vcombine.high %v3624_v6, %v3631_v12  ;;  %v16239_v22 = vrot.slane %v1874_v49, %v15631_v15 }
 0x538   : > { %v5271_v3 = vrot.slane %v5264_v41, %v15634_v42  ;;  %v5289_v8 = vrot.slane %v5282_v55, %v15631_v15  ;;  %v5297_v13 = vrot.slane %v12473_v44, %v15631_v15  ;;  %v16244_v34 = vrot.slane %v3636_v9, %v15631_v15 }
 0x539   : > { %v5272_v48 = vcombine.low %v5255_v10, %v5263_v29  ;;  %v5305_v39 = vrot.slane %v5298_v50, %v15631_v15  ;;  %v5313_v46 = vrot.slane %v12474_v43, %v15631_v15  ;;  %v3702_v18 = vcombine.high %v1878_v5, %v15628_v52 }
 0x53a   : > { %v16250_v51 = vrot.slane %v1878_v5, %v15631_v15  ;;  %v5314_v33 = vcombine.low %v5289_v8, %v5297_v13  ;;  %v1762_v45 = vpack.i.b16 %v1591_v0, %v15576_v32  ;;  %v1765_v62 = vshrl.u32 %v1591_v0, 16 }
 0x53b   : > { %v5279_v20 = vrot.slane %v5272_v48, %v15634_v42  ;;  %v5322_v36 = vcombine.low %v5305_v39, %v5313_v46  ;;  %v16255_v59 = vrot.slane %v3702_v18, %v15631_v15  ;;  %v1754_v17 = vpack.i.b16 %v1637_v4, %v15554_v31  ;;  %v1607_v18 = vpop.permute.xlu0 %1606 }
 0x53c   : > { %v1757_v63 = vshrl.u32 %v1637_v4, 16  ;;  %v5321_v49 = vrot.slane %v5314_v33, %v15634_v42  ;;  %v19222_v27 = vshrl.u32 %v15576_v32, 16  ;;  %v2712_v1 = vcombine.high %v1762_v45, %v15628_v52 }
 0x53d   : > { %v5280_v57 = vcombine.low %v5271_v3, %v5279_v20  ;;  %v5281_v19 = vcombine.high %v5271_v3, %v5279_v20  ;;  %v5329_v38 = vrot.slane %v5322_v36, %v15634_v42  ;;  %v16264_v14 = vrot.slane %v1762_v45, %v15631_v15 }
 0x53e   : > { %v1766_v2 = vpack.i.b16 %v1765_v62, %v19222_v27  ;;  %v19223_v16 = vshrl.u32 %v15554_v31, 16  ;;  %v16273_v7 = vrot.slane %v2712_v1, %v15631_v15  ;;  %v2595_v54 = vcombine.high %v1754_v17, %v15628_v52 }
 0x53f   : > { %v5828_v9 = vshrl.u32 %v5280_v57, 16  ;;  %v5836_v26 = vshrl.u32 %v5281_v19, 16  ;;  %v5330_v28 = vcombine.low %v5321_v49, %v5329_v38  ;;  %v5331_v32 = vcombine.high %v5321_v49, %v5329_v38 }
 0x540   : > { %v1758_v11 = vpack.i.b16 %v1757_v63, %v19223_v16  ;;  %v2778_v25 = vcombine.high %v1766_v2, %v15628_v52  ;;  %v16270_v35 = vrot.slane %v1766_v2, %v15631_v15  ;;  %v2602_v31 = vrot.slane %v1754_v17, %v15631_v15 }
 0x541   : > { %v5826_v12 = vpack.i.b16 %v5330_v28, %v5280_v57  ;;  %v5829_v41 = vshrl.u32 %v5330_v28, 16  ;;  %v5834_v60 = vpack.i.b16 %v5331_v32, %v5281_v19  ;;  %v5837_v5 = vshrl.u32 %v5331_v32, 16 }
 0x542   : > { %v16277_v56 = vrot.slane %v2778_v25, %v15631_v15  ;;  %v2661_v47 = vcombine.high %v1758_v11, %v15628_v52  ;;  %v2668_v6 = vrot.slane %v1758_v11, %v15631_v15  ;;  %v2609_v10 = vrot.slane %v2595_v54, %v15631_v15  ;;  %v1653_v25 = vpop.permute.xlu1 %1652 }
 0x543   : > { %v2610_v29 = vcombine.low %v16183_v21, %v2602_v31  ;;  %v2611_v55 = vcombine.high %v16183_v21, %v2602_v31  ;;  %v5830_v3 = vpack.i.b16 %v5829_v41, %v5828_v9  ;;  %v5838_v50 = vpack.i.b16 %v5837_v5, %v5836_v26  ;;  %5901 = vst.msk [vmem:[#allocation3 + $0x60] sm:$0xff] %vm5888_vm0, %v5826_v12 }
 0x544   : > { %v2675_v44 = vrot.slane %v2661_v47, %v15631_v15  ;;  %5933 = vst.msk [vmem:[#allocation4 + $0x60] sm:$0xff] %vm5888_vm0, %v5834_v60  ;;  %v2676_v43 = vcombine.low %v16198_v58, %v2668_v6  ;;  %v2677_v0 = vcombine.high %v16198_v58, %v2668_v6  ;;  %v2626_v13 = vcombine.low %v16189_v61, %v2609_v10  ;;  %v16313_v47 = vpop.permute.xlu0 %1638 }
 0x545   : > { %v2618_v48 = vrot.slane %v2610_v29, %v15634_v42  ;;  %v2625_v8 = vrot.slane %v2611_v55, %v15634_v42  ;;  %v2627_v21 = vcombine.high %v16189_v61, %v2609_v10  ;;  %5917 = vst.msk [vmem:[#allocation3 + $0xe0] sm:$0xff] %vm5888_vm0, %v5830_v3  ;;  %5949 = vst.msk [vmem:[#allocation4 + $0xe0] sm:$0xff] %vm5888_vm0, %v5838_v50  ;;  %v1893_v31 = vshrl.u32 %v1607_v18, 16 }
 0x546   : > { %v2684_v4 = vrot.slane %v2676_v43, %v15634_v42  ;;  %v2691_v39 = vrot.slane %v2677_v0, %v15634_v42  ;;  %v2692_v46 = vcombine.low %v16205_v24, %v2675_v44  ;;  %v2693_v58 = vcombine.high %v16205_v24, %v2675_v44 }
 0x547   : > { %v2634_v20 = vrot.slane %v2626_v13, %v15634_v42  ;;  %v2641_v33 = vrot.slane %v2627_v21, %v15634_v42  ;;  %v4532_v45 = vcombine.low %v2618_v48, %v2625_v8  ;;  %v12443_v62 = vcombine.high %v2618_v48, %v2625_v8 }
 0x548   : > { %v2700_v61 = vrot.slane %v2692_v46, %v15634_v42  ;;  %v2707_v36 = vrot.slane %v2693_v58, %v15634_v42  ;;  %v4582_v17 = vcombine.low %v2684_v4, %v2691_v39  ;;  %v12445_v63 = vcombine.high %v2684_v4, %v2691_v39 }
 0x549   : > { %v4539_v57 = vrot.slane %v4532_v45, %v15631_v15  ;;  %v4547_v19 = vrot.slane %v12443_v62, %v15631_v15  ;;  %v4548_v49 = vcombine.low %v2634_v20, %v2641_v33  ;;  %v12444_v27 = vcombine.high %v2634_v20, %v2641_v33 }
 0x54a   : > { %v4589_v24 = vrot.slane %v4582_v17, %v15631_v15  ;;  %v4597_v2 = vrot.slane %v12445_v63, %v15631_v15  ;;  %v4598_v38 = vcombine.low %v2700_v61, %v2707_v36  ;;  %v12446_v1 = vcombine.high %v2700_v61, %v2707_v36 }
 0x54b   : > { %v4555_v16 = vrot.slane %v4548_v49, %v15631_v15  ;;  %v4563_v11 = vrot.slane %v12444_v27, %v15631_v15  ;;  %v4564_v9 = vcombine.low %v4539_v57, %v4547_v19  ;;  %v1890_v26 = vpack.i.b16 %v1607_v18, %v15588_v40 }
 0x54c   : > { %v4605_v28 = vrot.slane %v4598_v38, %v15631_v15  ;;  %v4613_v32 = vrot.slane %v12446_v1, %v15631_v15  ;;  %v4614_v54 = vcombine.low %v4589_v24, %v4597_v2  ;;  %v19224_v29 = vshrl.u32 %v15588_v40, 16 }
 0x54d   : > { %v4571_v6 = vrot.slane %v4564_v9, %v15634_v42  ;;  %v4572_v12 = vcombine.low %v4555_v16, %v4563_v11  ;;  %v3768_v41 = vcombine.high %v1890_v26, %v15628_v52  ;;  %v16318_v60 = vrot.slane %v1890_v26, %v15631_v15 }
 0x54e   : > { %v4621_v5 = vrot.slane %v4614_v54, %v15634_v42  ;;  %v4622_v10 = vcombine.low %v4605_v28, %v4613_v32  ;;  %v1894_v55 = vpack.i.b16 %v1893_v31, %v19224_v29  ;;  %v1882_v44 = vpack.i.b16 %v1653_v25, %v15566_v30 }
 0x54f   : > { %v4579_v3 = vrot.slane %v4572_v12, %v15634_v42  ;;  %v16326_v50 = vrot.slane %v3768_v41, %v15631_v15  ;;  %v1885_v43 = vshrl.u32 %v1653_v25, 16  ;;  %v16330_v0 = vpack.i.b16 %v16313_v47, %v15578_v23 }
 0x550   : > { %v4629_v48 = vrot.slane %v4622_v10, %v15634_v42  ;;  %v3834_v8 = vcombine.high %v1894_v55, %v15628_v52  ;;  %v16335_v13 = vrot.slane %v1894_v55, %v15631_v15  ;;  %v3651_v40 = vcombine.high %v1882_v44, %v15628_v52 }
 0x551   : > { %v4580_v21 = vcombine.low %v4571_v6, %v4579_v3  ;;  %v4581_v4 = vcombine.high %v4571_v6, %v4579_v3  ;;  %v19225_v39 = vshrl.u32 %v15566_v30, 16  ;;  %v3658_v58 = vrot.slane %v1882_v44, %v15631_v15 }
 0x552   : > { %v4630_v18 = vcombine.low %v4621_v5, %v4629_v48  ;;  %v4631_v20 = vcombine.high %v4621_v5, %v4629_v48  ;;  %v16342_v33 = vrot.slane %v3834_v8, %v15631_v15  ;;  %v3665_v45 = vrot.slane %v3651_v40, %v15631_v15 }
 0x553   : > { %v1886_v46 = vpack.i.b16 %v1885_v43, %v19225_v39  ;;  %v5716_v62 = vshrl.u32 %v4580_v21, 16  ;;  %v5724_v61 = vshrl.u32 %v4581_v4, 16  ;;  %v3666_v36 = vcombine.low %v16239_v22, %v3658_v58 }
 0x554   : > { %v3667_v17 = vcombine.high %v16239_v22, %v3658_v58  ;;  %v5714_v63 = vpack.i.b16 %v4630_v18, %v4580_v21  ;;  %v5717_v57 = vshrl.u32 %v4630_v18, 16  ;;  %v5722_v19 = vpack.i.b16 %v4631_v20, %v4581_v4 }
 0x555   : > { %v5725_v30 = vshrl.u32 %v4631_v20, 16  ;;  %v3674_v49 = vrot.slane %v3666_v36, %v15634_v42  ;;  %v3682_v24 = vcombine.low %v16244_v34, %v3665_v45  ;;  %v3683_v2 = vcombine.high %v16244_v34, %v3665_v45 }
 0x556   : > { %v3681_v27 = vrot.slane %v3667_v17, %v15634_v42  ;;  %v5718_v38 = vpack.i.b16 %v5717_v57, %v5716_v62  ;;  %5894 = vst.msk [vmem:[#allocation3 + $0x28] sm:$0xff] %vm5888_vm0, %v5714_v63  ;;  %5926 = vst.msk [vmem:[#allocation4 + $0x28] sm:$0xff] %vm5888_vm0, %v5722_v19  ;;  %v3717_v22 = vcombine.high %v1886_v46, %v15628_v52  ;;  %v1773_v54 = vshrl.u32 %v16313_v47, 16 }
 0x557   : > { %v5726_v1 = vpack.i.b16 %v5725_v30, %v5724_v61  ;;  %v3724_v16 = vrot.slane %v1886_v46, %v15631_v15  ;;  %v3690_v11 = vrot.slane %v3682_v24, %v15634_v42  ;;  %v3697_v9 = vrot.slane %v3683_v2, %v15634_v42 }
 0x558   : > { %v5332_v26 = vcombine.low %v3674_v49, %v3681_v27  ;;  %v12475_v25 = vcombine.high %v3674_v49, %v3681_v27  ;;  %5910 = vst.msk [vmem:[#allocation3 + $0xa8] sm:$0xff] %vm5888_vm0, %v5718_v38  ;;  %v3731_v34 = vrot.slane %v3717_v22, %v15631_v15  ;;  %v19226_v47 = vshrl.u32 %v15578_v23, 16 }
 0x559   : > { %5942 = vst.msk [vmem:[#allocation4 + $0xa8] sm:$0xff] %vm5888_vm0, %v5726_v1  ;;  %v3732_v28 = vcombine.low %v16250_v51, %v3724_v16  ;;  %v3733_v32 = vcombine.high %v16250_v51, %v3724_v16  ;;  %v5348_v12 = vcombine.low %v3690_v11, %v3697_v9  ;;  %v12476_v41 = vcombine.high %v3690_v11, %v3697_v9 }
 0x55a   : > { %v5339_v31 = vrot.slane %v5332_v26, %v15631_v15  ;;  %v5347_v6 = vrot.slane %v12475_v25, %v15631_v15  ;;  %v3748_v29 = vcombine.low %v16255_v59, %v3731_v34  ;;  %v3749_v55 = vcombine.high %v16255_v59, %v3731_v34 }
 0x55b   : > { %v3740_v5 = vrot.slane %v3732_v28, %v15634_v42  ;;  %v3747_v10 = vrot.slane %v3733_v32, %v15634_v42  ;;  %v5355_v44 = vrot.slane %v5348_v12, %v15631_v15  ;;  %v5363_v51 = vrot.slane %v12476_v41, %v15631_v15 }
 0x55c   : > { %v5364_v3 = vcombine.low %v5339_v31, %v5347_v6  ;;  %v1774_v43 = vpack.i.b16 %v1773_v54, %v19226_v47  ;;  %v3756_v48 = vrot.slane %v3748_v29, %v15634_v42  ;;  %v3763_v8 = vrot.slane %v3749_v55, %v15634_v42 }
 0x55d   : > { %v5382_v40 = vcombine.low %v3740_v5, %v3747_v10  ;;  %v12477_v21 = vcombine.high %v3740_v5, %v3747_v10  ;;  %v5372_v39 = vcombine.low %v5355_v44, %v5363_v51  ;;  %v2727_v59 = vcombine.high %v16330_v0, %v15628_v52 }
 0x55e   : > { %v5371_v4 = vrot.slane %v5364_v3, %v15634_v42  ;;  %v2734_v46 = vrot.slane %v16330_v0, %v15631_v15  ;;  %v5398_v18 = vcombine.low %v3756_v48, %v3763_v8  ;;  %v12478_v20 = vcombine.high %v3756_v48, %v3763_v8  ;;  %v1593_v8 = vpop.permute.xlu1 %1592 }
 0x55f   : > { %v5389_v58 = vrot.slane %v5382_v40, %v15631_v15  ;;  %v5397_v23 = vrot.slane %v12477_v21, %v15631_v15  ;;  %v5379_v45 = vrot.slane %v5372_v39, %v15634_v42  ;;  %v2741_v62 = vrot.slane %v2727_v59, %v15631_v15  ;;  %v1655_v59 = vpop.permute.xlu0 %1654 }
 0x560   : > { %v2742_v61 = vcombine.low %v16264_v14, %v2734_v46  ;;  %v2743_v36 = vcombine.high %v16264_v14, %v2734_v46  ;;  %v5405_v17 = vrot.slane %v5398_v18, %v15631_v15  ;;  %v5413_v63 = vrot.slane %v12478_v20, %v15631_v15 }
 0x561   : > { %v5414_v57 = vcombine.low %v5389_v58, %v5397_v23  ;;  %v2793_v0 = vcombine.high %v1774_v43, %v15628_v52  ;;  %v5380_v19 = vcombine.low %v5371_v4, %v5379_v45  ;;  %v5381_v30 = vcombine.high %v5371_v4, %v5379_v45 }
 0x562   : > { %v2750_v49 = vrot.slane %v2742_v61, %v15634_v42  ;;  %v2757_v27 = vrot.slane %v2743_v36, %v15634_v42  ;;  %v5422_v2 = vcombine.low %v5405_v17, %v5413_v63  ;;  %v2758_v38 = vcombine.low %v16273_v7, %v2741_v62 }
 0x563   : > { %v5421_v24 = vrot.slane %v5414_v57, %v15634_v42  ;;  %v2759_v14 = vcombine.high %v16273_v7, %v2741_v62  ;;  %v5844_v1 = vshrl.u32 %v5380_v19, 16  ;;  %v5852_v22 = vshrl.u32 %v5381_v30, 16 }
 0x564   : > { %v2800_v16 = vrot.slane %v1774_v43, %v15631_v15  ;;  %v2807_v11 = vrot.slane %v2793_v0, %v15631_v15  ;;  %v5429_v9 = vrot.slane %v5422_v2, %v15634_v42  ;;  %v2766_v26 = vrot.slane %v2758_v38, %v15634_v42 }
 0x565   : > { %v2773_v25 = vrot.slane %v2759_v14, %v15634_v42  ;;  %v4632_v34 = vcombine.low %v2750_v49, %v2757_v27  ;;  %v12447_v41 = vcombine.high %v2750_v49, %v2757_v27  ;;  %v1778_v61 = vpack.i.b16 %v1593_v8, %v15600_v53 }
 0x566   : > { %v2808_v28 = vcombine.low %v16270_v35, %v2800_v16  ;;  %v2809_v32 = vcombine.high %v16270_v35, %v2800_v16  ;;  %v2824_v54 = vcombine.low %v16277_v56, %v2807_v11  ;;  %v2825_v7 = vcombine.high %v16277_v56, %v2807_v11 }
 0x567   : > { %v5430_v31 = vcombine.low %v5421_v24, %v5429_v9  ;;  %v5431_v6 = vcombine.high %v5421_v24, %v5429_v9  ;;  %v4639_v12 = vrot.slane %v4632_v34, %v15631_v15  ;;  %v4647_v47 = vrot.slane %v12447_v41, %v15631_v15 }
 0x568   : > { %v2816_v5 = vrot.slane %v2808_v28, %v15634_v42  ;;  %v2823_v10 = vrot.slane %v2809_v32, %v15634_v42  ;;  %v2832_v29 = vrot.slane %v2824_v54, %v15634_v42  ;;  %v2839_v55 = vrot.slane %v2825_v7, %v15634_v42 }
 0x569   : > { %v5842_v44 = vpack.i.b16 %v5430_v31, %v5380_v19  ;;  %v5845_v51 = vshrl.u32 %v5430_v31, 16  ;;  %v5850_v35 = vpack.i.b16 %v5431_v6, %v5381_v30  ;;  %v5853_v3 = vshrl.u32 %v5431_v6, 16 }
 0x56a   : > { %v4648_v56 = vcombine.low %v2766_v26, %v2773_v25  ;;  %v12448_v43 = vcombine.high %v2766_v26, %v2773_v25  ;;  %v4682_v48 = vcombine.low %v2816_v5, %v2823_v10  ;;  %v12449_v4 = vcombine.high %v2816_v5, %v2823_v10 }
 0x56b   : > { %v5846_v40 = vpack.i.b16 %v5845_v51, %v5844_v1  ;;  %v5854_v21 = vpack.i.b16 %v5853_v3, %v5852_v22  ;;  %5902 = vst.msk [vmem:[#allocation3 + $0x68] sm:$0xff] %vm5888_vm0, %v5842_v44  ;;  %5934 = vst.msk [vmem:[#allocation4 + $0x68] sm:$0xff] %vm5888_vm0, %v5850_v35  ;;  %v4698_v39 = vcombine.low %v2832_v29, %v2839_v55  ;;  %v1781_v63 = vshrl.u32 %v1593_v8, 16  ;;  %v1609_v3 = vpop.permute.xlu1 %1608 }
 0x56c   : > { %v4655_v46 = vrot.slane %v4648_v56, %v15631_v15  ;;  %v4663_v58 = vrot.slane %v12448_v43, %v15631_v15  ;;  %v4664_v23 = vcombine.low %v4639_v12, %v4647_v47  ;;  %v4689_v18 = vrot.slane %v4682_v48, %v15631_v15 }
 0x56d   : > { %5918 = vst.msk [vmem:[#allocation3 + $0xe8] sm:$0xff] %vm5888_vm0, %v5846_v40  ;;  %5950 = vst.msk [vmem:[#allocation4 + $0xe8] sm:$0xff] %vm5888_vm0, %v5854_v21  ;;  %v4697_v20 = vrot.slane %v12449_v4, %v15631_v15  ;;  %v4705_v45 = vrot.slane %v4698_v39, %v15631_v15  ;;  %v12450_v62 = vcombine.high %v2832_v29, %v2839_v55  ;;  %v19227_v24 = vshrl.u32 %v15600_v53, 16 }
 0x56e   : > { %v4671_v36 = vrot.slane %v4664_v23, %v15634_v42  ;;  %v4672_v17 = vcombine.low %v4655_v46, %v4663_v58  ;;  %v1898_v57 = vpack.i.b16 %v1655_v59, %v15590_v37  ;;  %v2844_v30 = vcombine.high %v1778_v61, %v15628_v52 }
 0x56f   : > { %v4713_v0 = vrot.slane %v12450_v62, %v15631_v15  ;;  %v4714_v19 = vcombine.low %v4689_v18, %v4697_v20  ;;  %v16424_v49 = vrot.slane %v1778_v61, %v15631_v15  ;;  %v1782_v2 = vpack.i.b16 %v1781_v63, %v19227_v24  ;;  %v19229_v63 = vld [vmem:[#allocation52_spill] sm:$0xff] }
 0x570   : > { %v4679_v27 = vrot.slane %v4672_v17, %v15634_v42  ;;  %v1901_v38 = vshrl.u32 %v1655_v59, 16  ;;  %v3783_v14 = vcombine.high %v1898_v57, %v15628_v52  ;;  %v16432_v16 = vrot.slane %v2844_v30, %v15631_v15 }
 0x571   : > { %v4721_v1 = vrot.slane %v4714_v19, %v15634_v42  ;;  %v4722_v22 = vcombine.low %v4705_v45, %v4713_v0  ;;  %v3790_v11 = vrot.slane %v1898_v57, %v15631_v15  ;;  %v2910_v25 = vcombine.high %v1782_v2, %v15628_v52 }
 0x572   : > { %v4680_v9 = vcombine.low %v4671_v36, %v4679_v27  ;;  %v4681_v26 = vcombine.high %v4671_v36, %v4679_v27  ;;  %v16437_v34 = vrot.slane %v1782_v2, %v15631_v15  ;;  %v19228_v28 = vshrl.u32 %v15590_v37, 16 }
 0x573   : > { %v4729_v53 = vrot.slane %v4722_v22, %v15634_v42  ;;  %v3797_v54 = vrot.slane %v3783_v14, %v15631_v15  ;;  %v3798_v7 = vcombine.low %v16318_v60, %v3790_v11  ;;  %v16445_v12 = vrot.slane %v2910_v25, %v15631_v15 }
 0x574   : > { %v1902_v32 = vpack.i.b16 %v1901_v38, %v19228_v28  ;;  %v5732_v31 = vshrl.u32 %v4680_v9, 16  ;;  %v5740_v6 = vshrl.u32 %v4681_v26, 16  ;;  %v3799_v41 = vcombine.high %v16318_v60, %v3790_v11 }
 0x575   : > { %v4730_v5 = vcombine.low %v4721_v1, %v4729_v53  ;;  %v4731_v10 = vcombine.high %v4721_v1, %v4729_v53  ;;  %v3806_v29 = vrot.slane %v3798_v7, %v15634_v42  ;;  %v3814_v55 = vcombine.low %v16326_v50, %v3797_v54 }
 0x576   : > { %v3813_v37 = vrot.slane %v3799_v41, %v15634_v42  ;;  %v3815_v44 = vcombine.high %v16326_v50, %v3797_v54  ;;  %v3849_v51 = vcombine.high %v1902_v32, %v15628_v52  ;;  %v3856_v35 = vrot.slane %v1902_v32, %v15631_v15 }
 0x577   : > { %v5730_v47 = vpack.i.b16 %v4730_v5, %v4680_v9  ;;  %v5733_v56 = vshrl.u32 %v4730_v5, 16  ;;  %v5738_v43 = vpack.i.b16 %v4731_v10, %v4681_v26  ;;  %v5741_v48 = vshrl.u32 %v4731_v10, 16 }
 0x578   : > { %v3822_v60 = vrot.slane %v3814_v55, %v15634_v42  ;;  %v3829_v8 = vrot.slane %v3815_v44, %v15634_v42  ;;  %v3863_v40 = vrot.slane %v3849_v51, %v15631_v15  ;;  %v3864_v21 = vcombine.low %v16335_v13, %v3856_v35 }
 0x579   : > { %v5734_v4 = vpack.i.b16 %v5733_v56, %v5732_v31  ;;  %v5742_v39 = vpack.i.b16 %v5741_v48, %v5740_v6  ;;  %5895 = vst.msk [vmem:[#allocation3 + $0x30] sm:$0xff] %vm5888_vm0, %v5730_v47  ;;  %5927 = vst.msk [vmem:[#allocation4 + $0x30] sm:$0xff] %vm5888_vm0, %v5738_v43  ;;  %v3865_v50 = vcombine.high %v16335_v13, %v3856_v35  ;;  %v1909_v14 = vshrl.u32 %v1609_v3, 16 }
 0x57a   : > { %v5432_v59 = vcombine.low %v3806_v29, %v3813_v37  ;;  %v3872_v46 = vrot.slane %v3864_v21, %v15634_v42  ;;  %v3880_v58 = vcombine.low %v16342_v33, %v3863_v40  ;;  %v3881_v23 = vcombine.high %v16342_v33, %v3863_v40  ;;  %v1641_v33 = vpop.permute.xlu1 %1640 }
 0x57b   : > { %v12479_v18 = vcombine.high %v3806_v29, %v3813_v37  ;;  %5911 = vst.msk [vmem:[#allocation3 + $0xb0] sm:$0xff] %vm5888_vm0, %v5734_v4  ;;  %5943 = vst.msk [vmem:[#allocation4 + $0xb0] sm:$0xff] %vm5888_vm0, %v5742_v39  ;;  %v3879_v20 = vrot.slane %v3865_v50, %v15634_v42  ;;  %v5448_v62 = vcombine.low %v3822_v60, %v3829_v8  ;;  %v19230_v28 = vshrl.u32 %v19229_v63, 16  ;;  %v19231_v29 = vld [vmem:[#allocation51_spill] sm:$0xff]  ;;  %v19233_v4 = vld [vmem:[#allocation53_spill] sm:$0xff] }
 0x57c   : > { %v5439_v45 = vrot.slane %v5432_v59, %v15631_v15  ;;  %v12480_v61 = vcombine.high %v3822_v60, %v3829_v8  ;;  %v3888_v13 = vrot.slane %v3880_v58, %v15634_v42  ;;  %v3895_v36 = vrot.slane %v3881_v23, %v15634_v42 }
 0x57d   : > { %v5447_v17 = vrot.slane %v12479_v18, %v15631_v15  ;;  %v1906_v57 = vpack.i.b16 %v1609_v3, %v19229_v63  ;;  %v5455_v0 = vrot.slane %v5448_v62, %v15631_v15  ;;  %v5482_v30 = vcombine.low %v3872_v46, %v3879_v20 }
 0x57e   : > { %v5463_v19 = vrot.slane %v12480_v61, %v15631_v15  ;;  %v12481_v27 = vcombine.high %v3872_v46, %v3879_v20  ;;  %v5498_v2 = vcombine.low %v3888_v13, %v3895_v36  ;;  %v12482_v38 = vcombine.high %v3888_v13, %v3895_v36  ;;  %v1657_v37 = vpop.permute.xlu1 %1656 }
 0x57f   : > { %v5464_v24 = vcombine.low %v5439_v45, %v5447_v17  ;;  %v5489_v22 = vrot.slane %v5482_v30, %v15631_v15  ;;  %v3900_v9 = vcombine.high %v1906_v57, %v15628_v52  ;;  %v1910_v32 = vpack.i.b16 %v1909_v14, %v19230_v28 }
 0x580   : > { %v5472_v1 = vcombine.low %v5455_v0, %v5463_v19  ;;  %v5497_v11 = vrot.slane %v12481_v27, %v15631_v15  ;;  %v5505_v25 = vrot.slane %v5498_v2, %v15631_v15  ;;  %v5513_v53 = vrot.slane %v12482_v38, %v15631_v15 }
 0x581   : > { %v5471_v26 = vrot.slane %v5464_v24, %v15634_v42  ;;  %v16484_v31 = vrot.slane %v1906_v57, %v15631_v15  ;;  %v16487_v6 = vrot.slane %v3900_v9, %v15631_v15  ;;  %v3966_v5 = vcombine.high %v1910_v32, %v15628_v52 }
 0x582   : > { %v5479_v54 = vrot.slane %v5472_v1, %v15634_v42  ;;  %v5514_v7 = vcombine.low %v5489_v22, %v5497_v11  ;;  %v5522_v41 = vcombine.low %v5505_v25, %v5513_v53  ;;  %v16491_v10 = vrot.slane %v1910_v32, %v15631_v15 }
 0x583   : > { %v1786_v55 = vpack.i.b16 %v1641_v33, %v19231_v29  ;;  %v1789_v3 = vshrl.u32 %v1641_v33, 16  ;;  %v16497_v56 = vrot.slane %v3966_v5, %v15631_v15  ;;  %v19232_v40 = vshrl.u32 %v19231_v29, 16 }
 0x584   : > { %v5480_v44 = vcombine.low %v5471_v26, %v5479_v54  ;;  %v5481_v51 = vcombine.high %v5471_v26, %v5479_v54  ;;  %v5521_v35 = vrot.slane %v5514_v7, %v15634_v42  ;;  %v5529_v47 = vrot.slane %v5522_v41, %v15634_v42 }
 0x585   : > { %v2859_v43 = vcombine.high %v1786_v55, %v15628_v52  ;;  %v2866_v48 = vrot.slane %v1786_v55, %v15631_v15  ;;  %v1790_v21 = vpack.i.b16 %v1789_v3, %v19232_v40  ;;  %v1914_v39 = vpack.i.b16 %v1657_v37, %v19233_v4 }
 0x586   : > { %v5860_v60 = vshrl.u32 %v5480_v44, 16  ;;  %v5868_v8 = vshrl.u32 %v5481_v51, 16  ;;  %v5530_v50 = vcombine.low %v5521_v35, %v5529_v47  ;;  %v5531_v59 = vcombine.high %v5521_v35, %v5529_v47 }
 0x587   : > { %v2873_v46 = vrot.slane %v2859_v43, %v15631_v15  ;;  %v2874_v58 = vcombine.low %v16424_v49, %v2866_v48  ;;  %v2875_v23 = vcombine.high %v16424_v49, %v2866_v48  ;;  %v2925_v18 = vcombine.high %v1790_v21, %v15628_v52 }
 0x588   : > { %v2932_v20 = vrot.slane %v1790_v21, %v15631_v15  ;;  %v1917_v45 = vshrl.u32 %v1657_v37, 16  ;;  %v5858_v62 = vpack.i.b16 %v5530_v50, %v5480_v44  ;;  %v5861_v61 = vshrl.u32 %v5530_v50, 16 }
 0x589   : > { %v5866_v13 = vpack.i.b16 %v5531_v59, %v5481_v51  ;;  %v5869_v36 = vshrl.u32 %v5531_v59, 16  ;;  %v2882_v17 = vrot.slane %v2874_v58, %v15634_v42  ;;  %v2889_v63 = vrot.slane %v2875_v23, %v15634_v42 }
 0x58a   : > { %v2890_v57 = vcombine.low %v16432_v16, %v2873_v46  ;;  %v2891_v33 = vcombine.high %v16432_v16, %v2873_v46  ;;  %v5862_v0 = vpack.i.b16 %v5861_v61, %v5860_v60  ;;  %5903 = vst.msk [vmem:[#allocation3 + $0x70] sm:$0xff] %vm5888_vm0, %v5858_v62  ;;  %v2939_v49 = vrot.slane %v2925_v18, %v15631_v15 }
 0x58b   : > { %v5870_v19 = vpack.i.b16 %v5869_v36, %v5868_v8  ;;  %5935 = vst.msk [vmem:[#allocation4 + $0x70] sm:$0xff] %vm5888_vm0, %v5866_v13  ;;  %v2940_v30 = vcombine.low %v16437_v34, %v2932_v20  ;;  %v2941_v2 = vcombine.high %v16437_v34, %v2932_v20  ;;  %v4732_v38 = vcombine.low %v2882_v17, %v2889_v63 }
 0x58c   : > { %v2898_v27 = vrot.slane %v2890_v57, %v15634_v42  ;;  %v2905_v24 = vrot.slane %v2891_v33, %v15634_v42  ;;  %5919 = vst.msk [vmem:[#allocation3 + $0xf0] sm:$0xff] %vm5888_vm0, %v5862_v0  ;;  %v2956_v14 = vcombine.low %v16445_v12, %v2939_v49  ;;  %v2957_v1 = vcombine.high %v16445_v12, %v2939_v49 }
 0x58d   : > { %5951 = vst.msk [vmem:[#allocation4 + $0xf0] sm:$0xff] %vm5888_vm0, %v5870_v19  ;;  %v2948_v16 = vrot.slane %v2940_v30, %v15634_v42  ;;  %v12451_v22 = vcombine.high %v2882_v17, %v2889_v63  ;;  %v2955_v11 = vrot.slane %v2941_v2, %v15634_v42  ;;  %v4739_v9 = vrot.slane %v4732_v38, %v15631_v15 }
 0x58e   : > { %v4748_v26 = vcombine.low %v2898_v27, %v2905_v24  ;;  %v12452_v25 = vcombine.high %v2898_v27, %v2905_v24  ;;  %v2964_v34 = vrot.slane %v2956_v14, %v15634_v42  ;;  %v2971_v53 = vrot.slane %v2957_v1, %v15634_v42 }
 0x58f   : > { %v4747_v28 = vrot.slane %v12451_v22, %v15631_v15  ;;  %v19234_v32 = vshrl.u32 %v19233_v4, 16  ;;  %v4782_v41 = vcombine.low %v2948_v16, %v2955_v11  ;;  %v12453_v5 = vcombine.high %v2948_v16, %v2955_v11 }
 0x590   : > { %v4755_v7 = vrot.slane %v4748_v26, %v15631_v15  ;;  %v4763_v12 = vrot.slane %v12452_v25, %v15631_v15  ;;  %v4798_v55 = vcombine.low %v2964_v34, %v2971_v53  ;;  %v12454_v37 = vcombine.high %v2964_v34, %v2971_v53 }
 0x591   : > { %v1918_v54 = vpack.i.b16 %v1917_v45, %v19234_v32  ;;  %v4764_v29 = vcombine.low %v4739_v9, %v4747_v28  ;;  %v3915_v44 = vcombine.high %v1914_v39, %v15628_v52  ;;  %v4789_v35 = vrot.slane %v4782_v41, %v15631_v15 }
 0x592   : > { %v4772_v51 = vcombine.low %v4755_v7, %v4763_v12  ;;  %v4797_v3 = vrot.slane %v12453_v5, %v15631_v15  ;;  %v3922_v47 = vrot.slane %v1914_v39, %v15631_v15  ;;  %v4805_v48 = vrot.slane %v4798_v55, %v15631_v15 }
 0x593   : > { %v4771_v43 = vrot.slane %v4764_v29, %v15634_v42  ;;  %v4813_v60 = vrot.slane %v12454_v37, %v15631_v15  ;;  %v3929_v8 = vrot.slane %v3915_v44, %v15631_v15  ;;  %v3981_v58 = vcombine.high %v1918_v54, %v15628_v52 }
 0x594   : > { %v4779_v40 = vrot.slane %v4772_v51, %v15634_v42  ;;  %v4814_v21 = vcombine.low %v4789_v35, %v4797_v3  ;;  %v3930_v4 = vcombine.low %v16484_v31, %v3922_v47  ;;  %v3931_v50 = vcombine.high %v16484_v31, %v3922_v47 }
 0x595   : > { %v4822_v59 = vcombine.low %v4805_v48, %v4813_v60  ;;  %v3946_v46 = vcombine.low %v16487_v6, %v3929_v8  ;;  %v3947_v39 = vcombine.high %v16487_v6, %v3929_v8  ;;  %v3988_v6 = vrot.slane %v1918_v54, %v15631_v15 }
 0x596   : > { %v4780_v23 = vcombine.low %v4771_v43, %v4779_v40  ;;  %v4781_v18 = vcombine.high %v4771_v43, %v4779_v40  ;;  %v4821_v20 = vrot.slane %v4814_v21, %v15634_v42  ;;  %v3938_v45 = vrot.slane %v3930_v4, %v15634_v42 }
 0x597   : > { %v4829_v62 = vrot.slane %v4822_v59, %v15634_v42  ;;  %v3945_v61 = vrot.slane %v3931_v50, %v15634_v42  ;;  %v3954_v13 = vrot.slane %v3946_v46, %v15634_v42  ;;  %v3961_v31 = vrot.slane %v3947_v39, %v15634_v42 }
 0x598   : > { %v5748_v36 = vshrl.u32 %v4780_v23, 16  ;;  %v5756_v17 = vshrl.u32 %v4781_v18, 16  ;;  %v3995_v52 = vrot.slane %v3981_v58, %v15631_v15  ;;  %v3996_v19 = vcombine.low %v16491_v10, %v3988_v6 }
 0x599   : > { %v4830_v63 = vcombine.low %v4821_v20, %v4829_v62  ;;  %v4831_v57 = vcombine.high %v4821_v20, %v4829_v62  ;;  %v5532_v33 = vcombine.low %v3938_v45, %v3945_v61  ;;  %v12483_v0 = vcombine.high %v3938_v45, %v3945_v61 }
 0x59a   : > { %v3997_v49 = vcombine.high %v16491_v10, %v3988_v6  ;;  %v4012_v30 = vcombine.low %v16497_v56, %v3995_v52  ;;  %v4013_v27 = vcombine.high %v16497_v56, %v3995_v52  ;;  %v4004_v14 = vrot.slane %v3996_v19, %v15634_v42 }
 0x59b   : > { %v5746_v24 = vpack.i.b16 %v4830_v63, %v4780_v23  ;;  %v5749_v2 = vshrl.u32 %v4830_v63, 16  ;;  %v5754_v38 = vpack.i.b16 %v4831_v57, %v4781_v18  ;;  %v5757_v16 = vshrl.u32 %v4831_v57, 16 }
 0x59c   : > { %v4011_v1 = vrot.slane %v3997_v49, %v15634_v42  ;;  %v4020_v22 = vrot.slane %v4012_v30, %v15634_v42  ;;  %v4027_v11 = vrot.slane %v4013_v27, %v15634_v42  ;;  %v5539_v10 = vrot.slane %v5532_v33, %v15631_v15 }
 0x59d   : > { %v5750_v9 = vpack.i.b16 %v5749_v2, %v5748_v36  ;;  %v5758_v26 = vpack.i.b16 %v5757_v16, %v5756_v17  ;;  %5896 = vst.msk [vmem:[#allocation3 + $0x38] sm:$0xff] %vm5888_vm0, %v5746_v24  ;;  %5928 = vst.msk [vmem:[#allocation4 + $0x38] sm:$0xff] %vm5888_vm0, %v5754_v38  ;;  %v5547_v56 = vrot.slane %v12483_v0, %v15631_v15 }
 0x59e   : > { %v5548_v25 = vcombine.low %v3954_v13, %v3961_v31  ;;  %v12484_v34 = vcombine.high %v3954_v13, %v3961_v31  ;;  %v5582_v53 = vcombine.low %v4004_v14, %v4011_v1  ;;  %v12485_v28 = vcombine.high %v4004_v14, %v4011_v1 }
 0x59f   : > { %5912 = vst.msk [vmem:[#allocation3 + $0xb8] sm:$0xff] %vm5888_vm0, %v5750_v9  ;;  %5944 = vst.msk [vmem:[#allocation4 + $0xb8] sm:$0xff] %vm5888_vm0, %v5758_v26  ;;  %v5564_v32 = vcombine.low %v5539_v10, %v5547_v56  ;;  %v5598_v54 = vcombine.low %v4020_v22, %v4027_v11  ;;  %v12486_v7 = vcombine.high %v4020_v22, %v4027_v11 }
 0x5a0   : > { %v5555_v12 = vrot.slane %v5548_v25, %v15631_v15  ;;  %v5563_v41 = vrot.slane %v12484_v34, %v15631_v15  ;;  %v5589_v5 = vrot.slane %v5582_v53, %v15631_v15  ;;  %v5597_v29 = vrot.slane %v12485_v28, %v15631_v15 }
 0x5a1   : > { %v5605_v55 = vrot.slane %v5598_v54, %v15631_v15  ;;  %v5613_v37 = vrot.slane %v12486_v7, %v15631_v15  ;;  %v5571_v3 = vrot.slane %v5564_v32, %v15634_v42 }
 0x5a2   : > { %v5572_v44 = vcombine.low %v5555_v12, %v5563_v41  ;;  %v5614_v51 = vcombine.low %v5589_v5, %v5597_v29 }
 0x5a3   : > { %v5622_v35 = vcombine.low %v5605_v55, %v5613_v37 }
 0x5a4   : > { %v5579_v47 = vrot.slane %v5572_v44, %v15634_v42  ;;  %v5621_v43 = vrot.slane %v5614_v51, %v15634_v42 }
 0x5a5   : > { %v5629_v48 = vrot.slane %v5622_v35, %v15634_v42 }
 0x5a6   : > { %v5580_v60 = vcombine.low %v5571_v3, %v5579_v47  ;;  %v5581_v8 = vcombine.high %v5571_v3, %v5579_v47 }
 0x5a7   : > { %v5630_v40 = vcombine.low %v5621_v43, %v5629_v48  ;;  %v5631_v21 = vcombine.high %v5621_v43, %v5629_v48 }
 0x5a8   : > { %v5876_v4 = vshrl.u32 %v5580_v60, 16  ;;  %v5884_v50 = vshrl.u32 %v5581_v8, 16 }
 0x5a9   : > { %v5874_v59 = vpack.i.b16 %v5630_v40, %v5580_v60  ;;  %v5877_v46 = vshrl.u32 %v5630_v40, 16  ;;  %v5882_v15 = vpack.i.b16 %v5631_v21, %v5581_v8  ;;  %v5885_v39 = vshrl.u32 %v5631_v21, 16 }
 0x5ab   : > { %v5878_v58 = vpack.i.b16 %v5877_v46, %v5876_v4  ;;  %v5886_v23 = vpack.i.b16 %v5885_v39, %v5884_v50  ;;  %5904 = vst.msk [vmem:[#allocation3 + $0x78] sm:$0xff] %vm5888_vm0, %v5874_v59  ;;  %5936 = vst.msk [vmem:[#allocation4 + $0x78] sm:$0xff] %vm5888_vm0, %v5882_v15 }
 0x5ad   : > { %5920 = vst.msk [vmem:[#allocation3 + $0xf8] sm:$0xff] %vm5888_vm0, %v5878_v58  ;;  %5952 = vst.msk [vmem:[#allocation4 + $0xf8] sm:$0xff] %vm5888_vm0, %v5886_v23 }
 0x5ae PF: > { %v13431_v42 = vld [vmem:[#allocation11] sm:$0xff]   ;;  %s19235_s26 = sld [smem:[#allocation45_spill]]  ;;  %v13432_v18 = vld [vmem:[#allocation11 + $0x8] sm:$0xff]   ;;  %v13433_v20 = vld [vmem:[#allocation11 + $0x10] sm:$0xff]   ;;  %vm7901_vm1 = vcmask 523264   ;;  %s14436_s19 = smov 64  }
 0x5af   : > { %12949 = vmatprep.subr.bf16.mxu0 %v13431_v42  ;;  %v13434_v45 = vld [vmem:[#allocation11 + $0x18] sm:$0xff]   ;;  %v13435_v61 = vld [vmem:[#allocation11 + $0x20] sm:$0xff]   ;;  %v13436_v13 = vld [vmem:[#allocation11 + $0x28] sm:$0xff]   ;;  %s19352_s25 = sld [smem:[#allocation46_spill]]  ;;  %s12142_s0 = sshll.u32 %s15019_s23, 4  ;;  %s18974_s0 = int_to_ptr.vmem [resolvable:$true] %s12142_s0 }
 0x5b0   : > { %12950 = vmatpush3.bf16.msra.mxu0 %v13431_v42  ;;  %v13437_v31 = vld [vmem:[#allocation11 + $0x30] sm:$0xff]   ;;  %v13438_v36 = vld [vmem:[#allocation11 + $0x38] sm:$0xff]   ;;  %v7878_v2 = vld [vmem:[#allocation3 + $0x48] sm:$0xff]  ;;  %p19355_p9 = scmp.ne.s32.totalorder %s19189_s20, 0 }
 0x5b1   : > { %12951 = vmatprep.subr.bf16.mxu0 %v13432_v18  ;;  %v7877_v19 = vld [vmem:[#allocation3 + $0x40] sm:$0xff]  ;;  %v7894_v16 = vld [vmem:[#allocation3 + $0xc8] sm:$0xff]  ;;  %v7879_v9 = vld [vmem:[#allocation3 + $0x50] sm:$0xff] }
 0x5b2   : > { %v7869_v49 = vld [vmem:[#allocation3] sm:$0xff]  ;;  %13029 = vmatprep.subr.msk.bf16.mxu1 %vm7901_vm1, %v7877_v19  ;;  %v7870_v14 = vld [vmem:[#allocation3 + $0x8] sm:$0xff]  ;;  %v7895_v26 = vld [vmem:[#allocation3 + $0xd0] sm:$0xff] }
 0x5b3   : > { %v7893_v30 = vld [vmem:[#allocation3 + $0xc0] sm:$0xff]  ;;  %v7927_v27 = vsel %vm7901_vm1, %v7869_v49, 0  ;;  %v7886_v1 = vld [vmem:[#allocation3 + $0x88] sm:$0xff]  ;;  %v7930_v22 = vsel %vm7901_vm1, %v7870_v14, 0  ;;  %v7871_v10 = vld [vmem:[#allocation3 + $0x10] sm:$0xff] }
 0x5b4   : > { %s12487_s22 = sshll.u32 %s19235_s26, 7  ;;  %12952 = vmatpush3.bf16.msra.mxu0 %v13432_v18  ;;  %v7885_v24 = vld [vmem:[#allocation3 + $0x80] sm:$0xff]  ;;  %12678 = vmatpush3.bf16.xpose.msra.mxu1 %v7927_v27  ;;  %v8115_v11 = vsel %vm7901_vm1, %v7886_v1, 0  ;;  %v7887_v56 = vld [vmem:[#allocation3 + $0x90] sm:$0xff]  ;;  %v7933_v25 = vsel %vm7901_vm1, %v7871_v10, 0  ;;  %v7880_v53 = vld [vmem:[#allocation3 + $0x58] sm:$0xff] }
 0x5b5   : > { %s5971_s1 = sshra.s32 %s12487_s22, 4  ;;  %12953 = vmatprep.subr.bf16.mxu0 %v13433_v20  ;;  %v8112_v38 = vsel %vm7901_vm1, %v7885_v24, 0  ;;  %13030 = vmatprep.subr.msk.bf16.mxu1 %vm7901_vm1, %v7878_v2  ;;  %v8118_v34 = vsel %vm7901_vm1, %v7887_v56, 0  ;;  %v7896_v28 = vld [vmem:[#allocation3 + $0xd8] sm:$0xff]  ;;  %v7881_v41 = vld [vmem:[#allocation3 + $0x60] sm:$0xff]  ;;  %v7882_v51 = vld [vmem:[#allocation3 + $0x68] sm:$0xff]  ;;  %s18535_s18 = scalar_lea.vmem %s14982_s4, %s12487_s22 [#allocation5] }
 0x5b6   : > { %s12488_s6 = sshll.u32 %s5971_s1, 3  ;;  %v7872_v32 = vld [vmem:[#allocation3 + $0x18] sm:$0xff]  ;;  %v7897_v5 = vld [vmem:[#allocation3 + $0xe0] sm:$0xff]  ;;  %v7874_v35 = vld [vmem:[#allocation3 + $0x28] sm:$0xff]  ;;  %s12655_s4 = sshll.u32 %s19235_s26, 4 }
 0x5b7   : > { %s5974_s17 = scalar_lea.vmem [#allocation2], %s12488_s6  ;;  %v7888_v54 = vld [vmem:[#allocation3 + $0x98] sm:$0xff]  ;;  %v7936_v7 = vsel %vm7901_vm1, %v7872_v32, 0  ;;  %v7873_v29 = vld [vmem:[#allocation3 + $0x20] sm:$0xff]  ;;  %v7942_v3 = vsel %vm7901_vm1, %v7874_v35, 0  ;;  %v7898_v47 = vld [vmem:[#allocation3 + $0xe8] sm:$0xff] }
 0x5b8   : > { %v5975_v62 = vld [vmem:[%s5974_s17] sm:$0xff]  ;;  %12954 = vmatpush3.bf16.msra.mxu0 %v13433_v20  ;;  %v5976_v17 = vld [vmem:[%s5974_s17 + $0x8] sm:$0xff]  ;;  %v5977_v6 = vld [vmem:[%s5974_s17 + $0x10] sm:$0xff]  ;;  %v8121_v12 = vsel %vm7901_vm1, %v7888_v54, 0  ;;  %v7939_v37 = vsel %vm7901_vm1, %v7873_v29, 0  ;;  %s12656_s16 = sshll.u32 %s19352_s25, 5 }
 0x5b9   : > { %12965 = vmatprep.mubr.bf16.mxu0 %v5975_v62  ;;  %12955 = vmatprep.subr.bf16.mxu0 %v13434_v45  ;;  %v5978_v52 = vld [vmem:[%s5974_s17 + $0x18] sm:$0xff]  ;;  %v5979_v63 = vld [vmem:[%s5974_s17 + $0x20] sm:$0xff]  ;;  %v5980_v57 = vld [vmem:[%s5974_s17 + $0x28] sm:$0xff]  ;;  %v14437_v29 = vmov 1983009808   ;;  %s12139_s21 = sadd.s32 %s12656_s16, %s12655_s4  ;;  %s19354_s1 = sld [smem:[#allocation80_spill]] }
 0x5ba   : > { %v5981_v33 = vld [vmem:[%s5974_s17 + $0x30] sm:$0xff]  ;;  %v5982_v0 = vld [vmem:[%s5974_s17 + $0x38] sm:$0xff]  ;;  %v7889_v55 = vld [vmem:[#allocation3 + $0xa0] sm:$0xff]  ;;  %s12657_s3 = sshll.u32 %s12139_s21, 7  ;;  %s18986_s17 = scalar_lea.sflag [#allocation7], %s709_s27 }
 0x5bb   : > { %v8124_v44 = vsel %vm7901_vm1, %v7889_v55, 0  ;;  %v12489_v48 = vld [vmem:[#allocation13] ss:$0 sm:$0xff]  ;;  %v7890_v60 = vld [vmem:[#allocation3 + $0xa8] sm:$0xff]  ;;  %v7876_v32 = vld [vmem:[#allocation3 + $0x38] sm:$0xff]  ;;  %v6255_v55 = vunpack.c.l.s4 %v14437_v29 }
 0x5bc   : > { %12956 = vmatpush3.bf16.msra.mxu0 %v13434_v45  ;;  %12680 = vmatpush3.bf16.xpose.msra.mxu1 %v7930_v22  ;;  %v8127_v40 = vsel %vm7901_vm1, %v7890_v60, 0  ;;  %v7948_v54 = vsel %vm7901_vm1, %v7876_v32, 0 }
 0x5bd   : > { %12957 = vmatprep.subr.bf16.mxu0 %v13435_v61  ;;  %13031 = vmatprep.subr.msk.bf16.mxu1 %vm7901_vm1, %v7879_v9 }
 0x5bf   : > { %s18981_s6 = scalar_lea.hbm %s19354_s1, %s12657_s3 }
 0x5c0   : > { %12958 = vmatpush3.bf16.msra.mxu0 %v13435_v61 }
 0x5c1   : > { %12959 = vmatprep.subr.bf16.mxu0 %v13436_v13 }
 0x5c4   : > { %12960 = vmatpush3.bf16.msra.mxu0 %v13436_v13  ;;  %12682 = vmatpush3.bf16.xpose.msra.mxu1 %v7933_v25  ;;  %v7883_v13 = vld [vmem:[#allocation3 + $0x70] sm:$0xff] }
 0x5c5   : > { %12961 = vmatprep.subr.bf16.mxu0 %v13437_v31  ;;  %13032 = vmatprep.subr.msk.bf16.mxu1 %vm7901_vm1, %v7880_v53 }
 0x5c8   : > { %12962 = vmatpush3.bf16.msra.mxu0 %v13437_v31  ;;  %v7875_v31 = vld [vmem:[#allocation3 + $0x30] sm:$0xff] }
 0x5c9   : > { %12963 = vmatprep.subr.bf16.mxu0 %v13438_v36 }
 0x5cc   : > { %12964 = vmatpush3.bf16.msra.mxu0 %v13438_v36  ;;  %12684 = vmatpush3.bf16.xpose.msra.mxu1 %v7936_v7  ;;  %v7900_v7 = vld [vmem:[#allocation3 + $0xf8] sm:$0xff] }
 0x5cd   : > { %13037 = vmatprep.subr.msk.bf16.mxu0 %vm7901_vm1, %v7893_v30  ;;  %13033 = vmatprep.subr.msk.bf16.mxu1 %vm7901_vm1, %v7881_v41  ;;  %v7891_v30 = vld [vmem:[#allocation3 + $0xb0] sm:$0xff] }
 0x5ce   : > { %v8130_v2 = vsel %vm7901_vm1, %v7891_v30, 0 }
 0x5cf   : > { %12966 = vmatmul.mubr.bf16.vlgmr.msra.gmra.mrb[0].mxu0 %v5976_v17  ;;  %v7945_v17 = vsel %vm7901_vm1, %v7875_v31, 0 }
 0x5d0   : > { %12969 = vmatprep.mubr.bf16.mxu0 %v5977_v6 }
 0x5d4   : > { %12686 = vmatpush3.bf16.xpose.msra.mxu1 %v7939_v37  ;;  %v6257_v37 = vlaneseq }
 0x5d5   : > { %12710 = vmatpush3.bf16.xpose.msra.mxu0 %v8112_v38  ;;  %13034 = vmatprep.subr.msk.bf16.mxu1 %vm7901_vm1, %v7882_v51 }
 0x5d6   : > { %13038 = vmatprep.subr.msk.bf16.mxu0 %vm7901_vm1, %v7894_v16  ;;  %v16651_v51 = vshrl.u32 %v6257_v37, 7 }
 0x5d7   : > { %12970 = vmatmul.mubr.bf16.gmra.mrb[4].mxu0 %v5978_v52  ;;  %v7899_v52 = vld [vmem:[#allocation3 + $0xf0] sm:$0xff] }
 0x5d8   : > { %12973 = vmatprep.mubr.bf16.mxu0 %v5979_v63  ;;  %19236 = vst [vmem:[#allocation54_spill] sm:$0xff] %v16651_v51 }
 0x5dc   : > { %12688 = vmatpush3.bf16.xpose.msra.mxu1 %v7942_v3  ;;  %v19094_v3 = vmov 0  }
 0x5dd   : > { %12712 = vmatpush3.bf16.xpose.msra.mxu0 %v8115_v11  ;;  %13035 = vmatprep.subr.msk.bf16.mxu1 %vm7901_vm1, %v7883_v13 }
 0x5de   : > { %13039 = vmatprep.subr.msk.bf16.mxu0 %vm7901_vm1, %v7895_v26 }
 0x5df   : > { %12974 = vmatmul.mubr.bf16.gmra.mrb[8].mxu0 %v5980_v57 }
 0x5e0   : > { %12977 = vmatprep.mubr.bf16.mxu0 %v5981_v33 }
 0x5e4   : > { %12690 = vmatpush3.bf16.xpose.msra.mxu1 %v7945_v17 }
 0x5e5   : > { %12714 = vmatpush3.bf16.xpose.msra.mxu0 %v8118_v34 }
 0x5e6   : > { %13040 = vmatprep.subr.msk.bf16.mxu0 %vm7901_vm1, %v7896_v28  ;;  %v7884_v28 = vld [vmem:[#allocation3 + $0x78] sm:$0xff] }
 0x5e7   : > { %12978 = vmatmul.mubr.bf16.gmra.mrb[12].mxu0 %v5982_v0  ;;  %13036 = vmatprep.subr.msk.bf16.mxu1 %vm7901_vm1, %v7884_v28 }
 0x5ec   : > { %12692 = vmatpush3.bf16.xpose.msra.mxu1 %v7948_v54 }
 0x5ed   : > { %12716 = vmatpush3.bf16.xpose.msra.mxu0 %v8121_v12  ;;  %v7892_v12 = vld [vmem:[#allocation3 + $0xb8] sm:$0xff] }
 0x5ee   : > { %13041 = vmatprep.subr.msk.bf16.mxu0 %vm7901_vm1, %v7897_v5  ;;  %v8133_v41 = vsel %vm7901_vm1, %v7892_v12, 0 }
 0x5f5   : > { %12718 = vmatpush3.bf16.xpose.msra.mxu0 %v8124_v44  ;;  %v6256_v44 = vunpack.c.0.s8 %v6255_v55 }
 0x5f6   : > { %13042 = vmatprep.subr.msk.bf16.mxu0 %vm7901_vm1, %v7898_v47  ;;  %v16655_v47 = vpack.i.b16 %v19094_v3, %v19094_v3 }
 0x5fd   : > { %12720 = vmatpush3.bf16.xpose.msra.mxu0 %v8127_v40  ;;  %v14439_v40 = vmov 1934713408  }
 0x5fe   : > { %13043 = vmatprep.subr.msk.bf16.mxu0 %vm7901_vm1, %v7899_v52 }
 0x605   : > { %12722 = vmatpush3.bf16.xpose.msra.mxu0 %v8130_v2 }
 0x606   : > { %13044 = vmatprep.subr.msk.bf16.mxu0 %vm7901_vm1, %v7900_v7 }
 0x60d   : > { %12724 = vmatpush3.bf16.xpose.msra.mxu0 %v8133_v41 }
 0x6a2   : > { %v12967_v43 = vpop.f32.mrb[0].mxu0 }
 0x6a3   : > { %v6088_v8 = vpop.f32.mrb[1].mxu0  ;;  %v6097_v4 = vadd.f32 %v12967_v43, %v12489_v48 }
 0x6a4   : > { %v12968_v21 = vpop.f32.mrb[2].mxu0  ;;  %v6089_v46 = vadd.f32 %v12489_v48, %v6088_v8  ;;  %v16660_v8 = vsub.s32 %v6256_v44, %v16651_v51 }
 0x6a5   : > { %v6100_v50 = vadd.f32 %v12968_v21, %v12489_v48  ;;  %v6091_v59 = vpop.f32.mrb[3].mxu0  ;;  %v6270_v21 = vunpack.c.l.s4 %v14439_v40 }
 0x6a6   : > { %v6092_v15 = vadd.f32 %v12489_v48, %v6091_v59  ;;  %19237 = vst [vmem:[#allocation55_spill] sm:$0xff] %v16660_v8 }
 0x6a7   : > { %v16611_v39 = vpack.c.bf16 %v6100_v50, %v6097_v4 }
 0x6a8   : > { %v16613_v58 = vpack.c.bf16 %v6092_v15, %v6089_v46 }
 0x6a9   : > { %v6201_v59 = vshrl.u32 %v16611_v39, 16 }
 0x6aa   : > { %v12971_v23 = vpop.f32.mrb[4].mxu0  ;;  %6167 = vrot.lane.b32.xlu0 %v16613_v58, %s14436_s19  ;;  %v6187_v50 = vshrl.u32 %v16613_v58, 16 }
 0x6ab   : > { %v6113_v42 = vadd.f32 %v12971_v23, %v12489_v48  ;;  %v6104_v18 = vpop.f32.mrb[5].mxu0 }
 0x6ac   : > { %v6105_v20 = vadd.f32 %v12489_v48, %v6104_v18  ;;  %v12972_v45 = vpop.f32.mrb[6].mxu0 }
 0x6ad   : > { %v6116_v62 = vadd.f32 %v12972_v45, %v12489_v48  ;;  %v6107_v61 = vpop.f32.mrb[7].mxu0 }
 0x6ae   : > { %v6108_v36 = vadd.f32 %v12489_v48, %v6107_v61  ;;  %6169 = vrot.lane.b32.xlu0 %v16611_v39, %s14436_s19 }
 0x6af   : > { %v16621_v6 = vpack.c.bf16 %v6116_v62, %v6113_v42  ;;  %v6271_v42 = vunpack.c.0.s8 %v6270_v21 }
 0x6b0   : > { %v16623_v63 = vpack.c.bf16 %v6108_v36, %v6105_v20 }
 0x6b1   : > { %v6217_v31 = vshrl.u32 %v16621_v6, 16  ;;  %v16674_v36 = vsub.s32 %v6271_v42, %v16651_v51 }
 0x6b2   : > { %v12975_v57 = vpop.f32.mrb[8].mxu0  ;;  %6171 = vrot.lane.b32.xlu1 %v16623_v63, %s14436_s19 }
 0x6b3   : > { %v6129_v33 = vadd.f32 %v12975_v57, %v12489_v48  ;;  %v6120_v0 = vpop.f32.mrb[9].mxu0  ;;  %19238 = vst [vmem:[#allocation56_spill] sm:$0xff] %v16674_v36  ;;  %v6209_v57 = vshrl.u32 %v16623_v63, 16 }
 0x6b4   : > { %v6121_v19 = vadd.f32 %v12489_v48, %v6120_v0  ;;  %v12976_v49 = vpop.f32.mrb[10].mxu0 }
 0x6b5   : > { %v6132_v27 = vadd.f32 %v12976_v49, %v12489_v48  ;;  %v6123_v24 = vpop.f32.mrb[11].mxu0 }
 0x6b6   : > { %v6124_v38 = vadd.f32 %v12489_v48, %v6123_v24  ;;  %6173 = vrot.lane.b32.xlu1 %v16621_v6, %s14436_s19 }
 0x6b7   : > { %v16631_v16 = vpack.c.bf16 %v6132_v27, %v6129_v33 }
 0x6b8   : > { %v16633_v14 = vpack.c.bf16 %v6124_v38, %v6121_v19 }
 0x6b9   : > { %v6233_v49 = vshrl.u32 %v16631_v16, 16 }
 0x6ba   : > { %v12979_v1 = vpop.f32.mrb[12].mxu0  ;;  %6177 = vrot.lane.b32.xlu1 %v16631_v16, %s14436_s19  ;;  %6175 = vrot.lane.b32.xlu0 %v16633_v14, %s14436_s19  ;;  %v6225_v30 = vshrl.u32 %v16633_v14, 16 }
 0x6bb   : > { %v6145_v22 = vadd.f32 %v12979_v1, %v12489_v48  ;;  %v6136_v11 = vpop.f32.mrb[13].mxu0 }
 0x6bc   : > { %v6137_v9 = vadd.f32 %v12489_v48, %v6136_v11  ;;  %v12980_v26 = vpop.f32.mrb[14].mxu0 }
 0x6bd   : > { %v6148_v10 = vadd.f32 %v12980_v26, %v12489_v48  ;;  %v6139_v56 = vpop.f32.mrb[15].mxu0 }
 0x6be   : > { %v6140_v25 = vadd.f32 %v12489_v48, %v6139_v56 }
 0x6bf   : > { %v16639_v34 = vpack.c.bf16 %v6148_v10, %v6145_v22 }
 0x6c0   : > { %v16641_v53 = vpack.c.bf16 %v6140_v25, %v6137_v9 }
 0x6c1   : > { %6181 = vrot.lane.b32.xlu1 %v16639_v34, %s14436_s19 }
 0x6c2   : > { %6179 = vrot.lane.b32.xlu0 %v16641_v53, %s14436_s19 }
 0x71c   : > { %v6168_v5 = vpop.permute.xlu0 %6167 }
 0x71d   : > { %v6185_v43 = vpack.i.b16 %v6168_v5, %v16613_v58  ;;  %v6188_v48 = vshrl.u32 %v6168_v5, 16 }
 0x71f   : > { %v6253_v46 = vcombine.high %v6185_v43, %v16655_v47  ;;  %v6189_v15 = vpack.i.b16 %v6188_v48, %v6187_v50  ;;  %v6260_v18 = vrot.slane %v6185_v43, %v16660_v8 }
 0x720   : > { %v6170_v35 = vpop.permute.xlu0 %6169 }
 0x721   : > { %v6199_v60 = vpack.i.b16 %v6170_v35, %v16611_v39  ;;  %v6202_v4 = vshrl.u32 %v6170_v35, 16  ;;  %v6267_v61 = vrot.slane %v6253_v46, %v16660_v8  ;;  %v6302_v13 = vcombine.high %v6189_v15, %v16655_v47 }
 0x722   : > { %v6268_v17 = vcombine.high %v6260_v18, %v19094_v3  ;;  %v6309_v24 = vrot.slane %v6189_v15, %v16660_v8  ;;  %v16691_v11 = vrot.slane %v6260_v18, %v16674_v36 }
 0x723   : > { %v6351_v23 = vcombine.high %v6199_v60, %v16655_v47  ;;  %v6203_v20 = vpack.i.b16 %v6202_v4, %v6201_v59  ;;  %v6358_v62 = vrot.slane %v6199_v60, %v16660_v8  ;;  %v6283_v27 = vcombine.high %v6267_v61, %v19094_v3 }
 0x724   : > { %v6172_v45 = vpop.permute.xlu1 %6171  ;;  %v6316_v38 = vrot.slane %v6302_v13, %v16660_v8  ;;  %v16694_v9 = vrot.slane %v6268_v17, %v16674_v36  ;;  %v16698_v10 = vrot.slane %v6267_v61, %v16674_v36  ;;  %v6317_v54 = vcombine.high %v6309_v24, %v19094_v3 }
 0x725   : > { %v6365_v58 = vrot.slane %v6351_v23, %v16660_v8  ;;  %v6207_v39 = vpack.i.b16 %v6172_v45, %v16623_v63  ;;  %v6407_v52 = vrot.slane %v6203_v20, %v16660_v8  ;;  %v6366_v33 = vcombine.high %v6358_v62, %v19094_v3 }
 0x726   : > { %v6400_v0 = vcombine.high %v6203_v20, %v16655_v47  ;;  %v6210_v19 = vshrl.u32 %v6172_v45, 16  ;;  %v16703_v32 = vrot.slane %v6283_v27, %v16674_v36  ;;  %v16707_v7 = vrot.slane %v6309_v24, %v16674_v36 }
 0x727   : > { %v6381_v1 = vcombine.high %v6365_v58, %v19094_v3  ;;  %v6449_v63 = vcombine.high %v6207_v39, %v16655_v47  ;;  %v6415_v26 = vcombine.high %v6407_v52, %v19094_v3  ;;  %v6380_v56 = vrot.slane %v6366_v33, %v16674_v36 }
 0x728   : > { %v6414_v25 = vrot.slane %v6400_v0, %v16660_v8  ;;  %v6211_v28 = vpack.i.b16 %v6210_v19, %v6209_v57  ;;  %v6456_v12 = vrot.slane %v6207_v39, %v16660_v8  ;;  %v16711_v41 = vcombine.high %v6316_v38, %v19094_v3  ;;  %v6174_v37 = vpop.permute.xlu1 %6173 }
 0x729   : > { %v6373_v5 = vrot.slane %v6358_v62, %v16674_v36  ;;  %v6395_v29 = vrot.slane %v6381_v1, %v16674_v36  ;;  %v6463_v55 = vrot.slane %v6449_v63, %v16660_v8  ;;  %v16717_v44 = vrot.slane %v6316_v38, %v16674_v36 }
 0x72a   : > { %v6388_v43 = vrot.slane %v6365_v58, %v16674_v36  ;;  %v6429_v48 = vrot.slane %v6415_v26, %v16674_v36  ;;  %v6422_v60 = vrot.slane %v6407_v52, %v16674_v36  ;;  %v6430_v40 = vcombine.high %v6414_v25, %v19094_v3 }
 0x72b   : > { %v7135_v21 = vcombine.low %v6373_v5, %v6380_v56  ;;  %v6498_v4 = vcombine.high %v6211_v28, %v16655_v47  ;;  %v12502_v50 = vcombine.high %v6373_v5, %v6380_v56  ;;  %v6464_v59 = vcombine.high %v6456_v12, %v19094_v3 }
 0x72c   : > { %v6505_v46 = vrot.slane %v6211_v28, %v16660_v8  ;;  %v6215_v15 = vpack.i.b16 %v6174_v37, %v16621_v6  ;;  %v7151_v23 = vcombine.low %v6388_v43, %v6395_v29  ;;  %v12503_v42 = vcombine.high %v6388_v43, %v6395_v29  ;;  %v6178_v57 = vpop.permute.xlu1 %6177 }
 0x72d   : > { %v6479_v18 = vcombine.high %v6463_v55, %v19094_v3  ;;  %v6218_v20 = vshrl.u32 %v6174_v37, 16  ;;  %v16731_v45 = vrot.slane %v6317_v54, %v16674_v36  ;;  %v7184_v61 = vcombine.low %v6422_v60, %v6429_v48 }
 0x72e   : > { %v12504_v13 = vcombine.high %v6422_v60, %v6429_v48  ;;  %v16736_v58 = vrot.slane %v6414_v25, %v16674_v36  ;;  %v16739_v39 = vrot.slane %v6430_v40, %v16674_v36  ;;  %v16742_v17 = vrot.slane %v7135_v21, %v16660_v8 }
 0x72f   : > { %v6512_v52 = vrot.slane %v6498_v4, %v16660_v8  ;;  %v16746_v33 = vrot.slane %v12502_v50, %v16660_v8  ;;  %v6478_v0 = vrot.slane %v6464_v59, %v16674_v36  ;;  %v6513_v19 = vcombine.high %v6505_v46, %v19094_v3 }
 0x730   : > { %v6547_v27 = vcombine.high %v6215_v15, %v16655_v47  ;;  %v16752_v24 = vrot.slane %v7151_v23, %v16660_v8  ;;  %v16755_v38 = vrot.slane %v12503_v42, %v16660_v8  ;;  %v6493_v1 = vrot.slane %v6479_v18, %v16674_v36 }
 0x731   : > { %v6219_v63 = vpack.i.b16 %v6218_v20, %v6217_v31  ;;  %v16761_v26 = vrot.slane %v7184_v61, %v16660_v8  ;;  %v16764_v56 = vrot.slane %v12504_v13, %v16660_v8  ;;  %v6471_v25 = vrot.slane %v6456_v12, %v16674_v36  ;;  %v6176_v20 = vpop.permute.xlu0 %6175 }
 0x732   : > { %v6231_v28 = vpack.i.b16 %v6178_v57, %v16631_v16  ;;  %v6486_v54 = vrot.slane %v6463_v55, %v16674_v36  ;;  %v6528_v5 = vcombine.high %v6512_v52, %v19094_v3  ;;  %v6554_v29 = vrot.slane %v6215_v15, %v16660_v8 }
 0x733   : > { %v6234_v37 = vshrl.u32 %v6178_v57, 16  ;;  %v6527_v31 = vrot.slane %v6513_v19, %v16674_v36  ;;  %v7233_v43 = vcombine.low %v6471_v25, %v6478_v0  ;;  %v6561_v48 = vrot.slane %v6547_v27, %v16660_v8 }
 0x734   : > { %v12506_v60 = vcombine.high %v6471_v25, %v6478_v0  ;;  %v7249_v40 = vcombine.low %v6486_v54, %v6493_v1  ;;  %v6596_v12 = vcombine.high %v6219_v63, %v16655_v47  ;;  %v6603_v21 = vrot.slane %v6219_v63, %v16660_v8 }
 0x735   : > { %v6520_v4 = vrot.slane %v6505_v46, %v16674_v36  ;;  %v12507_v50 = vcombine.high %v6486_v54, %v6493_v1  ;;  %v6743_v59 = vcombine.high %v6231_v28, %v16655_v47  ;;  %v16782_v15 = vrot.slane %v6512_v52, %v16674_v36 }
 0x736   : > { %v16785_v23 = vrot.slane %v6528_v5, %v16674_v36  ;;  %v6562_v42 = vcombine.high %v6554_v29, %v19094_v3  ;;  %v6235_v18 = vpack.i.b16 %v6234_v37, %v6233_v49  ;;  %v16791_v61 = vrot.slane %v7233_v43, %v16660_v8 }
 0x737   : > { %v7282_v13 = vcombine.low %v6520_v4, %v6527_v31  ;;  %v12508_v46 = vcombine.high %v6520_v4, %v6527_v31  ;;  %v6577_v57 = vcombine.high %v6561_v48, %v19094_v3  ;;  %v16795_v0 = vrot.slane %v12506_v60, %v16660_v8 }
 0x738   : > { %v16798_v52 = vrot.slane %v7249_v40, %v16660_v8  ;;  %v6610_v19 = vrot.slane %v6596_v12, %v16660_v8  ;;  %v6611_v27 = vcombine.high %v6603_v21, %v19094_v3  ;;  %v16803_v16 = vrot.slane %v12507_v50, %v16660_v8 }
 0x739   : > { %v6750_v49 = vrot.slane %v6231_v28, %v16660_v8  ;;  %v6757_v1 = vrot.slane %v6743_v59, %v16660_v8  ;;  %v6223_v63 = vpack.i.b16 %v6176_v20, %v16633_v14  ;;  %v6576_v5 = vrot.slane %v6562_v42, %v16674_v36 }
 0x73a   : > { %v6792_v37 = vcombine.high %v6235_v18, %v16655_v47  ;;  %v16815_v31 = vrot.slane %v7282_v13, %v16660_v8  ;;  %v16818_v43 = vrot.slane %v12508_v46, %v16660_v8  ;;  %v6591_v28 = vrot.slane %v6577_v57, %v16674_v36 }
 0x73b   : > { %v6799_v60 = vrot.slane %v6235_v18, %v16660_v8  ;;  %v6569_v40 = vrot.slane %v6554_v29, %v16674_v36  ;;  %v6625_v12 = vrot.slane %v6611_v27, %v16674_v36  ;;  %v6626_v4 = vcombine.high %v6610_v19, %v19094_v3 }
 0x73c   : > { %v6226_v50 = vshrl.u32 %v6176_v20, 16  ;;  %v6584_v59 = vrot.slane %v6561_v48, %v16674_v36  ;;  %v6758_v42 = vcombine.high %v6750_v49, %v19094_v3  ;;  %v6773_v13 = vcombine.high %v6757_v1, %v19094_v3 }
 0x73d   : > { %v6645_v46 = vcombine.high %v6223_v63, %v16655_v47  ;;  %v6618_v22 = vrot.slane %v6603_v21, %v16674_v36  ;;  %v7331_v57 = vcombine.low %v6569_v40, %v6576_v5  ;;  %v12510_v54 = vcombine.high %v6569_v40, %v6576_v5 }
 0x73e   : > { %v6806_v18 = vrot.slane %v6792_v37, %v16660_v8  ;;  %v16832_v29 = vrot.slane %v6610_v19, %v16674_v36  ;;  %v7347_v27 = vcombine.low %v6584_v59, %v6591_v28  ;;  %v12511_v25 = vcombine.high %v6584_v59, %v6591_v28 }
 0x73f   : > { %v6807_v20 = vcombine.high %v6799_v60, %v19094_v3  ;;  %v16836_v48 = vrot.slane %v6626_v4, %v16674_v36  ;;  %v7380_v55 = vcombine.low %v6618_v22, %v6625_v12  ;;  %v6227_v6 = vpack.i.b16 %v6226_v50, %v6225_v30 }
 0x740   : > { %v6652_v21 = vrot.slane %v6223_v63, %v16660_v8  ;;  %v12512_v2 = vcombine.high %v6618_v22, %v6625_v12  ;;  %v6772_v5 = vrot.slane %v6758_v42, %v16674_v36  ;;  %v6787_v37 = vrot.slane %v6773_v13, %v16674_v36  ;;  %v6182_v42 = vpop.permute.xlu1 %6181 }
 0x741   : > { %v6659_v19 = vrot.slane %v6645_v46, %v16660_v8  ;;  %v16845_v28 = vrot.slane %v7331_v57, %v16660_v8  ;;  %v16848_v40 = vrot.slane %v12510_v54, %v16660_v8  ;;  %v6765_v4 = vrot.slane %v6750_v49, %v16674_v36 }
 0x742   : > { %v6822_v14 = vcombine.high %v6806_v18, %v19094_v3  ;;  %v16853_v30 = vrot.slane %v7347_v27, %v16660_v8  ;;  %v16856_v22 = vrot.slane %v12511_v25, %v16660_v8  ;;  %v6780_v63 = vrot.slane %v6757_v1, %v16674_v36 }
 0x743   : > { %v6821_v12 = vrot.slane %v6807_v20, %v16674_v36  ;;  %v16861_v50 = vrot.slane %v7380_v55, %v16660_v8  ;;  %v6814_v54 = vrot.slane %v6799_v60, %v16674_v36  ;;  %v6660_v59 = vcombine.high %v6652_v21, %v19094_v3 }
 0x744   : > { %v6694_v49 = vcombine.high %v6227_v6, %v16655_v47  ;;  %v7527_v13 = vcombine.low %v6765_v4, %v6772_v5  ;;  %v12518_v46 = vcombine.high %v6765_v4, %v6772_v5  ;;  %v7543_v57 = vcombine.low %v6780_v63, %v6787_v37 }
 0x745   : > { %v6675_v25 = vcombine.high %v6659_v19, %v19094_v3  ;;  %v16868_v27 = vrot.slane %v12512_v2, %v16660_v8  ;;  %v16873_v55 = vrot.slane %v6822_v14, %v16674_v36  ;;  %v12519_v60 = vcombine.high %v6780_v63, %v6787_v37 }
 0x746   : > { %v7576_v62 = vcombine.low %v6814_v54, %v6821_v12  ;;  %v12520_v35 = vcombine.high %v6814_v54, %v6821_v12  ;;  %v6247_v5 = vpack.i.b16 %v6182_v42, %v16639_v34  ;;  %v16879_v4 = vrot.slane %v6806_v18, %v16674_v36 }
 0x747   : > { %v6674_v2 = vrot.slane %v6660_v59, %v16674_v36  ;;  %v6701_v3 = vrot.slane %v6227_v6, %v16660_v8  ;;  %v6708_v1 = vrot.slane %v6694_v49, %v16660_v8  ;;  %v16885_v14 = vrot.slane %v7527_v13, %v16660_v8 }
 0x748   : > { %v16888_v37 = vrot.slane %v12518_v46, %v16660_v8  ;;  %v16891_v63 = vrot.slane %v7543_v57, %v16660_v8  ;;  %v6689_v12 = vrot.slane %v6675_v25, %v16674_v36  ;;  %v16895_v18 = vrot.slane %v12519_v60, %v16660_v8 }
 0x749   : > { %19239 = vst [vmem:[#allocation57_spill] sm:$0xff] %v16885_v14  ;;  %v6667_v59 = vrot.slane %v6652_v21, %v16674_v36  ;;  %v16903_v49 = vrot.slane %v7576_v62, %v16660_v8  ;;  %v16906_v13 = vrot.slane %v12520_v35, %v16660_v8  ;;  %v6682_v46 = vrot.slane %v6659_v19, %v16674_v36 }
 0x74a   : > { %19240 = vst [vmem:[#allocation58_spill] sm:$0xff] %v16888_v37  ;;  %v6250_v57 = vshrl.u32 %v6182_v42, 16  ;;  %v19242_v25 = vmov 0   ;;  %v6939_v6 = vcombine.high %v6247_v5, %v16655_v47  ;;  %v16913_v21 = vrot.slane %v6247_v5, %v16660_v8 }
 0x74b   : > { %19241 = vst [vmem:[#allocation59_spill] sm:$0xff] %v16903_v49  ;;  %v6709_v60 = vcombine.high %v6701_v3, %v19242_v25  ;;  %v6724_v20 = vcombine.high %v6708_v1, %v19242_v25  ;;  %v7429_v51 = vcombine.low %v6667_v59, %v6674_v2  ;;  %v12514_v54 = vcombine.high %v6667_v59, %v6674_v2 }
 0x74c   : > { %v7445_v14 = vcombine.low %v6682_v46, %v6689_v12  ;;  %v12515_v37 = vcombine.high %v6682_v46, %v6689_v12  ;;  %v19243_v35 = vcombine.low %v16691_v11, %v16694_v9  ;;  %v19244_v19 = vcombine.high %v16691_v11, %v16694_v9 }
 0x74d   : > { %v7053_v2 = vcombine.low %v16698_v10, %v16703_v32  ;;  %v12499_v12 = vcombine.high %v16698_v10, %v16703_v32  ;;  %v16928_v59 = vrot.slane %v6701_v3, %v16674_v36  ;;  %v16931_v5 = vrot.slane %v6708_v1, %v16674_v36 }
 0x74e   : > { %v7044_v62 = vrot.slane %v19243_v35, %v16660_v8  ;;  %v7052_v42 = vrot.slane %v19244_v19, %v16660_v8  ;;  %v19245_v46 = vshrl.u32 %v16639_v34, 16  ;;  %v6346_v11 = vrot.slane %v16711_v41, %v16674_v36 }
 0x74f   : > { %v16940_v9 = vrot.slane %v6709_v60, %v16674_v36  ;;  %v16943_v19 = vrot.slane %v6724_v20, %v16674_v36  ;;  %v16946_v10 = vrot.slane %v7429_v51, %v16660_v8  ;;  %v16949_v3 = vrot.slane %v12514_v54, %v16660_v8 }
 0x750   : > { %v16935_v35 = vpack.i.b16 %v6250_v57, %v19245_v46  ;;  %v16952_v32 = vrot.slane %v6939_v6, %v16660_v8  ;;  %v16956_v34 = vcombine.high %v16913_v21, %v19242_v25  ;;  %v7060_v41 = vrot.slane %v7053_v2, %v16660_v8 }
 0x751   : > { %v7068_v1 = vrot.slane %v12499_v12, %v16660_v8  ;;  %v16961_v20 = vrot.slane %v7445_v14, %v16660_v8  ;;  %v16964_v51 = vrot.slane %v12515_v37, %v16660_v8  ;;  %v7069_v57 = vcombine.low %v7044_v62, %v7052_v42  ;;  %v6180_v42 = vpop.permute.xlu0 %6179 }
 0x752   : > { %v7086_v54 = vcombine.low %v16707_v7, %v16731_v45  ;;  %v12500_v60 = vcombine.high %v16707_v7, %v16731_v45  ;;  %v7102_v46 = vcombine.low %v16717_v44, %v6346_v11  ;;  %v12501_v2 = vcombine.high %v16717_v44, %v6346_v11 }
 0x753   : > { %v7077_v6 = vcombine.low %v7060_v41, %v7068_v1  ;;  %v7478_v12 = vcombine.low %v16928_v59, %v16940_v9  ;;  %v7167_v37 = vcombine.low %v16742_v17, %v16746_v33  ;;  %v7175_v62 = vcombine.low %v16752_v24, %v16755_v38 }
 0x754   : > { %v7093_v14 = vrot.slane %v7086_v54, %v16660_v8  ;;  %v7101_v7 = vrot.slane %v12500_v60, %v16660_v8  ;;  %v7109_v45 = vrot.slane %v7102_v46, %v16660_v8  ;;  %v7117_v44 = vrot.slane %v12501_v2, %v16660_v8 }
 0x755   : > { %v7084_v41 = vrot.slane %v7077_v6, %v16674_v36  ;;  %v12516_v11 = vcombine.high %v16928_v59, %v16940_v9  ;;  %v7182_v1 = vrot.slane %v7175_v62, %v16674_v36  ;;  %v19246_v17 = vcombine.low %v16736_v58, %v16739_v39 }
 0x756   : > { %v19247_v24 = vcombine.high %v16736_v58, %v16739_v39  ;;  %v7076_v54 = vrot.slane %v7069_v57, %v16674_v36  ;;  %v7118_v6 = vcombine.low %v7093_v14, %v7101_v7  ;;  %v7126_v60 = vcombine.low %v7109_v45, %v7117_v44 }
 0x757   : > { %v7207_v33 = vrot.slane %v19246_v17, %v16660_v8  ;;  %v7216_v46 = vcombine.low %v16761_v26, %v16764_v56  ;;  %v7494_v59 = vcombine.low %v16931_v5, %v16943_v19  ;;  %v6242_v9 = vshrl.u32 %v6180_v42, 16 }
 0x758   : > { %v7215_v38 = vrot.slane %v19247_v24, %v16660_v8  ;;  %v7174_v2 = vrot.slane %v7167_v37, %v16674_v36  ;;  %v12517_v17 = vcombine.high %v16931_v5, %v16943_v19  ;;  %v7085_v49 = vcombine.low %v7076_v54, %v7084_v41 }
 0x759   : > { %v7125_v58 = vrot.slane %v7118_v6, %v16674_v36  ;;  %v7133_v39 = vrot.slane %v7126_v60, %v16674_v36  ;;  %v7223_v14 = vrot.slane %v7216_v46, %v16674_v36  ;;  %v7273_v56 = vcombine.low %v16798_v52, %v16803_v16 }
 0x75a   : > { %v7224_v62 = vcombine.low %v7207_v33, %v7215_v38  ;;  %v7183_v57 = vcombine.low %v7174_v2, %v7182_v1  ;;  %v19248_v37 = vcombine.low %v16782_v15, %v16785_v23  ;;  %v19249_v5 = vcombine.high %v16782_v15, %v16785_v23 }
 0x75b   : > { %v7134_v7 = vcombine.low %v7125_v58, %v7133_v39  ;;  %v7314_v41 = vcombine.low %v16815_v31, %v16818_v43  ;;  %v6239_v44 = vpack.i.b16 %v6180_v42, %v16641_v53  ;;  %v19250_v1 = vshrl.u32 %v16641_v53, 16 }
 0x75c   : > { %v7231_v26 = vrot.slane %v7224_v62, %v16674_v36  ;;  %v7305_v45 = vrot.slane %v19248_v37, %v16660_v8  ;;  %v7313_v19 = vrot.slane %v19249_v5, %v16660_v8  ;;  %v7265_v16 = vcombine.low %v16791_v61, %v16795_v0 }
 0x75d   : > { %v6243_v33 = vpack.i.b16 %v6242_v9, %v19250_v1  ;;  %v7823_v24 = vpack.i.b16 %v7134_v7, %v7085_v49  ;;  %v7824_v38 = vshrl.u32 %v7085_v49, 16  ;;  %v7825_v54 = vshrl.u32 %v7134_v7, 16 }
 0x75e   : > { %v7232_v52 = vcombine.low %v7223_v14, %v7231_v26  ;;  %v7322_v6 = vcombine.low %v7305_v45, %v7313_v19  ;;  %v7830_v46 = vshrl.u32 %v7183_v57, 16  ;;  %v7280_v23 = vrot.slane %v7273_v56, %v16674_v36 }
 0x75f   : > { %12693 = vmatprep.mubr.msk.bf16.mxu1 %vm7901_vm1, %v7823_v24  ;;  %v7826_v31 = vpack.i.b16 %v7825_v54, %v7824_v38  ;;  %v7321_v43 = vrot.slane %v7314_v41, %v16674_v36  ;;  %v19251_v61 = vcombine.low %v16832_v29, %v16836_v48  ;;  %v17033_v49 = vrot.slane %v16913_v21, %v16674_v36 }
 0x760   : > { %v7829_v60 = vpack.i.b16 %v7232_v52, %v7183_v57  ;;  %v7831_v15 = vshrl.u32 %v7232_v52, 16  ;;  %v7329_v53 = vrot.slane %v7322_v6, %v16674_v36  ;;  %v6890_v42 = vcombine.high %v6243_v33, %v16655_v47  ;;  %12694 = vmatmul.mubr.msk.bf16.vlgmr.msra.gmra.mrb[0].mxu1 %vm7901_vm1, %v7823_v24 }
 0x761   : > { %v7403_v0 = vrot.slane %v19251_v61, %v16660_v8  ;;  %v19252_v2 = vcombine.high %v16832_v29, %v16836_v48  ;;  %v17043_v58 = vrot.slane %v16956_v34, %v16674_v36  ;;  %12725 = vmatprep.mubr.msk.bf16.mxu0 %vm7901_vm1, %v7826_v31  ;;  %v7272_v21 = vrot.slane %v7265_v16, %v16674_v36 }
 0x762   : > { %v7832_v9 = vpack.i.b16 %v7831_v15, %v7830_v46  ;;  %12695 = vmatprep.mubr.msk.bf16.mxu1 %vm7901_vm1, %v7829_v60  ;;  %v7330_v39 = vcombine.low %v7321_v43, %v7329_v53  ;;  %v7485_v57 = vrot.slane %v7478_v12, %v16660_v8  ;;  %v6995_v14 = vrot.slane %v16935_v35, %v16660_v8 }
 0x763   : > { %v7411_v62 = vrot.slane %v19252_v2, %v16660_v8  ;;  %v6841_v26 = vcombine.high %v6239_v44, %v16655_v47  ;;  %12726 = vmatmul.mubr.msk.bf16.vlgmr.msra.gmra.mrb[16].mxu0 %vm7901_vm1, %v7826_v31  ;;  %v7493_v48 = vrot.slane %v12516_v11, %v16660_v8  ;;  %v7281_v34 = vcombine.low %v7272_v21, %v7280_v23 }
 0x764   : > { %12727 = vmatprep.mubr.msk.bf16.mxu0 %vm7901_vm1, %v7832_v9  ;;  %v7371_v56 = vcombine.low %v16853_v30, %v16856_v22  ;;  %v7412_v7 = vcombine.low %v16861_v50, %v16868_v27  ;;  %v6969_v12 = vcombine.high %v16952_v32, %v19242_v25  ;;  %v6988_v37 = vcombine.high %v16935_v35, %v16655_v47 }
 0x765   : > { %v7420_v29 = vcombine.low %v7403_v0, %v7411_v62  ;;  %v6904_v45 = vrot.slane %v6890_v42, %v16660_v8  ;;  %v7363_v11 = vcombine.low %v16845_v28, %v16848_v40  ;;  %v7837_v5 = vshrl.u32 %v7330_v39, 16 }
 0x766   : > { %v7501_v41 = vrot.slane %v7494_v59, %v16660_v8  ;;  %v7509_v30 = vrot.slane %v12517_v17, %v16660_v8  ;;  %v7003_v22 = vcombine.high %v6995_v14, %v19242_v25  ;;  %v6848_v50 = vrot.slane %v6239_v44, %v16660_v8 }
 0x767   : > { %v7427_v19 = vrot.slane %v7420_v29, %v16674_v36  ;;  %v6855_v27 = vrot.slane %v6841_v26, %v16660_v8  ;;  %v6897_v47 = vrot.slane %v6243_v33, %v16660_v8  ;;  %v7835_v35 = vpack.i.b16 %v7330_v39, %v7281_v34 }
 0x768   : > { %v7836_v1 = vshrl.u32 %v7281_v34, 16  ;;  %v7378_v52 = vrot.slane %v7371_v56, %v16674_v36  ;;  %v7419_v28 = vrot.slane %v7412_v7, %v16674_v36  ;;  %v17077_v40 = vrot.slane %v16952_v32, %v16674_v36  ;;  %12696 = vmatmul.mubr.msk.bf16.gmra.mrb[4].mxu1 %vm7901_vm1, %v7829_v60 }
 0x769   : > { %v17080_v59 = vrot.slane %v6969_v12, %v16674_v36  ;;  %v7002_v17 = vrot.slane %v6988_v37, %v16660_v8  ;;  %v6920_v44 = vcombine.high %v6904_v45, %v19242_v25  ;;  %12697 = vmatprep.mubr.msk.bf16.mxu1 %vm7901_vm1, %v7835_v35  ;;  %v7370_v16 = vrot.slane %v7363_v11, %v16674_v36 }
 0x76a   : > { %v7838_v33 = vpack.i.b16 %v7837_v5, %v7836_v1  ;;  %v7428_v24 = vcombine.low %v7419_v28, %v7427_v19  ;;  %v7518_v38 = vcombine.low %v7501_v41, %v7509_v30  ;;  %v17088_v54 = vrot.slane %v6995_v14, %v16674_v36  ;;  %v19257_v28 = vld [vmem:[#allocation57_spill] sm:$0xff] }
 0x76b   : > { %v6856_v32 = vcombine.high %v6848_v50, %v19242_v25  ;;  %v6871_v6 = vcombine.high %v6855_v27, %v19242_v25  ;;  %v6905_v46 = vcombine.high %v6897_v47, %v19242_v25  ;;  %12728 = vmatmul.mubr.msk.bf16.gmra.mrb[20].mxu0 %vm7901_vm1, %v7832_v9  ;;  %v17095_v60 = vrot.slane %v7003_v22, %v16674_v36 }
 0x76c   : > { %12729 = vmatprep.mubr.msk.bf16.mxu0 %vm7901_vm1, %v7838_v33  ;;  %v7379_v15 = vcombine.low %v7370_v16, %v7378_v52  ;;  %v7469_v23 = vcombine.low %v16961_v20, %v16964_v51  ;;  %v7510_v31 = vcombine.low %v7485_v57, %v7493_v48  ;;  %v7018_v43 = vcombine.high %v7002_v17, %v19242_v25  ;;  %v19256_v52 = vld [vmem:[#allocation58_spill] sm:$0xff] }
 0x76d   : > { %v6863_v53 = vrot.slane %v6848_v50, %v16674_v36  ;;  %v6934_v61 = vrot.slane %v6920_v44, %v16674_v36  ;;  %v7461_v0 = vcombine.low %v16946_v10, %v16949_v3  ;;  %v7843_v42 = vshrl.u32 %v7428_v24, 16  ;;  %v19255_v50 = vld [vmem:[#allocation59_spill] sm:$0xff] }
 0x76e   : > { %v7525_v9 = vrot.slane %v7518_v38, %v16674_v36  ;;  %v19253_v2 = vcombine.low %v16879_v4, %v16873_v55  ;;  %v19254_v20 = vcombine.high %v16879_v4, %v16873_v55  ;;  %v6870_v21 = vrot.slane %v6856_v32, %v16674_v36 }
 0x76f   : > { %v6885_v39 = vrot.slane %v6871_v6, %v16674_v36  ;;  %v6919_v57 = vrot.slane %v6905_v46, %v16674_v36  ;;  %v6927_v10 = vrot.slane %v6904_v45, %v16674_v36  ;;  %v7841_v3 = vpack.i.b16 %v7428_v24, %v7379_v15 }
 0x770   : > { %v7599_v62 = vrot.slane %v19253_v2, %v16660_v8  ;;  %v7607_v51 = vrot.slane %v19254_v20, %v16660_v8  ;;  %v7842_v14 = vshrl.u32 %v7379_v15, 16  ;;  %v7476_v26 = vrot.slane %v7469_v23, %v16674_v36  ;;  %12698 = vmatmul.mubr.msk.bf16.gmra.mrb[8].mxu1 %vm7901_vm1, %v7835_v35 }
 0x771   : > { %v7517_v29 = vrot.slane %v7510_v31, %v16674_v36  ;;  %v6878_v48 = vrot.slane %v6855_v27, %v16674_v36  ;;  %v6912_v34 = vrot.slane %v6897_v47, %v16674_v36  ;;  %v7690_v55 = vcombine.low %v6927_v10, %v6934_v61  ;;  %12699 = vmatprep.mubr.msk.bf16.mxu1 %vm7901_vm1, %v7841_v3 }
 0x772   : > { %v12525_v4 = vcombine.high %v6927_v10, %v6934_v61  ;;  %v7844_v56 = vpack.i.b16 %v7843_v42, %v7842_v14  ;;  %v7468_v7 = vrot.slane %v7461_v0, %v16674_v36  ;;  %v7616_v37 = vcombine.low %v7599_v62, %v7607_v51 }
 0x773   : > { %v7526_v12 = vcombine.low %v7517_v29, %v7525_v9  ;;  %v7641_v45 = vcombine.low %v6878_v48, %v6885_v39  ;;  %v12523_v11 = vcombine.high %v6878_v48, %v6885_v39  ;;  %v7674_v5 = vcombine.low %v6912_v34, %v6919_v57  ;;  %12730 = vmatmul.mubr.msk.bf16.gmra.mrb[24].mxu0 %vm7901_vm1, %v7838_v33 }
 0x774   : > { %v12524_v19 = vcombine.high %v6912_v34, %v6919_v57  ;;  %v7025_v41 = vrot.slane %v7002_v17, %v16674_v36  ;;  %12731 = vmatprep.mubr.msk.bf16.mxu0 %vm7901_vm1, %v7844_v56  ;;  %v7477_v30 = vcombine.low %v7468_v7, %v7476_v26  ;;  %v7567_v22 = vcombine.low %v16891_v63, %v16895_v18 }
 0x775   : > { %v7608_v27 = vcombine.low %v19255_v50, %v16906_v13  ;;  %v7032_v47 = vrot.slane %v7018_v43, %v16674_v36  ;;  %v7625_v35 = vcombine.low %v6863_v53, %v6870_v21  ;;  %v12522_v1 = vcombine.high %v6863_v53, %v6870_v21 }
 0x776   : > { %v7559_v44 = vcombine.low %v19257_v28, %v19256_v52  ;;  %v7849_v16 = vshrl.u32 %v7526_v12, 16  ;;  %v7623_v33 = vrot.slane %v7616_v37, %v16674_v36  ;;  %v7697_v17 = vrot.slane %v7690_v55, %v16660_v8 }
 0x777   : > { %v7705_v24 = vrot.slane %v12525_v4, %v16660_v8  ;;  %v7648_v38 = vrot.slane %v7641_v45, %v16660_v8  ;;  %v7656_v63 = vrot.slane %v12523_v11, %v16660_v8  ;;  %v7681_v18 = vrot.slane %v7674_v5, %v16660_v8 }
 0x778   : > { %v7689_v13 = vrot.slane %v12524_v19, %v16660_v8  ;;  %v7847_v32 = vpack.i.b16 %v7526_v12, %v7477_v30  ;;  %v7848_v6 = vshrl.u32 %v7477_v30, 16  ;;  %v7574_v46 = vrot.slane %v7567_v22, %v16674_v36  ;;  %12700 = vmatmul.mubr.msk.bf16.gmra.mrb[12].mxu1 %vm7901_vm1, %v7841_v3 }
 0x779   : > { %v7615_v15 = vrot.slane %v7608_v27, %v16674_v36  ;;  %v7788_v23 = vcombine.low %v7025_v41, %v7032_v47  ;;  %v12529_v31 = vcombine.high %v7025_v41, %v7032_v47  ;;  %v7632_v43 = vrot.slane %v7625_v35, %v16660_v8 }
 0x77a   : > { %v7640_v53 = vrot.slane %v12522_v1, %v16660_v8  ;;  %12701 = vmatprep.mubr.msk.bf16.mxu1 %vm7901_vm1, %v7847_v32  ;;  %v7850_v61 = vpack.i.b16 %v7849_v16, %v7848_v6  ;;  %v7566_v0 = vrot.slane %v7559_v44, %v16674_v36  ;;  %v7714_v9 = vcombine.low %v7697_v17, %v7705_v24 }
 0x77b   : > { %v7624_v42 = vcombine.low %v7615_v15, %v7623_v33  ;;  %v7739_v2 = vcombine.low %v17077_v40, %v17080_v59  ;;  %v12527_v62 = vcombine.high %v17077_v40, %v17080_v59  ;;  %v7772_v20 = vcombine.low %v17088_v54, %v17095_v60  ;;  %12732 = vmatmul.mubr.msk.bf16.gmra.mrb[28].mxu0 %vm7901_vm1, %v7844_v56 }
 0x77c   : > { %v12528_v51 = vcombine.high %v17088_v54, %v17095_v60  ;;  %12733 = vmatprep.mubr.msk.bf16.mxu0 %vm7901_vm1, %v7850_v61  ;;  %v7575_v21 = vcombine.low %v7566_v0, %v7574_v46  ;;  %v7665_v39 = vcombine.low %v7648_v38, %v7656_v63  ;;  %v7706_v57 = vcombine.low %v7681_v18, %v7689_v13 }
 0x77d   : > { %v7723_v10 = vcombine.low %v17033_v49, %v17043_v58  ;;  %v12526_v3 = vcombine.high %v17033_v49, %v17043_v58  ;;  %v7657_v40 = vcombine.low %v7632_v43, %v7640_v53  ;;  %v7855_v59 = vshrl.u32 %v7624_v42, 16 }
 0x77e   : > { %v7721_v14 = vrot.slane %v7714_v9, %v16674_v36  ;;  %v7795_v26 = vrot.slane %v7788_v23, %v16660_v8  ;;  %v7803_v54 = vrot.slane %v12529_v31, %v16660_v8  ;;  %v7746_v60 = vrot.slane %v7739_v2, %v16660_v8 }
 0x77f   : > { %v7754_v29 = vrot.slane %v12527_v62, %v16660_v8  ;;  %v7779_v48 = vrot.slane %v7772_v20, %v16660_v8  ;;  %v7787_v34 = vrot.slane %v12528_v51, %v16660_v8  ;;  %v7853_v55 = vpack.i.b16 %v7624_v42, %v7575_v21 }
 0x780   : > { %v7854_v4 = vshrl.u32 %v7575_v21, 16  ;;  %v7672_v49 = vrot.slane %v7665_v39, %v16674_v36  ;;  %v7713_v58 = vrot.slane %v7706_v57, %v16674_v36  ;;  %v7730_v56 = vrot.slane %v7723_v10, %v16660_v8  ;;  %12702 = vmatmul.mubr.msk.bf16.gmra.mrb[16].mxu1 %vm7901_vm1, %v7847_v32 }
 0x781   : > { %v7738_v7 = vrot.slane %v12526_v3, %v16660_v8  ;;  %12703 = vmatprep.mubr.msk.bf16.mxu1 %vm7901_vm1, %v7853_v55  ;;  %v7664_v37 = vrot.slane %v7657_v40, %v16674_v36  ;;  %v7812_v11 = vcombine.low %v7795_v26, %v7803_v54  ;;  %v7763_v19 = vcombine.low %v7746_v60, %v7754_v29 }
 0x782   : > { %v7856_v12 = vpack.i.b16 %v7855_v59, %v7854_v4  ;;  %v7722_v45 = vcombine.low %v7713_v58, %v7721_v14  ;;  %v7804_v41 = vcombine.low %v7779_v48, %v7787_v34 }
 0x783   : > { %12734 = vmatmul.mubr.msk.bf16.gmra.mrb[32].mxu0 %vm7901_vm1, %v7850_v61  ;;  %v7673_v5 = vcombine.low %v7664_v37, %v7672_v49  ;;  %v7755_v22 = vcombine.low %v7730_v56, %v7738_v7  ;;  %v7819_v50 = vrot.slane %v7812_v11, %v16674_v36  ;;  %v7770_v35 = vrot.slane %v7763_v19, %v16674_v36 }
 0x784   : > { %12735 = vmatprep.mubr.msk.bf16.mxu0 %vm7901_vm1, %v7856_v12  ;;  %v7861_v30 = vshrl.u32 %v7722_v45, 16  ;;  %v7811_v1 = vrot.slane %v7804_v41, %v16674_v36 }
 0x785   : > { %v7859_v27 = vpack.i.b16 %v7722_v45, %v7673_v5  ;;  %v7860_v47 = vshrl.u32 %v7673_v5, 16  ;;  %v7762_v28 = vrot.slane %v7755_v22, %v16674_v36 }
 0x786   : > { %v7820_v44 = vcombine.low %v7811_v1, %v7819_v50 }
 0x787   : > { %v7862_v52 = vpack.i.b16 %v7861_v30, %v7860_v47  ;;  %v7771_v16 = vcombine.low %v7762_v28, %v7770_v35 }
 0x788   : > { %12704 = vmatmul.mubr.msk.bf16.gmra.mrb[20].mxu1 %vm7901_vm1, %v7853_v55  ;;  %v7867_v33 = vshrl.u32 %v7820_v44, 16 }
 0x789   : > { %12705 = vmatprep.mubr.msk.bf16.mxu1 %vm7901_vm1, %v7859_v27  ;;  %v7865_v17 = vpack.i.b16 %v7820_v44, %v7771_v16  ;;  %v7866_v24 = vshrl.u32 %v7771_v16, 16 }
 0x78b   : > { %12736 = vmatmul.mubr.msk.bf16.gmra.mrb[36].mxu0 %vm7901_vm1, %v7856_v12  ;;  %v7868_v38 = vpack.i.b16 %v7867_v33, %v7866_v24 }
 0x78c   : > { %12737 = vmatprep.mubr.msk.bf16.mxu0 %vm7901_vm1, %v7862_v52 }
 0x790   : > { %12706 = vmatmul.mubr.msk.bf16.gmra.mrb[24].mxu1 %vm7901_vm1, %v7859_v27 }
 0x791   : > { %12707 = vmatprep.mubr.msk.bf16.mxu1 %vm7901_vm1, %v7865_v17 }
 0x793   : > { %12738 = vmatmul.mubr.msk.bf16.gmra.mrb[40].mxu0 %vm7901_vm1, %v7862_v52 }
 0x794   : > { %12739 = vmatprep.mubr.msk.bf16.mxu0 %vm7901_vm1, %v7868_v38 }
 0x798   : > { %12708 = vmatmul.mubr.msk.bf16.gmra.mrb[28].mxu1 %vm7901_vm1, %v7865_v17 }
 0x79b   : > { %12740 = vmatmul.mubr.msk.bf16.gmra.mrb[44].mxu0 %vm7901_vm1, %v7868_v38 }
 0x833   : > { %v17193_v63 = vpop.f32.mrb[0].mxu1 }
 0x834   : > { %v17195_v18 = vpop.f32.mrb[1].mxu1 }
 0x835   : > { %v17197_v13 = vpop.f32.mrb[2].mxu1  ;;  %v8272_v6 = vmax.f32 %v17193_v63, %v17195_v18 }
 0x836   : > { %v17199_v32 = vpop.f32.mrb[16].mxu0  ;;  %v17203_v46 = vpop.f32.mrb[3].mxu1 }
 0x837   : > { %v17205_v15 = vpop.f32.mrb[17].mxu0  ;;  %8273 = vmax.xlane.f32.xlu0 %v8272_v6  ;;  %v8275_v31 = vmax.f32 %v17197_v13, %v17203_v46 }
 0x838   : > { %v17207_v23 = vpop.f32.mrb[18].mxu0  ;;  %v8320_v43 = vmax.f32 %v17199_v32, %v17205_v15 }
 0x839   : > { %v17213_v53 = vpop.f32.mrb[19].mxu0  ;;  %8276 = vmax.xlane.f32.xlu1 %v8275_v31 }
 0x83a   : > { %v8323_v61 = vmax.f32 %v17207_v23, %v17213_v53 }
 0x83b   : > { %8321 = vmax.xlane.f32.xlu0 %v8320_v43  ;;  %v17217_v0 = vpop.f32.mrb[4].mxu1 }
 0x83c   : > { %v17219_v42 = vpop.f32.mrb[5].mxu1 }
 0x83d   : > { %v17221_v9 = vpop.f32.mrb[6].mxu1  ;;  %v8278_v62 = vmax.f32 %v17217_v0, %v17219_v42 }
 0x83e   : > { %v17223_v2 = vpop.f32.mrb[20].mxu0  ;;  %v17227_v20 = vpop.f32.mrb[7].mxu1 }
 0x83f   : > { %v17229_v51 = vpop.f32.mrb[21].mxu0  ;;  %8324 = vmax.xlane.f32.xlu0 %v8323_v61  ;;  %8279 = vmax.xlane.f32.xlu1 %v8278_v62  ;;  %v8281_v57 = vmax.f32 %v17221_v9, %v17227_v20 }
 0x840   : > { %v17231_v21 = vpop.f32.mrb[22].mxu0  ;;  %v8326_v39 = vmax.f32 %v17223_v2, %v17229_v51 }
 0x841   : > { %v17237_v10 = vpop.f32.mrb[23].mxu0 }
 0x842   : > { %v8329_v3 = vmax.f32 %v17231_v21, %v17237_v10 }
 0x843   : > { %8327 = vmax.xlane.f32.xlu1 %v8326_v39  ;;  %8282 = vmax.xlane.f32.xlu0 %v8281_v57  ;;  %v17241_v40 = vpop.f32.mrb[8].mxu1 }
 0x844   : > { %v17243_v59 = vpop.f32.mrb[9].mxu1 }
 0x845   : > { %v17245_v14 = vpop.f32.mrb[10].mxu1  ;;  %v8284_v54 = vmax.f32 %v17241_v40, %v17243_v59 }
 0x846   : > { %v17247_v26 = vpop.f32.mrb[24].mxu0  ;;  %v17251_v60 = vpop.f32.mrb[11].mxu1 }
 0x847   : > { %v17253_v29 = vpop.f32.mrb[25].mxu0  ;;  %8330 = vmax.xlane.f32.xlu0 %v8329_v3  ;;  %8285 = vmax.xlane.f32.xlu1 %v8284_v54  ;;  %v8287_v55 = vmax.f32 %v17245_v14, %v17251_v60 }
 0x848   : > { %v17255_v48 = vpop.f32.mrb[26].mxu0  ;;  %v8332_v34 = vmax.f32 %v17247_v26, %v17253_v29 }
 0x849   : > { %v17261_v4 = vpop.f32.mrb[27].mxu0 }
 0x84a   : > { %v8335_v49 = vmax.f32 %v17255_v48, %v17261_v4 }
 0x84b   : > { %8333 = vmax.xlane.f32.xlu1 %v8332_v34  ;;  %8288 = vmax.xlane.f32.xlu0 %v8287_v55  ;;  %v17265_v58 = vpop.f32.mrb[12].mxu1 }
 0x84c   : > { %v17267_v56 = vpop.f32.mrb[13].mxu1 }
 0x84d   : > { %v17269_v7 = vpop.f32.mrb[14].mxu1  ;;  %v8290_v37 = vmax.f32 %v17265_v58, %v17267_v56 }
 0x84e   : > { %v17271_v12 = vpop.f32.mrb[28].mxu0  ;;  %v17275_v45 = vpop.f32.mrb[15].mxu1 }
 0x84f   : > { %v17277_v11 = vpop.f32.mrb[29].mxu0  ;;  %8336 = vmax.xlane.f32.xlu0 %v8335_v49  ;;  %8291 = vmax.xlane.f32.xlu1 %v8290_v37  ;;  %v8293_v41 = vmax.f32 %v17269_v7, %v17275_v45 }
 0x850   : > { %v17279_v5 = vpop.f32.mrb[30].mxu0  ;;  %v8338_v19 = vmax.f32 %v17271_v12, %v17277_v11 }
 0x851   : > { %v17285_v30 = vpop.f32.mrb[31].mxu0 }
 0x852   : > { %v8341_v22 = vmax.f32 %v17279_v5, %v17285_v30 }
 0x853   : > { %8339 = vmax.xlane.f32.xlu1 %v8338_v19  ;;  %8294 = vmax.xlane.f32.xlu0 %v8293_v41  ;;  %v17289_v50 = vpop.f32.mrb[16].mxu1 }
 0x854   : > { %v17291_v27 = vpop.f32.mrb[17].mxu1 }
 0x855   : > { %v17293_v47 = vpop.f32.mrb[18].mxu1  ;;  %v8296_v1 = vmax.f32 %v17289_v50, %v17291_v27 }
 0x856   : > { %v17295_v35 = vpop.f32.mrb[32].mxu0  ;;  %v17299_v52 = vpop.f32.mrb[19].mxu1 }
 0x857   : > { %v17301_v28 = vpop.f32.mrb[33].mxu0  ;;  %8342 = vmax.xlane.f32.xlu0 %v8341_v22  ;;  %8297 = vmax.xlane.f32.xlu1 %v8296_v1  ;;  %v8299_v33 = vmax.f32 %v17293_v47, %v17299_v52 }
 0x858   : > { %v17303_v44 = vpop.f32.mrb[34].mxu0  ;;  %v8344_v16 = vmax.f32 %v17295_v35, %v17301_v28 }
 0x859   : > { %v17309_v17 = vpop.f32.mrb[35].mxu0 }
 0x85a   : > { %v8347_v24 = vmax.f32 %v17303_v44, %v17309_v17 }
 0x85b   : > { %8345 = vmax.xlane.f32.xlu1 %v8344_v16  ;;  %8300 = vmax.xlane.f32.xlu0 %v8299_v33  ;;  %v17313_v38 = vpop.f32.mrb[20].mxu1 }
 0x85c   : > { %v17315_v6 = vpop.f32.mrb[21].mxu1 }
 0x85d   : > { %v17317_v31 = vpop.f32.mrb[22].mxu1  ;;  %v8302_v61 = vmax.f32 %v17313_v38, %v17315_v6 }
 0x85e   : > { %v17319_v43 = vpop.f32.mrb[36].mxu0  ;;  %v17323_v62 = vpop.f32.mrb[23].mxu1 }
 0x85f   : > { %v17325_v39 = vpop.f32.mrb[37].mxu0  ;;  %8348 = vmax.xlane.f32.xlu0 %v8347_v24  ;;  %8303 = vmax.xlane.f32.xlu1 %v8302_v61  ;;  %v8305_v54 = vmax.f32 %v17317_v31, %v17323_v62 }
 0x860   : > { %v17327_v57 = vpop.f32.mrb[38].mxu0  ;;  %v8350_v3 = vmax.f32 %v17319_v43, %v17325_v39 }
 0x861   : > { %v17333_v34 = vpop.f32.mrb[39].mxu0 }
 0x862   : > { %v8353_v55 = vmax.f32 %v17327_v57, %v17333_v34 }
 0x863   : > { %8351 = vmax.xlane.f32.xlu1 %v8350_v3  ;;  %8306 = vmax.xlane.f32.xlu0 %v8305_v54  ;;  %v17337_v49 = vpop.f32.mrb[24].mxu1 }
 0x864   : > { %v17339_v37 = vpop.f32.mrb[25].mxu1 }
 0x865   : > { %19258 = vst [vmem:[#allocation59_spill] sm:$0xff] %v17339_v37  ;;  %v17341_v19 = vpop.f32.mrb[26].mxu1  ;;  %v8308_v22 = vmax.f32 %v17337_v49, %v17339_v37  ;;  %v8809_v37 = vld [vmem:[#allocation4 + $0xc8] sm:$0xff] }
 0x866   : > { %19259 = vst [vmem:[#allocation58_spill] sm:$0xff] %v17341_v19  ;;  %v17343_v41 = vpop.f32.mrb[40].mxu0  ;;  %v17347_v1 = vpop.f32.mrb[27].mxu1 }
 0x867   : > { %19260 = vst [vmem:[#allocation57_spill] sm:$0xff] %v17343_v41  ;;  %19261 = vst [vmem:[#allocation60_spill] sm:$0xff] %v17347_v1  ;;  %v17349_v16 = vpop.f32.mrb[41].mxu0  ;;  %8354 = vmax.xlane.f32.xlu0 %v8353_v55  ;;  %8309 = vmax.xlane.f32.xlu1 %v8308_v22  ;;  %v8311_v61 = vmax.f32 %v17341_v19, %v17347_v1 }
 0x868   : > { %19262 = vst [vmem:[#allocation61_spill] sm:$0xff] %v17349_v16  ;;  %v17351_v33 = vpop.f32.mrb[42].mxu0  ;;  %v8356_v24 = vmax.f32 %v17343_v41, %v17349_v16  ;;  %v8784_v41 = vld [vmem:[#allocation4] sm:$0xff] }
 0x869   : > { %19263 = vst [vmem:[#allocation62_spill] sm:$0xff] %v17351_v33  ;;  %v17357_v3 = vpop.f32.mrb[43].mxu0 }
 0x86a   : > { %19264 = vst [vmem:[#allocation63_spill] sm:$0xff] %v17357_v3  ;;  %v8359_v54 = vmax.f32 %v17351_v33, %v17357_v3 }
 0x86b   : > { %8357 = vmax.xlane.f32.xlu1 %v8356_v24  ;;  %8312 = vmax.xlane.f32.xlu0 %v8311_v61  ;;  %v17361_v36 = vpop.f32.mrb[28].mxu1 }
 0x86c   : > { %19265 = vst [vmem:[#allocation64_spill] sm:$0xff] %v17361_v36  ;;  %v17363_v8 = vpop.f32.mrb[29].mxu1 }
 0x86d   : > { %19266 = vst [vmem:[#allocation65_spill] sm:$0xff] %v17363_v8  ;;  %v17365_v25 = vpop.f32.mrb[30].mxu1  ;;  %v8314_v22 = vmax.f32 %v17361_v36, %v17363_v8  ;;  %v8792_v8 = vld [vmem:[#allocation4 + $0x40] sm:$0xff] }
 0x86e   : > { %19267 = vst [vmem:[#allocation66_spill] sm:$0xff] %v17365_v25  ;;  %v17367_v55 = vpop.f32.mrb[44].mxu0  ;;  %v17371_v16 = vpop.f32.mrb[31].mxu1  ;;  %v8808_v36 = vld [vmem:[#allocation4 + $0xc0] sm:$0xff]  ;;  %12741 = vmatprep.subr.bf16.mxu1 %v8792_v8  ;;  %v8811_v8 = vld [vmem:[#allocation4 + $0xd8] sm:$0xff] }
 0x86f   : > { %19268 = vst [vmem:[#allocation67_spill] sm:$0xff] %v17367_v55  ;;  %19269 = vst [vmem:[#allocation68_spill] sm:$0xff] %v17371_v16  ;;  %v17373_v1 = vpop.f32.mrb[45].mxu0  ;;  %8360 = vmax.xlane.f32.xlu0 %v8359_v54  ;;  %8315 = vmax.xlane.f32.xlu1 %v8314_v22  ;;  %v8317_v61 = vmax.f32 %v17365_v25, %v17371_v16  ;;  %v8800_v54 = vld [vmem:[#allocation4 + $0x80] sm:$0xff]  ;;  %v8793_v22 = vld [vmem:[#allocation4 + $0x48] sm:$0xff] }
 0x870   : > { %19270 = vst [vmem:[#allocation69_spill] sm:$0xff] %v17373_v1  ;;  %v17375_v19 = vpop.f32.mrb[46].mxu0  ;;  %v8362_v24 = vmax.f32 %v17367_v55, %v17373_v1  ;;  %12805 = vmatprep.subr.bf16.mxu0 %v8808_v36  ;;  %12742 = vmatpush3.bf16.msra.mxu1 %v8784_v41  ;;  %v8785_v16 = vld [vmem:[#allocation4 + $0x8] sm:$0xff]  ;;  %v8794_v1 = vld [vmem:[#allocation4 + $0x50] sm:$0xff]  ;;  %v8787_v36 = vld [vmem:[#allocation4 + $0x18] sm:$0xff] }
 0x871   : > { %19271 = vst [vmem:[#allocation70_spill] sm:$0xff] %v17375_v19  ;;  %v17381_v3 = vpop.f32.mrb[47].mxu0  ;;  %12806 = vmatpush3.bf16.msra.mxu0 %v8800_v54  ;;  %12743 = vmatprep.subr.bf16.mxu1 %v8793_v22  ;;  %v8801_v25 = vld [vmem:[#allocation4 + $0x88] sm:$0xff]  ;;  %v8810_v55 = vld [vmem:[#allocation4 + $0xd0] sm:$0xff]  ;;  %v8803_v41 = vld [vmem:[#allocation4 + $0x98] sm:$0xff] }
 0x872   : > { %19272 = vst [vmem:[#allocation71_spill] sm:$0xff] %v17381_v3  ;;  %v8365_v33 = vmax.f32 %v17375_v19, %v17381_v3  ;;  %12807 = vmatprep.subr.bf16.mxu0 %v8809_v37  ;;  %v8796_v54 = vld [vmem:[#allocation4 + $0x60] sm:$0xff] }
 0x873   : > { %8363 = vmax.xlane.f32.xlu1 %v8362_v24  ;;  %8318 = vmax.xlane.f32.xlu0 %v8317_v61  ;;  %v8802_v24 = vld [vmem:[#allocation4 + $0x90] sm:$0xff]  ;;  %v8795_v61 = vld [vmem:[#allocation4 + $0x58] sm:$0xff]  ;;  %v8812_v37 = vld [vmem:[#allocation4 + $0xe0] sm:$0xff] }
 0x874   : > { %12744 = vmatpush3.bf16.msra.mxu1 %v8785_v16  ;;  %v8788_v16 = vld [vmem:[#allocation4 + $0x20] sm:$0xff] }
 0x875   : > { %12808 = vmatpush3.bf16.msra.mxu0 %v8801_v25  ;;  %12745 = vmatprep.subr.bf16.mxu1 %v8794_v1  ;;  %v8804_v25 = vld [vmem:[#allocation4 + $0xa0] sm:$0xff]  ;;  %v8797_v1 = vld [vmem:[#allocation4 + $0x68] sm:$0xff] }
 0x876   : > { %12809 = vmatprep.subr.bf16.mxu0 %v8810_v55  ;;  %v8813_v55 = vld [vmem:[#allocation4 + $0xe8] sm:$0xff] }
 0x877   : > { %8366 = vmax.xlane.f32.xlu0 %v8365_v33  ;;  %v8786_v33 = vld [vmem:[#allocation4 + $0x10] sm:$0xff] }
 0x878   : > { %12746 = vmatpush3.bf16.msra.mxu1 %v8786_v33 }
 0x879   : > { %12810 = vmatpush3.bf16.msra.mxu0 %v8802_v24  ;;  %12747 = vmatprep.subr.bf16.mxu1 %v8795_v61 }
 0x87a   : > { %12811 = vmatprep.subr.bf16.mxu0 %v8811_v8 }
 0x87c   : > { %12748 = vmatpush3.bf16.msra.mxu1 %v8787_v36 }
 0x87d   : > { %12812 = vmatpush3.bf16.msra.mxu0 %v8803_v41  ;;  %12749 = vmatprep.subr.bf16.mxu1 %v8796_v54 }
 0x87e   : > { %12813 = vmatprep.subr.bf16.mxu0 %v8812_v37 }
 0x880   : > { %12750 = vmatpush3.bf16.msra.mxu1 %v8788_v16 }
 0x881   : > { %12814 = vmatpush3.bf16.msra.mxu0 %v8804_v25  ;;  %12751 = vmatprep.subr.bf16.mxu1 %v8797_v1 }
 0x882   : > { %12815 = vmatprep.subr.bf16.mxu0 %v8813_v55 }
 0x8c4   : > { %v8274_v22 = vpop.xlane.xlu0 %8273 }
 0x8c5   : > { %v8368_v33 = vsub.f32 %v17193_v63, %v8274_v22  ;;  %v8369_v24 = vsub.f32 %v17195_v18, %v8274_v22 }
 0x8c6   : > { %v8277_v61 = vpop.xlane.xlu1 %8276 }
 0x8c7   : > { %v8432_v8 = vmul.f32 1.442695, %v8368_v33  ;;  %v8434_v3 = vmul.f32 1.442695, %v8369_v24  ;;  %v8370_v36 = vsub.f32 %v17197_v13, %v8277_v61  ;;  %v8371_v41 = vsub.f32 %v17203_v46, %v8277_v61 }
 0x8c8   : > { %v8322_v54 = vpop.xlane.xlu0 %8321 }
 0x8c9   : > { %13487 = vpow2.f32 %v8432_v8  ;;  %v8436_v37 = vmul.f32 1.442695, %v8370_v36  ;;  %v8438_v19 = vmul.f32 1.442695, %v8371_v41  ;;  %v8400_v16 = vsub.f32 %v17199_v32, %v8322_v54 }
 0x8ca   : > { %13489 = vpow2.f32 %v8434_v3  ;;  %v8401_v25 = vsub.f32 %v17205_v15, %v8322_v54 }
 0x8cb   : > { %13491 = vpow2.f32 %v8436_v37  ;;  %v8496_v63 = vmul.f32 1.442695, %v8400_v16 }
 0x8cc   : > { %13493 = vpow2.f32 %v8438_v19  ;;  %v8498_v18 = vmul.f32 1.442695, %v8401_v25  ;;  %v8325_v1 = vpop.xlane.xlu0 %8324  ;;  %v8280_v55 = vpop.xlane.xlu1 %8279 }
 0x8cd   : > { %13495 = vpow2.f32 %v8496_v63  ;;  %v8402_v13 = vsub.f32 %v17207_v23, %v8325_v1  ;;  %v8403_v46 = vsub.f32 %v17213_v53, %v8325_v1  ;;  %v8372_v22 = vsub.f32 %v17217_v0, %v8280_v55 }
 0x8ce   : > { %13497 = vpow2.f32 %v8498_v18  ;;  %v8373_v33 = vsub.f32 %v17219_v42, %v8280_v55 }
 0x8cf   : > { %v8500_v32 = vmul.f32 1.442695, %v8402_v13  ;;  %v8502_v3 = vmul.f32 1.442695, %v8403_v46  ;;  %v8440_v24 = vmul.f32 1.442695, %v8372_v22 }
 0x8d0   : > { %v8442_v15 = vmul.f32 1.442695, %v8373_v33  ;;  %v8328_v61 = vpop.xlane.xlu1 %8327  ;;  %v8283_v8 = vpop.xlane.xlu0 %8282 }
 0x8d1   : > { %13499 = vpow2.f32 %v8500_v32  ;;  %v8404_v19 = vsub.f32 %v17223_v2, %v8328_v61  ;;  %v8405_v36 = vsub.f32 %v17229_v51, %v8328_v61  ;;  %v8374_v23 = vsub.f32 %v17221_v9, %v8283_v8 }
 0x8d2   : > { %13501 = vpow2.f32 %v8502_v3  ;;  %v8375_v53 = vsub.f32 %v17227_v20, %v8283_v8 }
 0x8d3   : > { %v17399_v0 = vpop.eup %13487  ;;  %13503 = vpow2.f32 %v8440_v24  ;;  %v8504_v42 = vmul.f32 1.442695, %v8404_v19  ;;  %v8506_v41 = vmul.f32 1.442695, %v8405_v36  ;;  %v8444_v54 = vmul.f32 1.442695, %v8374_v23 }
 0x8d4   : > { %v17401_v37 = vpop.eup %13489  ;;  %13505 = vpow2.f32 %v8442_v15  ;;  %v8446_v16 = vmul.f32 1.442695, %v8375_v53  ;;  %v8331_v25 = vpop.xlane.xlu0 %8330 }
 0x8d5   : > { %v8286_v63 = vpop.xlane.xlu1 %8285  ;;  %v17403_v2 = vpop.eup %13491  ;;  %13507 = vpow2.f32 %v8504_v42  ;;  %v8406_v9 = vsub.f32 %v17231_v21, %v8331_v25  ;;  %v8407_v51 = vsub.f32 %v17237_v10, %v8331_v25  ;;  %v8560_v55 = vadd.f32 %v17401_v37, %v17399_v0 }
 0x8d6   : > { %v8376_v20 = vsub.f32 %v17241_v40, %v8286_v63  ;;  %v17408_v18 = vpop.eup %13493  ;;  %13509 = vpow2.f32 %v8506_v41  ;;  %v8377_v1 = vsub.f32 %v17243_v59, %v8286_v63 }
 0x8d7   : > { %v17413_v13 = vpop.eup %13495  ;;  %13511 = vpow2.f32 %v8444_v54  ;;  %v8508_v46 = vmul.f32 1.442695, %v8406_v9  ;;  %v8510_v22 = vmul.f32 1.442695, %v8407_v51  ;;  %8561 = vadd.xlane.f32.xlu1 %v8560_v55  ;;  %v8563_v3 = vadd.f32 %v17408_v18, %v17403_v2 }
 0x8d8   : > { %v8448_v33 = vmul.f32 1.442695, %v8376_v20  ;;  %v17415_v32 = vpop.eup %13497  ;;  %13513 = vpow2.f32 %v8446_v16  ;;  %v8450_v21 = vmul.f32 1.442695, %v8377_v1  ;;  %v8289_v40 = vpop.xlane.xlu0 %8288 }
 0x8d9   : > { %v8334_v10 = vpop.xlane.xlu1 %8333  ;;  %13515 = vpow2.f32 %v8508_v46  ;;  %v8378_v15 = vsub.f32 %v17245_v14, %v8289_v40  ;;  %v8379_v61 = vsub.f32 %v17251_v60, %v8289_v40  ;;  %8564 = vadd.xlane.f32.xlu0 %v8563_v3  ;;  %v8608_v8 = vadd.f32 %v17415_v32, %v17413_v13 }
 0x8da   : > { %v8408_v59 = vsub.f32 %v17247_v26, %v8334_v10  ;;  %v8409_v24 = vsub.f32 %v17253_v29, %v8334_v10  ;;  %13517 = vpow2.f32 %v8510_v22 }
 0x8db   : > { %v17425_v19 = vpop.eup %13499  ;;  %13519 = vpow2.f32 %v8448_v33  ;;  %v8452_v53 = vmul.f32 1.442695, %v8378_v15  ;;  %v8454_v26 = vmul.f32 1.442695, %v8379_v61  ;;  %8609 = vadd.xlane.f32.xlu1 %v8608_v8 }
 0x8dc   : > { %v8512_v36 = vmul.f32 1.442695, %v8408_v59  ;;  %v8514_v23 = vmul.f32 1.442695, %v8409_v24  ;;  %v17427_v42 = vpop.eup %13501  ;;  %13521 = vpow2.f32 %v8450_v21  ;;  %v8337_v29 = vpop.xlane.xlu0 %8336 }
 0x8dd   : > { %v8292_v14 = vpop.xlane.xlu1 %8291  ;;  %v17429_v41 = vpop.eup %13503  ;;  %v8410_v60 = vsub.f32 %v17255_v48, %v8337_v29  ;;  %v8411_v54 = vsub.f32 %v17261_v4, %v8337_v29  ;;  %v8611_v9 = vadd.f32 %v17427_v42, %v17425_v19 }
 0x8de   : > { %13523 = vpow2.f32 %v8512_v36  ;;  %v8380_v16 = vsub.f32 %v17265_v58, %v8292_v14  ;;  %v17434_v25 = vpop.eup %13505  ;;  %v8381_v63 = vsub.f32 %v17267_v56, %v8292_v14 }
 0x8df   : > { %13525 = vpow2.f32 %v8514_v23  ;;  %v17439_v51 = vpop.eup %13507  ;;  %v8516_v20 = vmul.f32 1.442695, %v8410_v60  ;;  %v8518_v1 = vmul.f32 1.442695, %v8411_v54  ;;  %v8566_v4 = vadd.f32 %v17434_v25, %v17429_v41  ;;  %8612 = vadd.xlane.f32.xlu0 %v8611_v9 }
 0x8e0   : > { %13527 = vpow2.f32 %v8452_v53  ;;  %v8456_v55 = vmul.f32 1.442695, %v8380_v16  ;;  %v17441_v46 = vpop.eup %13509  ;;  %v8458_v48 = vmul.f32 1.442695, %v8381_v63  ;;  %v8295_v22 = vpop.xlane.xlu0 %8294 }
 0x8e1   : > { %13529 = vpow2.f32 %v8454_v26  ;;  %v8340_v58 = vpop.xlane.xlu1 %8339  ;;  %v17445_v56 = vpop.eup %13511  ;;  %v8382_v10 = vsub.f32 %v17269_v7, %v8295_v22  ;;  %8567 = vadd.xlane.f32.xlu1 %v8566_v4  ;;  %v8383_v3 = vsub.f32 %v17275_v45, %v8295_v22  ;;  %v8614_v59 = vadd.f32 %v17441_v46, %v17439_v51 }
 0x8e2   : > { %13531 = vpow2.f32 %v8516_v20  ;;  %v8412_v33 = vsub.f32 %v17271_v12, %v8340_v58  ;;  %v8413_v21 = vsub.f32 %v17277_v11, %v8340_v58  ;;  %v17450_v40 = vpop.eup %13513 }
 0x8e3   : > { %13533 = vpow2.f32 %v8518_v1  ;;  %v17455_v24 = vpop.eup %13515  ;;  %v8460_v8 = vmul.f32 1.442695, %v8382_v10  ;;  %v8462_v11 = vmul.f32 1.442695, %v8383_v3  ;;  %v8569_v7 = vadd.f32 %v17450_v40, %v17445_v56 }
 0x8e4   : > { %13535 = vpow2.f32 %v8456_v55  ;;  %v8520_v15 = vmul.f32 1.442695, %v8412_v33  ;;  %v8522_v61 = vmul.f32 1.442695, %v8413_v21  ;;  %v17457_v12 = vpop.eup %13517  ;;  %v8343_v36 = vpop.xlane.xlu0 %8342 }
 0x8e5   : > { %13537 = vpow2.f32 %v8458_v48  ;;  %v8298_v23 = vpop.xlane.xlu1 %8297  ;;  %v17461_v53 = vpop.eup %13519  ;;  %v8414_v45 = vsub.f32 %v17279_v5, %v8343_v36  ;;  %v8415_v26 = vsub.f32 %v17285_v30, %v8343_v36  ;;  %8615 = vadd.xlane.f32.xlu1 %v8614_v59  ;;  %8570 = vadd.xlane.f32.xlu0 %v8569_v7  ;;  %v8617_v54 = vadd.f32 %v17457_v12, %v17455_v24 }
 0x8e6   : > { %13539 = vpow2.f32 %v8520_v15  ;;  %v8384_v29 = vsub.f32 %v17289_v50, %v8298_v23  ;;  %v17466_v14 = vpop.eup %13521  ;;  %v8385_v60 = vsub.f32 %v17291_v27, %v8298_v23 }
 0x8e7   : > { %13541 = vpow2.f32 %v8522_v61  ;;  %v8524_v63 = vmul.f32 1.442695, %v8414_v45  ;;  %v8526_v9 = vmul.f32 1.442695, %v8415_v26  ;;  %v8572_v50 = vadd.f32 %v17466_v14, %v17461_v53 }
 0x8e8   : > { %v17471_v16 = vpop.eup %13523  ;;  %13543 = vpow2.f32 %v8460_v8  ;;  %v8464_v5 = vmul.f32 1.442695, %v8384_v29  ;;  %v8466_v30 = vmul.f32 1.442695, %v8385_v60  ;;  %v8301_v55 = vpop.xlane.xlu0 %8300  ;;  %v8789_v29 = vld [vmem:[#allocation4 + $0x28] sm:$0xff] }
 0x8e9   : > { %v17473_v20 = vpop.eup %13525  ;;  %13545 = vpow2.f32 %v8462_v11  ;;  %v8346_v1 = vpop.xlane.xlu1 %8345  ;;  %v8386_v58 = vsub.f32 %v17293_v47, %v8301_v55  ;;  %8573 = vadd.xlane.f32.xlu1 %v8572_v50  ;;  %8618 = vadd.xlane.f32.xlu0 %v8617_v54  ;;  %v8387_v33 = vsub.f32 %v17299_v52, %v8301_v55 }
 0x8ea   : > { %v17477_v48 = vpop.eup %13527  ;;  %13547 = vpow2.f32 %v8524_v63  ;;  %v8416_v27 = vsub.f32 %v17295_v35, %v8346_v1  ;;  %v8417_v4 = vsub.f32 %v17301_v28, %v8346_v1  ;;  %v8620_v21 = vadd.f32 %v17473_v20, %v17471_v16  ;;  %12752 = vmatpush3.bf16.msra.mxu1 %v8789_v29  ;;  %v19273_v29 = vld [vmem:[#allocation59_spill] sm:$0xff] }
 0x8eb   : > { %v17482_v22 = vpop.eup %13529  ;;  %13549 = vpow2.f32 %v8526_v9  ;;  %v8468_v35 = vmul.f32 1.442695, %v8386_v58  ;;  %v8470_v47 = vmul.f32 1.442695, %v8387_v33 }
 0x8ec   : > { %v17487_v10 = vpop.eup %13531  ;;  %13551 = vpow2.f32 %v8464_v5  ;;  %v8528_v3 = vmul.f32 1.442695, %v8416_v27  ;;  %v8530_v59 = vmul.f32 1.442695, %v8417_v4  ;;  %v8575_v28 = vadd.f32 %v17482_v22, %v17477_v48  ;;  %v8349_v61 = vpop.xlane.xlu0 %8348  ;;  %v8805_v27 = vld [vmem:[#allocation4 + $0xa8] sm:$0xff]  ;;  %v8798_v4 = vld [vmem:[#allocation4 + $0x70] sm:$0xff] }
 0x8ed   : > { %v17489_v15 = vpop.eup %13533  ;;  %13553 = vpow2.f32 %v8466_v30  ;;  %v8304_v8 = vpop.xlane.xlu1 %8303  ;;  %v8418_v52 = vsub.f32 %v17303_v44, %v8349_v61  ;;  %v8419_v7 = vsub.f32 %v17309_v17, %v8349_v61  ;;  %8621 = vadd.xlane.f32.xlu1 %v8620_v21  ;;  %12816 = vmatpush3.bf16.msra.mxu0 %v8805_v27  ;;  %v8791_v27 = vld [vmem:[#allocation4 + $0x38] sm:$0xff] }
 0x8ee   : > { %v17493_v11 = vpop.eup %13535  ;;  %13555 = vpow2.f32 %v8528_v3  ;;  %v8388_v36 = vsub.f32 %v17313_v38, %v8304_v8  ;;  %8576 = vadd.xlane.f32.xlu0 %v8575_v28  ;;  %v8389_v45 = vsub.f32 %v17315_v6, %v8304_v8  ;;  %v8623_v26 = vadd.f32 %v17489_v15, %v17487_v10  ;;  %v8790_v3 = vld [vmem:[#allocation4 + $0x30] sm:$0xff]  ;;  %12753 = vmatprep.subr.bf16.mxu1 %v8798_v4 }
 0x8ef   : > { %v17498_v23 = vpop.eup %13537  ;;  %13557 = vpow2.f32 %v8530_v59  ;;  %v8532_v54 = vmul.f32 1.442695, %v8418_v52  ;;  %v8534_v44 = vmul.f32 1.442695, %v8419_v7  ;;  %12754 = vmatpush3.bf16.msra.mxu1 %v8790_v3  ;;  %v19275_v3 = vld [vmem:[#allocation61_spill] sm:$0xff] }
 0x8f0   : > { %v17503_v60 = vpop.eup %13539  ;;  %13559 = vpow2.f32 %v8468_v35  ;;  %v8472_v63 = vmul.f32 1.442695, %v8388_v36  ;;  %v8474_v38 = vmul.f32 1.442695, %v8389_v45  ;;  %v8578_v9 = vadd.f32 %v17498_v23, %v17493_v11  ;;  %v8307_v6 = vpop.xlane.xlu0 %8306  ;;  %v8814_v45 = vld [vmem:[#allocation4 + $0xf0] sm:$0xff] }
 0x8f1   : > { %v17505_v17 = vpop.eup %13541  ;;  %13561 = vpow2.f32 %v8470_v47  ;;  %v8352_v5 = vpop.xlane.xlu1 %8351  ;;  %v8390_v55 = vsub.f32 %v17317_v31, %v8307_v6  ;;  %v8391_v33 = vsub.f32 %v17323_v62, %v8307_v6  ;;  %12817 = vmatprep.subr.bf16.mxu0 %v8814_v45 }
 0x8f2   : > { %v17509_v30 = vpop.eup %13543  ;;  %13563 = vpow2.f32 %v8532_v54  ;;  %v8420_v50 = vsub.f32 %v17319_v43, %v8352_v5  ;;  %v8421_v1 = vsub.f32 %v17325_v39, %v8352_v5  ;;  %8579 = vadd.xlane.f32.xlu1 %v8578_v9  ;;  %8624 = vadd.xlane.f32.xlu0 %v8623_v26  ;;  %v8626_v21 = vadd.f32 %v17505_v17, %v17503_v60 }
 0x8f3   : > { %v17514_v58 = vpop.eup %13545  ;;  %13565 = vpow2.f32 %v8534_v44  ;;  %v8476_v35 = vmul.f32 1.442695, %v8390_v55  ;;  %v8478_v47 = vmul.f32 1.442695, %v8391_v33  ;;  %v8806_v55 = vld [vmem:[#allocation4 + $0xb0] sm:$0xff] }
 0x8f4   : > { %v17519_v59 = vpop.eup %13547  ;;  %13567 = vpow2.f32 %v8472_v63  ;;  %v8536_v43 = vmul.f32 1.442695, %v8420_v50  ;;  %v8538_v39 = vmul.f32 1.442695, %v8421_v1  ;;  %v8581_v28 = vadd.f32 %v17514_v58, %v17509_v30  ;;  %v8355_v62 = vpop.xlane.xlu0 %8354  ;;  %v8799_v63 = vld [vmem:[#allocation4 + $0x78] sm:$0xff]  ;;  %v19274_v33 = vld [vmem:[#allocation57_spill] sm:$0xff]  ;;  %12818 = vmatpush3.bf16.msra.mxu0 %v8806_v55 }
 0x8f5   : > { %v17521_v31 = vpop.eup %13549  ;;  %13569 = vpow2.f32 %v8474_v38  ;;  %v8310_v61 = vpop.xlane.xlu1 %8309  ;;  %v8422_v52 = vsub.f32 %v17327_v57, %v8355_v62  ;;  %v8423_v7 = vsub.f32 %v17333_v34, %v8355_v62  ;;  %12755 = vmatprep.subr.bf16.mxu1 %v8799_v63  ;;  %v19277_v62 = vld [vmem:[#allocation60_spill] sm:$0xff] }
 0x8f6   : > { %v17525_v8 = vpop.eup %13551  ;;  %13571 = vpow2.f32 %v8536_v43  ;;  %v8392_v36 = vsub.f32 %v17337_v49, %v8310_v61  ;;  %8627 = vadd.xlane.f32.xlu1 %v8626_v21  ;;  %8582 = vadd.xlane.f32.xlu0 %v8581_v28  ;;  %v8393_v54 = vsub.f32 %v19273_v29, %v8310_v61  ;;  %v8629_v44 = vadd.f32 %v17521_v31, %v17519_v59 }
 0x8f7   : > { %v17530_v26 = vpop.eup %13553  ;;  %13573 = vpow2.f32 %v8538_v39  ;;  %v8540_v57 = vmul.f32 1.442695, %v8422_v52  ;;  %v8542_v9 = vmul.f32 1.442695, %v8423_v7  ;;  %v19276_v39 = vld [vmem:[#allocation58_spill] sm:$0xff]  ;;  %12756 = vmatpush3.bf16.msra.mxu1 %v8791_v27  ;;  %v19280_v27 = vld [vmem:[#allocation63_spill] sm:$0xff] }
 0x8f8   : > { %v17535_v38 = vpop.eup %13555  ;;  %13575 = vpow2.f32 %v8476_v35  ;;  %v8480_v34 = vmul.f32 1.442695, %v8392_v36  ;;  %v8482_v5 = vmul.f32 1.442695, %v8393_v54  ;;  %v8584_v6 = vadd.f32 %v17530_v26, %v17525_v8  ;;  %v8313_v1 = vpop.xlane.xlu0 %8312  ;;  %v8807_v7 = vld [vmem:[#allocation4 + $0xb8] sm:$0xff] }
 0x8f9   : > { %v17537_v49 = vpop.eup %13557  ;;  %13577 = vpow2.f32 %v8478_v47  ;;  %v8358_v50 = vpop.xlane.xlu1 %8357  ;;  %v8394_v35 = vsub.f32 %v19276_v39, %v8313_v1  ;;  %v8815_v47 = vld [vmem:[#allocation4 + $0xf8] sm:$0xff]  ;;  %v8395_v61 = vsub.f32 %v19277_v62, %v8313_v1 }
 0x8fa   : > { %v17541_v4 = vpop.eup %13559  ;;  %13579 = vpow2.f32 %v8540_v57  ;;  %v8424_v21 = vsub.f32 %v19274_v33, %v8358_v50  ;;  %v8425_v43 = vsub.f32 %v19275_v3, %v8358_v50  ;;  %8585 = vadd.xlane.f32.xlu1 %v8584_v6  ;;  %8630 = vadd.xlane.f32.xlu0 %v8629_v44  ;;  %v8632_v52 = vadd.f32 %v17537_v49, %v17535_v38  ;;  %v19279_v1 = vld [vmem:[#allocation62_spill] sm:$0xff]  ;;  %v19281_v33 = vld [vmem:[#allocation64_spill] sm:$0xff] }
 0x8fb   : > { %v17546_v28 = vpop.eup %13561  ;;  %13581 = vpow2.f32 %v8542_v9  ;;  %v8484_v54 = vmul.f32 1.442695, %v8394_v35  ;;  %12819 = vmatprep.subr.bf16.mxu0 %v8815_v47  ;;  %v8486_v57 = vmul.f32 1.442695, %v8395_v61 }
 0x8fc   : > { %v17551_v36 = vpop.eup %13563  ;;  %13583 = vpow2.f32 %v8480_v34  ;;  %v8544_v45 = vmul.f32 1.442695, %v8424_v21  ;;  %v8546_v29 = vmul.f32 1.442695, %v8425_v43  ;;  %v8587_v44 = vadd.f32 %v17546_v28, %v17541_v4  ;;  %v8361_v9 = vpop.xlane.xlu0 %8360  ;;  %12820 = vmatpush3.bf16.msra.mxu0 %v8807_v7 }
 0x8fd   : > { %v17553_v63 = vpop.eup %13565  ;;  %13585 = vpow2.f32 %v8482_v5  ;;  %v8316_v6 = vpop.xlane.xlu1 %8315  ;;  %v8426_v55 = vsub.f32 %v19279_v1, %v8361_v9  ;;  %v8427_v34 = vsub.f32 %v19280_v27, %v8361_v9  ;;  %v19283_v5 = vld [vmem:[#allocation65_spill] sm:$0xff] }
 0x8fe   : > { %v17557_v50 = vpop.eup %13567  ;;  %13587 = vpow2.f32 %v8544_v45  ;;  %v8396_v21 = vsub.f32 %v19281_v33, %v8316_v6  ;;  %8633 = vadd.xlane.f32.xlu1 %v8632_v52  ;;  %8588 = vadd.xlane.f32.xlu0 %v8587_v44  ;;  %v8397_v43 = vsub.f32 %v19283_v5, %v8316_v6  ;;  %v8635_v39 = vadd.f32 %v17553_v63, %v17551_v36  ;;  %v19285_v6 = vld [vmem:[#allocation67_spill] sm:$0xff]  ;;  %v19286_v27 = vld [vmem:[#allocation69_spill] sm:$0xff] }
 0x8ff   : > { %19278 = vst [vmem:[#allocation59_spill] sm:$0xff] %v17557_v50  ;;  %v17562_v3 = vpop.eup %13569  ;;  %13589 = vpow2.f32 %v8546_v29  ;;  %v8548_v47 = vmul.f32 1.442695, %v8426_v55  ;;  %v8550_v62 = vmul.f32 1.442695, %v8427_v34 }
 0x900   : > { %19282 = vst [vmem:[#allocation57_spill] sm:$0xff] %v17562_v3  ;;  %v17567_v35 = vpop.eup %13571  ;;  %13591 = vpow2.f32 %v8484_v54  ;;  %v8488_v61 = vmul.f32 1.442695, %v8396_v21  ;;  %v8490_v7 = vmul.f32 1.442695, %v8397_v43  ;;  %v8590_v29 = vadd.f32 %v17562_v3, %v17557_v50  ;;  %v8319_v44 = vpop.xlane.xlu0 %8318  ;;  %v19287_v54 = vld [vmem:[#allocation66_spill] sm:$0xff] }
 0x901   : > { %19284 = vst [vmem:[#allocation61_spill] sm:$0xff] %v17567_v35  ;;  %v17569_v45 = vpop.eup %13573  ;;  %13593 = vpow2.f32 %v8486_v57  ;;  %v8364_v52 = vpop.xlane.xlu1 %8363  ;;  %v8398_v55 = vsub.f32 %v19287_v54, %v8319_v44  ;;  %v19288_v57 = vld [vmem:[#allocation68_spill] sm:$0xff]  ;;  %v19290_v54 = vld [vmem:[#allocation71_spill] sm:$0xff] }
 0x902   : > { %v17573_v9 = vpop.eup %13575  ;;  %13595 = vpow2.f32 %v8548_v47  ;;  %v8428_v1 = vsub.f32 %v19285_v6, %v8364_v52  ;;  %v8429_v33 = vsub.f32 %v19286_v27, %v8364_v52  ;;  %8591 = vadd.xlane.f32.xlu1 %v8590_v29  ;;  %8636 = vadd.xlane.f32.xlu0 %v8635_v39  ;;  %v8399_v21 = vsub.f32 %v19288_v57, %v8319_v44  ;;  %v19289_v44 = vld [vmem:[#allocation70_spill] sm:$0xff] }
 0x903   : > { %v17578_v34 = vpop.eup %13577  ;;  %13597 = vpow2.f32 %v8550_v62  ;;  %v8638_v5 = vadd.f32 %v17569_v45, %v17567_v35  ;;  %v8492_v6 = vmul.f32 1.442695, %v8398_v55 }
 0x904   : > { %v17583_v43 = vpop.eup %13579  ;;  %13599 = vpow2.f32 %v8488_v61  ;;  %v8552_v47 = vmul.f32 1.442695, %v8428_v1  ;;  %v8554_v50 = vmul.f32 1.442695, %v8429_v33  ;;  %v8494_v52 = vmul.f32 1.442695, %v8399_v21  ;;  %v8367_v29 = vpop.xlane.xlu0 %8366 }
 0x905   : > { %v17585_v3 = vpop.eup %13581  ;;  %13601 = vpow2.f32 %v8490_v7  ;;  %v8593_v62 = vadd.f32 %v17578_v34, %v17573_v9  ;;  %v8430_v27 = vsub.f32 %v19289_v44, %v8367_v29  ;;  %v8431_v57 = vsub.f32 %v19290_v54, %v8367_v29 }
 0x906   : > { %v17589_v39 = vpop.eup %13583  ;;  %13603 = vpow2.f32 %v8552_v47  ;;  %8639 = vadd.xlane.f32.xlu1 %v8638_v5  ;;  %v8641_v61 = vadd.f32 %v17585_v3, %v17583_v43 }
 0x907   : > { %v17593_v35 = vpop.eup %13585  ;;  %13605 = vpow2.f32 %v8554_v50  ;;  %8594 = vadd.xlane.f32.xlu0 %v8593_v62  ;;  %v8556_v1 = vmul.f32 1.442695, %v8430_v27  ;;  %v8558_v33 = vmul.f32 1.442695, %v8431_v57 }
 0x908   : > { %v17597_v7 = vpop.eup %13587  ;;  %13607 = vpow2.f32 %v8492_v6  ;;  %v8596_v55 = vadd.f32 %v17593_v35, %v17589_v39 }
 0x909   : > { %19291 = vst [vmem:[#allocation58_spill] sm:$0xff] %v17597_v7  ;;  %v17601_v21 = vpop.eup %13589  ;;  %13609 = vpow2.f32 %v8494_v52 }
 0x90a   : > { %19292 = vst [vmem:[#allocation60_spill] sm:$0xff] %v17601_v21  ;;  %v17603_v47 = vpop.eup %13591  ;;  %13611 = vpow2.f32 %v8556_v1  ;;  %8597 = vadd.xlane.f32.xlu1 %v8596_v55  ;;  %v8644_v5 = vadd.f32 %v17601_v21, %v17597_v7 }
 0x90b   : > { %v17605_v50 = vpop.eup %13593  ;;  %13613 = vpow2.f32 %v8558_v33  ;;  %8642 = vadd.xlane.f32.xlu0 %v8641_v61 }
 0x90c   : > { %v17609_v6 = vpop.eup %13595  ;;  %v8599_v62 = vadd.f32 %v17605_v50, %v17603_v47 }
 0x90d   : > { %19293 = vst [vmem:[#allocation62_spill] sm:$0xff] %v17609_v6  ;;  %v17613_v29 = vpop.eup %13597 }
 0x90e   : > { %19294 = vst [vmem:[#allocation63_spill] sm:$0xff] %v17613_v29  ;;  %v17615_v44 = vpop.eup %13599  ;;  %8645 = vadd.xlane.f32.xlu1 %v8644_v5  ;;  %v8647_v27 = vadd.f32 %v17613_v29, %v17609_v6 }
 0x90f   : > { %19295 = vst [vmem:[#allocation64_spill] sm:$0xff] %v17615_v44  ;;  %v17617_v52 = vpop.eup %13601  ;;  %8600 = vadd.xlane.f32.xlu0 %v8599_v62 }
 0x910   : > { %19296 = vst [vmem:[#allocation65_spill] sm:$0xff] %v17617_v52  ;;  %v17621_v54 = vpop.eup %13603  ;;  %v8602_v57 = vadd.f32 %v17617_v52, %v17615_v44 }
 0x911   : > { %19297 = vst [vmem:[#allocation67_spill] sm:$0xff] %v17621_v54  ;;  %v17625_v61 = vpop.eup %13605 }
 0x912   : > { %19298 = vst [vmem:[#allocation69_spill] sm:$0xff] %v17625_v61  ;;  %v17627_v1 = vpop.eup %13607  ;;  %8603 = vadd.xlane.f32.xlu1 %v8602_v57  ;;  %v8650_v55 = vadd.f32 %v17625_v61, %v17621_v54 }
 0x913   : > { %19299 = vst [vmem:[#allocation66_spill] sm:$0xff] %v17627_v1  ;;  %v17629_v33 = vpop.eup %13609  ;;  %8648 = vadd.xlane.f32.xlu0 %v8647_v27 }
 0x914   : > { %19300 = vst [vmem:[#allocation68_spill] sm:$0xff] %v17629_v33  ;;  %v17633_v5 = vpop.eup %13611  ;;  %v8605_v62 = vadd.f32 %v17629_v33, %v17627_v1 }
 0x915   : > { %19301 = vst [vmem:[#allocation70_spill] sm:$0xff] %v17633_v5  ;;  %v17637_v6 = vpop.eup %13613 }
 0x916   : > { %19302 = vst [vmem:[#allocation71_spill] sm:$0xff] %v17637_v6  ;;  %8651 = vadd.xlane.f32.xlu1 %v8650_v55  ;;  %v8653_v44 = vadd.f32 %v17637_v6, %v17633_v5 }
 0x917   : > { %8606 = vadd.xlane.f32.xlu0 %v8605_v62 }
 0x91b   : > { %8654 = vadd.xlane.f32.xlu0 %v8653_v44 }
 0x964   : > { %v8562_v52 = vpop.xlane.xlu1 %8561 }
 0x965   : > { %13615 = vrcp.f32 %v8562_v52 }
 0x966   : > { %v8565_v57 = vpop.xlane.xlu0 %8564 }
 0x967   : > { %13617 = vrcp.f32 %v8565_v57 }
 0x968   : > { %v8610_v27 = vpop.xlane.xlu1 %8609 }
 0x969   : > { %13619 = vrcp.f32 %v8610_v27 }
 0x96c   : > { %v8613_v54 = vpop.xlane.xlu0 %8612 }
 0x96d   : > { %13621 = vrcp.f32 %v8613_v54 }
 0x96e   : > { %v8568_v61 = vpop.xlane.xlu1 %8567 }
 0x96f   : > { %v13616_v7 = vpop.eup %13615  ;;  %13623 = vrcp.f32 %v8568_v61 }
 0x970   : > { %v8688_v1 = vmul.f32 %v13616_v7, %v17399_v0  ;;  %v8689_v44 = vmul.f32 %v13616_v7, %v17401_v37 }
 0x971   : > { %v13618_v29 = vpop.eup %13617 }
 0x972   : > { %v8690_v55 = vmul.f32 %v13618_v29, %v17403_v2  ;;  %v8616_v62 = vpop.xlane.xlu1 %8615  ;;  %v8571_v33 = vpop.xlane.xlu0 %8570  ;;  %v8691_v52 = vmul.f32 %v13618_v29, %v17408_v18 }
 0x973   : > { %v13620_v5 = vpop.eup %13619  ;;  %13625 = vrcp.f32 %v8571_v33 }
 0x974   : > { %v8753_v57 = vpack.c.bf16 %v8691_v52, %v8689_v44  ;;  %v8752_v27 = vpack.c.bf16 %v8690_v55, %v8688_v1  ;;  %13627 = vrcp.f32 %v8616_v62  ;;  %v8720_v61 = vmul.f32 %v13620_v5, %v17413_v13 }
 0x975   : > { %v8721_v2 = vmul.f32 %v13620_v5, %v17415_v32 }
 0x976   : > { %v8574_v54 = vpop.xlane.xlu1 %8573  ;;  %v8619_v6 = vpop.xlane.xlu0 %8618  ;;  %8848 = vmatprep.mubr.bf16.mxu1 %v8753_v57 }
 0x977   : > { %v13622_v21 = vpop.eup %13621  ;;  %8849 = vmatmul.mubr.bf16.vlgmr.msra.gmra.mrb[32].mxu1 %v8752_v27  ;;  %13629 = vrcp.f32 %v8619_v6 }
 0x978   : > { %v8722_v0 = vmul.f32 %v13622_v21, %v17425_v19  ;;  %v8723_v37 = vmul.f32 %v13622_v21, %v17427_v42  ;;  %13631 = vrcp.f32 %v8574_v54 }
 0x979   : > { %v13624_v33 = vpop.eup %13623 }
 0x97a   : > { %v8622_v18 = vpop.xlane.xlu1 %8621  ;;  %v8769_v29 = vpack.c.bf16 %v8723_v37, %v8721_v2  ;;  %v8768_v1 = vpack.c.bf16 %v8722_v0, %v8720_v61  ;;  %v8693_v19 = vmul.f32 %v13624_v33, %v17434_v25  ;;  %v8692_v32 = vmul.f32 %v13624_v33, %v17429_v41 }
 0x97b   : > { %v8577_v7 = vpop.xlane.xlu0 %8576 }
 0x97c   : > { %13633 = vrcp.f32 %v8577_v7  ;;  %8945 = vmatprep.mubr.bf16.mxu0 %v8769_v29 }
 0x97d   : > { %8946 = vmatmul.mubr.bf16.vlgmr.msra.gmra.mrb[48].mxu0 %v8768_v1  ;;  %v13626_v55 = vpop.eup %13625  ;;  %13635 = vrcp.f32 %v8622_v18 }
 0x97e   : > { %v8695_v6 = vmul.f32 %v13626_v55, %v17450_v40  ;;  %v8694_v42 = vmul.f32 %v13626_v55, %v17445_v56  ;;  %v13628_v21 = vpop.eup %13627 }
 0x97f   : > { %v8580_v13 = vpop.xlane.xlu1 %8579  ;;  %v8625_v62 = vpop.xlane.xlu0 %8624  ;;  %v8725_v54 = vmul.f32 %v13628_v21, %v17441_v46  ;;  %v8724_v25 = vmul.f32 %v13628_v21, %v17439_v51 }
 0x980   : > { %13637 = vrcp.f32 %v8625_v62  ;;  %v8755_v5 = vpack.c.bf16 %v8695_v6, %v8693_v19  ;;  %v8754_v44 = vpack.c.bf16 %v8694_v42, %v8692_v32 }
 0x981   : > { %v13630_v52 = vpop.eup %13629  ;;  %13639 = vrcp.f32 %v8580_v13 }
 0x982   : > { %8856 = vmatprep.mubr.bf16.mxu1 %v8755_v5  ;;  %v8727_v61 = vmul.f32 %v13630_v52, %v17457_v12  ;;  %v8726_v40 = vmul.f32 %v13630_v52, %v17455_v24  ;;  %v13632_v41 = vpop.eup %13631 }
 0x983   : > { %v8628_v57 = vpop.xlane.xlu1 %8627  ;;  %v8583_v27 = vpop.xlane.xlu0 %8582  ;;  %8857 = vmatmul.mubr.bf16.gmra.mrb[36].mxu1 %v8754_v44  ;;  %v8697_v7 = vmul.f32 %v13632_v41, %v17466_v14  ;;  %v8696_v12 = vmul.f32 %v13632_v41, %v17461_v53 }
 0x984   : > { %13641 = vrcp.f32 %v8583_v27  ;;  %v8771_v56 = vpack.c.bf16 %v8727_v61, %v8725_v54  ;;  %v8770_v0 = vpack.c.bf16 %v8726_v40, %v8724_v25 }
 0x985   : > { %13643 = vrcp.f32 %v8628_v57 }
 0x986   : > { %v13634_v2 = vpop.eup %13633  ;;  %8953 = vmatprep.mubr.bf16.mxu0 %v8771_v56 }
 0x987   : > { %v8586_v37 = vpop.xlane.xlu1 %8585  ;;  %v8631_v18 = vpop.xlane.xlu0 %8630  ;;  %v8699_v46 = vmul.f32 %v13634_v2, %v17482_v22  ;;  %v8698_v51 = vmul.f32 %v13634_v2, %v17477_v48  ;;  %8954 = vmatmul.mubr.bf16.gmra.mrb[52].mxu0 %v8770_v0 }
 0x988   : > { %v13636_v29 = vpop.eup %13635  ;;  %13645 = vrcp.f32 %v8631_v18 }
 0x989   : > { %v8757_v24 = vpack.c.bf16 %v8699_v46, %v8697_v7  ;;  %v8756_v1 = vpack.c.bf16 %v8698_v51, %v8696_v12  ;;  %13647 = vrcp.f32 %v8586_v37  ;;  %v8729_v62 = vmul.f32 %v13636_v29, %v17473_v20 }
 0x98a   : > { %v13638_v33 = vpop.eup %13637  ;;  %v8728_v22 = vmul.f32 %v13636_v29, %v17471_v16 }
 0x98b   : > { %v8634_v55 = vpop.xlane.xlu1 %8633  ;;  %v8589_v13 = vpop.xlane.xlu0 %8588  ;;  %8864 = vmatprep.mubr.bf16.mxu1 %v8757_v24  ;;  %v8731_v14 = vmul.f32 %v13638_v33, %v17489_v15  ;;  %v8730_v53 = vmul.f32 %v13638_v33, %v17487_v10 }
 0x98c   : > { %v13640_v19 = vpop.eup %13639  ;;  %13649 = vrcp.f32 %v8589_v13  ;;  %8865 = vmatmul.mubr.bf16.gmra.mrb[40].mxu1 %v8756_v1  ;;  %v19303_v13 = vld [vmem:[#allocation57_spill] sm:$0xff] }
 0x98d   : > { %v8773_v48 = vpack.c.bf16 %v8731_v14, %v8729_v62  ;;  %v8772_v6 = vpack.c.bf16 %v8730_v53, %v8728_v22  ;;  %13651 = vrcp.f32 %v8634_v55  ;;  %v8701_v5 = vmul.f32 %v13640_v19, %v17498_v23  ;;  %v19304_v14 = vld [vmem:[#allocation59_spill] sm:$0xff] }
 0x98e   : > { %v13642_v32 = vpop.eup %13641  ;;  %v8700_v15 = vmul.f32 %v13640_v19, %v17493_v11 }
 0x98f   : > { %v8592_v42 = vpop.xlane.xlu1 %8591  ;;  %v8637_v21 = vpop.xlane.xlu0 %8636  ;;  %8961 = vmatprep.mubr.bf16.mxu0 %v8773_v48  ;;  %v8703_v20 = vmul.f32 %v13642_v32, %v17514_v58  ;;  %v8702_v16 = vmul.f32 %v13642_v32, %v17509_v30 }
 0x990   : > { %v13644_v44 = vpop.eup %13643  ;;  %13653 = vrcp.f32 %v8637_v21  ;;  %8962 = vmatmul.mubr.bf16.gmra.mrb[56].mxu0 %v8772_v6 }
 0x991   : > { %v8759_v10 = vpack.c.bf16 %v8703_v20, %v8701_v5  ;;  %v8758_v52 = vpack.c.bf16 %v8702_v16, %v8700_v15  ;;  %13655 = vrcp.f32 %v8592_v42  ;;  %v8733_v61 = vmul.f32 %v13644_v44, %v17505_v17 }
 0x992   : > { %v13646_v57 = vpop.eup %13645  ;;  %v8732_v58 = vmul.f32 %v13644_v44, %v17503_v60 }
 0x993   : > { %v8640_v27 = vpop.xlane.xlu1 %8639  ;;  %8872 = vmatprep.mubr.bf16.mxu1 %v8759_v10  ;;  %v8735_v23 = vmul.f32 %v13646_v57, %v17521_v31  ;;  %v8734_v11 = vmul.f32 %v13646_v57, %v17519_v59  ;;  %v13648_v25 = vpop.eup %13647 }
 0x994   : > { %v8595_v54 = vpop.xlane.xlu0 %8594  ;;  %8873 = vmatmul.mubr.bf16.gmra.mrb[44].mxu1 %v8758_v52  ;;  %v8705_v2 = vmul.f32 %v13648_v25, %v17530_v26  ;;  %v8704_v31 = vmul.f32 %v13648_v25, %v17525_v8  ;;  %v19308_v25 = vld [vmem:[#allocation58_spill] sm:$0xff] }
 0x995   : > { %13657 = vrcp.f32 %v8595_v54  ;;  %v8775_v30 = vpack.c.bf16 %v8735_v23, %v8733_v61  ;;  %v8774_v40 = vpack.c.bf16 %v8734_v11, %v8732_v58  ;;  %v19306_v61 = vld [vmem:[#allocation60_spill] sm:$0xff]  ;;  %v19307_v58 = vld [vmem:[#allocation63_spill] sm:$0xff] }
 0x996   : > { %v13650_v41 = vpop.eup %13649  ;;  %13659 = vrcp.f32 %v8640_v27 }
 0x997   : > { %v8598_v56 = vpop.xlane.xlu1 %8597  ;;  %8969 = vmatprep.mubr.bf16.mxu0 %v8775_v30  ;;  %v8707_v17 = vmul.f32 %v13650_v41, %v17546_v28  ;;  %v8706_v60 = vmul.f32 %v13650_v41, %v17541_v4  ;;  %v13652_v37 = vpop.eup %13651  ;;  %v19309_v30 = vld [vmem:[#allocation62_spill] sm:$0xff] }
 0x998   : > { %v8643_v0 = vpop.xlane.xlu0 %8642  ;;  %8970 = vmatmul.mubr.bf16.gmra.mrb[60].mxu0 %v8774_v40  ;;  %v8737_v51 = vmul.f32 %v13652_v37, %v17537_v49  ;;  %v8736_v28 = vmul.f32 %v13652_v37, %v17535_v38 }
 0x999   : > { %13661 = vrcp.f32 %v8643_v0  ;;  %v8761_v59 = vpack.c.bf16 %v8707_v17, %v8705_v2  ;;  %v8760_v18 = vpack.c.bf16 %v8706_v60, %v8704_v31  ;;  %v19310_v0 = vld [vmem:[#allocation65_spill] sm:$0xff]  ;;  %v19311_v17 = vld [vmem:[#allocation68_spill] sm:$0xff] }
 0x99a   : > { %13663 = vrcp.f32 %v8598_v56  ;;  %v13654_v7 = vpop.eup %13653  ;;  %v19312_v60 = vld [vmem:[#allocation64_spill] sm:$0xff] }
 0x99b   : > { %v8646_v46 = vpop.xlane.xlu1 %8645  ;;  %8880 = vmatprep.mubr.bf16.mxu1 %v8761_v59  ;;  %v8739_v26 = vmul.f32 %v13654_v7, %v17553_v63  ;;  %v8738_v8 = vmul.f32 %v13654_v7, %v17551_v36  ;;  %v13656_v29 = vpop.eup %13655  ;;  %v19313_v59 = vld [vmem:[#allocation66_spill] sm:$0xff] }
 0x99c   : > { %v8601_v12 = vpop.xlane.xlu0 %8600  ;;  %8881 = vmatmul.mubr.bf16.gmra.mrb[48].mxu1 %v8760_v18  ;;  %v8709_v62 = vmul.f32 %v13656_v29, %v19303_v13  ;;  %v8708_v63 = vmul.f32 %v13656_v29, %v19304_v14  ;;  %v19316_v29 = vld [vmem:[#allocation67_spill] sm:$0xff]  ;;  %v19318_v13 = vmov 0  }
 0x99d   : > { %13665 = vrcp.f32 %v8601_v12  ;;  %v8777_v4 = vpack.c.bf16 %v8739_v26, %v8737_v51  ;;  %v8776_v24 = vpack.c.bf16 %v8738_v8, %v8736_v28  ;;  %v19314_v51 = vld [vmem:[#allocation69_spill] sm:$0xff]  ;;  %v19315_v28 = vld [vmem:[#allocation71_spill] sm:$0xff] }
 0x99e   : > { %13667 = vrcp.f32 %v8646_v46 }
 0x99f   : > { %v13658_v1 = vpop.eup %13657  ;;  %v8604_v33 = vpop.xlane.xlu1 %8603  ;;  %8977 = vmatprep.mubr.bf16.mxu0 %v8777_v4 }
 0x9a0   : > { %v8649_v55 = vpop.xlane.xlu0 %8648  ;;  %v8711_v49 = vmul.f32 %v13658_v1, %v17578_v34  ;;  %v8710_v38 = vmul.f32 %v13658_v1, %v17573_v9  ;;  %v13660_v22 = vpop.eup %13659  ;;  %8978 = vmatmul.mubr.bf16.gmra.mrb[64].mxu0 %v8776_v24  ;;  %v19305_v34 = vld [vmem:[#allocation61_spill] sm:$0xff]  ;;  %v19317_v24 = vld [vmem:[#allocation70_spill] sm:$0xff] }
 0x9a1   : > { %13669 = vrcp.f32 %v8649_v55  ;;  %v8741_v42 = vmul.f32 %v13660_v22, %v17569_v45  ;;  %v8740_v5 = vmul.f32 %v13660_v22, %v19305_v34 }
 0x9a2   : > { %v8763_v36 = vpack.c.bf16 %v8711_v49, %v8709_v62  ;;  %v8762_v53 = vpack.c.bf16 %v8710_v38, %v8708_v63  ;;  %13671 = vrcp.f32 %v8604_v33 }
 0x9a3   : > { %v13662_v19 = vpop.eup %13661  ;;  %v8652_v48 = vpop.xlane.xlu1 %8651 }
 0x9a4   : > { %v8607_v6 = vpop.xlane.xlu0 %8606  ;;  %v13664_v32 = vpop.eup %13663  ;;  %8888 = vmatprep.mubr.bf16.mxu1 %v8763_v36  ;;  %v8743_v21 = vmul.f32 %v13662_v19, %v17585_v3  ;;  %v8742_v20 = vmul.f32 %v13662_v19, %v17583_v43  ;;  %v13440_v19 = vld [vmem:[#allocation17 + $0x8] sm:$0xff]  }
 0x9a5   : > { %13673 = vrcp.f32 %v8607_v6  ;;  %8889 = vmatmul.mubr.bf16.gmra.mrb[52].mxu1 %v8762_v53  ;;  %v8713_v10 = vmul.f32 %v13664_v32, %v17593_v35  ;;  %v8712_v45 = vmul.f32 %v13664_v32, %v17589_v39  ;;  %v13439_v53 = vld [vmem:[#allocation17] sm:$0xff]  }
 0x9a6   : > { %13675 = vrcp.f32 %v8652_v48  ;;  %v8779_v9 = vpack.c.bf16 %v8743_v21, %v8741_v42  ;;  %v8778_v15 = vpack.c.bf16 %v8742_v20, %v8740_v5  ;;  %v19133_v48 = vmov 0.0   ;;  %12981 = vmatprep.subr.bf16.mxu1 %v13439_v53  ;;  %v19319_v20 = vld [vmem:[#allocation55_spill] sm:$0xff] }
 0x9a7   : > { %v13666_v16 = vpop.eup %13665  ;;  %12982 = vmatpush3.bf16.msra.mxu1 %v13439_v53 }
 0x9a8   : > { %v8655_v44 = vpop.xlane.xlu0 %8654  ;;  %8985 = vmatprep.mubr.bf16.mxu0 %v8779_v9  ;;  %v8715_v52 = vmul.f32 %v13666_v16, %v17605_v50  ;;  %v8714_v3 = vmul.f32 %v13666_v16, %v17603_v47  ;;  %v13668_v57 = vpop.eup %13667  ;;  %12983 = vmatprep.subr.bf16.mxu1 %v13440_v19 }
 0x9a9   : > { %13677 = vrcp.f32 %v8655_v44  ;;  %8986 = vmatmul.mubr.bf16.gmra.mrb[68].mxu0 %v8778_v15  ;;  %v8745_v23 = vmul.f32 %v13668_v57, %v19306_v61  ;;  %v8744_v35 = vmul.f32 %v13668_v57, %v19308_v25 }
 0x9aa   : > { %v8765_v43 = vpack.c.bf16 %v8715_v52, %v8713_v10  ;;  %v8764_v27 = vpack.c.bf16 %v8714_v3, %v8712_v45  ;;  %v13441_v10 = vld [vmem:[#allocation17 + $0x10] sm:$0xff]  }
 0x9ab   : > { %v13670_v54 = vpop.eup %13669  ;;  %12984 = vmatpush3.bf16.msra.mxu1 %v13440_v19 }
 0x9ac   : > { %8896 = vmatprep.mubr.bf16.mxu1 %v8765_v43  ;;  %v8747_v11 = vmul.f32 %v13670_v54, %v19307_v58  ;;  %v8746_v40 = vmul.f32 %v13670_v54, %v19309_v30  ;;  %v13672_v41 = vpop.eup %13671  ;;  %v19320_v58 = vld [vmem:[#allocation56_spill] sm:$0xff]  ;;  %12985 = vmatprep.subr.bf16.mxu1 %v13441_v10 }
 0x9ad   : > { %8897 = vmatmul.mubr.bf16.gmra.mrb[56].mxu1 %v8764_v27  ;;  %v8717_v2 = vmul.f32 %v13672_v41, %v19310_v0  ;;  %v8716_v37 = vmul.f32 %v13672_v41, %v19312_v60  ;;  %v13442_v41 = vld [vmem:[#allocation17 + $0x18] sm:$0xff]  }
 0x9ae   : > { %v8781_v50 = vpack.c.bf16 %v8747_v11, %v8745_v23  ;;  %v8780_v39 = vpack.c.bf16 %v8746_v40, %v8744_v35 }
 0x9af   : > { %v13674_v56 = vpop.eup %13673  ;;  %12986 = vmatpush3.bf16.msra.mxu1 %v13441_v10 }
 0x9b0   : > { %v13676_v47 = vpop.eup %13675  ;;  %8993 = vmatprep.mubr.bf16.mxu0 %v8781_v50  ;;  %v8719_v31 = vmul.f32 %v13674_v56, %v19311_v17  ;;  %v8718_v18 = vmul.f32 %v13674_v56, %v19313_v59  ;;  %12987 = vmatprep.subr.bf16.mxu1 %v13442_v41 }
 0x9b1   : > { %8994 = vmatmul.mubr.bf16.gmra.mrb[72].mxu0 %v8780_v39  ;;  %v8749_v26 = vmul.f32 %v13676_v47, %v19314_v51  ;;  %v8748_v4 = vmul.f32 %v13676_v47, %v19316_v29 }
 0x9b2   : > { %v8767_v46 = vpack.c.bf16 %v8719_v31, %v8717_v2  ;;  %v8766_v12 = vpack.c.bf16 %v8718_v18, %v8716_v37 }
 0x9b3   : > { %v13678_v7 = vpop.eup %13677  ;;  %12988 = vmatpush3.bf16.msra.mxu1 %v13442_v41 }
 0x9b4   : > { %v8751_v8 = vmul.f32 %v13678_v7, %v19315_v28  ;;  %v8750_v1 = vmul.f32 %v13678_v7, %v19317_v24  ;;  %8904 = vmatprep.mubr.bf16.mxu1 %v8767_v46 }
 0x9b5   : > { %8905 = vmatmul.mubr.bf16.gmra.mrb[60].mxu1 %v8766_v12 }
 0x9b6   : > { %v8783_v33 = vpack.c.bf16 %v8751_v8, %v8749_v26  ;;  %v8782_v55 = vpack.c.bf16 %v8750_v1, %v8748_v4  ;;  %v13443_v4 = vld [vmem:[#allocation17 + $0x20] sm:$0xff]  }
 0x9b7   : > { %12989 = vmatprep.subr.bf16.mxu1 %v13443_v4 }
 0x9b8   : > { %9001 = vmatprep.mubr.bf16.mxu0 %v8783_v33  ;;  %12990 = vmatpush3.bf16.msra.mxu1 %v13443_v4 }
 0x9b9   : > { %9002 = vmatmul.mubr.bf16.gmra.mrb[76].mxu0 %v8782_v55 }
 0x9ba   : > { %11509 = vmatprep.mubr.bf16.mxu0 %v19318_v13 }
 0xa4a   : > { %v12757_v62 = vpop.f32.mrb[32].mxu1 }
 0xa4b   : > { %v12758_v49 = vpop.f32.mrb[33].mxu1 }
 0xa4c   : > { %v12759_v14 = vadd.f32 %v12758_v49, %v12757_v62  ;;  %v12760_v63 = vpop.f32.mrb[34].mxu1 }
 0xa4d   : > { %v12761_v38 = vpop.f32.mrb[35].mxu1 }
 0xa4e   : > { %v12762_v22 = vadd.f32 %v12761_v38, %v12760_v63  ;;  %v9010_v6 = vcombine.high %v12759_v14, %v19133_v48  ;;  %v9017_v9 = vrot.slane %v12759_v14, %v19319_v20 }
 0xa50   : > { %v12821_v36 = vpop.f32.mrb[48].mxu0  ;;  %v9076_v34 = vcombine.high %v12762_v22, %v19133_v48  ;;  %v9024_v52 = vrot.slane %v9010_v6, %v19319_v20  ;;  %v9083_v27 = vrot.slane %v12762_v22, %v19319_v20 }
 0xa51   : > { %v12822_v32 = vpop.f32.mrb[49].mxu0 }
 0xa52   : > { %v12823_v42 = vadd.f32 %v12822_v32, %v12821_v36  ;;  %v12824_v21 = vpop.f32.mrb[50].mxu0  ;;  %v9090_v54 = vrot.slane %v9076_v34, %v19319_v20 }
 0xa53   : > { %v12825_v5 = vpop.f32.mrb[51].mxu0 }
 0xa54   : > { %v9025_v15 = vcombine.high %v12823_v42, %v19133_v48  ;;  %v9032_v16 = vrot.slane %v12823_v42, %v19319_v20  ;;  %v12826_v44 = vadd.f32 %v12825_v5, %v12824_v21 }
 0xa56   : > { %v9039_v45 = vrot.slane %v9025_v15, %v19319_v20  ;;  %v9040_v3 = vcombine.low %v9017_v9, %v9032_v16  ;;  %v9041_v57 = vcombine.high %v9017_v9, %v9032_v16  ;;  %v9091_v43 = vcombine.high %v12826_v44, %v19133_v48  ;;  %v12763_v23 = vpop.f32.mrb[36].mxu1  ;;  %v13444_v15 = vld [vmem:[#allocation17 + $0x28] sm:$0xff]  }
 0xa57   : > { %v9098_v61 = vrot.slane %v12826_v44, %v19319_v20  ;;  %v12764_v40 = vpop.f32.mrb[37].mxu1  ;;  %12991 = vmatprep.subr.bf16.mxu1 %v13444_v15 }
 0xa58   : > { %v9048_v11 = vrot.slane %v9040_v3, %v19320_v58  ;;  %v9055_v25 = vrot.slane %v9041_v57, %v19320_v58  ;;  %v9056_v35 = vcombine.low %v9024_v52, %v9039_v45  ;;  %v9057_v30 = vcombine.high %v9024_v52, %v9039_v45  ;;  %v12766_v0 = vpop.f32.mrb[38].mxu1  ;;  %12992 = vmatpush3.bf16.msra.mxu1 %v13444_v15 }
 0xa59   : > { %v9105_v50 = vrot.slane %v9091_v43, %v19319_v20  ;;  %v9106_v39 = vcombine.low %v9083_v27, %v9098_v61  ;;  %v9107_v56 = vcombine.high %v9083_v27, %v9098_v61  ;;  %v12765_v47 = vadd.f32 %v12764_v40, %v12763_v23  ;;  %v12767_v37 = vpop.f32.mrb[39].mxu1 }
 0xa5a   : > { %v9064_v2 = vrot.slane %v9056_v35, %v19320_v58  ;;  %v9071_v17 = vrot.slane %v9057_v30, %v19320_v58  ;;  %v10066_v31 = vcombine.low %v9048_v11, %v9055_v25  ;;  %v12546_v60 = vcombine.high %v9048_v11, %v9055_v25  ;;  %v12827_v12 = vpop.f32.mrb[52].mxu0 }
 0xa5b   : > { %v9114_v59 = vrot.slane %v9106_v39, %v19320_v58  ;;  %v9121_v18 = vrot.slane %v9107_v56, %v19320_v58  ;;  %v9122_v7 = vcombine.low %v9090_v54, %v9105_v50  ;;  %v9123_v46 = vcombine.high %v9090_v54, %v9105_v50  ;;  %v12828_v29 = vpop.f32.mrb[53].mxu0  ;;  %v13445_v56 = vld [vmem:[#allocation17 + $0x30] sm:$0xff]  }
 0xa5c   : > { %v17725_v51 = vrot.slane %v10066_v31, %v19319_v20  ;;  %v17728_v26 = vrot.slane %v12546_v60, %v19319_v20  ;;  %v10082_v28 = vcombine.low %v9064_v2, %v9071_v17  ;;  %v12547_v8 = vcombine.high %v9064_v2, %v9071_v17  ;;  %v12830_v62 = vpop.f32.mrb[54].mxu0  ;;  %12993 = vmatprep.subr.bf16.mxu1 %v13445_v56 }
 0xa5d   : > { %v17731_v24 = vrot.slane %v9122_v7, %v19320_v58  ;;  %v17734_v1 = vrot.slane %v9123_v46, %v19320_v58  ;;  %v10116_v33 = vcombine.low %v9114_v59, %v9121_v18  ;;  %v12548_v55 = vcombine.high %v9114_v59, %v9121_v18  ;;  %v12831_v22 = vpop.f32.mrb[55].mxu0  ;;  %12994 = vmatpush3.bf16.msra.mxu1 %v13445_v56 }
 0xa5e   : > { %v9142_v49 = vcombine.high %v12765_v47, %v19133_v48  ;;  %v9149_v14 = vrot.slane %v12765_v47, %v19319_v20  ;;  %v12768_v63 = vadd.f32 %v12767_v37, %v12766_v0  ;;  %v12829_v38 = vadd.f32 %v12828_v29, %v12827_v12 }
 0xa5f   : > { %v17739_v36 = vrot.slane %v10116_v33, %v19319_v20  ;;  %v17742_v53 = vrot.slane %v12548_v55, %v19319_v20  ;;  %v10132_v19 = vcombine.low %v17731_v24, %v17734_v1  ;;  %v12549_v6 = vcombine.high %v17731_v24, %v17734_v1  ;;  %v12769_v32 = vpop.f32.mrb[40].mxu1 }
 0xa60   : > { %v9156_v42 = vrot.slane %v9142_v49, %v19319_v20  ;;  %v9208_v21 = vcombine.high %v12768_v63, %v19133_v48  ;;  %v9215_v34 = vrot.slane %v12768_v63, %v19319_v20  ;;  %v9157_v5 = vcombine.high %v12829_v38, %v19133_v48  ;;  %v12770_v9 = vpop.f32.mrb[41].mxu1 }
 0xa61   : > { %v9164_v16 = vrot.slane %v12829_v38, %v19319_v20  ;;  %v12832_v44 = vadd.f32 %v12831_v22, %v12830_v62  ;;  %v12771_v10 = vadd.f32 %v12770_v9, %v12769_v32  ;;  %v12772_v52 = vpop.f32.mrb[42].mxu1  ;;  %v17754_v45 = vrot.slane %v10082_v28, %v19319_v20 }
 0xa62   : > { %v9222_v3 = vrot.slane %v9208_v21, %v19319_v20  ;;  %v9171_v57 = vrot.slane %v9157_v5, %v19319_v20  ;;  %v12773_v43 = vpop.f32.mrb[43].mxu1  ;;  %v17759_v27 = vrot.slane %v12547_v8, %v19319_v20  ;;  %v10098_v54 = vcombine.low %v17725_v51, %v17728_v26 }
 0xa63   : > { %v9172_v61 = vcombine.low %v9149_v14, %v9164_v16  ;;  %v9173_v23 = vcombine.high %v9149_v14, %v9164_v16  ;;  %v9223_v11 = vcombine.high %v12832_v44, %v19133_v48  ;;  %v9230_v25 = vrot.slane %v12832_v44, %v19319_v20  ;;  %v12833_v35 = vpop.f32.mrb[56].mxu0 }
 0xa64   : > { %v9188_v30 = vcombine.low %v9156_v42, %v9171_v57  ;;  %v9189_v40 = vcombine.high %v9156_v42, %v9171_v57  ;;  %v9274_v41 = vcombine.high %v12771_v10, %v19133_v48  ;;  %v17767_v50 = vrot.slane %v12771_v10, %v19319_v20  ;;  %v12834_v39 = vpop.f32.mrb[57].mxu0 }
 0xa65   : > { %v9180_v47 = vrot.slane %v9172_v61, %v19320_v58  ;;  %v9187_v0 = vrot.slane %v9173_v23, %v19320_v58  ;;  %v9237_v2 = vrot.slane %v9223_v11, %v19319_v20  ;;  %v9238_v17 = vcombine.low %v9215_v34, %v9230_v25  ;;  %v12836_v31 = vpop.f32.mrb[58].mxu0 }
 0xa66   : > { %v17773_v60 = vrot.slane %v9188_v30, %v19320_v58  ;;  %v17776_v37 = vrot.slane %v9189_v40, %v19320_v58  ;;  %v9239_v59 = vcombine.high %v9215_v34, %v9230_v25  ;;  %v17779_v18 = vrot.slane %v9274_v41, %v19319_v20  ;;  %v12837_v7 = vpop.f32.mrb[59].mxu0 }
 0xa67   : > { %v10166_v46 = vcombine.low %v9180_v47, %v9187_v0  ;;  %v12550_v12 = vcombine.high %v9180_v47, %v9187_v0  ;;  %v9246_v28 = vrot.slane %v9238_v17, %v19320_v58  ;;  %v9254_v8 = vcombine.low %v9222_v3, %v9237_v2  ;;  %v12775_v29 = vpop.f32.mrb[44].mxu1 }
 0xa68   : > { %v10182_v4 = vcombine.low %v17773_v60, %v17776_v37  ;;  %v12551_v33 = vcombine.high %v17773_v60, %v17776_v37  ;;  %v9253_v55 = vrot.slane %v9239_v59, %v19320_v58  ;;  %v9255_v62 = vcombine.high %v9222_v3, %v9237_v2  ;;  %v12776_v49 = vpop.f32.mrb[45].mxu1 }
 0xa69   : > { %v17788_v14 = vrot.slane %v10166_v46, %v19319_v20  ;;  %v17791_v63 = vrot.slane %v12550_v12, %v19319_v20  ;;  %v17794_v38 = vrot.slane %v9254_v8, %v19320_v58  ;;  %v12774_v22 = vadd.f32 %v12773_v43, %v12772_v52  ;;  %v12778_v32 = vpop.f32.mrb[46].mxu1 }
 0xa6a   : > { %v17797_v42 = vrot.slane %v9255_v62, %v19320_v58  ;;  %v10216_v21 = vcombine.low %v9246_v28, %v9253_v55  ;;  %v12552_v34 = vcombine.high %v9246_v28, %v9253_v55  ;;  %v12835_v5 = vadd.f32 %v12834_v39, %v12833_v35  ;;  %v12779_v9 = vpop.f32.mrb[47].mxu1 }
 0xa6b   : > { %v9340_v15 = vcombine.high %v12774_v22, %v19133_v48  ;;  %v9347_v16 = vrot.slane %v12774_v22, %v19319_v20  ;;  %v12838_v44 = vadd.f32 %v12837_v7, %v12836_v31  ;;  %v12777_v10 = vadd.f32 %v12776_v49, %v12775_v29  ;;  %v12839_v3 = vpop.f32.mrb[60].mxu0 }
 0xa6c   : > { %v17802_v57 = vrot.slane %v10216_v21, %v19319_v20  ;;  %v17805_v52 = vrot.slane %v12552_v34, %v19319_v20  ;;  %v12840_v23 = vpop.f32.mrb[61].mxu0  ;;  %v9289_v25 = vcombine.high %v12835_v5, %v19133_v48  ;;  %v9296_v35 = vrot.slane %v12835_v5, %v19319_v20 }
 0xa6d   : > { %v9354_v11 = vrot.slane %v9340_v15, %v19319_v20  ;;  %v9355_v30 = vcombine.high %v12838_v44, %v19133_v48  ;;  %v12842_v40 = vpop.f32.mrb[62].mxu0  ;;  %v9362_v41 = vrot.slane %v12838_v44, %v19319_v20  ;;  %v9406_v39 = vcombine.high %v12777_v10, %v19133_v48 }
 0xa6e   : > { %v17818_v56 = vrot.slane %v12777_v10, %v19319_v20  ;;  %v12780_v47 = vadd.f32 %v12779_v9, %v12778_v32  ;;  %v12843_v0 = vpop.f32.mrb[63].mxu0  ;;  %v9303_v2 = vrot.slane %v9289_v25, %v19319_v20  ;;  %v9304_v17 = vcombine.low %v17767_v50, %v9296_v35 }
 0xa6f   : > { %v9305_v31 = vcombine.high %v17767_v50, %v9296_v35  ;;  %v9369_v59 = vrot.slane %v9355_v30, %v19319_v20  ;;  %v12781_v7 = vpop.f32.mrb[48].mxu1  ;;  %v9370_v46 = vcombine.low %v9347_v16, %v9362_v41  ;;  %v9371_v12 = vcombine.high %v9347_v16, %v9362_v41 }
 0xa70   : > { %v17825_v28 = vrot.slane %v9406_v39, %v19319_v20  ;;  %v9472_v8 = vcombine.high %v12780_v47, %v19133_v48  ;;  %v12782_v29 = vpop.f32.mrb[49].mxu1  ;;  %v9312_v55 = vrot.slane %v9304_v17, %v19320_v58  ;;  %v9320_v49 = vcombine.low %v17779_v18, %v9303_v2 }
 0xa71   : > { %v9319_v62 = vrot.slane %v9305_v31, %v19320_v58  ;;  %v9321_v22 = vcombine.high %v17779_v18, %v9303_v2  ;;  %v12784_v50 = vpop.f32.mrb[50].mxu1  ;;  %v9378_v32 = vrot.slane %v9370_v46, %v19320_v58  ;;  %v9385_v21 = vrot.slane %v9371_v12, %v19320_v58  ;;  %v13446_v46 = vld [vmem:[#allocation17 + $0x38] sm:$0xff]  }
 0xa72   : > { %v9386_v34 = vcombine.low %v9354_v11, %v9369_v59  ;;  %v9387_v5 = vcombine.high %v9354_v11, %v9369_v59  ;;  %v12785_v9 = vpop.f32.mrb[51].mxu1  ;;  %v17835_v15 = vrot.slane %v9320_v49, %v19320_v58  ;;  %12995 = vmatprep.subr.bf16.mxu1 %v13446_v46  ;;  %v10148_v51 = vcombine.low %v17739_v36, %v17742_v53 }
 0xa73   : > { %v17838_v16 = vrot.slane %v9321_v22, %v19320_v58  ;;  %v10266_v44 = vcombine.low %v9312_v55, %v9319_v62  ;;  %v12554_v10 = vcombine.high %v9312_v55, %v9319_v62  ;;  %v17840_v25 = vpop.f32.mrb[64].mxu0  ;;  %v10316_v30 = vcombine.low %v9378_v32, %v9385_v21  ;;  %12996 = vmatpush3.bf16.msra.mxu1 %v13446_v46 }
 0xa74   : > { %v17843_v18 = vrot.slane %v9386_v34, %v19320_v58  ;;  %v17846_v35 = vrot.slane %v9387_v5, %v19320_v58  ;;  %v12556_v41 = vcombine.high %v9378_v32, %v9385_v21  ;;  %v17848_v11 = vpop.f32.mrb[65].mxu0  ;;  %v9479_v32 = vrot.slane %v12780_v47, %v19319_v20 }
 0xa75   : > { %v17851_v39 = vrot.slane %v10266_v44, %v19319_v20  ;;  %v17854_v2 = vrot.slane %v12554_v10, %v19319_v20  ;;  %v17860_v59 = vpop.f32.mrb[66].mxu0  ;;  %v17863_v12 = vrot.slane %v10316_v30, %v19319_v20  ;;  %v17876_v21 = vrot.slane %v9472_v8, %v19319_v20 }
 0xa76   : > { %v17866_v55 = vrot.slane %v12556_v41, %v19319_v20  ;;  %v17872_v22 = vpop.f32.mrb[67].mxu0  ;;  %v12841_v34 = vadd.f32 %v12840_v23, %v12839_v3  ;;  %v17882_v5 = vrot.slane %v10098_v54, %v19320_v58  ;;  %v10106_v10 = vcombine.low %v17754_v45, %v17759_v27 }
 0xa77   : > { %v10139_v47 = vrot.slane %v10132_v19, %v19319_v20  ;;  %v10147_v3 = vrot.slane %v12549_v6, %v19319_v20  ;;  %v12844_v27 = vadd.f32 %v12843_v0, %v12842_v40  ;;  %v12783_v23 = vadd.f32 %v12782_v29, %v12781_v7 }
 0xa78   : > { %v17884_v44 = vpop.f32.mrb[52].mxu1  ;;  %v9421_v54 = vcombine.high %v12841_v34, %v19133_v48  ;;  %v9428_v45 = vrot.slane %v12841_v34, %v19319_v20  ;;  %v17905_v19 = vrot.slane %v10106_v10, %v19320_v58  ;;  %v17908_v24 = vrot.slane %v10148_v51, %v19320_v58 }
 0xa79   : > { %v17898_v26 = vpop.f32.mrb[53].mxu1  ;;  %v10156_v1 = vcombine.low %v10139_v47, %v10147_v3  ;;  %v12786_v6 = vadd.f32 %v12785_v9, %v12784_v50  ;;  %v9487_v40 = vcombine.high %v12844_v27, %v19133_v48  ;;  %v9494_v50 = vrot.slane %v12844_v27, %v19319_v20 }
 0xa7a   : > { %v17902_v8 = vpop.f32.mrb[54].mxu1  ;;  %19321 = vst [vmem:[#allocation57_spill] sm:$0xff] %v17908_v24  ;;  %v9435_v53 = vrot.slane %v9421_v54, %v19319_v20  ;;  %v9436_v30 = vcombine.low %v17818_v56, %v9428_v45  ;;  %v9437_v41 = vcombine.high %v17818_v56, %v9428_v45  ;;  %v10115_v7 = vcombine.high %v17882_v5, %v17905_v19 }
 0xa7b   : > { %v17910_v36 = vpop.f32.mrb[55].mxu1  ;;  %v17921_v29 = vrot.slane %v10156_v1, %v19320_v58  ;;  %v9538_v9 = vcombine.high %v12783_v23, %v19133_v48  ;;  %v9501_v54 = vrot.slane %v9487_v40, %v19319_v20  ;;  %v9502_v45 = vcombine.low %v9479_v32, %v9494_v50 }
 0xa7c   : > { %v17916_v0 = vpop.f32.mrb[68].mxu0  ;;  %v9444_v34 = vrot.slane %v9436_v30, %v19320_v58  ;;  %v9451_v56 = vrot.slane %v9437_v41, %v19320_v58  ;;  %v9452_v10 = vcombine.low %v17825_v28, %v9435_v53  ;;  %v9453_v47 = vcombine.high %v17825_v28, %v9435_v53 }
 0xa7d   : > { %19322 = vst [vmem:[#allocation59_spill] sm:$0xff] %v17921_v29  ;;  %v17925_v46 = vpop.f32.mrb[69].mxu0  ;;  %v10165_v51 = vcombine.high %v17908_v24, %v17921_v29  ;;  %v9503_v27 = vcombine.high %v9479_v32, %v9494_v50  ;;  %v9510_v31 = vrot.slane %v9502_v45, %v19320_v58  ;;  %v9518_v40 = vcombine.low %v17876_v21, %v9501_v54 }
 0xa7e   : > { %v17931_v3 = vpop.f32.mrb[70].mxu0  ;;  %v17939_v49 = vrot.slane %v9452_v10, %v19320_v58  ;;  %v17942_v30 = vrot.slane %v9453_v47, %v19320_v58  ;;  %v10366_v41 = vcombine.low %v9444_v34, %v9451_v56  ;;  %v12558_v62 = vcombine.high %v9444_v34, %v9451_v56 }
 0xa7f   : > { %v17936_v1 = vpop.f32.mrb[71].mxu0  ;;  %v13391_v53 = vpack.i.bf16 %v10165_v51, %v10115_v7  ;;  %v9517_v17 = vrot.slane %v9503_v27, %v19320_v58  ;;  %v9519_v47 = vcombine.high %v17876_v21, %v9501_v54  ;;  %v17966_v51 = vrot.slane %v9518_v40, %v19320_v58 }
 0xa80   : > { %v17944_v28 = vpop.f32.mrb[56].mxu1  ;;  %v17952_v50 = vrot.slane %v10366_v41, %v19319_v20  ;;  %v17955_v10 = vrot.slane %v12558_v62, %v19319_v20  ;;  %v9545_v62 = vrot.slane %v12783_v23, %v19319_v20  ;;  %v9552_v34 = vrot.slane %v9538_v9, %v19319_v20 }
 0xa81   : > { %v17949_v32 = vpop.f32.mrb[57].mxu1  ;;  %13392 = vrot.lane.b32.xlu1 %v13391_v53, %s14436_s19  ;;  %v10416_v45 = vcombine.low %v9510_v31, %v9517_v17  ;;  %v12560_v27 = vcombine.high %v9510_v31, %v9517_v17  ;;  %v9604_v61 = vcombine.high %v12786_v6, %v19133_v48  ;;  %v17974_v7 = vrot.slane %v12786_v6, %v19319_v20 }
 0xa82   : > { %v17961_v56 = vpop.f32.mrb[58].mxu1  ;;  %v17979_v21 = vrot.slane %v9519_v47, %v19320_v58  ;;  %v12847_v31 = vadd.f32 %v17848_v11, %v17840_v25  ;;  %v10189_v6 = vrot.slane %v10182_v4, %v19319_v20  ;;  %v10197_v53 = vrot.slane %v12551_v33, %v19319_v20 }
 0xa83   : > { %v17968_v41 = vpop.f32.mrb[59].mxu1  ;;  %v17982_v54 = vrot.slane %v10416_v45, %v19319_v20  ;;  %v17985_v17 = vrot.slane %v12560_v27, %v19319_v20  ;;  %v17992_v9 = vrot.slane %v9604_v61, %v19319_v20  ;;  %v10198_v40 = vcombine.low %v17788_v14, %v17791_v63 }
 0xa84   : > { %v17976_v43 = vpop.f32.mrb[72].mxu0  ;;  %v9553_v11 = vcombine.high %v12847_v31, %v19133_v48  ;;  %v9560_v4 = vrot.slane %v12847_v31, %v19319_v20  ;;  %v10206_v37 = vcombine.low %v10189_v6, %v10197_v53  ;;  %v19324_v33 = vcombine.low %v17794_v38, %v17797_v42 }
 0xa85   : > { %v17989_v23 = vpop.f32.mrb[73].mxu0  ;;  %v18015_v60 = vrot.slane %v10198_v40, %v19320_v58  ;;  %v19325_v63 = vcombine.high %v17794_v38, %v17797_v42  ;;  %v10248_v40 = vcombine.low %v17802_v57, %v17805_v52  ;;  %v12850_v13 = vadd.f32 %v17872_v22, %v17860_v59 }
 0xa86   : > { %v18004_v47 = vpop.f32.mrb[74].mxu0  ;;  %v10239_v14 = vrot.slane %v19324_v33, %v19319_v20  ;;  %v9567_v31 = vrot.slane %v9553_v11, %v19319_v20  ;;  %v9568_v25 = vcombine.low %v9545_v62, %v9560_v4  ;;  %v9569_v48 = vcombine.high %v9545_v62, %v9560_v4 }
 0xa87   : > { %v18012_v45 = vpop.f32.mrb[75].mxu0  ;;  %19323 = vst [vmem:[#allocation61_spill] sm:$0xff] %v18015_v60  ;;  %v10247_v27 = vrot.slane %v19325_v63, %v19319_v20  ;;  %v18033_v53 = vrot.slane %v10206_v37, %v19320_v58  ;;  %v12789_v38 = vadd.f32 %v17898_v26, %v17884_v44  ;;  %v9626_v22 = vrot.slane %v12850_v13, %v19319_v20 }
 0xa88   : > { %v18025_v61 = vpop.f32.mrb[60].mxu1  ;;  %v9576_v11 = vrot.slane %v9568_v25, %v19320_v58  ;;  %v9583_v62 = vrot.slane %v9569_v48, %v19320_v58  ;;  %v9584_v4 = vcombine.low %v9552_v34, %v9567_v31  ;;  %v9585_v57 = vcombine.high %v9552_v34, %v9567_v31 }
 0xa89   : > { %v18030_v6 = vpop.f32.mrb[61].mxu1  ;;  %19326 = vst [vmem:[#allocation60_spill] sm:$0xff] %v18033_v53  ;;  %v10256_v33 = vcombine.low %v10239_v14, %v10247_v27  ;;  %v10215_v37 = vcombine.high %v18015_v60, %v18033_v53  ;;  %v18048_v14 = vrot.slane %v10248_v40, %v19320_v58  ;;  %v19329_v40 = vmov 0.0  }
 0xa8a   : > { %v18039_v42 = vpop.f32.mrb[62].mxu1  ;;  %v18058_v48 = vrot.slane %v9584_v4, %v19320_v58  ;;  %v18061_v26 = vrot.slane %v9585_v57, %v19320_v58  ;;  %v10466_v34 = vcombine.low %v9576_v11, %v9583_v62  ;;  %v12562_v25 = vcombine.high %v9576_v11, %v9583_v62 }
 0xa8b   : > { %v18043_v52 = vpop.f32.mrb[63].mxu1  ;;  %19327 = vst [vmem:[#allocation63_spill] sm:$0xff] %v18048_v14  ;;  %v18051_v59 = vrot.slane %v10256_v33, %v19320_v58  ;;  %v9619_v33 = vcombine.high %v12850_v13, %v19329_v40  ;;  %v9634_v13 = vcombine.low %v17974_v7, %v9626_v22  ;;  %v12792_v24 = vadd.f32 %v17910_v36, %v17902_v8 }
 0xa8c   : > { %v18055_v44 = vpop.f32.mrb[76].mxu0  ;;  %v18074_v4 = vrot.slane %v10466_v34, %v19319_v20  ;;  %v18077_v57 = vrot.slane %v12562_v25, %v19319_v20  ;;  %v9670_v34 = vcombine.high %v12789_v38, %v19329_v40  ;;  %v9677_v25 = vrot.slane %v12789_v38, %v19319_v20 }
 0xa8d   : > { %19328 = vst [vmem:[#allocation58_spill] sm:$0xff] %v18051_v59  ;;  %v18063_v63 = vpop.f32.mrb[77].mxu0  ;;  %v10265_v31 = vcombine.high %v18048_v14, %v18051_v59  ;;  %v9633_v59 = vrot.slane %v9619_v33, %v19319_v20  ;;  %v9635_v14 = vcombine.high %v17974_v7, %v9626_v22  ;;  %v12853_v11 = vadd.f32 %v17925_v46, %v17916_v0 }
 0xa8e   : > { %v18071_v53 = vpop.f32.mrb[78].mxu0  ;;  %v9684_v22 = vrot.slane %v9670_v34, %v19319_v20  ;;  %v9736_v38 = vcombine.high %v12792_v24, %v19329_v40  ;;  %v9743_v62 = vrot.slane %v12792_v24, %v19319_v20  ;;  %v19330_v24 = vcombine.low %v17835_v15, %v17838_v16 }
 0xa8f   : > { %v18083_v27 = vpop.f32.mrb[79].mxu0  ;;  %v13396_v60 = vpack.i.bf16 %v10265_v31, %v10215_v37  ;;  %v9642_v37 = vrot.slane %v9634_v13, %v19320_v58  ;;  %v9649_v31 = vrot.slane %v9635_v14, %v19320_v58  ;;  %v9650_v33 = vcombine.low %v17992_v9, %v9633_v59 }
 0xa90   : > { %v9651_v7 = vcombine.high %v17992_v9, %v9633_v59  ;;  %v9685_v8 = vcombine.high %v12853_v11, %v19329_v40  ;;  %v18110_v14 = vrot.slane %v9736_v38, %v19319_v20  ;;  %v9692_v9 = vrot.slane %v12853_v11, %v19319_v20 }
 0xa91   : > { %13397 = vrot.lane.b32.xlu0 %v13396_v60, %s14436_s19  ;;  %v18104_v36 = vrot.slane %v9650_v33, %v19320_v58  ;;  %v10516_v46 = vcombine.low %v9642_v37, %v9649_v31  ;;  %v12564_v60 = vcombine.high %v9642_v37, %v9649_v31  ;;  %v10289_v13 = vrot.slane %v19330_v24, %v19319_v20 }
 0xa92   : > { %v18107_v0 = vrot.slane %v9651_v7, %v19320_v58  ;;  %v9699_v59 = vrot.slane %v9685_v8, %v19319_v20  ;;  %v9700_v11 = vcombine.low %v9677_v25, %v9692_v9  ;;  %v9701_v7 = vcombine.high %v9677_v25, %v9692_v9 }
 0xa93   : > { %v18119_v34 = vrot.slane %v10516_v46, %v19319_v20  ;;  %v18122_v33 = vrot.slane %v12564_v60, %v19319_v20  ;;  %v19331_v24 = vcombine.high %v17835_v15, %v17838_v16  ;;  %v10298_v46 = vcombine.low %v17851_v39, %v17854_v2 }
 0xa94   : > { %v9716_v38 = vcombine.low %v9684_v22, %v9699_v59  ;;  %v9717_v8 = vcombine.high %v9684_v22, %v9699_v59  ;;  %v19332_v60 = vcombine.low %v17843_v18, %v17846_v35  ;;  %v19333_v31 = vcombine.high %v17843_v18, %v17846_v35 }
 0xa95   : > { %v10297_v29 = vrot.slane %v19331_v24, %v19319_v20  ;;  %v9708_v22 = vrot.slane %v9700_v11, %v19320_v58  ;;  %v9715_v9 = vrot.slane %v9701_v7, %v19320_v58  ;;  %v18151_v39 = vrot.slane %v10298_v46, %v19320_v58 }
 0xa96   : > { %v10339_v37 = vrot.slane %v19332_v60, %v19319_v20  ;;  %v10347_v25 = vrot.slane %v19333_v31, %v19319_v20  ;;  %v18145_v15 = vrot.slane %v9716_v38, %v19320_v58  ;;  %v18148_v16 = vrot.slane %v9717_v8, %v19320_v58 }
 0xa97   : > { %v10306_v2 = vcombine.low %v10289_v13, %v10297_v29  ;;  %v10348_v59 = vcombine.low %v17863_v12, %v17866_v55  ;;  %v10566_v18 = vcombine.low %v9708_v22, %v9715_v9  ;;  %v12566_v35 = vcombine.high %v9708_v22, %v9715_v9 }
 0xa98   : > { %v10356_v24 = vcombine.low %v10339_v37, %v10347_v25  ;;  %v10582_v31 = vcombine.low %v18145_v15, %v18148_v16  ;;  %v12567_v11 = vcombine.high %v18145_v15, %v18148_v16  ;;  %v12856_v12 = vadd.f32 %v17936_v1, %v17931_v3 }
 0xa99   : > { %v18160_v7 = vrot.slane %v10306_v2, %v19320_v58  ;;  %v18163_v38 = vrot.slane %v10348_v59, %v19320_v58  ;;  %v18171_v55 = vrot.slane %v10566_v18, %v19319_v20  ;;  %v18174_v13 = vrot.slane %v12566_v35, %v19319_v20 }
 0xa9a   : > { %v18166_v29 = vrot.slane %v10356_v24, %v19320_v58  ;;  %v12795_v37 = vadd.f32 %v17949_v32, %v17944_v28  ;;  %v12798_v8 = vadd.f32 %v17968_v41, %v17961_v56  ;;  %v9751_v3 = vcombine.high %v12856_v12, %v19329_v40 }
 0xa9b   : > { %v10315_v46 = vcombine.high %v18151_v39, %v18160_v7  ;;  %v9758_v1 = vrot.slane %v12856_v12, %v19319_v20  ;;  %v12859_v18 = vadd.f32 %v17989_v23, %v17976_v43  ;;  %v19334_v35 = vcombine.low %v17939_v49, %v17942_v30 }
 0xa9c   : > { %v10365_v60 = vcombine.high %v18163_v38, %v18166_v29  ;;  %v9802_v25 = vcombine.high %v12795_v37, %v19329_v40  ;;  %v9809_v22 = vrot.slane %v12795_v37, %v19319_v20  ;;  %v9868_v9 = vcombine.high %v12798_v8, %v19329_v40 }
 0xa9d   : > { %v18190_v28 = vrot.slane %v12798_v8, %v19319_v20  ;;  %v9765_v56 = vrot.slane %v9751_v3, %v19319_v20  ;;  %v9766_v41 = vcombine.low %v9743_v62, %v9758_v1  ;;  %v9767_v2 = vcombine.high %v9743_v62, %v9758_v1 }
 0xa9e   : > { %v13401_v32 = vpack.i.bf16 %v10365_v60, %v10315_v46  ;;  %v9816_v59 = vrot.slane %v9802_v25, %v19319_v20  ;;  %v18195_v24 = vrot.slane %v9868_v9, %v19319_v20  ;;  %v10389_v12 = vrot.slane %v19334_v35, %v19319_v20 }
 0xa9f   : > { %v9774_v37 = vrot.slane %v9766_v41, %v19320_v58  ;;  %v9781_v8 = vrot.slane %v9767_v2, %v19320_v58  ;;  %v9782_v62 = vcombine.low %v18110_v14, %v9765_v56  ;;  %v9783_v46 = vcombine.high %v18110_v14, %v9765_v56 }
 0xaa0   : > { %13402 = vrot.lane.b32.xlu1 %v13401_v32, %s14436_s19  ;;  %v9817_v60 = vcombine.high %v12859_v18, %v19329_v40  ;;  %v9824_v3 = vrot.slane %v12859_v18, %v19319_v20  ;;  %v19335_v43 = vcombine.high %v17939_v49, %v17942_v30  ;;  %v10398_v1 = vcombine.low %v17952_v50, %v17955_v10 }
 0xaa1   : > { %v18217_v25 = vrot.slane %v9782_v62, %v19320_v58  ;;  %v18220_v9 = vrot.slane %v9783_v46, %v19320_v58  ;;  %v10616_v32 = vcombine.low %v9774_v37, %v9781_v8  ;;  %v12568_v14 = vcombine.high %v9774_v37, %v9781_v8 }
 0xaa2   : > { %v10397_v23 = vrot.slane %v19335_v43, %v19319_v20  ;;  %v9831_v56 = vrot.slane %v9817_v60, %v19319_v20  ;;  %v9832_v41 = vcombine.low %v9809_v22, %v9824_v3  ;;  %v9833_v2 = vcombine.high %v9809_v22, %v9824_v3 }
 0xaa3   : > { %v18224_v18 = vrot.slane %v10398_v1, %v19320_v58  ;;  %v18227_v49 = vrot.slane %v10616_v32, %v19319_v20  ;;  %v18230_v30 = vrot.slane %v12568_v14, %v19319_v20  ;;  %v10632_v50 = vcombine.low %v18217_v25, %v18220_v9 }
 0xaa4   : > { %v12569_v10 = vcombine.high %v18217_v25, %v18220_v9  ;;  %v9840_v35 = vrot.slane %v9832_v41, %v19320_v58  ;;  %v9847_v37 = vrot.slane %v9833_v2, %v19320_v58  ;;  %v9848_v22 = vcombine.low %v9816_v59, %v9831_v56 }
 0xaa5   : > { %v9849_v8 = vcombine.high %v9816_v59, %v9831_v56  ;;  %v10406_v62 = vcombine.low %v10389_v12, %v10397_v23  ;;  %v19336_v46 = vcombine.low %v17966_v51, %v17979_v21  ;;  %v19337_v3 = vcombine.high %v17966_v51, %v17979_v21 }
 0xaa6   : > { %v10448_v1 = vcombine.low %v17982_v54, %v17985_v17  ;;  %v18249_v32 = vrot.slane %v9848_v22, %v19320_v58  ;;  %v10666_v59 = vcombine.low %v9840_v35, %v9847_v37  ;;  %v12570_v12 = vcombine.high %v9840_v35, %v9847_v37 }
 0xaa7   : > { %v10439_v60 = vrot.slane %v19336_v46, %v19319_v20  ;;  %v10447_v43 = vrot.slane %v19337_v3, %v19319_v20  ;;  %v18252_v14 = vrot.slane %v9849_v8, %v19320_v58  ;;  %v18255_v23 = vrot.slane %v10406_v62, %v19320_v58 }
 0xaa8   : > { %v18258_v56 = vrot.slane %v10448_v1, %v19320_v58  ;;  %v12862_v51 = vadd.f32 %v18012_v45, %v18004_v47  ;;  %v18263_v21 = vrot.slane %v10666_v59, %v19319_v20  ;;  %v18266_v54 = vrot.slane %v12570_v12, %v19319_v20 }
 0xaa9   : > { %v10456_v41 = vcombine.low %v10439_v60, %v10447_v43  ;;  %v10682_v17 = vcombine.low %v18249_v32, %v18252_v14  ;;  %v12571_v2 = vcombine.high %v18249_v32, %v18252_v14  ;;  %v10415_v35 = vcombine.high %v18224_v18, %v18255_v23 }
 0xaaa   : > { %v9883_v47 = vcombine.high %v12862_v51, %v19329_v40  ;;  %v9890_v45 = vrot.slane %v12862_v51, %v19319_v20  ;;  %v12801_v22 = vadd.f32 %v18030_v6, %v18025_v61  ;;  %v12804_v8 = vadd.f32 %v18043_v52, %v18039_v42 }
 0xaab   : > { %v18275_v37 = vrot.slane %v10456_v41, %v19320_v58  ;;  %v12865_v62 = vadd.f32 %v18063_v63, %v18055_v44  ;;  %v19338_v46 = vcombine.low %v18058_v48, %v18061_v26 }
 0xaac   : > { %v9897_v43 = vrot.slane %v9883_v47, %v19319_v20  ;;  %v9898_v1 = vcombine.low %v18190_v28, %v9890_v45  ;;  %v9899_v61 = vcombine.high %v18190_v28, %v9890_v45  ;;  %v9934_v6 = vcombine.high %v12801_v22, %v19329_v40 }
 0xaad   : > { %v10489_v60 = vrot.slane %v19338_v46, %v19319_v20  ;;  %v10465_v3 = vcombine.high %v18258_v56, %v18275_v37  ;;  %v9941_v42 = vrot.slane %v12801_v22, %v19319_v20  ;;  %v10000_v52 = vcombine.high %v12804_v8, %v19329_v40 }
 0xaae   : > { %v18298_v44 = vrot.slane %v12804_v8, %v19319_v20  ;;  %v9906_v59 = vrot.slane %v9898_v1, %v19320_v58  ;;  %v9913_v12 = vrot.slane %v9899_v61, %v19320_v58  ;;  %v9914_v41 = vcombine.low %v18195_v24, %v9897_v43 }
 0xaaf   : > { %v13406_v63 = vpack.i.bf16 %v10465_v3, %v10415_v35  ;;  %v9915_v51 = vcombine.high %v18195_v24, %v9897_v43  ;;  %v9948_v28 = vrot.slane %v9934_v6, %v19319_v20  ;;  %v18306_v47 = vrot.slane %v10000_v52, %v19319_v20 }
 0xab0   : > { %v9949_v45 = vcombine.high %v12865_v62, %v19329_v40  ;;  %v18311_v22 = vrot.slane %v9914_v41, %v19320_v58  ;;  %v10716_v35 = vcombine.low %v9906_v59, %v9913_v12  ;;  %v12572_v8 = vcombine.high %v9906_v59, %v9913_v12 }
 0xab1   : > { %13407 = vrot.lane.b32.xlu1 %v13406_v63, %s14436_s19  ;;  %v9956_v46 = vrot.slane %v12865_v62, %v19319_v20  ;;  %v18315_v3 = vrot.slane %v9915_v51, %v19320_v58  ;;  %v19339_v43 = vcombine.high %v18058_v48, %v18061_v26  ;;  %v10498_v61 = vcombine.low %v18074_v4, %v18077_v57 }
 0xab2   : > { %v9963_v24 = vrot.slane %v9949_v45, %v19319_v20  ;;  %v18325_v6 = vrot.slane %v10716_v35, %v19319_v20  ;;  %v18328_v52 = vrot.slane %v12572_v8, %v19319_v20  ;;  %v19340_v35 = vcombine.low %v18104_v36, %v18107_v0 }
 0xab3   : > { %v10497_v1 = vrot.slane %v19339_v43, %v19319_v20  ;;  %v9964_v62 = vcombine.low %v9941_v42, %v9956_v46  ;;  %v9965_v63 = vcombine.high %v9941_v42, %v9956_v46  ;;  %v10732_v59 = vcombine.low %v18311_v22, %v18315_v3 }
 0xab4   : > { %v12573_v12 = vcombine.high %v18311_v22, %v18315_v3  ;;  %v9980_v41 = vcombine.low %v9948_v28, %v9963_v24  ;;  %v9981_v48 = vcombine.high %v9948_v28, %v9963_v24  ;;  %v18337_v57 = vrot.slane %v10498_v61, %v19320_v58 }
 0xab5   : > { %v9972_v26 = vrot.slane %v9964_v62, %v19320_v58  ;;  %v9979_v4 = vrot.slane %v9965_v63, %v19320_v58  ;;  %v10506_v51 = vcombine.low %v10489_v60, %v10497_v1  ;;  %v10539_v8 = vrot.slane %v19340_v35, %v19319_v20 }
 0xab6   : > { %v18340_v45 = vrot.slane %v9980_v41, %v19320_v58  ;;  %v18343_v42 = vrot.slane %v9981_v48, %v19320_v58  ;;  %v19341_v28 = vcombine.high %v18104_v36, %v18107_v0  ;;  %v10548_v1 = vcombine.low %v18119_v34, %v18122_v33 }
 0xab7   : > { %v10766_v24 = vcombine.low %v9972_v26, %v9979_v4  ;;  %v12574_v43 = vcombine.high %v9972_v26, %v9979_v4  ;;  %v18354_v60 = vrot.slane %v10506_v51, %v19320_v58  ;;  %v12868_v41 = vadd.f32 %v18083_v27, %v18071_v53 }
 0xab8   : > { %v10547_v46 = vrot.slane %v19341_v28, %v19319_v20  ;;  %v10782_v61 = vcombine.low %v18340_v45, %v18343_v42  ;;  %v12575_v62 = vcombine.high %v18340_v45, %v18343_v42  ;;  %v18369_v26 = vrot.slane %v10548_v1, %v19320_v58 }
 0xab9   : > { %v10773_v36 = vrot.slane %v10766_v24, %v19319_v20  ;;  %v10781_v0 = vrot.slane %v12574_v43, %v19319_v20  ;;  %v10515_v48 = vcombine.high %v18337_v57, %v18354_v60  ;;  %v10015_v33 = vcombine.high %v12868_v41, %v19329_v40 }
 0xaba   : > { %v10556_v63 = vcombine.low %v10539_v8, %v10547_v46  ;;  %v10022_v4 = vrot.slane %v12868_v41, %v19319_v20  ;;  %v10589_v53 = vrot.slane %v10582_v31, %v19319_v20  ;;  %v10597_v27 = vrot.slane %v12567_v11, %v19319_v20 }
 0xabb   : > { %v10598_v51 = vcombine.low %v18171_v55, %v18174_v13  ;;  %v10639_v40 = vrot.slane %v10632_v50, %v19319_v20  ;;  %v10647_v45 = vrot.slane %v12569_v10, %v19319_v20  ;;  %v10029_v42 = vrot.slane %v10015_v33, %v19319_v20 }
 0xabc   : > { %v18372_v34 = vrot.slane %v10556_v63, %v19320_v58  ;;  %v10030_v15 = vcombine.low %v18298_v44, %v10022_v4  ;;  %v10031_v16 = vcombine.high %v18298_v44, %v10022_v4  ;;  %v10606_v55 = vcombine.low %v10589_v53, %v10597_v27 }
 0xabd   : > { %v18400_v11 = vrot.slane %v10598_v51, %v19320_v58  ;;  %v10648_v13 = vcombine.low %v18227_v49, %v18230_v30  ;;  %v10656_v50 = vcombine.low %v10639_v40, %v10647_v45  ;;  %v10046_v10 = vcombine.low %v18306_v47, %v10029_v42 }
 0xabe   : > { %v10565_v31 = vcombine.high %v18369_v26, %v18372_v34  ;;  %v10038_v25 = vrot.slane %v10030_v15, %v19320_v58  ;;  %v10045_v9 = vrot.slane %v10031_v16, %v19320_v58  ;;  %v10047_v8 = vcombine.high %v18306_v47, %v10029_v42 }
 0xabf   : > { %v18409_v28 = vrot.slane %v10606_v55, %v19320_v58  ;;  %v18412_v44 = vrot.slane %v10648_v13, %v19320_v58  ;;  %v18415_v46 = vrot.slane %v10656_v50, %v19320_v58  ;;  %v10054_v49 = vrot.slane %v10046_v10, %v19320_v58  ;;  %v19342_v10 = vld [vmem:[#allocation59_spill] sm:$0xff] }
 0xac0   : > { %v13411_v35 = vpack.i.bf16 %v10565_v31, %v10515_v48  ;;  %v10816_v30 = vcombine.low %v10038_v25, %v10045_v9  ;;  %v12576_v24 = vcombine.high %v10038_v25, %v10045_v9  ;;  %v10689_v47 = vrot.slane %v10682_v17, %v19319_v20 }
 0xac1   : > { %v10061_v43 = vrot.slane %v10047_v8, %v19320_v58  ;;  %v10615_v1 = vcombine.high %v18400_v11, %v18409_v28  ;;  %v10665_v63 = vcombine.high %v18412_v44, %v18415_v46  ;;  %v10697_v41 = vrot.slane %v12571_v2, %v19319_v20  ;;  %v19343_v8 = vld [vmem:[#allocation57_spill] sm:$0xff] }
 0xac2   : > { %13412 = vrot.lane.b32.xlu0 %v13411_v35, %s14436_s19  ;;  %v10823_v48 = vrot.slane %v10816_v30, %v19319_v20  ;;  %v10831_v33 = vrot.slane %v12576_v24, %v19319_v20  ;;  %v10698_v17 = vcombine.low %v18263_v21, %v18266_v54  ;;  %v10739_v4 = vrot.slane %v10732_v59, %v19319_v20 }
 0xac3   : > { %v10832_v53 = vcombine.low %v10054_v49, %v10061_v43  ;;  %v12577_v27 = vcombine.high %v10054_v49, %v10061_v43  ;;  %v13416_v51 = vpack.i.bf16 %v10665_v63, %v10615_v1  ;;  %v10706_v40 = vcombine.low %v10689_v47, %v10697_v41  ;;  %v19344_v43 = vld [vmem:[#allocation63_spill] sm:$0xff]  ;;  %v19345_v1 = vld [vmem:[#allocation58_spill] sm:$0xff] }
 0xac4   : > { %v18438_v45 = vrot.slane %v10698_v17, %v19320_v58  ;;  %v10747_v32 = vrot.slane %v12573_v12, %v19319_v20  ;;  %v10748_v14 = vcombine.low %v18325_v6, %v18328_v52  ;;  %v10789_v2 = vrot.slane %v10782_v61, %v19319_v20 }
 0xac5   : > { %13417 = vrot.lane.b32.xlu1 %v13416_v51, %s14436_s19  ;;  %v18449_v21 = vrot.slane %v10706_v40, %v19320_v58  ;;  %v10797_v54 = vrot.slane %v12575_v62, %v19319_v20  ;;  %v10798_v59 = vcombine.low %v10773_v36, %v10781_v0  ;;  %v10839_v31 = vrot.slane %v10832_v53, %v19319_v20 }
 0xac6   : > { %v10756_v42 = vcombine.low %v10739_v4, %v10747_v32  ;;  %v10847_v15 = vrot.slane %v12577_v27, %v19319_v20  ;;  %v10848_v22 = vcombine.low %v10823_v48, %v10831_v33  ;;  %v18457_v6 = vrot.slane %v10748_v14, %v19320_v58  ;;  %v19347_v48 = vld [vmem:[#allocation61_spill] sm:$0xff]  ;;  %v19348_v33 = vld [vmem:[#allocation60_spill] sm:$0xff] }
 0xac7   : > { %v10715_v3 = vcombine.high %v18438_v45, %v18449_v21  ;;  %v10806_v52 = vcombine.low %v10789_v2, %v10797_v54  ;;  %v18463_v61 = vrot.slane %v10798_v59, %v19320_v58  ;;  %v10314_v0 = vcombine.low %v18151_v39, %v18160_v7 }
 0xac8   : > { %v18460_v12 = vrot.slane %v10756_v42, %v19320_v58  ;;  %v18466_v62 = vrot.slane %v10848_v22, %v19320_v58  ;;  %v10856_v36 = vcombine.low %v10839_v31, %v10847_v15  ;;  %v10364_v16 = vcombine.low %v18163_v38, %v18166_v29 }
 0xac9   : > { %v18469_v20 = vrot.slane %v10806_v52, %v19320_v58  ;;  %v10414_v55 = vcombine.low %v18224_v18, %v18255_v23  ;;  %v10464_v35 = vcombine.low %v18258_v56, %v18275_v37  ;;  %v10514_v25 = vcombine.low %v18337_v57, %v18354_v60 }
 0xaca   : > { %v10765_v13 = vcombine.high %v18457_v6, %v18460_v12  ;;  %v18480_v50 = vrot.slane %v10856_v36, %v19320_v58  ;;  %v10564_v7 = vcombine.low %v18369_v26, %v18372_v34  ;;  %v10614_v38 = vcombine.low %v18400_v11, %v18409_v28 }
 0xacb   : > { %v10815_v39 = vcombine.high %v18463_v61, %v18469_v20  ;;  %v10664_v29 = vcombine.low %v18412_v44, %v18415_v46  ;;  %v10714_v23 = vcombine.low %v18438_v45, %v18449_v21  ;;  %v10764_v56 = vcombine.low %v18457_v6, %v18460_v12 }
 0xacc   : > { %v13421_v58 = vpack.i.bf16 %v10765_v13, %v10715_v3  ;;  %v10865_v18 = vcombine.high %v18466_v62, %v18480_v50  ;;  %v10814_v37 = vcombine.low %v18463_v61, %v18469_v20  ;;  %v10864_v57 = vcombine.low %v18466_v62, %v18480_v50 }
 0xacd   : > { %v10114_v9 = vcombine.low %v17882_v5, %v17905_v19  ;;  %v10164_v28 = vcombine.low %v19343_v8, %v19342_v10  ;;  %v19346_v63 = vcombine.low %v19344_v43, %v19345_v1  ;;  %v19349_v5 = vcombine.low %v19347_v48, %v19348_v33  ;;  %v5957_v8 = vld [vmem:[%s18535_s18 + $0x10] sm:$0xff] }
 0xace   : > { %13422 = vrot.lane.b32.xlu0 %v13421_v58, %s14436_s19  ;;  %v13426_v60 = vpack.i.bf16 %v10865_v18, %v10815_v39  ;;  %v18537_v18 = vld [vmem:[#allocation19] ss:$0 sm:$0xff] }
 0xad0   : > { %13427 = vrot.lane.b32.xlu1 %v13426_v60, %s14436_s19  ;;  %s14261_s19 = scalar_lea.vmem %s18974_s0, 2048 }
 0xad1   : > { %p14262_p8 = scmp.ne.s32.totalorder %s18974_s0, %s14261_s19 }
 0xad3   : > { %p14263_p12 = pnand %p14262_p8, %p19355_p9 }
 0xad5   : > { %p14264_p4 = pneg %p14263_p12 }
 0xaf3   : > { %v13393_v26 = vpop.permute.xlu1 %13392 }
 0xaf4   : > { %v13395_v34 = vunpack.i.h.bf16 %v13393_v26  ;;  %v13394_v11 = vunpack.i.l.bf16 %v13393_v26 }
 0xaf6   : > { %v10930_v44 = vsel %vm7901_vm1, %v10114_v9, %v13394_v11  ;;  %v10931_v46 = vsel %vm7901_vm1, %v10164_v28, %v13395_v34  ;;  %v5956_v34 = vld [vmem:[%s18535_s18 + $0x8] sm:$0xff] }
 0xaf7   : > { %v10946_v49 = vpack.c.bf16 %v10931_v46, %v10930_v44 }
 0xaf9   : > { %12997 = vmatprep.mubr.bf16.mxu1 %v10946_v49  ;;  %v5958_v49 = vld [vmem:[%s18535_s18 + $0x18] sm:$0xff] }
 0xb03   : > { %v13398_v30 = vpop.permute.xlu0 %13397 }
 0xb04   : > { %v13400_v24 = vunpack.i.h.bf16 %v13398_v30  ;;  %v13399_v47 = vunpack.i.l.bf16 %v13398_v30 }
 0xb06   : > { %v10933_v41 = vsel %vm7901_vm1, %v19346_v63, %v13400_v24  ;;  %v10932_v19 = vsel %vm7901_vm1, %v19349_v5, %v13399_v47  ;;  %v5959_v47 = vld [vmem:[%s18535_s18 + $0x20] sm:$0xff] }
 0xb07   : > { %v10947_v17 = vpack.c.bf16 %v10933_v41, %v10932_v19  ;;  %v5960_v41 = vld [vmem:[%s18535_s18 + $0x28] sm:$0xff] }
 0xb09   : > { %12998 = vmatmul.mubr.bf16.vlgmr.msra.gmra.mrb[64].mxu1 %v10947_v17  ;;  %v5961_v17 = vld [vmem:[%s18535_s18 + $0x30] sm:$0xff] }
 0xb12   : > { %v13403_v4 = vpop.permute.xlu1 %13402 }
 0xb13   : > { %v13405_v53 = vunpack.i.h.bf16 %v13403_v4  ;;  %v13404_v27 = vunpack.i.l.bf16 %v13403_v4 }
 0xb15   : > { %v10934_v51 = vsel %vm7901_vm1, %v10314_v0, %v13404_v27  ;;  %v10935_v40 = vsel %vm7901_vm1, %v10364_v16, %v13405_v53  ;;  %v5962_v27 = vld [vmem:[%s18535_s18 + $0x38] sm:$0xff] }
 0xb16   : > { %v10948_v45 = vpack.c.bf16 %v10935_v40, %v10934_v51 }
 0xb18   : > { %13001 = vmatprep.mubr.bf16.mxu1 %v10948_v45 }
 0xb23   : > { %v13408_v32 = vpop.permute.xlu1 %13407 }
 0xb24   : > { %v13410_v14 = vunpack.i.h.bf16 %v13408_v32  ;;  %v13409_v2 = vunpack.i.l.bf16 %v13408_v32  ;;  %v5963_v32 = vld [vmem:[%s18535_s18 + $0x40] sm:$0xff] }
 0xb26   : > { %v10936_v21 = vsel %vm7901_vm1, %v10414_v55, %v13409_v2  ;;  %v10937_v54 = vsel %vm7901_vm1, %v10464_v35, %v13410_v14 }
 0xb27   : > { %v10949_v59 = vpack.c.bf16 %v10937_v54, %v10936_v21  ;;  %v5964_v54 = vld [vmem:[%s18535_s18 + $0x48] sm:$0xff] }
 0xb29   : > { %13002 = vmatmul.mubr.bf16.gmra.mrb[68].mxu1 %v10949_v59 }
 0xb34   : > { %v13413_v31 = vpop.permute.xlu0 %13412 }
 0xb35   : > { %v13415_v42 = vunpack.i.h.bf16 %v13413_v31  ;;  %v13414_v15 = vunpack.i.l.bf16 %v13413_v31 }
 0xb37   : > { %v10938_v22 = vsel %vm7901_vm1, %v10514_v25, %v13414_v15  ;;  %v10939_v3 = vsel %vm7901_vm1, %v10564_v7, %v13415_v42  ;;  %v13418_v52 = vpop.permute.xlu1 %13417 }
 0xb38   : > { %v10950_v6 = vpack.c.bf16 %v10939_v3, %v10938_v22  ;;  %v13420_v12 = vunpack.i.h.bf16 %v13418_v52  ;;  %v13419_v61 = vunpack.i.l.bf16 %v13418_v52  ;;  %v5965_v22 = vld [vmem:[%s18535_s18 + $0x50] sm:$0xff]  ;;  %v5966_v52 = vld [vmem:[%s18535_s18 + $0x58] sm:$0xff] }
 0xb3a   : > { %13005 = vmatprep.mubr.bf16.mxu1 %v10950_v6  ;;  %v10940_v62 = vsel %vm7901_vm1, %v10614_v38, %v13419_v61  ;;  %v10941_v36 = vsel %vm7901_vm1, %v10664_v29, %v13420_v12 }
 0xb3b   : > { %v10951_v20 = vpack.c.bf16 %v10941_v36, %v10940_v62  ;;  %v5967_v36 = vld [vmem:[%s18535_s18 + $0x60] sm:$0xff] }
 0xb3d   : > { %13006 = vmatmul.mubr.bf16.gmra.mrb[72].mxu1 %v10951_v20 }
 0xb40   : > { %v13423_v0 = vpop.permute.xlu0 %13422 }
 0xb41   : > { %v13425_v16 = vunpack.i.h.bf16 %v13423_v0  ;;  %v13424_v55 = vunpack.i.l.bf16 %v13423_v0 }
 0xb42   : > { %v13428_v13 = vpop.permute.xlu1 %13427 }
 0xb43   : > { %v10942_v50 = vsel %vm7901_vm1, %v10714_v23, %v13424_v55  ;;  %v10943_v35 = vsel %vm7901_vm1, %v10764_v56, %v13425_v16  ;;  %v13430_v25 = vunpack.i.h.bf16 %v13428_v13  ;;  %v13429_v39 = vunpack.i.l.bf16 %v13428_v13  ;;  %v5955_v56 = vld [vmem:[%s18535_s18] sm:$0xff]  ;;  %v5968_v55 = vld [vmem:[%s18535_s18 + $0x68] sm:$0xff] }
 0xb44   : > { %v10952_v7 = vpack.c.bf16 %v10943_v35, %v10942_v50 }
 0xb45   : > { %v10944_v58 = vsel %vm7901_vm1, %v10814_v37, %v13429_v39  ;;  %v10945_v38 = vsel %vm7901_vm1, %v10864_v57, %v13430_v25  ;;  %v5969_v39 = vld [vmem:[%s18535_s18 + $0x70] sm:$0xff] }
 0xb46   : > { %13009 = vmatprep.mubr.bf16.mxu1 %v10952_v7  ;;  %v10953_v29 = vpack.c.bf16 %v10945_v38, %v10944_v58  ;;  %v5970_v38 = vld [vmem:[%s18535_s18 + $0x78] sm:$0xff]  ;;  %s14441_s18 = smov [#allocation29]  }
 0xb47   : > { %s14265_s25 = sshll.u32 %s14441_s18, 4  ;;  %s14266_s25 = int_to_ptr.vmem [resolvable:$false] %s14265_s25 }
 0xb48   : > { %13010 = vmatmul.mubr.bf16.gmra.mrb[76].mxu1 %v10953_v29  ;;  %s14267_s4 = scalar_lea.vmem %s14266_s25, 4096  ;;  %p14268_p7 = scmp.lt.s32.totalorder %s18974_s0, %s14266_s25 }
 0xb49   : > { %p14269_p6 = scmp.lt.s32.totalorder %s14267_s4, %s14261_s19 }
 0xb4b   : > { %p14270_p5 = por %p14269_p6, %p14268_p7 }
 0xb4d   : > { %p14271_p11 = pnand %p14270_p5, %p14264_p4 }
 0xbdc   : > { %v12999_v23 = vpop.f32.mrb[64].mxu1 }
 0xbdd   : > { %v11059_v60 = vpop.f32.mrb[65].mxu1  ;;  %v11068_v11 = vadd.f32 %v12999_v23, %v18537_v18 }
 0xbde   : > { %v11060_v26 = vadd.f32 %v18537_v18, %v11059_v60  ;;  %v13000_v37 = vpop.f32.mrb[66].mxu1  ;;  %v13449_v60 = vld [vmem:[#allocation23 + $0x4] ss:$8 sps:$4 sm:$0xff]  }
 0xbdf   : > { %v11062_v57 = vpop.f32.mrb[67].mxu1  ;;  %v18550_v44 = vadd.f32 %v11068_v11, %v5957_v8  ;;  %v11071_v46 = vadd.f32 %v13000_v37, %v18537_v18  ;;  %11477 = vmatprep.subr.bf16.mxu0 %v13449_v60  ;;  %v13455_v37 = vld [vmem:[#allocation23 + $0x24] ss:$8 sps:$4 sm:$0xff]   ;;  %v13456_v11 = vld [vmem:[#allocation23 + $0x30] ss:$8 sps:$4 sm:$0xff]  }
 0xbe0   : > { %v18543_v9 = vadd.f32 %v11060_v26, %v5955_v56  ;;  %v11063_v10 = vadd.f32 %v18537_v18, %v11062_v57  ;;  %v13447_v56 = vld [vmem:[#allocation23] ss:$8 sps:$4 sm:$0xff]   ;;  %v13452_v26 = vld [vmem:[#allocation23 + $0x14] ss:$8 sps:$4 sm:$0xff]  }
 0xbe1   : > { %v18556_v30 = vadd.f32 %v11071_v46, %v5958_v49  ;;  %11478 = vmatpush1.bf16.msra.mxu0 %v13447_v56  ;;  %v13458_v57 = vld [vmem:[#allocation23 + $0x34] ss:$8 sps:$4 sm:$0xff]   ;;  %v13459_v8 = vld [vmem:[#allocation23 + $0x40] ss:$8 sps:$4 sm:$0xff]  }
 0xbe2   : > { %v18547_v28 = vadd.f32 %v11063_v10, %v5956_v34  ;;  %11140 = vadd.xlane.f32.xlu0 %v18543_v9  ;;  %11479 = vmatprep.subr.bf16.mxu0 %v13452_v26  ;;  %v13453_v34 = vld [vmem:[#allocation23 + $0x20] ss:$8 sps:$4 sm:$0xff]   ;;  %v13461_v10 = vld [vmem:[#allocation23 + $0x44] ss:$8 sps:$4 sm:$0xff]  }
 0xbe4   : > { %11142 = vadd.xlane.f32.xlu1 %v18547_v28 }
 0xbe6   : > { %11144 = vadd.xlane.f32.xlu0 %v18550_v44 }
 0xbea   : > { %11146 = vadd.xlane.f32.xlu0 %v18556_v30 }
 0xbfc   : > { %v13003_v24 = vpop.f32.mrb[68].mxu1 }
 0xbfd   : > { %v11075_v43 = vpop.f32.mrb[69].mxu1  ;;  %v11084_v33 = vadd.f32 %v13003_v24, %v18537_v18 }
 0xbfe   : > { %v11076_v1 = vadd.f32 %v18537_v18, %v11075_v43  ;;  %v13004_v63 = vpop.f32.mrb[70].mxu1 }
 0xbff   : > { %v11078_v48 = vpop.f32.mrb[71].mxu1  ;;  %v11087_v4 = vadd.f32 %v13004_v63, %v18537_v18  ;;  %v18572_v51 = vadd.f32 %v11084_v33, %v5961_v17 }
 0xc00   : > { %v18563_v5 = vadd.f32 %v11076_v1, %v5959_v47  ;;  %v11079_v19 = vadd.f32 %v18537_v18, %v11078_v48 }
 0xc01   : > { %v18575_v40 = vadd.f32 %v11087_v4, %v5962_v27 }
 0xc02   : > { %v18568_v53 = vadd.f32 %v11079_v19, %v5960_v41  ;;  %11148 = vadd.xlane.f32.xlu1 %v18563_v5 }
 0xc04   : > { %11150 = vadd.xlane.f32.xlu0 %v18568_v53 }
 0xc06   : > { %11152 = vadd.xlane.f32.xlu1 %v18572_v51 }
 0xc08   : > { %11154 = vadd.xlane.f32.xlu0 %v18575_v40 }
 0xc10   : > { %v13007_v45 = vpop.f32.mrb[72].mxu1 }
 0xc11   : > { %v11091_v14 = vpop.f32.mrb[73].mxu1  ;;  %v11100_v31 = vadd.f32 %v13007_v45, %v18537_v18 }
 0xc12   : > { %v11092_v2 = vadd.f32 %v18537_v18, %v11091_v14  ;;  %v13008_v21 = vpop.f32.mrb[74].mxu1 }
 0xc13   : > { %v11094_v59 = vpop.f32.mrb[75].mxu1  ;;  %v11103_v3 = vadd.f32 %v13008_v21, %v18537_v18  ;;  %v18592_v12 = vadd.f32 %v11100_v31, %v5965_v22 }
 0xc14   : > { %v18583_v42 = vadd.f32 %v11092_v2, %v5963_v32  ;;  %v11095_v15 = vadd.f32 %v18537_v18, %v11094_v59 }
 0xc15   : > { %v18595_v61 = vadd.f32 %v11103_v3, %v5966_v52 }
 0xc16   : > { %v18588_v6 = vadd.f32 %v11095_v15, %v5964_v54  ;;  %11156 = vadd.xlane.f32.xlu1 %v18583_v42 }
 0xc18   : > { %11158 = vadd.xlane.f32.xlu0 %v18588_v6 }
 0xc1a   : > { %11160 = vadd.xlane.f32.xlu1 %v18592_v12 }
 0xc1b   : > { %v13011_v62 = vpop.f32.mrb[76].mxu1 }
 0xc1c   : > { %11162 = vadd.xlane.f32.xlu0 %v18595_v61  ;;  %v11107_v20 = vpop.f32.mrb[77].mxu1  ;;  %v11116_v50 = vadd.f32 %v13011_v62, %v18537_v18  ;;  %v13462_v62 = vld [vmem:[#allocation23 + $0x50] ss:$8 sps:$4 sm:$0xff]  }
 0xc1d   : > { %v11108_v0 = vadd.f32 %v18537_v18, %v11107_v20  ;;  %v13012_v16 = vpop.f32.mrb[78].mxu1 }
 0xc1e   : > { %v11110_v13 = vpop.f32.mrb[79].mxu1  ;;  %v11119_v7 = vadd.f32 %v13012_v16, %v18537_v18  ;;  %v18612_v29 = vadd.f32 %v11116_v50, %v5969_v39 }
 0xc1f   : > { %v18603_v35 = vadd.f32 %v11108_v0, %v5967_v36  ;;  %v11111_v25 = vadd.f32 %v18537_v18, %v11110_v13  ;;  %v13450_v18 = vld [vmem:[#allocation23 + $0x10] ss:$8 sps:$4 sm:$0xff]   ;;  %v13464_v36 = vld [vmem:[#allocation23 + $0x54] ss:$8 sps:$4 sm:$0xff]  }
 0xc20   : > { %v18615_v23 = vadd.f32 %v11119_v7, %v5970_v38  ;;  %11480 = vmatpush1.bf16.msra.mxu0 %v13450_v18 }
 0xc21   : > { %v18608_v58 = vadd.f32 %v11111_v25, %v5968_v55  ;;  %11164 = vadd.xlane.f32.xlu1 %v18603_v35  ;;  %11481 = vmatprep.subr.bf16.mxu0 %v13455_v37  ;;  %v13467_v55 = vld [vmem:[#allocation23 + $0x64] ss:$8 sps:$4 sm:$0xff]   ;;  %v13465_v25 = vld [vmem:[#allocation23 + $0x60] ss:$8 sps:$4 sm:$0xff]  }
 0xc23   : > { %11166 = vadd.xlane.f32.xlu0 %v18608_v58 }
 0xc24   : > { %11482 = vmatpush1.bf16.msra.mxu0 %v13453_v34 }
 0xc25   : > { %11168 = vadd.xlane.f32.xlu1 %v18612_v29  ;;  %11483 = vmatprep.subr.bf16.mxu0 %v13458_v57 }
 0xc27   : > { %11170 = vadd.xlane.f32.xlu0 %v18615_v23 }
 0xc28   : > { %11484 = vmatpush1.bf16.msra.mxu0 %v13456_v11  ;;  %v13468_v11 = vld [vmem:[#allocation23 + $0x70] ss:$8 sps:$4 sm:$0xff]  }
 0xc29   : > { %11485 = vmatprep.subr.bf16.mxu0 %v13461_v10  ;;  %v13470_v10 = vld [vmem:[#allocation23 + $0x74] ss:$8 sps:$4 sm:$0xff]  }
 0xc2c   : > { %11486 = vmatpush1.bf16.msra.mxu0 %v13459_v8 }
 0xc2d   : > { %11487 = vmatprep.subr.bf16.mxu0 %v13464_v36 }
 0xc30   : > { %11488 = vmatpush1.bf16.msra.mxu0 %v13462_v62 }
 0xc31   : > { %11489 = vmatprep.subr.bf16.mxu0 %v13467_v55 }
 0xc34   : > { %11490 = vmatpush1.bf16.msra.mxu0 %v13465_v25 }
 0xc35   : > { %11491 = vmatprep.subr.bf16.mxu0 %v13470_v10 }
 0xc38   : > { %11492 = vmatpush1.bf16.msra.mxu0 %v13468_v11  ;;  %v18699_v11 = vld [vmem:[#allocation20] ss:$0 sm:$0xff] }
 0xc6f   : > { %v11141_v46 = vpop.xlane.xlu0 %11140 }
 0xc70   : > { %v11173_v49 = vmul.f32 0.0078125, %v11141_v46 }
 0xc71   : > { %v11143_v24 = vpop.xlane.xlu1 %11142 }
 0xc72   : > { %v18620_v47 = vsub.f32 %v18543_v9, %v11173_v49  ;;  %v11174_v43 = vmul.f32 0.0078125, %v11143_v24 }
 0xc73   : > { %v11145_v1 = vpop.xlane.xlu0 %11144 }
 0xc74   : > { %v18623_v63 = vsub.f32 %v18547_v28, %v11174_v43  ;;  %v11175_v41 = vmul.f32 0.0078125, %v11145_v1  ;;  %v11205_v48 = vmul.f32 %v18620_v47, %v18620_v47 }
 0xc76   : > { %v18628_v33 = vsub.f32 %v18550_v44, %v11175_v41  ;;  %11221 = vadd.xlane.f32.xlu1 %v11205_v48  ;;  %v11206_v19 = vmul.f32 %v18623_v63, %v18623_v63 }
 0xc77   : > { %v11147_v17 = vpop.xlane.xlu0 %11146 }
 0xc78   : > { %v11176_v4 = vmul.f32 0.0078125, %v11147_v17  ;;  %11223 = vadd.xlane.f32.xlu0 %v11206_v19  ;;  %v11207_v27 = vmul.f32 %v18628_v33, %v18628_v33 }
 0xc7a   : > { %v18635_v45 = vsub.f32 %v18556_v30, %v11176_v4  ;;  %11225 = vadd.xlane.f32.xlu1 %v11207_v27 }
 0xc7c   : > { %v11208_v32 = vmul.f32 %v18635_v45, %v18635_v45 }
 0xc7e   : > { %11227 = vadd.xlane.f32.xlu0 %v11208_v32 }
 0xc8f   : > { %v11149_v14 = vpop.xlane.xlu1 %11148 }
 0xc90   : > { %v11177_v2 = vmul.f32 0.0078125, %v11149_v14 }
 0xc91   : > { %v11151_v21 = vpop.xlane.xlu0 %11150 }
 0xc92   : > { %v18640_v54 = vsub.f32 %v18563_v5, %v11177_v2  ;;  %v11178_v59 = vmul.f32 0.0078125, %v11151_v21 }
 0xc93   : > { %v11153_v31 = vpop.xlane.xlu1 %11152 }
 0xc94   : > { %v18643_v15 = vsub.f32 %v18568_v53, %v11178_v59  ;;  %v11179_v22 = vmul.f32 0.0078125, %v11153_v31  ;;  %v11209_v3 = vmul.f32 %v18640_v54, %v18640_v54 }
 0xc95   : > { %v11155_v52 = vpop.xlane.xlu0 %11154 }
 0xc96   : > { %v18648_v20 = vsub.f32 %v18572_v51, %v11179_v22  ;;  %v11180_v0 = vmul.f32 0.0078125, %v11155_v52  ;;  %11229 = vadd.xlane.f32.xlu1 %v11209_v3  ;;  %v11210_v16 = vmul.f32 %v18643_v15, %v18643_v15 }
 0xc98   : > { %v18653_v13 = vsub.f32 %v18575_v40, %v11180_v0  ;;  %11231 = vadd.xlane.f32.xlu0 %v11210_v16  ;;  %v11211_v50 = vmul.f32 %v18648_v20, %v18648_v20 }
 0xc9a   : > { %11233 = vadd.xlane.f32.xlu1 %v11211_v50  ;;  %v11212_v39 = vmul.f32 %v18653_v13, %v18653_v13 }
 0xc9c   : > { %11235 = vadd.xlane.f32.xlu0 %v11212_v39 }
 0xca3   : > { %v11157_v7 = vpop.xlane.xlu1 %11156 }
 0xca4   : > { %v11181_v38 = vmul.f32 0.0078125, %v11157_v7 }
 0xca5   : > { %v11159_v56 = vpop.xlane.xlu0 %11158 }
 0xca6   : > { %v18660_v60 = vsub.f32 %v18583_v42, %v11181_v38  ;;  %v11182_v26 = vmul.f32 0.0078125, %v11159_v56 }
 0xca7   : > { %v11161_v18 = vpop.xlane.xlu1 %11160 }
 0xca8   : > { %v18663_v37 = vsub.f32 %v18588_v6, %v11182_v26  ;;  %v11183_v34 = vmul.f32 0.0078125, %v11161_v18  ;;  %v11213_v57 = vmul.f32 %v18660_v60, %v18660_v60 }
 0xca9   : > { %v11163_v8 = vpop.xlane.xlu0 %11162 }
 0xcaa   : > { %v18668_v46 = vsub.f32 %v18592_v12, %v11183_v34  ;;  %v11184_v49 = vmul.f32 0.0078125, %v11163_v8  ;;  %11237 = vadd.xlane.f32.xlu1 %v11213_v57  ;;  %v11214_v24 = vmul.f32 %v18663_v37, %v18663_v37 }
 0xcac   : > { %v18673_v43 = vsub.f32 %v18595_v61, %v11184_v49  ;;  %11239 = vadd.xlane.f32.xlu0 %v11214_v24  ;;  %v11215_v1 = vmul.f32 %v18668_v46, %v18668_v46 }
 0xcae   : > { %11241 = vadd.xlane.f32.xlu1 %v11215_v1  ;;  %v11216_v41 = vmul.f32 %v18673_v43, %v18673_v43  ;;  %v11165_v48 = vpop.xlane.xlu1 %11164 }
 0xcaf   : > { %v11185_v19 = vmul.f32 0.0078125, %v11165_v48 }
 0xcb0   : > { %11243 = vadd.xlane.f32.xlu0 %v11216_v41  ;;  %v11167_v17 = vpop.xlane.xlu0 %11166  ;;  %v18704_v41 = vld [vmem:[#allocation22] ss:$0 sm:$0xff] }
 0xcb1   : > { %v18680_v4 = vsub.f32 %v18603_v35, %v11185_v19  ;;  %v11186_v27 = vmul.f32 0.0078125, %v11167_v17 }
 0xcb2   : > { %v11169_v32 = vpop.xlane.xlu1 %11168 }
 0xcb3   : > { %v18683_v14 = vsub.f32 %v18608_v58, %v11186_v27  ;;  %v11187_v2 = vmul.f32 0.0078125, %v11169_v32  ;;  %v11217_v21 = vmul.f32 %v18680_v4, %v18680_v4 }
 0xcb4   : > { %v11171_v59 = vpop.xlane.xlu0 %11170 }
 0xcb5   : > { %v18688_v31 = vsub.f32 %v18612_v29, %v11187_v2  ;;  %v11188_v22 = vmul.f32 0.0078125, %v11171_v59  ;;  %11245 = vadd.xlane.f32.xlu1 %v11217_v21  ;;  %v11218_v3 = vmul.f32 %v18683_v14, %v18683_v14  ;;  %v19350_v59 = vmov 0  }
 0xcb7   : > { %v18693_v52 = vsub.f32 %v18615_v23, %v11188_v22  ;;  %11247 = vadd.xlane.f32.xlu0 %v11218_v3  ;;  %v11219_v62 = vmul.f32 %v18688_v31, %v18688_v31 }
 0xcb9   : > { %11249 = vadd.xlane.f32.xlu1 %v11219_v62  ;;  %v11220_v36 = vmul.f32 %v18693_v52, %v18693_v52 }
 0xcbb   : > { %11251 = vadd.xlane.f32.xlu0 %v11220_v36 }
 0xd03   : > { %v11222_v0 = vpop.xlane.xlu1 %11221 }
 0xd04   : > { %v11253_v16 = vmul.f32 0.0078125, %v11222_v0 }
 0xd05   : > { %v11224_v55 = vpop.xlane.xlu0 %11223 }
 0xd06   : > { %v11269_v50 = vadd.f32 1e-05, %v11253_v16  ;;  %v11254_v25 = vmul.f32 0.0078125, %v11224_v55 }
 0xd07   : > { %v11226_v39 = vpop.xlane.xlu1 %11225 }
 0xd08   : > { %13679 = vrsqrt.f32 %v11269_v50  ;;  %v11270_v7 = vadd.f32 1e-05, %v11254_v25  ;;  %v11255_v38 = vmul.f32 0.0078125, %v11226_v39 }
 0xd0a   : > { %13681 = vrsqrt.f32 %v11270_v7  ;;  %v11271_v56 = vadd.f32 1e-05, %v11255_v38 }
 0xd0b   : > { %v11228_v26 = vpop.xlane.xlu0 %11227 }
 0xd0c   : > { %13683 = vrsqrt.f32 %v11271_v56  ;;  %v11256_v18 = vmul.f32 0.0078125, %v11228_v26 }
 0xd0e   : > { %v11272_v34 = vadd.f32 1e-05, %v11256_v18 }
 0xd10   : > { %13685 = vrsqrt.f32 %v11272_v34 }
 0xd12   : > { %v13680_v57 = vpop.eup %13679 }
 0xd13   : > { %v11301_v10 = vmul.f32 %v13680_v57, %v18620_v47 }
 0xd14   : > { %v13682_v8 = vpop.eup %13681 }
 0xd15   : > { %v11323_v49 = vmul.f32 %v18699_v11, %v11301_v10  ;;  %v11302_v24 = vmul.f32 %v13682_v8, %v18623_v63 }
 0xd16   : > { %v13684_v1 = vpop.eup %13683 }
 0xd17   : > { %v11324_v48 = vmul.f32 %v18699_v11, %v11302_v24  ;;  %v11345_v19 = vadd.f32 %v18704_v41, %v11323_v49  ;;  %v11303_v27 = vmul.f32 %v13684_v1, %v18628_v33 }
 0xd19   : > { %v11346_v17 = vadd.f32 %v18704_v41, %v11324_v48  ;;  %v11325_v21 = vmul.f32 %v18699_v11, %v11303_v27 }
 0xd1a   : > { %v13686_v32 = vpop.eup %13685 }
 0xd1b   : > { %v11361_v2 = vpack.c.bf16 %v11346_v17, %v11345_v19  ;;  %v11304_v47 = vmul.f32 %v13686_v32, %v18635_v45  ;;  %v11347_v3 = vadd.f32 %v18704_v41, %v11325_v21 }
 0xd1d   : > { %11510 = vmatmul.mubr.bf16.vlgmr.msra.gmra.mrb[80].mxu0 %v11361_v2  ;;  %v11326_v63 = vmul.f32 %v18699_v11, %v11304_v47 }
 0xd1e   : > { %11519 = vmatprep.mubr.bf16.mxu0 %v19350_v59 }
 0xd1f   : > { %v11348_v22 = vadd.f32 %v18704_v41, %v11326_v63 }
 0xd21   : > { %v11362_v36 = vpack.c.bf16 %v11348_v22, %v11347_v3 }
 0xd23   : > { %v11230_v62 = vpop.xlane.xlu1 %11229 }
 0xd24   : > { %v11257_v0 = vmul.f32 0.0078125, %v11230_v62 }
 0xd25   : > { %v11232_v16 = vpop.xlane.xlu0 %11231  ;;  %11520 = vmatmul.mubr.bf16.gmra.mrb[84].mxu0 %v11362_v36 }
 0xd26   : > { %v11273_v33 = vadd.f32 1e-05, %v11257_v0  ;;  %v11258_v55 = vmul.f32 0.0078125, %v11232_v16  ;;  %11529 = vmatprep.mubr.bf16.mxu0 %v19350_v59 }
 0xd27   : > { %v11234_v45 = vpop.xlane.xlu1 %11233 }
 0xd28   : > { %13687 = vrsqrt.f32 %v11273_v33  ;;  %v11274_v50 = vadd.f32 1e-05, %v11258_v55  ;;  %v11259_v25 = vmul.f32 0.0078125, %v11234_v45 }
 0xd29   : > { %v11236_v39 = vpop.xlane.xlu0 %11235 }
 0xd2a   : > { %13689 = vrsqrt.f32 %v11274_v50  ;;  %v11275_v7 = vadd.f32 1e-05, %v11259_v25  ;;  %v11260_v38 = vmul.f32 0.0078125, %v11236_v39 }
 0xd2c   : > { %13691 = vrsqrt.f32 %v11275_v7  ;;  %v11276_v56 = vadd.f32 1e-05, %v11260_v38 }
 0xd2e   : > { %13693 = vrsqrt.f32 %v11276_v56 }
 0xd32   : > { %v13688_v26 = vpop.eup %13687 }
 0xd33   : > { %v11305_v18 = vmul.f32 %v13688_v26, %v18640_v54 }
 0xd34   : > { %v13690_v34 = vpop.eup %13689 }
 0xd35   : > { %v11306_v57 = vmul.f32 %v13690_v34, %v18643_v15  ;;  %v11327_v10 = vmul.f32 %v18699_v11, %v11305_v18 }
 0xd36   : > { %v13692_v8 = vpop.eup %13691 }
 0xd37   : > { %v11238_v49 = vpop.xlane.xlu1 %11237  ;;  %v11328_v24 = vmul.f32 %v18699_v11, %v11306_v57  ;;  %v11349_v17 = vadd.f32 %v18704_v41, %v11327_v10  ;;  %v11307_v32 = vmul.f32 %v13692_v8, %v18648_v20 }
 0xd38   : > { %v13694_v1 = vpop.eup %13693  ;;  %v11261_v48 = vmul.f32 0.0078125, %v11238_v49 }
 0xd39   : > { %v11240_v19 = vpop.xlane.xlu0 %11239  ;;  %v11350_v27 = vadd.f32 %v18704_v41, %v11328_v24  ;;  %v11308_v54 = vmul.f32 %v13694_v1, %v18653_v13  ;;  %v11329_v36 = vmul.f32 %v18699_v11, %v11307_v32 }
 0xd3a   : > { %v11277_v2 = vadd.f32 1e-05, %v11261_v48  ;;  %v11262_v47 = vmul.f32 0.0078125, %v11240_v19 }
 0xd3b   : > { %v11242_v15 = vpop.xlane.xlu1 %11241  ;;  %v11363_v21 = vpack.c.bf16 %v11350_v27, %v11349_v17  ;;  %v11330_v63 = vmul.f32 %v18699_v11, %v11308_v54  ;;  %v11351_v33 = vadd.f32 %v18704_v41, %v11329_v36 }
 0xd3c   : > { %13695 = vrsqrt.f32 %v11277_v2  ;;  %v11278_v22 = vadd.f32 1e-05, %v11262_v47  ;;  %v11263_v3 = vmul.f32 0.0078125, %v11242_v15 }
 0xd3d   : > { %v11244_v62 = vpop.xlane.xlu0 %11243  ;;  %11530 = vmatmul.mubr.bf16.gmra.mrb[88].mxu0 %v11363_v21  ;;  %v11352_v20 = vadd.f32 %v18704_v41, %v11330_v63 }
 0xd3e   : > { %13697 = vrsqrt.f32 %v11278_v22  ;;  %v11279_v0 = vadd.f32 1e-05, %v11263_v3  ;;  %v11264_v16 = vmul.f32 0.0078125, %v11244_v62  ;;  %11539 = vmatprep.mubr.bf16.mxu0 %v19350_v59 }
 0xd3f   : > { %v11364_v50 = vpack.c.bf16 %v11352_v20, %v11351_v33 }
 0xd40   : > { %13699 = vrsqrt.f32 %v11279_v0  ;;  %v11280_v13 = vadd.f32 1e-05, %v11264_v16 }
 0xd42   : > { %13701 = vrsqrt.f32 %v11280_v13  ;;  %v11246_v55 = vpop.xlane.xlu1 %11245 }
 0xd43   : > { %v11265_v45 = vmul.f32 0.0078125, %v11246_v55 }
 0xd44   : > { %v11248_v25 = vpop.xlane.xlu0 %11247 }
 0xd45   : > { %v11281_v39 = vadd.f32 1e-05, %v11265_v45  ;;  %11540 = vmatmul.mubr.bf16.gmra.mrb[92].mxu0 %v11364_v50  ;;  %v11266_v7 = vmul.f32 0.0078125, %v11248_v25 }
 0xd46   : > { %v13696_v38 = vpop.eup %13695  ;;  %v11250_v56 = vpop.xlane.xlu1 %11249  ;;  %11549 = vmatprep.mubr.bf16.mxu0 %v19350_v59 }
 0xd47   : > { %13703 = vrsqrt.f32 %v11281_v39  ;;  %v11282_v26 = vadd.f32 1e-05, %v11266_v7  ;;  %v11309_v18 = vmul.f32 %v13696_v38, %v18660_v60  ;;  %v11267_v57 = vmul.f32 0.0078125, %v11250_v56  ;;  %v13471_v38 = vld [vmem:[#allocation26 + $0x40] sm:$0xff]  }
 0xd48   : > { %v13698_v34 = vpop.eup %13697  ;;  %v11252_v10 = vpop.xlane.xlu0 %11251  ;;  %v13472_v56 = vld [vmem:[#allocation26] sm:$0xff]   ;;  %12885 = vmatprep.subr.bf16.mxu1 %v13471_v38 }
 0xd49   : > { %13705 = vrsqrt.f32 %v11282_v26  ;;  %v11268_v8 = vmul.f32 0.0078125, %v11252_v10  ;;  %v11310_v49 = vmul.f32 %v13698_v34, %v18663_v37  ;;  %v11331_v1 = vmul.f32 %v18699_v11, %v11309_v18  ;;  %12886 = vmatpush3.bf16.msra.mxu1 %v13472_v56  ;;  %v13474_v26 = vld [vmem:[#allocation26 + $0x8] sm:$0xff]   ;;  %v13476_v18 = vld [vmem:[#allocation26 + $0x10] sm:$0xff]   ;;  %v13479_v34 = vld [vmem:[#allocation26 + $0x60] sm:$0xff]  }
 0xd4a   : > { %v13700_v24 = vpop.eup %13699  ;;  %v11283_v27 = vadd.f32 1e-05, %v11267_v57  ;;  %v13481_v57 = vld [vmem:[#allocation26 + $0x68] sm:$0xff]  }
 0xd4b   : > { %v11284_v48 = vadd.f32 1e-05, %v11268_v8  ;;  %v11332_v19 = vmul.f32 %v18699_v11, %v11310_v49  ;;  %v11353_v32 = vadd.f32 %v18704_v41, %v11331_v1  ;;  %v11311_v60 = vmul.f32 %v13700_v24, %v18668_v46  ;;  %v13482_v10 = vld [vmem:[#allocation26 + $0x28] sm:$0xff]   ;;  %v13483_v8 = vld [vmem:[#allocation26 + $0x70] sm:$0xff]   ;;  %v13485_v24 = vld [vmem:[#allocation26 + $0x78] sm:$0xff]  }
 0xd4c   : > { %v13702_v17 = vpop.eup %13701  ;;  %v13484_v49 = vld [vmem:[#allocation26 + $0x30] sm:$0xff]   ;;  %v13486_v1 = vld [vmem:[#allocation26 + $0x38] sm:$0xff]  }
 0xd4d   : > { %v11354_v54 = vadd.f32 %v18704_v41, %v11332_v19  ;;  %v11312_v2 = vmul.f32 %v13702_v17, %v18673_v43  ;;  %13707 = vrsqrt.f32 %v11284_v48  ;;  %v11333_v21 = vmul.f32 %v18699_v11, %v11311_v60  ;;  %v19351_v48 = vld [vmem:[#allocation54_spill] sm:$0xff]  ;;  %v11385_v17 = vld [vmem:[#allocation25] sm:$0x3] }
 0xd4e   : > { %13709 = vrsqrt.f32 %v11283_v27  ;;  %v11389_v19 = vsub.s32 0, %v19351_v48  ;;  %v11393_v27 = vsub.s32 1, %v19351_v48 }
 0xd4f   : > { %v11365_v47 = vpack.c.bf16 %v11354_v54, %v11353_v32  ;;  %v11334_v37 = vmul.f32 %v18699_v11, %v11312_v2  ;;  %v11355_v43 = vadd.f32 %v18704_v41, %v11333_v21 }
 0xd50   : > { %v18760_v32 = vrot.slane %v11385_v17, %v11389_v19  ;;  %v18762_v54 = vrot.slane %v11385_v17, %v11393_v27 }
 0xd51   : > { %v13704_v15 = vpop.eup %13703  ;;  %11550 = vmatmul.mubr.bf16.gmra.mrb[96].mxu0 %v11365_v47  ;;  %v11356_v22 = vadd.f32 %v18704_v41, %v11334_v37 }
 0xd52   : > { %11559 = vmatprep.mubr.bf16.mxu0 %v19350_v59  ;;  %v11313_v3 = vmul.f32 %v13704_v15, %v18680_v4 }
 0xd53   : > { %v13706_v63 = vpop.eup %13705  ;;  %v11366_v36 = vpack.c.bf16 %v11356_v22, %v11355_v43 }
 0xd54   : > { %v11314_v46 = vmul.f32 %v13706_v63, %v18683_v14  ;;  %v11335_v0 = vmul.f32 %v18699_v11, %v11313_v3 }
 0xd56   : > { %v11336_v62 = vmul.f32 %v18699_v11, %v11314_v46  ;;  %v11357_v33 = vadd.f32 %v18704_v41, %v11335_v0 }
 0xd57   : > { %v13708_v16 = vpop.eup %13707 }
 0xd58   : > { %v11358_v20 = vadd.f32 %v18704_v41, %v11336_v62  ;;  %v13710_v13 = vpop.eup %13709  ;;  %v11316_v4 = vmul.f32 %v13708_v16, %v18693_v52  ;;  %v13473_v52 = vld [vmem:[#allocation26 + $0x48] sm:$0xff]  }
 0xd59   : > { %11560 = vmatmul.mubr.bf16.gmra.mrb[100].mxu0 %v11366_v36  ;;  %v11315_v14 = vmul.f32 %v13710_v13, %v18688_v31  ;;  %v13475_v31 = vld [vmem:[#allocation26 + $0x50] sm:$0xff]   ;;  %12887 = vmatprep.subr.bf16.mxu1 %v13473_v52 }
 0xd5a   : > { %11569 = vmatprep.mubr.bf16.mxu0 %v19350_v59  ;;  %v11367_v55 = vpack.c.bf16 %v11358_v20, %v11357_v33  ;;  %v11338_v45 = vmul.f32 %v18699_v11, %v11316_v4  ;;  %12888 = vmatpush3.bf16.msra.mxu1 %v13474_v26 }
 0xd5b   : > { %v11337_v50 = vmul.f32 %v18699_v11, %v11315_v14  ;;  %12889 = vmatprep.subr.bf16.mxu1 %v13475_v31  ;;  %v13477_v11 = vld [vmem:[#allocation26 + $0x58] sm:$0xff]  }
 0xd5c   : > { %v11360_v25 = vadd.f32 %v18704_v41, %v11338_v45 }
 0xd5d   : > { %v11359_v39 = vadd.f32 %v18704_v41, %v11337_v50  ;;  %v13480_v41 = vld [vmem:[#allocation26 + $0x20] sm:$0xff]  }
 0xd5e   : > { %12890 = vmatpush3.bf16.msra.mxu1 %v13476_v18 }
 0xd5f   : > { %v11368_v7 = vpack.c.bf16 %v11360_v25, %v11359_v39  ;;  %12891 = vmatprep.subr.bf16.mxu1 %v13477_v11 }
 0xd61   : > { %11570 = vmatmul.mubr.bf16.gmra.mrb[104].mxu0 %v11367_v55 }
 0xd62   : > { %11579 = vmatprep.mubr.bf16.mxu0 %v19350_v59  ;;  %v13478_v59 = vld [vmem:[#allocation26 + $0x18] sm:$0xff]  }
 0xd63   : > { %12892 = vmatpush3.bf16.msra.mxu1 %v13478_v59 }
 0xd64   : > { %12893 = vmatprep.subr.bf16.mxu1 %v13479_v34 }
 0xd67   : > { %12894 = vmatpush3.bf16.msra.mxu1 %v13480_v41 }
 0xd68   : > { %12895 = vmatprep.subr.bf16.mxu1 %v13481_v57 }
 0xd69   : > { %11580 = vmatmul.mubr.bf16.gmra.mrb[108].mxu0 %v11368_v7 }
 0xd6b   : > { %12896 = vmatpush3.bf16.msra.mxu1 %v13482_v10 }
 0xd6c   : > { %12897 = vmatprep.subr.bf16.mxu1 %v13483_v8 }
 0xd6f   : > { %12898 = vmatpush3.bf16.msra.mxu1 %v13484_v49 }
 0xd70   : > { %12899 = vmatprep.subr.bf16.mxu1 %v13485_v24 }
 0xd73   : > { %12900 = vmatpush3.bf16.msra.mxu1 %v13486_v1 }
 0xdf0   : > { %v11511_v60 = vpop.f32.mrb[80].mxu0 }
 0xdf1   : > { %v18765_v2 = vadd.f32 %v11511_v60, %v18760_v32  ;;  %v11513_v47 = vpop.f32.mrb[81].mxu0 }
 0xdf2   : > { %v18768_v37 = vadd.f32 %v11513_v47, %v18762_v54  ;;  %v11515_v15 = vpop.f32.mrb[82].mxu0 }
 0xdf3   : > { %v12605_v21 = vmul.f32 -1.702, %v18765_v2  ;;  %v18772_v63 = vadd.f32 %v11515_v15, %v18760_v32  ;;  %v11517_v22 = vpop.f32.mrb[83].mxu0 }
 0xdf4   : > { %v12606_v3 = vmul.f32 -1.702, %v18768_v37  ;;  %v18776_v46 = vadd.f32 %v11517_v22, %v18762_v54 }
 0xdf5   : > { %v11654_v43 = vmul.f32 1.442695, %v12605_v21  ;;  %v12607_v62 = vmul.f32 -1.702, %v18772_v63 }
 0xdf6   : > { %v11656_v36 = vmul.f32 1.442695, %v12606_v3  ;;  %v12608_v0 = vmul.f32 -1.702, %v18776_v46 }
 0xdf7   : > { %13711 = vpow2.f32 %v11654_v43  ;;  %v11658_v16 = vmul.f32 1.442695, %v12607_v62 }
 0xdf8   : > { %13713 = vpow2.f32 %v11656_v36  ;;  %v11660_v20 = vmul.f32 1.442695, %v12608_v0  ;;  %v11521_v13 = vpop.f32.mrb[84].mxu0 }
 0xdf9   : > { %13715 = vpow2.f32 %v11658_v16  ;;  %v18781_v33 = vadd.f32 %v11521_v13, %v18760_v32  ;;  %v11523_v4 = vpop.f32.mrb[85].mxu0 }
 0xdfa   : > { %13717 = vpow2.f32 %v11660_v20  ;;  %v18784_v55 = vadd.f32 %v11523_v4, %v18762_v54  ;;  %v11525_v14 = vpop.f32.mrb[86].mxu0 }
 0xdfb   : > { %v12609_v45 = vmul.f32 -1.702, %v18781_v33  ;;  %v18788_v50 = vadd.f32 %v11525_v14, %v18760_v32  ;;  %v11527_v25 = vpop.f32.mrb[87].mxu0 }
 0xdfc   : > { %v12610_v39 = vmul.f32 -1.702, %v18784_v55  ;;  %v18792_v7 = vadd.f32 %v11527_v25, %v18762_v54 }
 0xdfd   : > { %v11662_v38 = vmul.f32 1.442695, %v12609_v45  ;;  %v12611_v56 = vmul.f32 -1.702, %v18788_v50 }
 0xdfe   : > { %v11664_v52 = vmul.f32 1.442695, %v12610_v39  ;;  %v12612_v26 = vmul.f32 -1.702, %v18792_v7 }
 0xdff   : > { %13719 = vpow2.f32 %v11662_v38  ;;  %v11666_v31 = vmul.f32 1.442695, %v12611_v56 }
 0xe00   : > { %13721 = vpow2.f32 %v11664_v52  ;;  %v11668_v18 = vmul.f32 1.442695, %v12612_v26 }
 0xe01   : > { %v13712_v11 = vpop.eup %13711  ;;  %13723 = vpow2.f32 %v11666_v31 }
 0xe02   : > { %v13714_v59 = vpop.eup %13713  ;;  %v11718_v34 = vadd.f32 1.0, %v13712_v11  ;;  %13725 = vpow2.f32 %v11668_v18 }
 0xe03   : > { %v13716_v41 = vpop.eup %13715  ;;  %v11719_v57 = vadd.f32 1.0, %v13714_v59 }
 0xe04   : > { %v13718_v10 = vpop.eup %13717  ;;  %13727 = vrcp.f32 %v11718_v34  ;;  %v11720_v8 = vadd.f32 1.0, %v13716_v41 }
 0xe05   : > { %13729 = vrcp.f32 %v11719_v57  ;;  %v11721_v49 = vadd.f32 1.0, %v13718_v10 }
 0xe06   : > { %13731 = vrcp.f32 %v11720_v8 }
 0xe07   : > { %13733 = vrcp.f32 %v11721_v49 }
 0xe09   : > { %v13720_v24 = vpop.eup %13719 }
 0xe0a   : > { %v13722_v1 = vpop.eup %13721  ;;  %v11722_v48 = vadd.f32 1.0, %v13720_v24 }
 0xe0b   : > { %v13724_v19 = vpop.eup %13723  ;;  %v11723_v17 = vadd.f32 1.0, %v13722_v1 }
 0xe0c   : > { %v13726_v27 = vpop.eup %13725  ;;  %13735 = vrcp.f32 %v11722_v48  ;;  %v11724_v60 = vadd.f32 1.0, %v13724_v19 }
 0xe0d   : > { %13737 = vrcp.f32 %v11723_v17  ;;  %v11725_v47 = vadd.f32 1.0, %v13726_v27 }
 0xe0e   : > { %v13728_v15 = vpop.eup %13727  ;;  %13739 = vrcp.f32 %v11724_v60 }
 0xe0f   : > { %v13730_v21 = vpop.eup %13729  ;;  %13741 = vrcp.f32 %v11725_v47  ;;  %v11814_v62 = vmul.f32 %v13728_v15, %v18765_v2 }
 0xe10   : > { %v13732_v22 = vpop.eup %13731  ;;  %v11531_v3 = vpop.f32.mrb[88].mxu0  ;;  %v11815_v20 = vmul.f32 %v13730_v21, %v18768_v37 }
 0xe11   : > { %v13734_v43 = vpop.eup %13733  ;;  %v11816_v36 = vmul.f32 %v13732_v22, %v18772_v63  ;;  %v18799_v0 = vadd.f32 %v11531_v3, %v18760_v32  ;;  %v11533_v16 = vpop.f32.mrb[89].mxu0 }
 0xe12   : > { %v11817_v13 = vmul.f32 %v13734_v43, %v18776_v46  ;;  %v18804_v4 = vadd.f32 %v11533_v16, %v18762_v54  ;;  %v11535_v14 = vpop.f32.mrb[90].mxu0 }
 0xe13   : > { %v11846_v45 = vpack.c.bf16 %v11816_v36, %v11814_v62  ;;  %v12613_v25 = vmul.f32 -1.702, %v18799_v0  ;;  %v18808_v39 = vadd.f32 %v11535_v14, %v18760_v32  ;;  %v11537_v2 = vpop.f32.mrb[91].mxu0 }
 0xe14   : > { %v12614_v63 = vmul.f32 -1.702, %v18804_v4  ;;  %v18812_v38 = vadd.f32 %v11537_v2, %v18762_v54  ;;  %v11847_v56 = vpack.c.bf16 %v11817_v13, %v11815_v20 }
 0xe15   : > { %v11670_v37 = vmul.f32 1.442695, %v12613_v25  ;;  %v12615_v46 = vmul.f32 -1.702, %v18808_v39 }
 0xe16   : > { %v13736_v52 = vpop.eup %13735  ;;  %v11672_v26 = vmul.f32 1.442695, %v12614_v63  ;;  %v12616_v31 = vmul.f32 -1.702, %v18812_v38  ;;  %12029 = vmatprep.mubr.bf16.mxu1 %v11847_v56 }
 0xe17   : > { %v13738_v18 = vpop.eup %13737  ;;  %13743 = vpow2.f32 %v11670_v37  ;;  %v11674_v11 = vmul.f32 1.442695, %v12615_v46  ;;  %12030 = vmatmul.mubr.bf16.vlgmr.msra.gmra.mrb[80].mxu1 %v11846_v45  ;;  %v11818_v10 = vmul.f32 %v13736_v52, %v18781_v33 }
 0xe18   : > { %v13740_v59 = vpop.eup %13739  ;;  %13745 = vpow2.f32 %v11672_v26  ;;  %v11676_v34 = vmul.f32 1.442695, %v12616_v31  ;;  %v11541_v41 = vpop.f32.mrb[92].mxu0  ;;  %v11819_v1 = vmul.f32 %v13738_v18, %v18784_v55 }
 0xe19   : > { %v13742_v57 = vpop.eup %13741  ;;  %v11820_v8 = vmul.f32 %v13740_v59, %v18788_v50  ;;  %13747 = vpow2.f32 %v11674_v11  ;;  %v18819_v49 = vadd.f32 %v11541_v41, %v18760_v32  ;;  %v11543_v24 = vpop.f32.mrb[93].mxu0 }
 0xe1a   : > { %v11821_v48 = vmul.f32 %v13742_v57, %v18792_v7  ;;  %13749 = vpow2.f32 %v11676_v34  ;;  %v18824_v19 = vadd.f32 %v11543_v24, %v18762_v54  ;;  %v11545_v17 = vpop.f32.mrb[94].mxu0 }
 0xe1b   : > { %v12617_v27 = vmul.f32 -1.702, %v18819_v49  ;;  %v18828_v33 = vadd.f32 %v11545_v17, %v18760_v32  ;;  %v11547_v50 = vpop.f32.mrb[95].mxu0  ;;  %v11848_v60 = vpack.c.bf16 %v11820_v8, %v11818_v10 }
 0xe1c   : > { %v12618_v47 = vmul.f32 -1.702, %v18824_v19  ;;  %v18832_v15 = vadd.f32 %v11547_v50, %v18762_v54  ;;  %v11849_v55 = vpack.c.bf16 %v11821_v48, %v11819_v1 }
 0xe1d   : > { %v11678_v21 = vmul.f32 1.442695, %v12617_v27  ;;  %v12619_v7 = vmul.f32 -1.702, %v18828_v33 }
 0xe1e   : > { %v11680_v22 = vmul.f32 1.442695, %v12618_v47  ;;  %v12620_v3 = vmul.f32 -1.702, %v18832_v15  ;;  %12037 = vmatprep.mubr.bf16.mxu1 %v11849_v55 }
 0xe1f   : > { %13751 = vpow2.f32 %v11678_v21  ;;  %v11682_v43 = vmul.f32 1.442695, %v12619_v7  ;;  %12038 = vmatmul.mubr.bf16.gmra.mrb[84].mxu1 %v11848_v60 }
 0xe20   : > { %13753 = vpow2.f32 %v11680_v22  ;;  %v11684_v62 = vmul.f32 1.442695, %v12620_v3 }
 0xe21   : > { %v13744_v36 = vpop.eup %13743  ;;  %13755 = vpow2.f32 %v11682_v43 }
 0xe22   : > { %v13746_v16 = vpop.eup %13745  ;;  %v11726_v20 = vadd.f32 1.0, %v13744_v36  ;;  %13757 = vpow2.f32 %v11684_v62 }
 0xe23   : > { %v13748_v13 = vpop.eup %13747  ;;  %v11727_v14 = vadd.f32 1.0, %v13746_v16 }
 0xe24   : > { %v13750_v45 = vpop.eup %13749  ;;  %13759 = vrcp.f32 %v11726_v20  ;;  %v11728_v25 = vadd.f32 1.0, %v13748_v13  ;;  %v11551_v2 = vpop.f32.mrb[96].mxu0 }
 0xe25   : > { %13761 = vrcp.f32 %v11727_v14  ;;  %v11729_v63 = vadd.f32 1.0, %v13750_v45  ;;  %v18837_v56 = vadd.f32 %v11551_v2, %v18760_v32  ;;  %v11553_v37 = vpop.f32.mrb[97].mxu0 }
 0xe26   : > { %13763 = vrcp.f32 %v11728_v25  ;;  %v18840_v46 = vadd.f32 %v11553_v37, %v18762_v54  ;;  %v11555_v52 = vpop.f32.mrb[98].mxu0 }
 0xe27   : > { %13765 = vrcp.f32 %v11729_v63  ;;  %v12621_v26 = vmul.f32 -1.702, %v18837_v56  ;;  %v18844_v31 = vadd.f32 %v11555_v52, %v18760_v32  ;;  %v11557_v18 = vpop.f32.mrb[99].mxu0 }
 0xe28   : > { %v12622_v11 = vmul.f32 -1.702, %v18840_v46  ;;  %v18848_v59 = vadd.f32 %v11557_v18, %v18762_v54 }
 0xe29   : > { %v13752_v34 = vpop.eup %13751  ;;  %v11686_v41 = vmul.f32 1.442695, %v12621_v26  ;;  %v12623_v57 = vmul.f32 -1.702, %v18844_v31 }
 0xe2a   : > { %v13754_v10 = vpop.eup %13753  ;;  %v11730_v8 = vadd.f32 1.0, %v13752_v34  ;;  %v12624_v24 = vmul.f32 -1.702, %v18848_v59  ;;  %v11688_v50 = vmul.f32 1.442695, %v12622_v11 }
 0xe2b   : > { %v13756_v1 = vpop.eup %13755  ;;  %v11731_v48 = vadd.f32 1.0, %v13754_v10  ;;  %13767 = vpow2.f32 %v11686_v41  ;;  %v11690_v55 = vmul.f32 1.442695, %v12623_v57 }
 0xe2c   : > { %v13758_v17 = vpop.eup %13757  ;;  %13769 = vrcp.f32 %v11730_v8  ;;  %v11732_v27 = vadd.f32 1.0, %v13756_v1  ;;  %v11561_v60 = vpop.f32.mrb[100].mxu0  ;;  %v11692_v3 = vmul.f32 1.442695, %v12624_v24 }
 0xe2d   : > { %13771 = vrcp.f32 %v11731_v48  ;;  %v11733_v47 = vadd.f32 1.0, %v13758_v17  ;;  %v18853_v21 = vadd.f32 %v11561_v60, %v18760_v32  ;;  %v11563_v7 = vpop.f32.mrb[101].mxu0 }
 0xe2e   : > { %v13760_v22 = vpop.eup %13759  ;;  %13773 = vrcp.f32 %v11732_v27  ;;  %v18856_v43 = vadd.f32 %v11563_v7, %v18762_v54  ;;  %v11565_v62 = vpop.f32.mrb[102].mxu0 }
 0xe2f   : > { %v13762_v36 = vpop.eup %13761  ;;  %v11822_v16 = vmul.f32 %v13760_v22, %v18799_v0  ;;  %13775 = vrcp.f32 %v11733_v47  ;;  %v12625_v20 = vmul.f32 -1.702, %v18853_v21  ;;  %v18861_v13 = vadd.f32 %v11565_v62, %v18760_v32  ;;  %v11567_v14 = vpop.f32.mrb[103].mxu0 }
 0xe30   : > { %v13764_v45 = vpop.eup %13763  ;;  %v11823_v25 = vmul.f32 %v13762_v36, %v18804_v4  ;;  %13777 = vpow2.f32 %v11688_v50  ;;  %v12626_v2 = vmul.f32 -1.702, %v18856_v43  ;;  %v18866_v63 = vadd.f32 %v11567_v14, %v18762_v54 }
 0xe31   : > { %v13766_v37 = vpop.eup %13765  ;;  %v11824_v52 = vmul.f32 %v13764_v45, %v18808_v39  ;;  %13779 = vpow2.f32 %v11690_v55  ;;  %v11694_v0 = vmul.f32 1.442695, %v12625_v20  ;;  %v12627_v26 = vmul.f32 -1.702, %v18861_v13 }
 0xe32   : > { %v11825_v18 = vmul.f32 %v13766_v37, %v18812_v38  ;;  %13781 = vpow2.f32 %v11692_v3  ;;  %v11696_v11 = vmul.f32 1.442695, %v12626_v2  ;;  %v12628_v34 = vmul.f32 -1.702, %v18866_v63 }
 0xe33   : > { %13783 = vpow2.f32 %v11694_v0  ;;  %v11698_v4 = vmul.f32 1.442695, %v12627_v26  ;;  %v11850_v41 = vpack.c.bf16 %v11824_v52, %v11822_v16 }
 0xe34   : > { %13785 = vpow2.f32 %v11696_v11  ;;  %v11700_v57 = vmul.f32 1.442695, %v12628_v34  ;;  %v11571_v10 = vpop.f32.mrb[104].mxu0  ;;  %v11851_v8 = vpack.c.bf16 %v11825_v18, %v11823_v25 }
 0xe35   : > { %v13768_v24 = vpop.eup %13767  ;;  %13787 = vpow2.f32 %v11698_v4  ;;  %v18873_v39 = vadd.f32 %v11571_v10, %v18760_v32  ;;  %v11573_v1 = vpop.f32.mrb[105].mxu0 }
 0xe36   : > { %v13770_v48 = vpop.eup %13769  ;;  %v11734_v17 = vadd.f32 1.0, %v13768_v24  ;;  %13789 = vpow2.f32 %v11700_v57  ;;  %v18876_v38 = vadd.f32 %v11573_v1, %v18762_v54  ;;  %v11575_v27 = vpop.f32.mrb[106].mxu0  ;;  %12045 = vmatprep.mubr.bf16.mxu1 %v11851_v8 }
 0xe37   : > { %v13772_v50 = vpop.eup %13771  ;;  %v12629_v60 = vmul.f32 -1.702, %v18873_v39  ;;  %v18880_v47 = vadd.f32 %v11575_v27, %v18760_v32  ;;  %v11577_v55 = vpop.f32.mrb[107].mxu0  ;;  %12046 = vmatmul.mubr.bf16.gmra.mrb[88].mxu1 %v11850_v41  ;;  %v11826_v22 = vmul.f32 %v13770_v48, %v18819_v49 }
 0xe38   : > { %v13774_v7 = vpop.eup %13773  ;;  %v12630_v3 = vmul.f32 -1.702, %v18876_v38  ;;  %v11827_v36 = vmul.f32 %v13772_v50, %v18824_v19  ;;  %v18887_v14 = vadd.f32 %v11577_v55, %v18762_v54  ;;  %13791 = vrcp.f32 %v11734_v17 }
 0xe39   : > { %v13776_v62 = vpop.eup %13775  ;;  %v11828_v16 = vmul.f32 %v13774_v7, %v18828_v33  ;;  %v11702_v20 = vmul.f32 1.442695, %v12629_v60  ;;  %v12631_v37 = vmul.f32 -1.702, %v18880_v47 }
 0xe3a   : > { %v13778_v45 = vpop.eup %13777  ;;  %v11829_v25 = vmul.f32 %v13776_v62, %v18832_v15  ;;  %v11704_v2 = vmul.f32 1.442695, %v12630_v3  ;;  %v12632_v4 = vmul.f32 -1.702, %v18887_v14 }
 0xe3b   : > { %v13780_v52 = vpop.eup %13779  ;;  %v11735_v49 = vadd.f32 1.0, %v13778_v45  ;;  %13793 = vpow2.f32 %v11702_v20  ;;  %v11852_v0 = vpack.c.bf16 %v11828_v16, %v11826_v22  ;;  %v11706_v8 = vmul.f32 1.442695, %v12631_v37 }
 0xe3c   : > { %v13782_v26 = vpop.eup %13781  ;;  %v11736_v18 = vadd.f32 1.0, %v13780_v52  ;;  %13795 = vpow2.f32 %v11704_v2  ;;  %v11581_v19 = vpop.f32.mrb[108].mxu0  ;;  %v11853_v33 = vpack.c.bf16 %v11829_v25, %v11827_v36  ;;  %v11708_v36 = vmul.f32 1.442695, %v12632_v4 }
 0xe3d   : > { %v13784_v11 = vpop.eup %13783  ;;  %13797 = vrcp.f32 %v11735_v49  ;;  %v11737_v34 = vadd.f32 1.0, %v13782_v26  ;;  %v18893_v15 = vadd.f32 %v11581_v19, %v18760_v32  ;;  %v11583_v41 = vpop.f32.mrb[109].mxu0 }
 0xe3e   : > { %v13786_v57 = vpop.eup %13785  ;;  %13799 = vrcp.f32 %v11736_v18  ;;  %v11738_v10 = vadd.f32 1.0, %v13784_v11  ;;  %v18896_v24 = vadd.f32 %v11583_v41, %v18762_v54  ;;  %v11585_v1 = vpop.f32.mrb[110].mxu0  ;;  %12053 = vmatprep.mubr.bf16.mxu1 %v11853_v33 }
 0xe3f   : > { %v13788_v48 = vpop.eup %13787  ;;  %13801 = vrcp.f32 %v11737_v34  ;;  %v11739_v17 = vadd.f32 1.0, %v13786_v57  ;;  %v12633_v27 = vmul.f32 -1.702, %v18893_v15  ;;  %v18900_v50 = vadd.f32 %v11585_v1, %v18760_v32  ;;  %v11587_v60 = vpop.f32.mrb[111].mxu0  ;;  %12054 = vmatmul.mubr.bf16.gmra.mrb[92].mxu1 %v11852_v0 }
 0xe40   : > { %v13790_v55 = vpop.eup %13789  ;;  %13803 = vrcp.f32 %v11738_v10  ;;  %v11740_v7 = vadd.f32 1.0, %v13788_v48  ;;  %v12634_v22 = vmul.f32 -1.702, %v18896_v24  ;;  %v18904_v3 = vadd.f32 %v11587_v60, %v18762_v54 }
 0xe41   : > { %13805 = vrcp.f32 %v11739_v17  ;;  %v11741_v62 = vadd.f32 1.0, %v13790_v55  ;;  %v11710_v16 = vmul.f32 1.442695, %v12633_v27  ;;  %v12635_v20 = vmul.f32 -1.702, %v18900_v50 }
 0xe42   : > { %13807 = vrcp.f32 %v11740_v7  ;;  %v11712_v32 = vmul.f32 1.442695, %v12634_v22  ;;  %v12636_v45 = vmul.f32 -1.702, %v18904_v3  ;;  %v13792_v25 = vpop.eup %13791 }
 0xe43   : > { %13809 = vrcp.f32 %v11741_v62  ;;  %v11714_v52 = vmul.f32 1.442695, %v12635_v20  ;;  %v11830_v18 = vmul.f32 %v13792_v25, %v18837_v56 }
 0xe44   : > { %13811 = vpow2.f32 %v11706_v8  ;;  %v11716_v49 = vmul.f32 1.442695, %v12636_v45 }
 0xe45   : > { %v13794_v2 = vpop.eup %13793  ;;  %13813 = vpow2.f32 %v11708_v36 }
 0xe46   : > { %v13796_v37 = vpop.eup %13795  ;;  %13815 = vpow2.f32 %v11710_v16  ;;  %v11742_v41 = vadd.f32 1.0, %v13794_v2 }
 0xe47   : > { %v13798_v54 = vpop.eup %13797  ;;  %13817 = vpow2.f32 %v11712_v32  ;;  %v11743_v8 = vadd.f32 1.0, %v13796_v37 }
 0xe48   : > { %v13800_v0 = vpop.eup %13799  ;;  %v11831_v11 = vmul.f32 %v13798_v54, %v18840_v46  ;;  %13819 = vpow2.f32 %v11714_v52 }
 0xe49   : > { %v13802_v26 = vpop.eup %13801  ;;  %v11832_v19 = vmul.f32 %v13800_v0, %v18844_v31  ;;  %13821 = vpow2.f32 %v11716_v49 }
 0xe4a   : > { %v13804_v33 = vpop.eup %13803  ;;  %v11833_v34 = vmul.f32 %v13802_v26, %v18848_v59  ;;  %13823 = vrcp.f32 %v11742_v41 }
 0xe4b   : > { %v13806_v4 = vpop.eup %13805  ;;  %v11854_v57 = vpack.c.bf16 %v11832_v19, %v11830_v18  ;;  %v11834_v17 = vmul.f32 %v13804_v33, %v18853_v21  ;;  %13825 = vrcp.f32 %v11743_v8 }
 0xe4c   : > { %v13808_v10 = vpop.eup %13807  ;;  %v11855_v1 = vpack.c.bf16 %v11833_v34, %v11831_v11  ;;  %v11835_v31 = vmul.f32 %v13806_v4, %v18856_v43 }
 0xe4d   : > { %v13810_v48 = vpop.eup %13809  ;;  %v11836_v56 = vmul.f32 %v13808_v10, %v18861_v13 }
 0xe4e   : > { %v13812_v27 = vpop.eup %13811  ;;  %v11837_v46 = vmul.f32 %v13810_v48, %v18866_v63  ;;  %12061 = vmatprep.mubr.bf16.mxu1 %v11855_v1 }
 0xe4f   : > { %v13814_v59 = vpop.eup %13813  ;;  %v11744_v60 = vadd.f32 1.0, %v13812_v27  ;;  %12062 = vmatmul.mubr.bf16.gmra.mrb[96].mxu1 %v11854_v57  ;;  %v11856_v55 = vpack.c.bf16 %v11836_v56, %v11834_v17  ;;  %v18924_v57 = vld [vmem:[#allocation28] ss:$0 sm:$0xff] }
 0xe50   : > { %v13816_v7 = vpop.eup %13815  ;;  %v11745_v22 = vadd.f32 1.0, %v13814_v59  ;;  %v11857_v62 = vpack.c.bf16 %v11837_v46, %v11835_v31 }
 0xe51   : > { %v13818_v36 = vpop.eup %13817  ;;  %13827 = vrcp.f32 %v11744_v60  ;;  %v11746_v21 = vadd.f32 1.0, %v13816_v7 }
 0xe52   : > { %13829 = vrcp.f32 %v11745_v22  ;;  %v11747_v13 = vadd.f32 1.0, %v13818_v36  ;;  %12069 = vmatprep.mubr.bf16.mxu1 %v11857_v62  ;;  %v13820_v16 = vpop.eup %13819 }
 0xe53   : > { %v13822_v43 = vpop.eup %13821  ;;  %13831 = vrcp.f32 %v11746_v21  ;;  %v11748_v63 = vadd.f32 1.0, %v13820_v16 }
 0xe54   : > { %13833 = vrcp.f32 %v11747_v13  ;;  %v11749_v20 = vadd.f32 1.0, %v13822_v43  ;;  %v13824_v32 = vpop.eup %13823 }
 0xe55   : > { %13835 = vrcp.f32 %v11748_v63  ;;  %v13826_v45 = vpop.eup %13825  ;;  %v11838_v37 = vmul.f32 %v13824_v32, %v18873_v39 }
 0xe56   : > { %13837 = vrcp.f32 %v11749_v20  ;;  %v11839_v54 = vmul.f32 %v13826_v45, %v18876_v38 }
 0xe57   : > { %12070 = vmatmul.mubr.bf16.gmra.mrb[100].mxu1 %v11856_v55 }
 0xe5b   : > { %v13828_v25 = vpop.eup %13827 }
 0xe5c   : > { %v13830_v2 = vpop.eup %13829  ;;  %v11840_v52 = vmul.f32 %v13828_v25, %v18880_v47 }
 0xe5d   : > { %v11841_v49 = vmul.f32 %v13830_v2, %v18887_v14  ;;  %v13832_v26 = vpop.eup %13831 }
 0xe5e   : > { %v11858_v0 = vpack.c.bf16 %v11840_v52, %v11838_v37  ;;  %v13834_v19 = vpop.eup %13833  ;;  %v11842_v34 = vmul.f32 %v13832_v26, %v18893_v15 }
 0xe5f   : > { %v11859_v18 = vpack.c.bf16 %v11841_v49, %v11839_v54  ;;  %v13836_v33 = vpop.eup %13835  ;;  %v11843_v39 = vmul.f32 %v13834_v19, %v18896_v24 }
 0xe60   : > { %v13838_v11 = vpop.eup %13837  ;;  %v11844_v4 = vmul.f32 %v13836_v33, %v18900_v50 }
 0xe61   : > { %12077 = vmatprep.mubr.bf16.mxu1 %v11859_v18  ;;  %v11845_v47 = vmul.f32 %v13838_v11, %v18904_v3 }
 0xe62   : > { %12078 = vmatmul.mubr.bf16.gmra.mrb[104].mxu1 %v11858_v0  ;;  %v11860_v38 = vpack.c.bf16 %v11844_v4, %v11842_v34 }
 0xe63   : > { %v11861_v41 = vpack.c.bf16 %v11845_v47, %v11843_v39 }
 0xe65   : > { %12085 = vmatprep.mubr.bf16.mxu1 %v11861_v41 }
 0xe6a   : > { %12086 = vmatmul.mubr.bf16.gmra.mrb[108].mxu1 %v11860_v38 }
 0xeea   : > { %v12901_v14 = vpop.f32.mrb[80].mxu1 }
 0xeeb   : > { %v12902_v10 = vpop.f32.mrb[81].mxu1 }
 0xeec   : > { %v12903_v8 = vadd.f32 %v12902_v10, %v12901_v14  ;;  %v12904_v1 = vpop.f32.mrb[82].mxu1 }
 0xeed   : > { %v12905_v15 = vpop.f32.mrb[83].mxu1 }
 0xeee   : > { %v12032_v50 = vadd.f32 %v12903_v8, %v18924_v57  ;;  %v12906_v48 = vadd.f32 %v12905_v15, %v12904_v1 }
 0xef0   : > { %v12094_v24 = vadd.f32 %v12032_v50, %v18543_v9  ;;  %v12035_v3 = vadd.f32 %v12906_v48, %v18924_v57 }
 0xef2   : > { %12110 = vst [vmem:[%s15019_s23] sm:$0xff] %v12094_v24  ;;  %v12095_v17 = vadd.f32 %v12035_v3, %v18547_v28  ;;  %v12907_v56 = vpop.f32.mrb[84].mxu1 }
 0xef3   : > { %v12908_v27 = vpop.f32.mrb[85].mxu1 }
 0xef4   : > { %12111 = vst [vmem:[%s15019_s23 + $0x8] sm:$0xff] %v12095_v17  ;;  %v12909_v31 = vadd.f32 %v12908_v27, %v12907_v56  ;;  %v12910_v46 = vpop.f32.mrb[86].mxu1 }
 0xef5   : > { %v12911_v59 = vpop.f32.mrb[87].mxu1 }
 0xef6   : > { %v12040_v60 = vadd.f32 %v12909_v31, %v18924_v57  ;;  %v12912_v55 = vadd.f32 %v12911_v59, %v12910_v46 }
 0xef8   : > { %v12096_v7 = vadd.f32 %v12040_v60, %v18550_v44  ;;  %v12043_v9 = vadd.f32 %v12912_v55, %v18924_v57 }
 0xefa   : > { %12112 = vst [vmem:[%s15019_s23 + $0x10] sm:$0xff] %v12096_v7  ;;  %v12097_v22 = vadd.f32 %v12043_v9, %v18556_v30 }
 0xefc   : > { %12113 = vst [vmem:[%s15019_s23 + $0x18] sm:$0xff] %v12097_v22 }
 0xf0a   : > { %v12913_v28 = vpop.f32.mrb[88].mxu1 }
 0xf0b   : > { %v12914_v62 = vpop.f32.mrb[89].mxu1 }
 0xf0c   : > { %v12915_v36 = vadd.f32 %v12914_v62, %v12913_v28  ;;  %v12916_v21 = vpop.f32.mrb[90].mxu1 }
 0xf0d   : > { %v12917_v13 = vpop.f32.mrb[91].mxu1 }
 0xf0e   : > { %v12048_v16 = vadd.f32 %v12915_v36, %v18924_v57  ;;  %v12918_v43 = vadd.f32 %v12917_v13, %v12916_v21 }
 0xf10   : > { %v12098_v63 = vadd.f32 %v12048_v16, %v18563_v5  ;;  %v12051_v44 = vadd.f32 %v12918_v43, %v18924_v57 }
 0xf12   : > { %12114 = vst [vmem:[%s15019_s23 + $0x20] sm:$0xff] %v12098_v63  ;;  %v12099_v20 = vadd.f32 %v12051_v44, %v18568_v53  ;;  %v12919_v32 = vpop.f32.mrb[92].mxu1 }
 0xf13   : > { %v12920_v30 = vpop.f32.mrb[93].mxu1 }
 0xf14   : > { %12115 = vst [vmem:[%s15019_s23 + $0x28] sm:$0xff] %v12099_v20  ;;  %v12921_v45 = vadd.f32 %v12920_v30, %v12919_v32  ;;  %v12922_v25 = vpop.f32.mrb[94].mxu1 }
 0xf15   : > { %v12923_v2 = vpop.f32.mrb[95].mxu1 }
 0xf16   : > { %v12056_v37 = vadd.f32 %v12921_v45, %v18924_v57  ;;  %v12924_v52 = vadd.f32 %v12923_v2, %v12922_v25 }
 0xf18   : > { %v12100_v54 = vadd.f32 %v12056_v37, %v18572_v51  ;;  %v12059_v5 = vadd.f32 %v12924_v52, %v18924_v57 }
 0xf1a   : > { %12116 = vst [vmem:[%s15019_s23 + $0x30] sm:$0xff] %v12100_v54  ;;  %v12101_v49 = vadd.f32 %v12059_v5, %v18575_v40 }
 0xf1c   : > { %12117 = vst [vmem:[%s15019_s23 + $0x38] sm:$0xff] %v12101_v49 }
 0xf22   : > { %v12925_v53 = vpop.f32.mrb[96].mxu1 }
 0xf23   : > { %v12926_v0 = vpop.f32.mrb[97].mxu1 }
 0xf24   : > { %v12927_v26 = vadd.f32 %v12926_v0, %v12925_v53  ;;  %v12928_v18 = vpop.f32.mrb[98].mxu1 }
 0xf25   : > { %v12929_v19 = vpop.f32.mrb[99].mxu1 }
 0xf26   : > { %v12064_v33 = vadd.f32 %v12927_v26, %v18924_v57  ;;  %v12930_v11 = vadd.f32 %v12929_v19, %v12928_v18 }
 0xf28   : > { %v12102_v34 = vadd.f32 %v12064_v33, %v18583_v42  ;;  %v12067_v51 = vadd.f32 %v12930_v11, %v18924_v57 }
 0xf2a   : > { %12118 = vst [vmem:[%s15019_s23 + $0x40] sm:$0xff] %v12102_v34  ;;  %v12103_v4 = vadd.f32 %v12067_v51, %v18588_v6  ;;  %v12931_v39 = vpop.f32.mrb[100].mxu1 }
 0xf2b   : > { %v12932_v40 = vpop.f32.mrb[101].mxu1 }
 0xf2c   : > { %12119 = vst [vmem:[%s15019_s23 + $0x48] sm:$0xff] %v12103_v4  ;;  %v12933_v47 = vadd.f32 %v12932_v40, %v12931_v39  ;;  %v12934_v38 = vpop.f32.mrb[102].mxu1 }
 0xf2d   : > { %v12935_v41 = vpop.f32.mrb[103].mxu1 }
 0xf2e   : > { %v12072_v14 = vadd.f32 %v12933_v47, %v18924_v57  ;;  %v12936_v10 = vadd.f32 %v12935_v41, %v12934_v38 }
 0xf30   : > { %v12104_v8 = vadd.f32 %v12072_v14, %v18592_v12  ;;  %v12075_v42 = vadd.f32 %v12936_v10, %v18924_v57 }
 0xf32   : > { %12120 = vst [vmem:[%s15019_s23 + $0x50] sm:$0xff] %v12104_v8  ;;  %v12105_v1 = vadd.f32 %v12075_v42, %v18595_v61 }
 0xf34   : > { %12121 = vst [vmem:[%s15019_s23 + $0x58] sm:$0xff] %v12105_v1 }
 0xf35   : > { %v12937_v6 = vpop.f32.mrb[104].mxu1 }
 0xf36   : > { %v12938_v15 = vpop.f32.mrb[105].mxu1 }
 0xf37   : > { %v12939_v50 = vadd.f32 %v12938_v15, %v12937_v6  ;;  %v12940_v48 = vpop.f32.mrb[106].mxu1 }
 0xf38   : > { %v12941_v24 = vpop.f32.mrb[107].mxu1 }
 0xf39   : > { %v12080_v3 = vadd.f32 %v12939_v50, %v18924_v57  ;;  %v12942_v17 = vadd.f32 %v12941_v24, %v12940_v48 }
 0xf3b   : > { %v12106_v56 = vadd.f32 %v12080_v3, %v18603_v35  ;;  %v12083_v12 = vadd.f32 %v12942_v17, %v18924_v57 }
 0xf3d   : > { %12122 = vst [vmem:[%s15019_s23 + $0x60] sm:$0xff] %v12106_v56  ;;  %v12107_v61 = vadd.f32 %v12083_v12, %v18608_v58  ;;  %v12943_v27 = vpop.f32.mrb[108].mxu1 }
 0xf3e   : > { %v12944_v31 = vpop.f32.mrb[109].mxu1 }
 0xf3f   : > { %12123 = vst [vmem:[%s15019_s23 + $0x68] sm:$0xff] %v12107_v61  ;;  %v12945_v46 = vadd.f32 %v12944_v31, %v12943_v27  ;;  %v12946_v59 = vpop.f32.mrb[110].mxu1 }
 0xf40   : > { %v12947_v60 = vpop.f32.mrb[111].mxu1 }
 0xf41   : > { %v12088_v35 = vadd.f32 %v12945_v46, %v18924_v57  ;;  %v12948_v55 = vadd.f32 %v12947_v60, %v12946_v59 }
 0xf43   : > { %v12108_v7 = vadd.f32 %v12088_v35, %v18612_v29  ;;  %v12091_v9 = vadd.f32 %v12948_v55, %v18924_v57 }
 0xf45   : > { %12124 = vst [vmem:[%s15019_s23 + $0x70] sm:$0xff] %v12108_v7  ;;  %v12109_v58 = vadd.f32 %v12091_v9, %v18615_v23 }
 0xf47   : > { %12125 = vst [vmem:[%s15019_s23 + $0x78] sm:$0xff] %v12109_v58 }
 0xf48   : > { %14274 = shalt.err (!%p14271_p11)
}
 0xf49   : > { %s14275_s27 = scalar_lea.hbm %s18981_s6, 2048  ;;  %s14279_s7 = scalar_lea.hbm %s19354_s1, 8192 }
 0xf4a   : > { %p14276_p1 = scmp.ne.s32.totalorder %s18981_s6, %s14275_s27  ;;  %p14280_p3 = scmp.lt.u32.totalorder %s18981_s6, %s19354_s1 }
 0xf4b   : > { %p14281_p2 = scmp.lt.u32.totalorder %s14279_s7, %s14275_s27  ;;  %p14283_p8 = scmp.lt.u32.totalorder %s14275_s27, %s18981_s6 }
 0xf4c   : > { %p14277_p13 = pnand %p14276_p1, %p19355_p9 }
 0xf4d   : > { %p14282_p10 = por %p14281_p2, %p14280_p3 }
 0xf4e   : > { %p14278_p0 = pneg %p14277_p13 }
 0xf4f   : > { %p14284_p12 = por %p14283_p8, %p14282_p10 }
 0xf51   : > { %p14285_p4 = pnand %p14284_p12, %p14278_p0 }
 0xf53   : > { %14288 = shalt.err (!%p14285_p4)
}
 0xf54   : > { %s14442_s26 = smov 128   ;;  %s14443_s22 = smov 8  }
 0xf55   : > { %13103 = dma.vmem_to_hbm [thread:$0]  (%p19355_p9), %s18974_s0, 2048, %s18981_s6, %s18986_s17, %s14442_s26, %s14442_s26, %s14443_s22  }
 0xf56 PF: > { %s19356_s19 = sld [smem:[#allocation39_spill]]  ;;  %p13185_p7 = scmp.ge.s32.totalorder %s14411_s28, 2 }
 0xf57   : > { %p19357_p6 = scmp.ne.s32.totalorder %s19190_s5, 0 }
 0xf59   : > { %p13153_p5 = pnand %p13185_p7, %p19357_p6 }
 0xf5c   : > { %s12157_s18 = sand.u32 1, %s19356_s19  }
 0xf5d   : > { %s12158_s25 = scalar_lea.sflag [#allocation7], %s12157_s18 }
 0xf5e   : > { %14366 = dma.done.wait (!%p13153_p5), %s12158_s25, 2048  }
 0xf5f   : > { %14368 = vsyncadd (!%p13153_p5), %s12158_s25, 4294965248  ;;  %s38_s28 = sadd.s32 1, %s14411_s28   ;;  %s19358_s18 = sld [smem:[#allocation40_spill]] }
 0xf60   : > { %p35_p11 = scmp.ge.s32.totalorder %s38_s28, 6   ;;  %s19359_s19 = sld [smem:[#allocation41_spill]] }
 0xf61   : > { %s19360_s21 = sld [smem:[#allocation43_spill]]  ;;  %s19361_s22 = sld [smem:[#allocation44_spill]] }
 0xf62   : > { %s19362_s0 = sld [smem:[#allocation47_spill]]  ;;  %s19363_s25 = sld [smem:[#allocation48_spill]] }
 0xf63   : > { %s19364_s6 = smov %s19375_s24  ;;  %s19365_s20 = smov %s19377_s15 }
 0xf64   : > { %s19366_s23 = smov %s14921_s2  ;;  %s19368_s26 = smov %s19371_s29 }
 0xf65   : > { %s19369_s27 = smov %s19364_s6  ;;  %37 = sbr.rel (!%p35_p11) target bundleno = 26 (0x1a), region = 187 }
 0xf68   : > { %s19367_s24 = smov %s19362_s0 }
 0xf6c   :  { %12163 = vsyncpa [#allocation6], 1 }
 0xf6d   :  { %12165 = vsyncpa [#allocation6 + $0x1], 1 }
 0xf6e   :  { %12166 = vsyncpa [#allocation9], 1 }
 0xf6f   :  { %12167 = vsyncpa [#allocation12], 1 }
 0xf70   :  { %12168 = vsyncpa [#allocation15], 1 }
 0xf71   :  { %12169 = vsyncpa [#allocation18], 1 }
 0xf72   :  { %12170 = vsyncpa [#allocation21], 1 }
 0xf73   :  { %12171 = vsyncpa [#allocation24], 1 }
 0xf74   :  { %12172 = vsyncpa [#allocation27], 1 }
 0xf75   :  { %12173 = vsyncpa [#allocation7], 1 }
 0xf76   :  { %12175 = vsyncpa [#allocation7 + $0x1], 1 }

</bundles_post_ra>
